<compile_context>
chip_gen: v6e
topology: v6e:2x2x1
jax: 0.10.0
libtpu: 0.0.40
codegen_flags: <defaults>
</compile_context>

<pallas_src>
import functools

import jax
import jax.numpy as jnp
from jax import lax
from jax.experimental import pallas as pl
from jax.experimental.pallas import tpu as pltpu  # noqa: F401  (TPU backend)

BN_EPS = 1e-5
LANES = 128            # every channel axis is padded to 128 lanes


# ----------------------------- Pallas kernel --------------------------------

def _layer_kernel(*refs, m_rows, act, bn, has_res):
    """Fused conv-as-matmul + BatchNorm (batch stats) + residual + activation."""
    if bn:
        if has_res:
            a_ref, w_ref, g_ref, b_ref, r_ref, o_ref = refs
        else:
            a_ref, w_ref, g_ref, b_ref, o_ref = refs
    else:
        a_ref, w_ref, b_ref, o_ref = refs

    # MXU matmul: bf16 inputs, fp32 accumulation.
    y = jnp.dot(a_ref[...], w_ref[...], preferred_element_type=jnp.float32)

    if bn:
        inv_m = 1.0 / m_rows
        s = jnp.sum(y, axis=0, keepdims=True)
        q = jnp.sum(y * y, axis=0, keepdims=True)
        mean = s * inv_m
        var = jnp.maximum(q * inv_m - mean * mean, 0.0)   # guard cancellation
        inv = lax.rsqrt(var + BN_EPS)
        scale = g_ref[...] * inv          # gamma padded with 0 -> padded lanes stay 0
        shift = b_ref[...] - mean * scale
        y = y * scale + shift
    else:
        y = y + b_ref[...]                # final conv bias (padded with zeros)

    if has_res:
        y = y + r_ref[...].astype(jnp.float32)

    if act == "relu":
        y = jnp.maximum(y, 0.0)
    elif act == "tanh":
        y = jnp.tanh(y)

    o_ref[...] = y.astype(o_ref.dtype)


def fused_conv_layer(patches, wm, *, gamma=None, beta=None, bias=None,
                     act="none", residual=None, out_dtype=jnp.bfloat16):
    """patches: (M, K) bf16, wm: (K, 128) bf16 -> (M, 128) activation."""
    M = patches.shape[0]
    bn = gamma is not None
    args = [patches, wm]
    if bn:
        args += [gamma, beta]
    else:
        args += [bias]
    has_res = residual is not None
    if has_res:
        assert bn
        args.append(residual)
    kernel = functools.partial(_layer_kernel, m_rows=float(M), act=act,
                               bn=bn, has_res=has_res)
    return pl.pallas_call(
        kernel,
        out_shape=jax.ShapeDtypeStruct((M, LANES), out_dtype),
    )(*args)


# ------------------------------- XLA glue -----------------------------------

def _extract_patches(x, kh, kw, stride):
    """im2col: NHWC -> (N*Ho*Wo, kh*kw*C), patch columns ordered (kh, kw, C)."""
    N, H, W, C = x.shape
    Ho = (H - kh) // stride + 1
    Wo = (W - kw) // stride + 1
    cols = []
    for i in range(kh):
        for j in range(kw):
            cols.append(x[:, i:i + (Ho - 1) * stride + 1:stride,
                          j:j + (Wo - 1) * stride + 1:stride, :])
    p = jnp.stack(cols, axis=3)                        # (N, Ho, Wo, kh*kw, C)
    return p.reshape(N * Ho * Wo, kh * kw * C), (N, Ho, Wo)


def conv_patches(x, kh, kw, stride=1, pad=0, pad_mode="zero"):
    if pad > 0:
        mode = "reflect" if pad_mode == "reflect" else "constant"
        x = jnp.pad(x, ((0, 0), (pad, pad), (pad, pad), (0, 0)), mode=mode)
    return _extract_patches(x, kh, kw, stride)


def conv_transpose_patches(x, kh=3, kw=3):
    """ConvTranspose2d(k=3, s=2, p=1, output_padding=1) as a stride-1 conv over
    the zero-dilated input; weight flip is pre-applied at packing time."""
    N, H, W, C = x.shape
    dil = jnp.zeros((N, 2 * H - 1, 2 * W - 1, C), x.dtype)
    dil = dil.at[:, ::2, ::2, :].set(x)
    # pad top/left = k-1-p = 1, bottom/right = k-1-p+output_padding = 2
    xp = jnp.pad(dil, ((0, 0), (1, 2), (1, 2), (0, 0)))
    return _extract_patches(xp, kh, kw, 1)


# ------------------------------ parameters -----------------------------------
# Weights are pre-packed once into their matmul layout (kh*kw*Cin, 128) bf16;
# gamma/beta/bias are pre-padded (1, 128) fp32 rows.

def _pack_conv(w_oihw, cin_pad=None):
    cout, cin, kh, kw = w_oihw.shape
    if cin_pad is not None and cin_pad > cin:
        w_oihw = jnp.pad(w_oihw, ((0, 0), (0, cin_pad - cin), (0, 0), (0, 0)))
        cin = cin_pad
    wm = jnp.transpose(w_oihw, (2, 3, 1, 0)).reshape(kh * kw * cin, cout)
    wm = jnp.pad(wm, ((0, 0), (0, LANES - cout)))
    return wm.astype(jnp.bfloat16)


def _pack_conv_transpose(w_iohw):
    cin, cout, kh, kw = w_iohw.shape
    wf = jnp.flip(w_iohw, axis=(2, 3))
    wm = jnp.transpose(wf, (2, 3, 0, 1)).reshape(kh * kw * cin, cout)
    wm = jnp.pad(wm, ((0, 0), (0, LANES - cout)))
    return wm.astype(jnp.bfloat16)


def _row128(v):
    v = v.astype(jnp.float32)[None, :]
    return jnp.pad(v, ((0, 0), (0, LANES - v.shape[1])))


def init_params(key, input_nc=3, output_nc=3, ngf=8, n_blocks=2):
    params = {}
    keys = iter(jax.random.split(key, 64))

    def rnd(shape, scale=0.05):
        return scale * jax.random.normal(next(keys), shape, jnp.float32)

    # c7s1-ngf (use_bias=False because norm is BatchNorm2d).  Input channels
    # are padded 3 -> 8 so the contraction dim is a multiple of 8 everywhere.
    params["c1_w"] = _pack_conv(rnd((ngf, input_nc, 7, 7)), cin_pad=8)
    params["bn1_g"] = _row128(jnp.ones((ngf,)))
    params["bn1_b"] = _row128(jnp.zeros((ngf,)))
    ch = ngf
    for i in range(2):                                  # downsampling
        params[f"down{i}_w"] = _pack_conv(rnd((ch * 2, ch, 3, 3)))
        params[f"down{i}_g"] = _row128(jnp.ones((ch * 2,)))
        params[f"down{i}_b"] = _row128(jnp.zeros((ch * 2,)))
        ch *= 2
    for b in range(n_blocks):                           # resnet blocks
        params[f"res{b}_w1"] = _pack_conv(rnd((ch, ch, 3, 3)))
        params[f"res{b}_g1"] = _row128(jnp.ones((ch,)))
        params[f"res{b}_b1"] = _row128(jnp.zeros((ch,)))
        params[f"res{b}_w2"] = _pack_conv(rnd((ch, ch, 3, 3)))
        params[f"res{b}_g2"] = _row128(jnp.ones((ch,)))
        params[f"res{b}_b2"] = _row128(jnp.zeros((ch,)))
    for i in range(2):                                  # upsampling
        params[f"up{i}_w"] = _pack_conv_transpose(rnd((ch, ch // 2, 3, 3)))
        params[f"up{i}_g"] = _row128(jnp.ones((ch // 2,)))
        params[f"up{i}_b"] = _row128(jnp.zeros((ch // 2,)))
        ch //= 2
    # final conv has bias=True (no norm after it)
    params["cf_w"] = _pack_conv(rnd((output_nc, ch, 7, 7)))
    params["cf_b"] = _row128(rnd((output_nc,)))
    return params


# ------------------------------ forward pass ---------------------------------

def generator_forward(x_nhwc, params, ngf=8, output_nc=3, n_blocks=2):
    # Pad image channels 3 -> 8 and cast to bf16 once.
    x = jnp.pad(x_nhwc, ((0, 0), (0, 0), (0, 0), (0, 8 - x_nhwc.shape[-1])))
    x = x.astype(jnp.bfloat16)

    def to4d(y2d, shp, c):
        n, h, w = shp
        return y2d.reshape(n, h, w, LANES)[..., :c]

    # ReflectionPad(3) + Conv7x7 + BN + ReLU
    patches, shp = conv_patches(x, 7, 7, stride=1, pad=3, pad_mode="reflect")
    ch = ngf
    y2d = fused_conv_layer(patches, params["c1_w"],
                           gamma=params["bn1_g"], beta=params["bn1_b"], act="relu")
    x4d = to4d(y2d, shp, ch)

    # two stride-2 downsampling convs
    for i in range(2):
        patches, shp = conv_patches(x4d, 3, 3, stride=2, pad=1, pad_mode="zero")
        ch *= 2
        y2d = fused_conv_layer(patches, params[f"down{i}_w"],
                               gamma=params[f"down{i}_g"],
                               beta=params[f"down{i}_b"], act="relu")
        x4d = to4d(y2d, shp, ch)

    # resnet blocks (reflect padding, no dropout with defaults)
    for b in range(n_blocks):
        skip = y2d                       # lane-dense (M, 128) block input
        patches, shp = conv_patches(x4d, 3, 3, stride=1, pad=1, pad_mode="reflect")
        h2d = fused_conv_layer(patches, params[f"res{b}_w1"],
                               gamma=params[f"res{b}_g1"],
                               beta=params[f"res{b}_b1"], act="relu")
        h4d = to4d(h2d, shp, ch)
        patches, shp = conv_patches(h4d, 3, 3, stride=1, pad=1, pad_mode="reflect")
        y2d = fused_conv_layer(patches, params[f"res{b}_w2"],
                               gamma=params[f"res{b}_g2"],
                               beta=params[f"res{b}_b2"], act="none",
                               residual=skip)
        x4d = to4d(y2d, shp, ch)

    # two stride-2 transposed convs
    for i in range(2):
        patches, shp = conv_transpose_patches(x4d)
        ch //= 2
        y2d = fused_conv_layer(patches, params[f"up{i}_w"],
                               gamma=params[f"up{i}_g"],
                               beta=params[f"up{i}_b"], act="relu")
        x4d = to4d(y2d, shp, ch)

    # ReflectionPad(3) + Conv7x7 (with bias) + Tanh
    patches, shp = conv_patches(x4d, 7, 7, stride=1, pad=3, pad_mode="reflect")
    y2d = fused_conv_layer(patches, params["cf_w"], bias=params["cf_b"],
                           act="tanh", out_dtype=jnp.float32)
    n, h, w = shp
    return y2d.reshape(n, h, w, LANES)[..., :output_nc]


# --------------------------------- main ---------------------------------------

if __name__ == "__main__":
    key = jax.random.PRNGKey(0)
    k_x, k_p = jax.random.split(key)

    # Small shapes consistent with the module: batch=2, 3 in/out channels,
    # 16x16 spatial, ngf=8, n_blocks=2.
    N, H, W, input_nc = 2, 16, 16, 3
    ngf, n_blocks, output_nc = 8, 2, 3

    x = jax.random.normal(k_x, (N, H, W, input_nc), jnp.float32)
    params = init_params(k_p, input_nc, output_nc, ngf, n_blocks)

    fwd = jax.jit(functools.partial(generator_forward, ngf=ngf,
                                    output_nc=output_nc, n_blocks=n_blocks))
    out = jax.block_until_ready(fwd(x, params))

    assert out.shape == (N, H, W, output_nc), out.shape
    assert bool(jnp.all(jnp.isfinite(out)))
    assert bool(jnp.all(jnp.abs(out) <= 1.0))   # tanh output range
    print("KERNEL_OK")
</pallas_src>

<mosaic_0001>
module attributes {stable_mosaic.version = 11 : i64} {
  func.func @_layer_kernel(%arg0: memref<512x392xbf16, #tpu.memory_space<vmem>>, %arg1: memref<392x128xbf16, #tpu.memory_space<vmem>>, %arg2: memref<1x128xf32, #tpu.memory_space<vmem>>, %arg3: memref<1x128xf32, #tpu.memory_space<vmem>>, %arg4: memref<512x128xbf16, #tpu.memory_space<vmem>>) attributes {dimension_semantics = [], scalar_prefetch = 0 : i64, scratch_operands = 0 : i64, tpu.core_type = #tpu.core_type<tc>} {
    %c0 = arith.constant 0 : index
    %c0_0 = arith.constant 0 : index
    %0 = vector.load %arg0[%c0, %c0_0] : memref<512x392xbf16, #tpu.memory_space<vmem>>, vector<512x392xbf16>
    %c0_1 = arith.constant 0 : index
    %c0_2 = arith.constant 0 : index
    %1 = vector.load %arg1[%c0_1, %c0_2] : memref<392x128xbf16, #tpu.memory_space<vmem>>, vector<392x128xbf16>
    %cst = arith.constant dense<0.000000e+00> : vector<512x128xf32>
    %2 = tpu.matmul %0, %1, %cst {dimension_numbers = #tpu.dot_dimension_numbers<[1], [0], [0], [1], [0, 0, 1, 1], [], []>} : vector<512x392xbf16>, vector<392x128xbf16>, vector<512x128xf32> -> vector<512x128xf32>
    %cst_3 = arith.constant dense<0.000000e+00> : vector<128xf32>
    %3 = vector.multi_reduction <add>, %2, %cst_3 [0] : vector<512x128xf32> to vector<128xf32>
    %4 = vector.shape_cast %3 : vector<128xf32> to vector<1x128xf32>
    %5 = arith.mulf %2, %2 : vector<512x128xf32>
    %cst_4 = arith.constant dense<0.000000e+00> : vector<128xf32>
    %6 = vector.multi_reduction <add>, %5, %cst_4 [0] : vector<512x128xf32> to vector<128xf32>
    %7 = vector.shape_cast %6 : vector<128xf32> to vector<1x128xf32>
    %cst_5 = arith.constant 0.001953125 : f32
    %8 = vector.broadcast %cst_5 : f32 to vector<1x128xf32>
    %9 = arith.mulf %4, %8 : vector<1x128xf32>
    %cst_6 = arith.constant 0.001953125 : f32
    %10 = vector.broadcast %cst_6 : f32 to vector<1x128xf32>
    %11 = arith.mulf %7, %10 : vector<1x128xf32>
    %12 = arith.mulf %9, %9 : vector<1x128xf32>
    %13 = arith.subf %11, %12 : vector<1x128xf32>
    %cst_7 = arith.constant 0.000000e+00 : f32
    %14 = vector.broadcast %cst_7 : f32 to vector<1x128xf32>
    %15 = arith.maximumf %13, %14 : vector<1x128xf32>
    %cst_8 = arith.constant 9.99999974E-6 : f32
    %16 = vector.broadcast %cst_8 : f32 to vector<1x128xf32>
    %17 = arith.addf %15, %16 : vector<1x128xf32>
    %18 = math.rsqrt %17 : vector<1x128xf32>
    %c0_9 = arith.constant 0 : index
    %c0_10 = arith.constant 0 : index
    %19 = vector.load %arg2[%c0_9, %c0_10] : memref<1x128xf32, #tpu.memory_space<vmem>>, vector<1x128xf32>
    %20 = arith.mulf %19, %18 : vector<1x128xf32>
    %c0_11 = arith.constant 0 : index
    %c0_12 = arith.constant 0 : index
    %21 = vector.load %arg3[%c0_11, %c0_12] : memref<1x128xf32, #tpu.memory_space<vmem>>, vector<1x128xf32>
    %22 = arith.mulf %9, %20 : vector<1x128xf32>
    %23 = arith.subf %21, %22 : vector<1x128xf32>
    %24 = vector.broadcast %20 : vector<1x128xf32> to vector<512x128xf32>
    %25 = arith.mulf %2, %24 : vector<512x128xf32>
    %26 = vector.broadcast %23 : vector<1x128xf32> to vector<512x128xf32>
    %27 = arith.addf %25, %26 : vector<512x128xf32>
    %cst_13 = arith.constant 0.000000e+00 : f32
    %28 = vector.broadcast %cst_13 : f32 to vector<512x128xf32>
    %29 = arith.maximumf %27, %28 : vector<512x128xf32>
    %30 = arith.truncf %29 : vector<512x128xf32> to vector<512x128xbf16>
    %c0_14 = arith.constant 0 : index
    %c0_15 = arith.constant 0 : index
    %31 = vector.load %arg4[%c0_14, %c0_15] : memref<512x128xbf16, #tpu.memory_space<vmem>>, vector<512x128xbf16>
    tpu.vector_store %arg4[%c0_14, %c0_15], %30 {strides = array<i32>} : memref<512x128xbf16, #tpu.memory_space<vmem>>, vector<512x128xbf16>,
    return
  }
}

module attributes {stable_mosaic.version = 11 : i64} {
  func.func @_layer_kernel(%arg0: memref<128x72xbf16, #tpu.memory_space<vmem>>, %arg1: memref<72x128xbf16, #tpu.memory_space<vmem>>, %arg2: memref<1x128xf32, #tpu.memory_space<vmem>>, %arg3: memref<1x128xf32, #tpu.memory_space<vmem>>, %arg4: memref<128x128xbf16, #tpu.memory_space<vmem>>) attributes {dimension_semantics = [], scalar_prefetch = 0 : i64, scratch_operands = 0 : i64, tpu.core_type = #tpu.core_type<tc>} {
    %c0 = arith.constant 0 : index
    %c0_0 = arith.constant 0 : index
    %0 = vector.load %arg0[%c0, %c0_0] : memref<128x72xbf16, #tpu.memory_space<vmem>>, vector<128x72xbf16>
    %c0_1 = arith.constant 0 : index
    %c0_2 = arith.constant 0 : index
    %1 = vector.load %arg1[%c0_1, %c0_2] : memref<72x128xbf16, #tpu.memory_space<vmem>>, vector<72x128xbf16>
    %cst = arith.constant dense<0.000000e+00> : vector<128x128xf32>
    %2 = tpu.matmul %0, %1, %cst {dimension_numbers = #tpu.dot_dimension_numbers<[1], [0], [0], [1], [0, 0, 1, 1], [], []>} : vector<128x72xbf16>, vector<72x128xbf16>, vector<128x128xf32> -> vector<128x128xf32>
    %cst_3 = arith.constant dense<0.000000e+00> : vector<128xf32>
    %3 = vector.multi_reduction <add>, %2, %cst_3 [0] : vector<128x128xf32> to vector<128xf32>
    %4 = vector.shape_cast %3 : vector<128xf32> to vector<1x128xf32>
    %5 = arith.mulf %2, %2 : vector<128x128xf32>
    %cst_4 = arith.constant dense<0.000000e+00> : vector<128xf32>
    %6 = vector.multi_reduction <add>, %5, %cst_4 [0] : vector<128x128xf32> to vector<128xf32>
    %7 = vector.shape_cast %6 : vector<128xf32> to vector<1x128xf32>
    %cst_5 = arith.constant 7.812500e-03 : f32
    %8 = vector.broadcast %cst_5 : f32 to vector<1x128xf32>
    %9 = arith.mulf %4, %8 : vector<1x128xf32>
    %cst_6 = arith.constant 7.812500e-03 : f32
    %10 = vector.broadcast %cst_6 : f32 to vector<1x128xf32>
    %11 = arith.mulf %7, %10 : vector<1x128xf32>
    %12 = arith.mulf %9, %9 : vector<1x128xf32>
    %13 = arith.subf %11, %12 : vector<1x128xf32>
    %cst_7 = arith.constant 0.000000e+00 : f32
    %14 = vector.broadcast %cst_7 : f32 to vector<1x128xf32>
    %15 = arith.maximumf %13, %14 : vector<1x128xf32>
    %cst_8 = arith.constant 9.99999974E-6 : f32
    %16 = vector.broadcast %cst_8 : f32 to vector<1x128xf32>
    %17 = arith.addf %15, %16 : vector<1x128xf32>
    %18 = math.rsqrt %17 : vector<1x128xf32>
    %c0_9 = arith.constant 0 : index
    %c0_10 = arith.constant 0 : index
    %19 = vector.load %arg2[%c0_9, %c0_10] : memref<1x128xf32, #tpu.memory_space<vmem>>, vector<1x128xf32>
    %20 = arith.mulf %19, %18 : vector<1x128xf32>
    %c0_11 = arith.constant 0 : index
    %c0_12 = arith.constant 0 : index
    %21 = vector.load %arg3[%c0_11, %c0_12] : memref<1x128xf32, #tpu.memory_space<vmem>>, vector<1x128xf32>
    %22 = arith.mulf %9, %20 : vector<1x128xf32>
    %23 = arith.subf %21, %22 : vector<1x128xf32>
    %24 = vector.broadcast %20 : vector<1x128xf32> to vector<128x128xf32>
    %25 = arith.mulf %2, %24 : vector<128x128xf32>
    %26 = vector.broadcast %23 : vector<1x128xf32> to vector<128x128xf32>
    %27 = arith.addf %25, %26 : vector<128x128xf32>
    %cst_13 = arith.constant 0.000000e+00 : f32
    %28 = vector.broadcast %cst_13 : f32 to vector<128x128xf32>
    %29 = arith.maximumf %27, %28 : vector<128x128xf32>
    %30 = arith.truncf %29 : vector<128x128xf32> to vector<128x128xbf16>
    %c0_14 = arith.constant 0 : index
    %c0_15 = arith.constant 0 : index
    %31 = vector.load %arg4[%c0_14, %c0_15] : memref<128x128xbf16, #tpu.memory_space<vmem>>, vector<128x128xbf16>
    tpu.vector_store %arg4[%c0_14, %c0_15], %30 {strides = array<i32>} : memref<128x128xbf16, #tpu.memory_space<vmem>>, vector<128x128xbf16>,
    return
  }
}

module attributes {stable_mosaic.version = 11 : i64} {
  func.func @_layer_kernel(%arg0: memref<32x144xbf16, #tpu.memory_space<vmem>>, %arg1: memref<144x128xbf16, #tpu.memory_space<vmem>>, %arg2: memref<1x128xf32, #tpu.memory_space<vmem>>, %arg3: memref<1x128xf32, #tpu.memory_space<vmem>>, %arg4: memref<32x128xbf16, #tpu.memory_space<vmem>>) attributes {dimension_semantics = [], scalar_prefetch = 0 : i64, scratch_operands = 0 : i64, tpu.core_type = #tpu.core_type<tc>} {
    %c0 = arith.constant 0 : index
    %c0_0 = arith.constant 0 : index
    %0 = vector.load %arg0[%c0, %c0_0] : memref<32x144xbf16, #tpu.memory_space<vmem>>, vector<32x144xbf16>
    %c0_1 = arith.constant 0 : index
    %c0_2 = arith.constant 0 : index
    %1 = vector.load %arg1[%c0_1, %c0_2] : memref<144x128xbf16, #tpu.memory_space<vmem>>, vector<144x128xbf16>
    %cst = arith.constant dense<0.000000e+00> : vector<32x128xf32>
    %2 = tpu.matmul %0, %1, %cst {dimension_numbers = #tpu.dot_dimension_numbers<[1], [0], [0], [1], [0, 0, 1, 1], [], []>} : vector<32x144xbf16>, vector<144x128xbf16>, vector<32x128xf32> -> vector<32x128xf32>
    %cst_3 = arith.constant dense<0.000000e+00> : vector<128xf32>
    %3 = vector.multi_reduction <add>, %2, %cst_3 [0] : vector<32x128xf32> to vector<128xf32>
    %4 = vector.shape_cast %3 : vector<128xf32> to vector<1x128xf32>
    %5 = arith.mulf %2, %2 : vector<32x128xf32>
    %cst_4 = arith.constant dense<0.000000e+00> : vector<128xf32>
    %6 = vector.multi_reduction <add>, %5, %cst_4 [0] : vector<32x128xf32> to vector<128xf32>
    %7 = vector.shape_cast %6 : vector<128xf32> to vector<1x128xf32>
    %cst_5 = arith.constant 3.125000e-02 : f32
    %8 = vector.broadcast %cst_5 : f32 to vector<1x128xf32>
    %9 = arith.mulf %4, %8 : vector<1x128xf32>
    %cst_6 = arith.constant 3.125000e-02 : f32
    %10 = vector.broadcast %cst_6 : f32 to vector<1x128xf32>
    %11 = arith.mulf %7, %10 : vector<1x128xf32>
    %12 = arith.mulf %9, %9 : vector<1x128xf32>
    %13 = arith.subf %11, %12 : vector<1x128xf32>
    %cst_7 = arith.constant 0.000000e+00 : f32
    %14 = vector.broadcast %cst_7 : f32 to vector<1x128xf32>
    %15 = arith.maximumf %13, %14 : vector<1x128xf32>
    %cst_8 = arith.constant 9.99999974E-6 : f32
    %16 = vector.broadcast %cst_8 : f32 to vector<1x128xf32>
    %17 = arith.addf %15, %16 : vector<1x128xf32>
    %18 = math.rsqrt %17 : vector<1x128xf32>
    %c0_9 = arith.constant 0 : index
    %c0_10 = arith.constant 0 : index
    %19 = vector.load %arg2[%c0_9, %c0_10] : memref<1x128xf32, #tpu.memory_space<vmem>>, vector<1x128xf32>
    %20 = arith.mulf %19, %18 : vector<1x128xf32>
    %c0_11 = arith.constant 0 : index
    %c0_12 = arith.constant 0 : index
    %21 = vector.load %arg3[%c0_11, %c0_12] : memref<1x128xf32, #tpu.memory_space<vmem>>, vector<1x128xf32>
    %22 = arith.mulf %9, %20 : vector<1x128xf32>
    %23 = arith.subf %21, %22 : vector<1x128xf32>
    %24 = vector.broadcast %20 : vector<1x128xf32> to vector<32x128xf32>
    %25 = arith.mulf %2, %24 : vector<32x128xf32>
    %26 = vector.broadcast %23 : vector<1x128xf32> to vector<32x128xf32>
    %27 = arith.addf %25, %26 : vector<32x128xf32>
    %cst_13 = arith.constant 0.000000e+00 : f32
    %28 = vector.broadcast %cst_13 : f32 to vector<32x128xf32>
    %29 = arith.maximumf %27, %28 : vector<32x128xf32>
    %30 = arith.truncf %29 : vector<32x128xf32> to vector<32x128xbf16>
    %c0_14 = arith.constant 0 : index
    %c0_15 = arith.constant 0 : index
    %31 = vector.load %arg4[%c0_14, %c0_15] : memref<32x128xbf16, #tpu.memory_space<vmem>>, vector<32x128xbf16>
    tpu.vector_store %arg4[%c0_14, %c0_15], %30 {strides = array<i32>} : memref<32x128xbf16, #tpu.memory_space<vmem>>, vector<32x128xbf16>,
    return
  }
}

module attributes {stable_mosaic.version = 11 : i64} {
  func.func @_layer_kernel(%arg0: memref<32x288xbf16, #tpu.memory_space<vmem>>, %arg1: memref<288x128xbf16, #tpu.memory_space<vmem>>, %arg2: memref<1x128xf32, #tpu.memory_space<vmem>>, %arg3: memref<1x128xf32, #tpu.memory_space<vmem>>, %arg4: memref<32x128xbf16, #tpu.memory_space<vmem>>) attributes {dimension_semantics = [], scalar_prefetch = 0 : i64, scratch_operands = 0 : i64, tpu.core_type = #tpu.core_type<tc>} {
    %c0 = arith.constant 0 : index
    %c0_0 = arith.constant 0 : index
    %0 = vector.load %arg0[%c0, %c0_0] : memref<32x288xbf16, #tpu.memory_space<vmem>>, vector<32x288xbf16>
    %c0_1 = arith.constant 0 : index
    %c0_2 = arith.constant 0 : index
    %1 = vector.load %arg1[%c0_1, %c0_2] : memref<288x128xbf16, #tpu.memory_space<vmem>>, vector<288x128xbf16>
    %cst = arith.constant dense<0.000000e+00> : vector<32x128xf32>
    %2 = tpu.matmul %0, %1, %cst {dimension_numbers = #tpu.dot_dimension_numbers<[1], [0], [0], [1], [0, 0, 1, 1], [], []>} : vector<32x288xbf16>, vector<288x128xbf16>, vector<32x128xf32> -> vector<32x128xf32>
    %cst_3 = arith.constant dense<0.000000e+00> : vector<128xf32>
    %3 = vector.multi_reduction <add>, %2, %cst_3 [0] : vector<32x128xf32> to vector<128xf32>
    %4 = vector.shape_cast %3 : vector<128xf32> to vector<1x128xf32>
    %5 = arith.mulf %2, %2 : vector<32x128xf32>
    %cst_4 = arith.constant dense<0.000000e+00> : vector<128xf32>
    %6 = vector.multi_reduction <add>, %5, %cst_4 [0] : vector<32x128xf32> to vector<128xf32>
    %7 = vector.shape_cast %6 : vector<128xf32> to vector<1x128xf32>
    %cst_5 = arith.constant 3.125000e-02 : f32
    %8 = vector.broadcast %cst_5 : f32 to vector<1x128xf32>
    %9 = arith.mulf %4, %8 : vector<1x128xf32>
    %cst_6 = arith.constant 3.125000e-02 : f32
    %10 = vector.broadcast %cst_6 : f32 to vector<1x128xf32>
    %11 = arith.mulf %7, %10 : vector<1x128xf32>
    %12 = arith.mulf %9, %9 : vector<1x128xf32>
    %13 = arith.subf %11, %12 : vector<1x128xf32>
    %cst_7 = arith.constant 0.000000e+00 : f32
    %14 = vector.broadcast %cst_7 : f32 to vector<1x128xf32>
    %15 = arith.maximumf %13, %14 : vector<1x128xf32>
    %cst_8 = arith.constant 9.99999974E-6 : f32
    %16 = vector.broadcast %cst_8 : f32 to vector<1x128xf32>
    %17 = arith.addf %15, %16 : vector<1x128xf32>
    %18 = math.rsqrt %17 : vector<1x128xf32>
    %c0_9 = arith.constant 0 : index
    %c0_10 = arith.constant 0 : index
    %19 = vector.load %arg2[%c0_9, %c0_10] : memref<1x128xf32, #tpu.memory_space<vmem>>, vector<1x128xf32>
    %20 = arith.mulf %19, %18 : vector<1x128xf32>
    %c0_11 = arith.constant 0 : index
    %c0_12 = arith.constant 0 : index
    %21 = vector.load %arg3[%c0_11, %c0_12] : memref<1x128xf32, #tpu.memory_space<vmem>>, vector<1x128xf32>
    %22 = arith.mulf %9, %20 : vector<1x128xf32>
    %23 = arith.subf %21, %22 : vector<1x128xf32>
    %24 = vector.broadcast %20 : vector<1x128xf32> to vector<32x128xf32>
    %25 = arith.mulf %2, %24 : vector<32x128xf32>
    %26 = vector.broadcast %23 : vector<1x128xf32> to vector<32x128xf32>
    %27 = arith.addf %25, %26 : vector<32x128xf32>
    %cst_13 = arith.constant 0.000000e+00 : f32
    %28 = vector.broadcast %cst_13 : f32 to vector<32x128xf32>
    %29 = arith.maximumf %27, %28 : vector<32x128xf32>
    %30 = arith.truncf %29 : vector<32x128xf32> to vector<32x128xbf16>
    %c0_14 = arith.constant 0 : index
    %c0_15 = arith.constant 0 : index
    %31 = vector.load %arg4[%c0_14, %c0_15] : memref<32x128xbf16, #tpu.memory_space<vmem>>, vector<32x128xbf16>
    tpu.vector_store %arg4[%c0_14, %c0_15], %30 {strides = array<i32>} : memref<32x128xbf16, #tpu.memory_space<vmem>>, vector<32x128xbf16>,
    return
  }
}

module attributes {stable_mosaic.version = 11 : i64} {
  func.func @_layer_kernel(%arg0: memref<32x288xbf16, #tpu.memory_space<vmem>>, %arg1: memref<288x128xbf16, #tpu.memory_space<vmem>>, %arg2: memref<1x128xf32, #tpu.memory_space<vmem>>, %arg3: memref<1x128xf32, #tpu.memory_space<vmem>>, %arg4: memref<32x128xbf16, #tpu.memory_space<vmem>>, %arg5: memref<32x128xbf16, #tpu.memory_space<vmem>>) attributes {dimension_semantics = [], scalar_prefetch = 0 : i64, scratch_operands = 0 : i64, tpu.core_type = #tpu.core_type<tc>} {
    %c0 = arith.constant 0 : index
    %c0_0 = arith.constant 0 : index
    %0 = vector.load %arg0[%c0, %c0_0] : memref<32x288xbf16, #tpu.memory_space<vmem>>, vector<32x288xbf16>
    %c0_1 = arith.constant 0 : index
    %c0_2 = arith.constant 0 : index
    %1 = vector.load %arg1[%c0_1, %c0_2] : memref<288x128xbf16, #tpu.memory_space<vmem>>, vector<288x128xbf16>
    %cst = arith.constant dense<0.000000e+00> : vector<32x128xf32>
    %2 = tpu.matmul %0, %1, %cst {dimension_numbers = #tpu.dot_dimension_numbers<[1], [0], [0], [1], [0, 0, 1, 1], [], []>} : vector<32x288xbf16>, vector<288x128xbf16>, vector<32x128xf32> -> vector<32x128xf32>
    %cst_3 = arith.constant dense<0.000000e+00> : vector<128xf32>
    %3 = vector.multi_reduction <add>, %2, %cst_3 [0] : vector<32x128xf32> to vector<128xf32>
    %4 = vector.shape_cast %3 : vector<128xf32> to vector<1x128xf32>
    %5 = arith.mulf %2, %2 : vector<32x128xf32>
    %cst_4 = arith.constant dense<0.000000e+00> : vector<128xf32>
    %6 = vector.multi_reduction <add>, %5, %cst_4 [0] : vector<32x128xf32> to vector<128xf32>
    %7 = vector.shape_cast %6 : vector<128xf32> to vector<1x128xf32>
    %cst_5 = arith.constant 3.125000e-02 : f32
    %8 = vector.broadcast %cst_5 : f32 to vector<1x128xf32>
    %9 = arith.mulf %4, %8 : vector<1x128xf32>
    %cst_6 = arith.constant 3.125000e-02 : f32
    %10 = vector.broadcast %cst_6 : f32 to vector<1x128xf32>
    %11 = arith.mulf %7, %10 : vector<1x128xf32>
    %12 = arith.mulf %9, %9 : vector<1x128xf32>
    %13 = arith.subf %11, %12 : vector<1x128xf32>
    %cst_7 = arith.constant 0.000000e+00 : f32
    %14 = vector.broadcast %cst_7 : f32 to vector<1x128xf32>
    %15 = arith.maximumf %13, %14 : vector<1x128xf32>
    %cst_8 = arith.constant 9.99999974E-6 : f32
    %16 = vector.broadcast %cst_8 : f32 to vector<1x128xf32>
    %17 = arith.addf %15, %16 : vector<1x128xf32>
    %18 = math.rsqrt %17 : vector<1x128xf32>
    %c0_9 = arith.constant 0 : index
    %c0_10 = arith.constant 0 : index
    %19 = vector.load %arg2[%c0_9, %c0_10] : memref<1x128xf32, #tpu.memory_space<vmem>>, vector<1x128xf32>
    %20 = arith.mulf %19, %18 : vector<1x128xf32>
    %c0_11 = arith.constant 0 : index
    %c0_12 = arith.constant 0 : index
    %21 = vector.load %arg3[%c0_11, %c0_12] : memref<1x128xf32, #tpu.memory_space<vmem>>, vector<1x128xf32>
    %22 = arith.mulf %9, %20 : vector<1x128xf32>
    %23 = arith.subf %21, %22 : vector<1x128xf32>
    %24 = vector.broadcast %20 : vector<1x128xf32> to vector<32x128xf32>
    %25 = arith.mulf %2, %24 : vector<32x128xf32>
    %26 = vector.broadcast %23 : vector<1x128xf32> to vector<32x128xf32>
    %27 = arith.addf %25, %26 : vector<32x128xf32>
    %c0_13 = arith.constant 0 : index
    %c0_14 = arith.constant 0 : index
    %28 = vector.load %arg4[%c0_13, %c0_14] : memref<32x128xbf16, #tpu.memory_space<vmem>>, vector<32x128xbf16>
    %29 = arith.extf %28 : vector<32x128xbf16> to vector<32x128xf32>
    %30 = arith.addf %27, %29 : vector<32x128xf32>
    %31 = arith.truncf %30 : vector<32x128xf32> to vector<32x128xbf16>
    %c0_15 = arith.constant 0 : index
    %c0_16 = arith.constant 0 : index
    %32 = vector.load %arg5[%c0_15, %c0_16] : memref<32x128xbf16, #tpu.memory_space<vmem>>, vector<32x128xbf16>
    tpu.vector_store %arg5[%c0_15, %c0_16], %31 {strides = array<i32>} : memref<32x128xbf16, #tpu.memory_space<vmem>>, vector<32x128xbf16>,
    return
  }
}

module attributes {stable_mosaic.version = 11 : i64} {
  func.func @_layer_kernel(%arg0: memref<128x288xbf16, #tpu.memory_space<vmem>>, %arg1: memref<288x128xbf16, #tpu.memory_space<vmem>>, %arg2: memref<1x128xf32, #tpu.memory_space<vmem>>, %arg3: memref<1x128xf32, #tpu.memory_space<vmem>>, %arg4: memref<128x128xbf16, #tpu.memory_space<vmem>>) attributes {dimension_semantics = [], scalar_prefetch = 0 : i64, scratch_operands = 0 : i64, tpu.core_type = #tpu.core_type<tc>} {
    %c0 = arith.constant 0 : index
    %c0_0 = arith.constant 0 : index
    %0 = vector.load %arg0[%c0, %c0_0] : memref<128x288xbf16, #tpu.memory_space<vmem>>, vector<128x288xbf16>
    %c0_1 = arith.constant 0 : index
    %c0_2 = arith.constant 0 : index
    %1 = vector.load %arg1[%c0_1, %c0_2] : memref<288x128xbf16, #tpu.memory_space<vmem>>, vector<288x128xbf16>
    %cst = arith.constant dense<0.000000e+00> : vector<128x128xf32>
    %2 = tpu.matmul %0, %1, %cst {dimension_numbers = #tpu.dot_dimension_numbers<[1], [0], [0], [1], [0, 0, 1, 1], [], []>} : vector<128x288xbf16>, vector<288x128xbf16>, vector<128x128xf32> -> vector<128x128xf32>
    %cst_3 = arith.constant dense<0.000000e+00> : vector<128xf32>
    %3 = vector.multi_reduction <add>, %2, %cst_3 [0] : vector<128x128xf32> to vector<128xf32>
    %4 = vector.shape_cast %3 : vector<128xf32> to vector<1x128xf32>
    %5 = arith.mulf %2, %2 : vector<128x128xf32>
    %cst_4 = arith.constant dense<0.000000e+00> : vector<128xf32>
    %6 = vector.multi_reduction <add>, %5, %cst_4 [0] : vector<128x128xf32> to vector<128xf32>
    %7 = vector.shape_cast %6 : vector<128xf32> to vector<1x128xf32>
    %cst_5 = arith.constant 7.812500e-03 : f32
    %8 = vector.broadcast %cst_5 : f32 to vector<1x128xf32>
    %9 = arith.mulf %4, %8 : vector<1x128xf32>
    %cst_6 = arith.constant 7.812500e-03 : f32
    %10 = vector.broadcast %cst_6 : f32 to vector<1x128xf32>
    %11 = arith.mulf %7, %10 : vector<1x128xf32>
    %12 = arith.mulf %9, %9 : vector<1x128xf32>
    %13 = arith.subf %11, %12 : vector<1x128xf32>
    %cst_7 = arith.constant 0.000000e+00 : f32
    %14 = vector.broadcast %cst_7 : f32 to vector<1x128xf32>
    %15 = arith.maximumf %13, %14 : vector<1x128xf32>
    %cst_8 = arith.constant 9.99999974E-6 : f32
    %16 = vector.broadcast %cst_8 : f32 to vector<1x128xf32>
    %17 = arith.addf %15, %16 : vector<1x128xf32>
    %18 = math.rsqrt %17 : vector<1x128xf32>
    %c0_9 = arith.constant 0 : index
    %c0_10 = arith.constant 0 : index
    %19 = vector.load %arg2[%c0_9, %c0_10] : memref<1x128xf32, #tpu.memory_space<vmem>>, vector<1x128xf32>
    %20 = arith.mulf %19, %18 : vector<1x128xf32>
    %c0_11 = arith.constant 0 : index
    %c0_12 = arith.constant 0 : index
    %21 = vector.load %arg3[%c0_11, %c0_12] : memref<1x128xf32, #tpu.memory_space<vmem>>, vector<1x128xf32>
    %22 = arith.mulf %9, %20 : vector<1x128xf32>
    %23 = arith.subf %21, %22 : vector<1x128xf32>
    %24 = vector.broadcast %20 : vector<1x128xf32> to vector<128x128xf32>
    %25 = arith.mulf %2, %24 : vector<128x128xf32>
    %26 = vector.broadcast %23 : vector<1x128xf32> to vector<128x128xf32>
    %27 = arith.addf %25, %26 : vector<128x128xf32>
    %cst_13 = arith.constant 0.000000e+00 : f32
    %28 = vector.broadcast %cst_13 : f32 to vector<128x128xf32>
    %29 = arith.maximumf %27, %28 : vector<128x128xf32>
    %30 = arith.truncf %29 : vector<128x128xf32> to vector<128x128xbf16>
    %c0_14 = arith.constant 0 : index
    %c0_15 = arith.constant 0 : index
    %31 = vector.load %arg4[%c0_14, %c0_15] : memref<128x128xbf16, #tpu.memory_space<vmem>>, vector<128x128xbf16>
    tpu.vector_store %arg4[%c0_14, %c0_15], %30 {strides = array<i32>} : memref<128x128xbf16, #tpu.memory_space<vmem>>, vector<128x128xbf16>,
    return
  }
}

module attributes {stable_mosaic.version = 11 : i64} {
  func.func @_layer_kernel(%arg0: memref<512x144xbf16, #tpu.memory_space<vmem>>, %arg1: memref<144x128xbf16, #tpu.memory_space<vmem>>, %arg2: memref<1x128xf32, #tpu.memory_space<vmem>>, %arg3: memref<1x128xf32, #tpu.memory_space<vmem>>, %arg4: memref<512x128xbf16, #tpu.memory_space<vmem>>) attributes {dimension_semantics = [], scalar_prefetch = 0 : i64, scratch_operands = 0 : i64, tpu.core_type = #tpu.core_type<tc>} {
    %c0 = arith.constant 0 : index
    %c0_0 = arith.constant 0 : index
    %0 = vector.load %arg0[%c0, %c0_0] : memref<512x144xbf16, #tpu.memory_space<vmem>>, vector<512x144xbf16>
    %c0_1 = arith.constant 0 : index
    %c0_2 = arith.constant 0 : index
    %1 = vector.load %arg1[%c0_1, %c0_2] : memref<144x128xbf16, #tpu.memory_space<vmem>>, vector<144x128xbf16>
    %cst = arith.constant dense<0.000000e+00> : vector<512x128xf32>
    %2 = tpu.matmul %0, %1, %cst {dimension_numbers = #tpu.dot_dimension_numbers<[1], [0], [0], [1], [0, 0, 1, 1], [], []>} : vector<512x144xbf16>, vector<144x128xbf16>, vector<512x128xf32> -> vector<512x128xf32>
    %cst_3 = arith.constant dense<0.000000e+00> : vector<128xf32>
    %3 = vector.multi_reduction <add>, %2, %cst_3 [0] : vector<512x128xf32> to vector<128xf32>
    %4 = vector.shape_cast %3 : vector<128xf32> to vector<1x128xf32>
    %5 = arith.mulf %2, %2 : vector<512x128xf32>
    %cst_4 = arith.constant dense<0.000000e+00> : vector<128xf32>
    %6 = vector.multi_reduction <add>, %5, %cst_4 [0] : vector<512x128xf32> to vector<128xf32>
    %7 = vector.shape_cast %6 : vector<128xf32> to vector<1x128xf32>
    %cst_5 = arith.constant 0.001953125 : f32
    %8 = vector.broadcast %cst_5 : f32 to vector<1x128xf32>
    %9 = arith.mulf %4, %8 : vector<1x128xf32>
    %cst_6 = arith.constant 0.001953125 : f32
    %10 = vector.broadcast %cst_6 : f32 to vector<1x128xf32>
    %11 = arith.mulf %7, %10 : vector<1x128xf32>
    %12 = arith.mulf %9, %9 : vector<1x128xf32>
    %13 = arith.subf %11, %12 : vector<1x128xf32>
    %cst_7 = arith.constant 0.000000e+00 : f32
    %14 = vector.broadcast %cst_7 : f32 to vector<1x128xf32>
    %15 = arith.maximumf %13, %14 : vector<1x128xf32>
    %cst_8 = arith.constant 9.99999974E-6 : f32
    %16 = vector.broadcast %cst_8 : f32 to vector<1x128xf32>
    %17 = arith.addf %15, %16 : vector<1x128xf32>
    %18 = math.rsqrt %17 : vector<1x128xf32>
    %c0_9 = arith.constant 0 : index
    %c0_10 = arith.constant 0 : index
    %19 = vector.load %arg2[%c0_9, %c0_10] : memref<1x128xf32, #tpu.memory_space<vmem>>, vector<1x128xf32>
    %20 = arith.mulf %19, %18 : vector<1x128xf32>
    %c0_11 = arith.constant 0 : index
    %c0_12 = arith.constant 0 : index
    %21 = vector.load %arg3[%c0_11, %c0_12] : memref<1x128xf32, #tpu.memory_space<vmem>>, vector<1x128xf32>
    %22 = arith.mulf %9, %20 : vector<1x128xf32>
    %23 = arith.subf %21, %22 : vector<1x128xf32>
    %24 = vector.broadcast %20 : vector<1x128xf32> to vector<512x128xf32>
    %25 = arith.mulf %2, %24 : vector<512x128xf32>
    %26 = vector.broadcast %23 : vector<1x128xf32> to vector<512x128xf32>
    %27 = arith.addf %25, %26 : vector<512x128xf32>
    %cst_13 = arith.constant 0.000000e+00 : f32
    %28 = vector.broadcast %cst_13 : f32 to vector<512x128xf32>
    %29 = arith.maximumf %27, %28 : vector<512x128xf32>
    %30 = arith.truncf %29 : vector<512x128xf32> to vector<512x128xbf16>
    %c0_14 = arith.constant 0 : index
    %c0_15 = arith.constant 0 : index
    %31 = vector.load %arg4[%c0_14, %c0_15] : memref<512x128xbf16, #tpu.memory_space<vmem>>, vector<512x128xbf16>
    tpu.vector_store %arg4[%c0_14, %c0_15], %30 {strides = array<i32>} : memref<512x128xbf16, #tpu.memory_space<vmem>>, vector<512x128xbf16>,
    return
  }
}

module attributes {stable_mosaic.version = 11 : i64} {
  func.func @_layer_kernel(%arg0: memref<512x392xbf16, #tpu.memory_space<vmem>>, %arg1: memref<392x128xbf16, #tpu.memory_space<vmem>>, %arg2: memref<1x128xf32, #tpu.memory_space<vmem>>, %arg3: memref<512x128xf32, #tpu.memory_space<vmem>>) attributes {dimension_semantics = [], scalar_prefetch = 0 : i64, scratch_operands = 0 : i64, tpu.core_type = #tpu.core_type<tc>} {
    %c0 = arith.constant 0 : index
    %c0_0 = arith.constant 0 : index
    %0 = vector.load %arg0[%c0, %c0_0] : memref<512x392xbf16, #tpu.memory_space<vmem>>, vector<512x392xbf16>
    %c0_1 = arith.constant 0 : index
    %c0_2 = arith.constant 0 : index
    %1 = vector.load %arg1[%c0_1, %c0_2] : memref<392x128xbf16, #tpu.memory_space<vmem>>, vector<392x128xbf16>
    %cst = arith.constant dense<0.000000e+00> : vector<512x128xf32>
    %2 = tpu.matmul %0, %1, %cst {dimension_numbers = #tpu.dot_dimension_numbers<[1], [0], [0], [1], [0, 0, 1, 1], [], []>} : vector<512x392xbf16>, vector<392x128xbf16>, vector<512x128xf32> -> vector<512x128xf32>
    %c0_3 = arith.constant 0 : index
    %c0_4 = arith.constant 0 : index
    %3 = vector.load %arg2[%c0_3, %c0_4] : memref<1x128xf32, #tpu.memory_space<vmem>>, vector<1x128xf32>
    %4 = vector.broadcast %3 : vector<1x128xf32> to vector<512x128xf32>
    %5 = arith.addf %2, %4 : vector<512x128xf32>
    %6 = math.tanh %5 : vector<512x128xf32>
    %c0_5 = arith.constant 0 : index
    %c0_6 = arith.constant 0 : index
    %7 = vector.load %arg3[%c0_5, %c0_6] : memref<512x128xf32, #tpu.memory_space<vmem>>, vector<512x128xf32>
    tpu.vector_store %arg3[%c0_5, %c0_6], %6 {strides = array<i32>} : memref<512x128xf32, #tpu.memory_space<vmem>>, vector<512x128xf32>,
    return
  }
}

</mosaic_0001>

<bundles_post_ra>
// kernel: generator_forward.10
= control target key start
LH: loop header
LB: loop body
LE: loop exit
PB: predicated region body
PF: predicated region fallthrough
CT: control target
= control target key end

     0   :  { %v3095_v0 = vmov 0   ;;  %vm950_vm0 = vcmask 64512   ;;  %vm1047_vm1 = vcmask 1043456   ;;  %s4713_s1 = inlined_call_operand.vmem [shape: bf16[392,128], index: 1, kind: input, shape index: {}]   ;;  %s4714_s0 = inlined_call_operand.vmem [shape: bf16[512,392], index: 0, kind: input, shape index: {}]   ;;  %s4715_s2 = inlined_call_operand.vmem [shape: f32[1,128], index: 2, kind: input, shape index: {}]   ;;  %s4716_s3 = inlined_call_operand.vmem [shape: f32[1,128], index: 3, kind: input, shape index: {}]   ;;  %s4717_s4 = inlined_call_operand.vmem [shape: bf16[512,128], index: 4, kind: output, shape index: {}]  }
   0x1   :  { %1051 = vmatprep.subr.bf16.mxu0 %v3095_v0  ;;  %v2876_v1 = vld [vmem:[%s4713_s1 + $0x38] sm:$0xff]   ;;  %1340 = vmatprep.subr.bf16.mxu1 %v3095_v0  ;;  %v2877_v2 = vld [vmem:[%s4713_s1 + $0x30] sm:$0xff]   ;;  %v2878_v3 = vld [vmem:[%s4713_s1 + $0x28] sm:$0xff]  }
   0x2   :  { %1052 = vmatpush1.bf16.msra.mxu0 %v2876_v1  ;;  %v2882_v4 = vld [vmem:[%s4713_s1 + $0xb8] sm:$0xff]   ;;  %v2884_v5 = vld [vmem:[%s4713_s1 + $0xb0] sm:$0xff]   ;;  %v2879_v6 = vld [vmem:[%s4713_s1 + $0x20] sm:$0xff]  }
   0x3   :  { %1053 = vmatprep.subr.bf16.mxu0 %v3095_v0  ;;  %1341 = vmatpush1.bf16.msra.mxu1 %v2882_v4  ;;  %v2886_v7 = vld [vmem:[%s4713_s1 + $0xa8] sm:$0xff]   ;;  %v2880_v8 = vld [vmem:[%s4713_s1 + $0x18] sm:$0xff]   ;;  %v2888_v9 = vld [vmem:[%s4713_s1 + $0xa0] sm:$0xff]  }
   0x4   :  { %1342 = vmatprep.subr.bf16.mxu1 %v3095_v0  ;;  %v2881_v10 = vld [vmem:[%s4713_s1 + $0x10] sm:$0xff]   ;;  %v2890_v11 = vld [vmem:[%s4713_s1 + $0x98] sm:$0xff]   ;;  %v2883_v12 = vld [vmem:[%s4713_s1 + $0x8] sm:$0xff]  }
   0x5   :  { %v2892_v13 = vld [vmem:[%s4713_s1 + $0x90] sm:$0xff]   ;;  %v2902_v14 = vld [vmem:[%s4714_s0 + $0xc] ss:$16 sps:$4 sm:$0xff]   ;;  %v2885_v15 = vld [vmem:[%s4713_s1] sm:$0xff]  }
   0x6   :  { %1054 = vmatpush1.bf16.msra.mxu0 %v2877_v2  ;;  %2524 = vmatprep.mubr.msk.bf16.mxu1 %vm950_vm0, %v2902_v14  ;;  %v2906_v16 = vld [vmem:[%s4714_s0 + $0x4] ss:$16 sps:$4 sm:$0xff]   ;;  %v2894_v17 = vld [vmem:[%s4713_s1 + $0x88] sm:$0xff]   ;;  %v2887_v18 = vld [vmem:[%s4713_s1 + $0x78] sm:$0xff]  }
   0x7   :  { %1055 = vmatprep.subr.bf16.mxu0 %v3095_v0  ;;  %1343 = vmatpush1.bf16.msra.mxu1 %v2884_v5  ;;  %v2896_v19 = vld [vmem:[%s4713_s1 + $0x80] sm:$0xff]   ;;  %v2889_v21 = vld [vmem:[%s4713_s1 + $0x70] sm:$0xff]   ;;  %v2891_v23 = vld [vmem:[%s4713_s1 + $0x68] sm:$0xff]  }
   0x8   :  { %1344 = vmatprep.subr.bf16.mxu1 %v3095_v0  ;;  %1083 = vmatprep.mubr.bf16.mxu0 %v2906_v16  ;;  %v2898_v20 = vld [vmem:[%s4713_s1 + $0xc0] ss:$0 sps:$4 sm:$0xff]   ;;  %v2900_v24 = vld [vmem:[%s4714_s0 + $0x8] ss:$16 sps:$4 sm:$0xff]   ;;  %v2907_v25 = vld [vmem:[%s4714_s0 + $0x2c] ss:$16 sps:$4 sm:$0xff]  }
   0x9   :  { %v1049_v22 = vsel %vm1047_vm1, %v2898_v20, 0  ;;  %v2893_v26 = vld [vmem:[%s4713_s1 + $0x60] sm:$0xff]   ;;  %v2895_v27 = vld [vmem:[%s4713_s1 + $0x58] sm:$0xff]   ;;  %v2897_v30 = vld [vmem:[%s4713_s1 + $0x50] sm:$0xff]  }
   0xa   :  { %1056 = vmatpush1.bf16.msra.mxu0 %v2878_v3  ;;  %v2909_v28 = vld [vmem:[%s4714_s0 + $0x28] ss:$16 sps:$4 sm:$0xff]   ;;  %v2913_v29 = vld [vmem:[%s4714_s0 + $0x4c] ss:$16 sps:$4 sm:$0xff]   ;;  %v2903_v34 = vld [vmem:[%s4713_s1 + $0x40] sm:$0xff]  }
   0xb   :  { %1057 = vmatprep.subr.bf16.mxu0 %v3095_v0  ;;  %1345 = vmatpush1.bf16.msra.mxu1 %v2886_v7  ;;  %v2899_v31 = vld [vmem:[%s4713_s1 + $0x48] sm:$0xff]   ;;  %v2904_v35 = vld [vmem:[%s4714_s0] ss:$16 sps:$4 sm:$0xff]   ;;  %v2910_v36 = vld [vmem:[%s4714_s0 + $0x24] ss:$16 sps:$4 sm:$0xff]  }
   0xc   :  { %1346 = vmatprep.subr.bf16.mxu1 %v3095_v0  ;;  %v2915_v32 = vld [vmem:[%s4714_s0 + $0x48] ss:$16 sps:$4 sm:$0xff]   ;;  %v2919_v33 = vld [vmem:[%s4714_s0 + $0x6c] ss:$16 sps:$4 sm:$0xff]   ;;  %v2912_v39 = vld [vmem:[%s4714_s0 + $0x20] ss:$16 sps:$4 sm:$0xff]  }
   0xd   :  { %v2921_v37 = vld [vmem:[%s4714_s0 + $0x68] ss:$16 sps:$4 sm:$0xff]   ;;  %v2925_v38 = vld [vmem:[%s4714_s0 + $0x8c] ss:$16 sps:$4 sm:$0xff]   ;;  %v2916_v40 = vld [vmem:[%s4714_s0 + $0x44] ss:$16 sps:$4 sm:$0xff]  }
   0xe   :  { %1058 = vmatpush1.bf16.msra.mxu0 %v2879_v6  ;;  %v2927_v41 = vld [vmem:[%s4714_s0 + $0x88] ss:$16 sps:$4 sm:$0xff]   ;;  %v2931_v42 = vld [vmem:[%s4714_s0 + $0xac] ss:$16 sps:$4 sm:$0xff]   ;;  %v2918_v43 = vld [vmem:[%s4714_s0 + $0x40] ss:$16 sps:$4 sm:$0xff]  }
   0xf   :  { %1059 = vmatprep.subr.bf16.mxu0 %v3095_v0  ;;  %1347 = vmatpush1.bf16.msra.mxu1 %v2888_v9  ;;  %v2922_v44 = vld [vmem:[%s4714_s0 + $0x64] ss:$16 sps:$4 sm:$0xff]   ;;  %v2933_v45 = vld [vmem:[%s4714_s0 + $0xa8] ss:$16 sps:$4 sm:$0xff]   ;;  %v2937_v46 = vld [vmem:[%s4714_s0 + $0xcc] ss:$16 sps:$4 sm:$0xff]  }
  0x10   :  { %1348 = vmatprep.subr.bf16.mxu1 %v3095_v0  ;;  %v2924_v47 = vld [vmem:[%s4714_s0 + $0x60] ss:$16 sps:$4 sm:$0xff]   ;;  %v2928_v48 = vld [vmem:[%s4714_s0 + $0x84] ss:$16 sps:$4 sm:$0xff]   ;;  %v2939_v49 = vld [vmem:[%s4714_s0 + $0xc8] ss:$16 sps:$4 sm:$0xff]  }
  0x11   :  { %v2943_v50 = vld [vmem:[%s4714_s0 + $0xec] ss:$16 sps:$4 sm:$0xff]   ;;  %v2930_v51 = vld [vmem:[%s4714_s0 + $0x80] ss:$16 sps:$4 sm:$0xff]   ;;  %v2934_v52 = vld [vmem:[%s4714_s0 + $0xa4] ss:$16 sps:$4 sm:$0xff]  }
  0x12   :  { %1060 = vmatpush1.bf16.msra.mxu0 %v2880_v8  ;;  %v2945_v53 = vld [vmem:[%s4714_s0 + $0xe8] ss:$16 sps:$4 sm:$0xff]   ;;  %v2949_v54 = vld [vmem:[%s4714_s0 + $0x10c] ss:$16 sps:$4 sm:$0xff]   ;;  %v2936_v55 = vld [vmem:[%s4714_s0 + $0xa0] ss:$16 sps:$4 sm:$0xff]  }
  0x13   :  { %1061 = vmatprep.subr.bf16.mxu0 %v3095_v0  ;;  %1349 = vmatpush1.bf16.msra.mxu1 %v2890_v11  ;;  %v2940_v56 = vld [vmem:[%s4714_s0 + $0xc4] ss:$16 sps:$4 sm:$0xff]   ;;  %v2951_v57 = vld [vmem:[%s4714_s0 + $0x108] ss:$16 sps:$4 sm:$0xff]   ;;  %v2955_v58 = vld [vmem:[%s4714_s0 + $0x12c] ss:$16 sps:$4 sm:$0xff]  }
  0x14   :  { %1350 = vmatprep.subr.bf16.mxu1 %v3095_v0  ;;  %v2942_v59 = vld [vmem:[%s4714_s0 + $0xc0] ss:$16 sps:$4 sm:$0xff]   ;;  %v2946_v60 = vld [vmem:[%s4714_s0 + $0xe4] ss:$16 sps:$4 sm:$0xff]   ;;  %v2957_v61 = vld [vmem:[%s4714_s0 + $0x128] ss:$16 sps:$4 sm:$0xff]  }
  0x15   :  { %v2961_v62 = vld [vmem:[%s4714_s0 + $0x14c] ss:$16 sps:$4 sm:$0xff]   ;;  %v2948_v63 = vld [vmem:[%s4714_s0 + $0xe0] ss:$16 sps:$4 sm:$0xff]   ;;  %v2963_v1 = vld [vmem:[%s4714_s0 + $0x148] ss:$16 sps:$4 sm:$0xff]  }
  0x16   :  { %1062 = vmatpush1.bf16.msra.mxu0 %v2881_v10  ;;  %v2967_v2 = vld [vmem:[%s4714_s0 + $0x16c] ss:$16 sps:$4 sm:$0xff]   ;;  %v2954_v3 = vld [vmem:[%s4714_s0 + $0x100] ss:$16 sps:$4 sm:$0xff]   ;;  %v2958_v4 = vld [vmem:[%s4714_s0 + $0x124] ss:$16 sps:$4 sm:$0xff]  }
  0x17   :  { %1063 = vmatprep.subr.bf16.mxu0 %v3095_v0  ;;  %1351 = vmatpush1.bf16.msra.mxu1 %v2892_v13  ;;  %v2969_v5 = vld [vmem:[%s4714_s0 + $0x168] ss:$16 sps:$4 sm:$0xff]   ;;  %v2973_v6 = vld [vmem:[%s4714_s0 + $0x18c] ss:$16 sps:$4 sm:$0xff]   ;;  %v2960_v7 = vld [vmem:[%s4714_s0 + $0x120] ss:$16 sps:$4 sm:$0xff]  }
  0x18   :  { %1352 = vmatprep.subr.bf16.mxu1 %v3095_v0  ;;  %v2964_v8 = vld [vmem:[%s4714_s0 + $0x144] ss:$16 sps:$4 sm:$0xff]   ;;  %v2975_v9 = vld [vmem:[%s4714_s0 + $0x188] ss:$16 sps:$4 sm:$0xff]   ;;  %v2979_v10 = vld [vmem:[%s4714_s0 + $0x1ac] ss:$16 sps:$4 sm:$0xff]  }
  0x19   :  { %v2966_v11 = vld [vmem:[%s4714_s0 + $0x140] ss:$16 sps:$4 sm:$0xff]   ;;  %v2981_v13 = vld [vmem:[%s4714_s0 + $0x1a8] ss:$16 sps:$4 sm:$0xff]   ;;  %v2985_v14 = vld [vmem:[%s4714_s0 + $0x1cc] ss:$16 sps:$4 sm:$0xff]  }
  0x1a   :  { %1064 = vmatpush1.bf16.msra.mxu0 %v2883_v12  ;;  %v2970_v12 = vld [vmem:[%s4714_s0 + $0x164] ss:$16 sps:$4 sm:$0xff]  }
  0x1b   :  { %1065 = vmatprep.subr.bf16.mxu0 %v3095_v0  ;;  %1353 = vmatpush1.bf16.msra.mxu1 %v2894_v17  ;;  %v2976_v16 = vld [vmem:[%s4714_s0 + $0x184] ss:$16 sps:$4 sm:$0xff]   ;;  %v2987_v17 = vld [vmem:[%s4714_s0 + $0x1c8] ss:$16 sps:$4 sm:$0xff]  }
  0x1c   :  { %1354 = vmatprep.subr.bf16.mxu1 %v3095_v0  ;;  %v2982_v20 = vld [vmem:[%s4714_s0 + $0x1a4] ss:$16 sps:$4 sm:$0xff]  }
  0x1e   :  { %1066 = vmatpush1.bf16.msra.mxu0 %v2885_v15  ;;  %v2972_v15 = vld [vmem:[%s4714_s0 + $0x160] ss:$16 sps:$4 sm:$0xff]  }
  0x1f   :  { %1067 = vmatprep.subr.bf16.mxu0 %v3095_v0  ;;  %1355 = vmatpush1.bf16.msra.mxu1 %v2896_v19  ;;  %v2978_v19 = vld [vmem:[%s4714_s0 + $0x180] ss:$16 sps:$4 sm:$0xff]  }
  0x20   :  { %1370 = vmatprep.subr.bf16.mxu1 %v3095_v0 }
  0x22   :  { %1068 = vmatpush2.bf16.msra.mxu0 %v2887_v18  ;;  %v2991_v18 = vld [vmem:[%s4714_s0 + $0x1ec] ss:$16 sps:$4 sm:$0xff]  }
  0x23   :  { %1069 = vmatprep.subr.bf16.mxu0 %v3095_v0  ;;  %1371 = vmatpush2.bf16.msra.mxu1 %v1049_v22  ;;  %v2997_v22 = vld [vmem:[%s4714_s0 + $0x20c] ss:$16 sps:$4 sm:$0xff]  }
  0x26   :  { %1070 = vmatpush2.bf16.msra.mxu0 %v2889_v21  ;;  %1373 = vmatmul.mubr.bf16.vlgmr.msra.gmra.mxu1 %v2900_v24  ;;  %v2993_v21 = vld [vmem:[%s4714_s0 + $0x1e8] ss:$16 sps:$4 sm:$0xff]   ;;  %v2988_v24 = vld [vmem:[%s4714_s0 + $0x1c4] ss:$16 sps:$4 sm:$0xff]  }
  0x27   :  { %1071 = vmatprep.subr.bf16.mxu0 %v3095_v0  ;;  %2525 = vmatprep.mubr.msk.bf16.mxu1 %vm950_vm0, %v2907_v25  ;;  %v2999_v25 = vld [vmem:[%s4714_s0 + $0x208] ss:$16 sps:$4 sm:$0xff]  }
  0x2a   :  { %1072 = vmatpush2.bf16.msra.mxu0 %v2891_v23  ;;  %v2984_v23 = vld [vmem:[%s4714_s0 + $0x1a0] ss:$16 sps:$4 sm:$0xff]  }
  0x2b   :  { %1073 = vmatprep.subr.bf16.mxu0 %v3095_v0 }
  0x2e   :  { %1074 = vmatpush2.bf16.msra.mxu0 %v2893_v26  ;;  %1381 = vmatmul.mubr.bf16.gmra.mxu1 %v2909_v28  ;;  %v3003_v26 = vld [vmem:[%s4714_s0 + $0x22c] ss:$16 sps:$4 sm:$0xff]   ;;  %v2994_v28 = vld [vmem:[%s4714_s0 + $0x1e4] ss:$16 sps:$4 sm:$0xff]  }
  0x2f   :  { %1075 = vmatprep.subr.bf16.mxu0 %v3095_v0  ;;  %2526 = vmatprep.mubr.msk.bf16.mxu1 %vm950_vm0, %v2913_v29  ;;  %v3005_v29 = vld [vmem:[%s4714_s0 + $0x228] ss:$16 sps:$4 sm:$0xff]  }
  0x32   :  { %1076 = vmatpush2.bf16.msra.mxu0 %v2895_v27  ;;  %v2990_v27 = vld [vmem:[%s4714_s0 + $0x1c0] ss:$16 sps:$4 sm:$0xff]  }
  0x33   :  { %1077 = vmatprep.subr.bf16.mxu0 %v3095_v0 }
  0x36   :  { %1078 = vmatpush2.bf16.msra.mxu0 %v2897_v30  ;;  %1389 = vmatmul.mubr.bf16.gmra.mxu1 %v2915_v32  ;;  %v3009_v30 = vld [vmem:[%s4714_s0 + $0x24c] ss:$16 sps:$4 sm:$0xff]   ;;  %v3000_v32 = vld [vmem:[%s4714_s0 + $0x204] ss:$16 sps:$4 sm:$0xff]  }
  0x37   :  { %1079 = vmatprep.subr.bf16.mxu0 %v3095_v0  ;;  %2527 = vmatprep.mubr.msk.bf16.mxu1 %vm950_vm0, %v2919_v33  ;;  %v3011_v33 = vld [vmem:[%s4714_s0 + $0x248] ss:$16 sps:$4 sm:$0xff]  }
  0x3a   :  { %1080 = vmatpush2.bf16.msra.mxu0 %v2899_v31  ;;  %v2996_v31 = vld [vmem:[%s4714_s0 + $0x1e0] ss:$16 sps:$4 sm:$0xff]  }
  0x3b   :  { %1081 = vmatprep.subr.bf16.mxu0 %v3095_v0  ;;  %v2952_v0 = vld [vmem:[%s4714_s0 + $0x104] ss:$16 sps:$4 sm:$0xff]  }
  0x3e   :  { %1082 = vmatpush2.bf16.msra.mxu0 %v2903_v34  ;;  %1397 = vmatmul.mubr.bf16.gmra.mxu1 %v2921_v37  ;;  %v3015_v34 = vld [vmem:[%s4714_s0 + $0x26c] ss:$16 sps:$4 sm:$0xff]   ;;  %v3017_v37 = vld [vmem:[%s4714_s0 + $0x268] ss:$16 sps:$4 sm:$0xff]  }
  0x3f   :  { %2528 = vmatprep.mubr.msk.bf16.mxu1 %vm950_vm0, %v2925_v38  ;;  %v3021_v38 = vld [vmem:[%s4714_s0 + $0x28c] ss:$16 sps:$4 sm:$0xff]  }
  0x41   :  { %1084 = vmatmul.mubr.bf16.vlgmr.msra.gmra.mxu0 %v2904_v35  ;;  %v3002_v35 = vld [vmem:[%s4714_s0 + $0x200] ss:$16 sps:$4 sm:$0xff]  }
  0x42   :  { %1091 = vmatprep.mubr.bf16.mxu0 %v2910_v36  ;;  %v3006_v36 = vld [vmem:[%s4714_s0 + $0x224] ss:$16 sps:$4 sm:$0xff]  }
  0x46   :  { %1405 = vmatmul.mubr.bf16.gmra.mxu1 %v2927_v41  ;;  %v3023_v41 = vld [vmem:[%s4714_s0 + $0x288] ss:$16 sps:$4 sm:$0xff]  }
  0x47   :  { %2529 = vmatprep.mubr.msk.bf16.mxu1 %vm950_vm0, %v2931_v42  ;;  %v3027_v42 = vld [vmem:[%s4714_s0 + $0x2ac] ss:$16 sps:$4 sm:$0xff]  }
  0x49   :  { %1092 = vmatmul.mubr.bf16.gmra.mxu0 %v2912_v39  ;;  %v3008_v39 = vld [vmem:[%s4714_s0 + $0x220] ss:$16 sps:$4 sm:$0xff]  }
  0x4a   :  { %1099 = vmatprep.mubr.bf16.mxu0 %v2916_v40  ;;  %v3012_v40 = vld [vmem:[%s4714_s0 + $0x244] ss:$16 sps:$4 sm:$0xff]  }
  0x4e   :  { %1413 = vmatmul.mubr.bf16.gmra.mxu1 %v2933_v45  ;;  %v3029_v45 = vld [vmem:[%s4714_s0 + $0x2a8] ss:$16 sps:$4 sm:$0xff]  }
  0x4f   :  { %2530 = vmatprep.mubr.msk.bf16.mxu1 %vm950_vm0, %v2937_v46  ;;  %v3033_v46 = vld [vmem:[%s4714_s0 + $0x2cc] ss:$16 sps:$4 sm:$0xff]  }
  0x51   :  { %1100 = vmatmul.mubr.bf16.gmra.mxu0 %v2918_v43  ;;  %v3014_v43 = vld [vmem:[%s4714_s0 + $0x240] ss:$16 sps:$4 sm:$0xff]  }
  0x52   :  { %1107 = vmatprep.mubr.bf16.mxu0 %v2922_v44  ;;  %v3018_v44 = vld [vmem:[%s4714_s0 + $0x264] ss:$16 sps:$4 sm:$0xff]  }
  0x56   :  { %1421 = vmatmul.mubr.bf16.gmra.mxu1 %v2939_v49  ;;  %v3035_v49 = vld [vmem:[%s4714_s0 + $0x2c8] ss:$16 sps:$4 sm:$0xff]  }
  0x57   :  { %2531 = vmatprep.mubr.msk.bf16.mxu1 %vm950_vm0, %v2943_v50  ;;  %v3039_v50 = vld [vmem:[%s4714_s0 + $0x2ec] ss:$16 sps:$4 sm:$0xff]  }
  0x59   :  { %1108 = vmatmul.mubr.bf16.gmra.mxu0 %v2924_v47  ;;  %v3020_v47 = vld [vmem:[%s4714_s0 + $0x260] ss:$16 sps:$4 sm:$0xff]  }
  0x5a   :  { %1115 = vmatprep.mubr.bf16.mxu0 %v2928_v48  ;;  %v3024_v48 = vld [vmem:[%s4714_s0 + $0x284] ss:$16 sps:$4 sm:$0xff]  }
  0x5e   :  { %1429 = vmatmul.mubr.bf16.gmra.mxu1 %v2945_v53  ;;  %v3041_v53 = vld [vmem:[%s4714_s0 + $0x2e8] ss:$16 sps:$4 sm:$0xff]  }
  0x5f   :  { %2532 = vmatprep.mubr.msk.bf16.mxu1 %vm950_vm0, %v2949_v54  ;;  %v3045_v54 = vld [vmem:[%s4714_s0 + $0x30c] ss:$16 sps:$4 sm:$0xff]  }
  0x61   :  { %1116 = vmatmul.mubr.bf16.gmra.mxu0 %v2930_v51  ;;  %v3026_v51 = vld [vmem:[%s4714_s0 + $0x280] ss:$16 sps:$4 sm:$0xff]  }
  0x62   :  { %1123 = vmatprep.mubr.bf16.mxu0 %v2934_v52  ;;  %v3030_v52 = vld [vmem:[%s4714_s0 + $0x2a4] ss:$16 sps:$4 sm:$0xff]  }
  0x66   :  { %1437 = vmatmul.mubr.bf16.gmra.mxu1 %v2951_v57  ;;  %v3047_v57 = vld [vmem:[%s4714_s0 + $0x308] ss:$16 sps:$4 sm:$0xff]  }
  0x67   :  { %2533 = vmatprep.mubr.msk.bf16.mxu1 %vm950_vm0, %v2955_v58  ;;  %v3051_v58 = vld [vmem:[%s4714_s0 + $0x32c] ss:$16 sps:$4 sm:$0xff]  }
  0x69   :  { %1124 = vmatmul.mubr.bf16.gmra.mxu0 %v2936_v55  ;;  %v3032_v55 = vld [vmem:[%s4714_s0 + $0x2a0] ss:$16 sps:$4 sm:$0xff]  }
  0x6a   :  { %1131 = vmatprep.mubr.bf16.mxu0 %v2940_v56  ;;  %v3036_v56 = vld [vmem:[%s4714_s0 + $0x2c4] ss:$16 sps:$4 sm:$0xff]  }
  0x6e   :  { %1445 = vmatmul.mubr.bf16.gmra.mxu1 %v2957_v61 }
  0x6f   :  { %2534 = vmatprep.mubr.msk.bf16.mxu1 %vm950_vm0, %v2961_v62  ;;  %v3042_v62 = vld [vmem:[%s4714_s0 + $0x2e4] ss:$16 sps:$4 sm:$0xff]  }
  0x71   :  { %1132 = vmatmul.mubr.bf16.gmra.mxu0 %v2942_v59 }
  0x72   :  { %1139 = vmatprep.mubr.bf16.mxu0 %v2946_v60  ;;  %v3038_v60 = vld [vmem:[%s4714_s0 + $0x2c0] ss:$16 sps:$4 sm:$0xff]  }
  0x76   :  { %1453 = vmatmul.mubr.bf16.gmra.mxu1 %v2963_v1  ;;  %v3057_v1 = vld [vmem:[%s4714_s0 + $0x34c] ss:$16 sps:$4 sm:$0xff]  }
  0x77   :  { %2535 = vmatprep.mubr.msk.bf16.mxu1 %vm950_vm0, %v2967_v2 }
  0x79   :  { %1140 = vmatmul.mubr.bf16.gmra.mxu0 %v2948_v63 }
  0x7a   :  { %1147 = vmatprep.mubr.bf16.mxu0 %v2952_v0  ;;  %v3053_v0 = vld [vmem:[%s4714_s0 + $0x328] ss:$16 sps:$4 sm:$0xff]  }
  0x7e   :  { %1461 = vmatmul.mubr.bf16.gmra.mxu1 %v2969_v5 }
  0x7f   :  { %2536 = vmatprep.mubr.msk.bf16.mxu1 %vm950_vm0, %v2973_v6  ;;  %v3048_v6 = vld [vmem:[%s4714_s0 + $0x304] ss:$16 sps:$4 sm:$0xff]  }
  0x81   :  { %1148 = vmatmul.mubr.bf16.gmra.mxu0 %v2954_v3 }
  0x82   :  { %1155 = vmatprep.mubr.bf16.mxu0 %v2958_v4  ;;  %v3044_v4 = vld [vmem:[%s4714_s0 + $0x2e0] ss:$16 sps:$4 sm:$0xff]  }
  0x86   :  { %1469 = vmatmul.mubr.bf16.gmra.mxu1 %v2975_v9  ;;  %v3063_v9 = vld [vmem:[%s4714_s0 + $0x36c] ss:$16 sps:$4 sm:$0xff]  }
  0x87   :  { %2537 = vmatprep.mubr.msk.bf16.mxu1 %vm950_vm0, %v2979_v10 }
  0x89   :  { %1156 = vmatmul.mubr.bf16.gmra.mxu0 %v2960_v7 }
  0x8a   :  { %1163 = vmatprep.mubr.bf16.mxu0 %v2964_v8  ;;  %v3059_v8 = vld [vmem:[%s4714_s0 + $0x348] ss:$16 sps:$4 sm:$0xff]  }
  0x8e   :  { %1477 = vmatmul.mubr.bf16.gmra.mxu1 %v2981_v13 }
  0x8f   :  { %2538 = vmatprep.mubr.msk.bf16.mxu1 %vm950_vm0, %v2985_v14  ;;  %v3054_v14 = vld [vmem:[%s4714_s0 + $0x324] ss:$16 sps:$4 sm:$0xff]  }
  0x91   :  { %1164 = vmatmul.mubr.bf16.gmra.mxu0 %v2966_v11 }
  0x92   :  { %1171 = vmatprep.mubr.bf16.mxu0 %v2970_v12  ;;  %v3050_v12 = vld [vmem:[%s4714_s0 + $0x300] ss:$16 sps:$4 sm:$0xff]  }
  0x96   :  { %1485 = vmatmul.mubr.bf16.gmra.mxu1 %v2987_v17  ;;  %v3069_v17 = vld [vmem:[%s4714_s0 + $0x38c] ss:$16 sps:$4 sm:$0xff]  }
  0x97   :  { %2539 = vmatprep.mubr.msk.bf16.mxu1 %vm950_vm0, %v2991_v18 }
  0x99   :  { %1172 = vmatmul.mubr.bf16.gmra.mxu0 %v2972_v15 }
  0x9a   :  { %1179 = vmatprep.mubr.bf16.mxu0 %v2976_v16  ;;  %v3065_v16 = vld [vmem:[%s4714_s0 + $0x368] ss:$16 sps:$4 sm:$0xff]  }
  0x9e   :  { %1493 = vmatmul.mubr.bf16.gmra.mxu1 %v2993_v21 }
  0x9f   :  { %2540 = vmatprep.mubr.msk.bf16.mxu1 %vm950_vm0, %v2997_v22 }
  0xa1   :  { %1180 = vmatmul.mubr.bf16.gmra.mxu0 %v2978_v19 }
  0xa2   :  { %1187 = vmatprep.mubr.bf16.mxu0 %v2982_v20 }
  0xa6   :  { %1501 = vmatmul.mubr.bf16.gmra.mxu1 %v2999_v25 }
  0xa7   :  { %2541 = vmatprep.mubr.msk.bf16.mxu1 %vm950_vm0, %v3003_v26 }
  0xa9   :  { %1188 = vmatmul.mubr.bf16.gmra.mxu0 %v2984_v23 }
  0xaa   :  { %1195 = vmatprep.mubr.bf16.mxu0 %v2988_v24  ;;  %v3056_v24 = vld [vmem:[%s4714_s0 + $0x320] ss:$16 sps:$4 sm:$0xff]  }
  0xae   :  { %1509 = vmatmul.mubr.bf16.gmra.mxu1 %v3005_v29 }
  0xaf   :  { %2542 = vmatprep.mubr.msk.bf16.mxu1 %vm950_vm0, %v3009_v30  ;;  %v3071_v30 = vld [vmem:[%s4714_s0 + $0x388] ss:$16 sps:$4 sm:$0xff]  }
  0xb1   :  { %1196 = vmatmul.mubr.bf16.gmra.mxu0 %v2990_v27  ;;  %v3060_v27 = vld [vmem:[%s4714_s0 + $0x344] ss:$16 sps:$4 sm:$0xff]  }
  0xb2   :  { %1203 = vmatprep.mubr.bf16.mxu0 %v2994_v28 }
  0xb6   :  { %1517 = vmatmul.mubr.bf16.gmra.mxu1 %v3011_v33 }
  0xb7   :  { %2543 = vmatprep.mubr.msk.bf16.mxu1 %vm950_vm0, %v3015_v34 }
  0xb9   :  { %1204 = vmatmul.mubr.bf16.gmra.mxu0 %v2996_v31  ;;  %v3075_v31 = vld [vmem:[%s4714_s0 + $0x3ac] ss:$16 sps:$4 sm:$0xff]  }
  0xba   :  { %1211 = vmatprep.mubr.bf16.mxu0 %v3000_v32 }
  0xbe   :  { %1525 = vmatmul.mubr.bf16.gmra.mxu1 %v3017_v37 }
  0xbf   :  { %2544 = vmatprep.mubr.msk.bf16.mxu1 %vm950_vm0, %v3021_v38  ;;  %v3062_v38 = vld [vmem:[%s4714_s0 + $0x340] ss:$16 sps:$4 sm:$0xff]  }
  0xc1   :  { %1212 = vmatmul.mubr.bf16.gmra.mxu0 %v3002_v35 }
  0xc2   :  { %1219 = vmatprep.mubr.bf16.mxu0 %v3006_v36 }
  0xc6   :  { %1533 = vmatmul.mubr.bf16.gmra.mxu1 %v3023_v41  ;;  %v3066_v41 = vld [vmem:[%s4714_s0 + $0x364] ss:$16 sps:$4 sm:$0xff]  }
  0xc7   :  { %2545 = vmatprep.mubr.msk.bf16.mxu1 %vm950_vm0, %v3027_v42 }
  0xc9   :  { %1220 = vmatmul.mubr.bf16.gmra.mxu0 %v3008_v39 }
  0xca   :  { %1227 = vmatprep.mubr.bf16.mxu0 %v3012_v40 }
  0xce   :  { %1541 = vmatmul.mubr.bf16.gmra.mxu1 %v3029_v45  ;;  %v3081_v45 = vld [vmem:[%s4714_s0 + $0x3cc] ss:$16 sps:$4 sm:$0xff]  }
  0xcf   :  { %2546 = vmatprep.mubr.msk.bf16.mxu1 %vm950_vm0, %v3033_v46 }
  0xd1   :  { %1228 = vmatmul.mubr.bf16.gmra.mxu0 %v3014_v43 }
  0xd2   :  { %1235 = vmatprep.mubr.bf16.mxu0 %v3018_v44  ;;  %v3077_v44 = vld [vmem:[%s4714_s0 + $0x3a8] ss:$16 sps:$4 sm:$0xff]  }
  0xd6   :  { %1549 = vmatmul.mubr.bf16.gmra.mxu1 %v3035_v49 }
  0xd7   :  { %2547 = vmatprep.mubr.msk.bf16.mxu1 %vm950_vm0, %v3039_v50 }
  0xd9   :  { %1236 = vmatmul.mubr.bf16.gmra.mxu0 %v3020_v47 }
  0xda   :  { %1243 = vmatprep.mubr.bf16.mxu0 %v3024_v48 }
  0xde   :  { %1557 = vmatmul.mubr.bf16.gmra.mxu1 %v3041_v53 }
  0xdf   :  { %2548 = vmatprep.mubr.msk.bf16.mxu1 %vm950_vm0, %v3045_v54 }
  0xe1   :  { %1244 = vmatmul.mubr.bf16.gmra.mxu0 %v3026_v51 }
  0xe2   :  { %1251 = vmatprep.mubr.bf16.mxu0 %v3030_v52  ;;  %v3068_v52 = vld [vmem:[%s4714_s0 + $0x360] ss:$16 sps:$4 sm:$0xff]  }
  0xe6   :  { %v1374_v59 = vpop.f32.mrf.mxu1  ;;  %1565 = vmatmul.mubr.bf16.gmra.mxu1 %v3047_v57 }
  0xe7   :  { %2549 = vmatprep.mubr.msk.bf16.mxu1 %vm950_vm0, %v3051_v58  ;;  %v3083_v58 = vld [vmem:[%s4714_s0 + $0x3c8] ss:$16 sps:$4 sm:$0xff]  }
  0xe8   :  { %v1376_v61 = vpop.f32.mrf.mxu1 }
  0xe9   :  { %1252 = vmatmul.mubr.bf16.gmra.mxu0 %v3032_v55  ;;  %v3074_v55 = vld [vmem:[%s4714_s0 + $0x384] ss:$16 sps:$4 sm:$0xff]  }
  0xea   :  { %1259 = vmatprep.mubr.bf16.mxu0 %v3036_v56  ;;  %v1377_v63 = vpop.f32.mrf.mxu1 }
  0xec   :  { %v1379_v2 = vpop.f32.mrf.mxu1 }
  0xed   :  { %v3072_v2 = vld [vmem:[%s4714_s0 + $0x380] ss:$16 sps:$4 sm:$0xff]  }
  0xee   :  { %v1382_v3 = vpop.f32.mrf.mxu1  ;;  %1573 = vmatmul.mubr.bf16.gmra.mxu1 %v3053_v0 }
  0xef   :  { %2550 = vmatprep.mubr.msk.bf16.mxu1 %vm950_vm0, %v3057_v1 }
  0xf0   :  { %v1384_v5 = vpop.f32.mrf.mxu1 }
  0xf1   :  { %1260 = vmatmul.mubr.bf16.gmra.mxu0 %v3038_v60  ;;  %v3080_v5 = vld [vmem:[%s4714_s0 + $0x3a4] ss:$16 sps:$4 sm:$0xff]  }
  0xf2   :  { %1267 = vmatprep.mubr.bf16.mxu0 %v3042_v62  ;;  %v1385_v7 = vpop.f32.mrf.mxu1 }
  0xf4   :  { %v1387_v10 = vpop.f32.mrf.mxu1 }
  0xf6   :  { %v1390_v11 = vpop.f32.mrf.mxu1  ;;  %1581 = vmatmul.mubr.bf16.gmra.mxu1 %v3059_v8  ;;  %v3089_v8 = vld [vmem:[%s4714_s0 + $0x3e8] ss:$16 sps:$4 sm:$0xff]  }
  0xf7   :  { %2551 = vmatprep.mubr.msk.bf16.mxu1 %vm950_vm0, %v3063_v9 }
  0xf8   :  { %v1392_v13 = vpop.f32.mrf.mxu1 }
  0xf9   :  { %1268 = vmatmul.mubr.bf16.gmra.mxu0 %v3044_v4 }
  0xfa   :  { %1275 = vmatprep.mubr.bf16.mxu0 %v3048_v6  ;;  %v1393_v15 = vpop.f32.mrf.mxu1 }
  0xfc   :  { %v1395_v19 = vpop.f32.mrf.mxu1 }
  0xfe   :  { %v1398_v22 = vpop.f32.mrf.mxu1  ;;  %1589 = vmatmul.mubr.bf16.gmra.mxu1 %v3065_v16 }
  0xff   :  { %2552 = vmatprep.mubr.msk.bf16.mxu1 %vm950_vm0, %v3069_v17 }
 0x100   :  { %v1400_v25 = vpop.f32.mrf.mxu1 }
 0x101   :  { %v1085_v18 = vpop.f32.mrf.mxu0  ;;  %1276 = vmatmul.mubr.bf16.gmra.mxu0 %v3050_v12 }
 0x102   :  { %v3573_v20 = vadd.f32 %v1374_v59, %v1085_v18  ;;  %1283 = vmatprep.mubr.bf16.mxu0 %v3054_v14  ;;  %v1401_v29 = vpop.f32.mrf.mxu1  ;;  %v3087_v59 = vld [vmem:[%s4714_s0 + $0x3ec] ss:$16 sps:$4 sm:$0xff]   ;;  %v3086_v18 = vld [vmem:[%s4714_s0 + $0x3c4] ss:$16 sps:$4 sm:$0xff]  }
 0x103   :  { %v1087_v21 = vpop.f32.mrf.mxu0 }
 0x104   :  { %v1403_v33 = vpop.f32.mrf.mxu1 }
 0x105   :  { %v1088_v23 = vpop.f32.mrf.mxu0 }
 0x106   :  { %v3579_v26 = vadd.f32 %v1377_v63, %v1088_v23  ;;  %v1406_v36 = vpop.f32.mrf.mxu1  ;;  %1597 = vmatmul.mubr.bf16.gmra.mxu1 %v3071_v30 }
 0x107   :  { %v1090_v28 = vpop.f32.mrf.mxu0  ;;  %2553 = vmatprep.mubr.msk.bf16.mxu1 %vm950_vm0, %v3075_v31 }
 0x108   :  { %v1408_v39 = vpop.f32.mrf.mxu1 }
 0x109   :  { %v1093_v32 = vpop.f32.mrf.mxu0  ;;  %1284 = vmatmul.mubr.bf16.gmra.mxu0 %v3056_v24 }
 0x10a   :  { %v3590_v34 = vadd.f32 %v1382_v3, %v1093_v32  ;;  %1291 = vmatprep.mubr.bf16.mxu0 %v3060_v27  ;;  %v1409_v43 = vpop.f32.mrf.mxu1  ;;  %v3092_v32 = vld [vmem:[%s4714_s0 + $0x3e4] ss:$16 sps:$4 sm:$0xff]  }
 0x10b   :  { %v1095_v35 = vpop.f32.mrf.mxu0 }
 0x10c   :  { %v1411_v47 = vpop.f32.mrf.mxu1 }
 0x10d   :  { %v1096_v37 = vpop.f32.mrf.mxu0 }
 0x10e   :  { %v3596_v40 = vadd.f32 %v1385_v7, %v1096_v37  ;;  %v1414_v50 = vpop.f32.mrf.mxu1  ;;  %1605 = vmatmul.mubr.bf16.gmra.mxu1 %v3077_v44 }
 0x10f   :  { %v1098_v42 = vpop.f32.mrf.mxu0  ;;  %2554 = vmatprep.mubr.msk.bf16.mxu1 %vm950_vm0, %v3081_v45 }
 0x110   :  { %v1416_v53 = vpop.f32.mrf.mxu1 }
 0x111   :  { %v1101_v46 = vpop.f32.mrf.mxu0  ;;  %1292 = vmatmul.mubr.bf16.gmra.mxu0 %v3062_v38 }
 0x112   :  { %v3607_v48 = vadd.f32 %v1390_v11, %v1101_v46  ;;  %1299 = vmatprep.mubr.bf16.mxu0 %v3066_v41  ;;  %v1417_v57 = vpop.f32.mrf.mxu1 }
 0x113   :  { %v1103_v49 = vpop.f32.mrf.mxu0 }
 0x114   :  { %v1419_v61 = vpop.f32.mrf.mxu1 }
 0x115   :  { %v1104_v51 = vpop.f32.mrf.mxu0 }
 0x116   :  { %v3613_v54 = vadd.f32 %v1393_v15, %v1104_v51  ;;  %v1422_v0 = vpop.f32.mrf.mxu1  ;;  %1613 = vmatmul.mubr.bf16.gmra.mxu1 %v3083_v58  ;;  %v3078_v15 = vld [vmem:[%s4714_s0 + $0x3a0] ss:$16 sps:$4 sm:$0xff]  }
 0x117   :  { %v1106_v56 = vpop.f32.mrf.mxu0  ;;  %2555 = vmatprep.mubr.msk.bf16.mxu1 %vm950_vm0, %v3087_v59 }
 0x118   :  { %v1424_v3 = vpop.f32.mrf.mxu1 }
 0x119   :  { %v1109_v60 = vpop.f32.mrf.mxu0  ;;  %1300 = vmatmul.mubr.bf16.gmra.mxu0 %v3068_v52 }
 0x11a   :  { %v3624_v62 = vadd.f32 %v1398_v22, %v1109_v60  ;;  %1307 = vmatprep.mubr.bf16.mxu0 %v3074_v55  ;;  %v1425_v7 = vpop.f32.mrf.mxu1 }
 0x11b   :  { %v1111_v63 = vpop.f32.mrf.mxu0 }
 0x11c   :  { %v1427_v10 = vpop.f32.mrf.mxu1 }
 0x11d   :  { %v1112_v1 = vpop.f32.mrf.mxu0 }
 0x11e   :  { %v3630_v4 = vadd.f32 %v1401_v29, %v1112_v1  ;;  %v1430_v13 = vpop.f32.mrf.mxu1  ;;  %1621 = vmatmul.mubr.bf16.gmra.mxu1 %v3089_v8  ;;  %v3084_v29 = vld [vmem:[%s4714_s0 + $0x3c0] ss:$16 sps:$4 sm:$0xff]  }
 0x11f   :  { %v1114_v6 = vpop.f32.mrf.mxu0 }
 0x120   :  { %v1432_v16 = vpop.f32.mrf.mxu1 }
 0x121   :  { %v1117_v9 = vpop.f32.mrf.mxu0  ;;  %1308 = vmatmul.mubr.bf16.gmra.mxu0 %v3072_v2 }
 0x122   :  { %v3638_v11 = vadd.f32 %v1406_v36, %v1117_v9  ;;  %1315 = vmatprep.mubr.bf16.mxu0 %v3080_v5  ;;  %v1433_v21 = vpop.f32.mrf.mxu1 }
 0x123   :  { %v1119_v12 = vpop.f32.mrf.mxu0 }
 0x124   :  { %v1435_v23 = vpop.f32.mrf.mxu1 }
 0x125   :  { %v1120_v14 = vpop.f32.mrf.mxu0 }
 0x126   :  { %v3643_v17 = vadd.f32 %v1409_v43, %v1120_v14  ;;  %v1438_v27 = vpop.f32.mrf.mxu1  ;;  %v3090_v43 = vld [vmem:[%s4714_s0 + $0x3e0] ss:$16 sps:$4 sm:$0xff]  }
 0x127   :  { %v1122_v19 = vpop.f32.mrf.mxu0 }
 0x128   :  { %v1440_v30 = vpop.f32.mrf.mxu1 }
 0x129   :  { %v1125_v22 = vpop.f32.mrf.mxu0  ;;  %1316 = vmatmul.mubr.bf16.gmra.mxu0 %v3078_v15 }
 0x12a   :  { %v3648_v24 = vadd.f32 %v1414_v50, %v1125_v22  ;;  %1323 = vmatprep.mubr.bf16.mxu0 %v3086_v18  ;;  %v1441_v35 = vpop.f32.mrf.mxu1 }
 0x12b   :  { %v1127_v25 = vpop.f32.mrf.mxu0 }
 0x12c   :  { %v1443_v37 = vpop.f32.mrf.mxu1 }
 0x12d   :  { %v1128_v28 = vpop.f32.mrf.mxu0 }
 0x12e   :  { %v3653_v31 = vadd.f32 %v1417_v57, %v1128_v28  ;;  %v1446_v41 = vpop.f32.mrf.mxu1 }
 0x12f   :  { %v1130_v33 = vpop.f32.mrf.mxu0 }
 0x130   :  { %v1448_v44 = vpop.f32.mrf.mxu1 }
 0x131   :  { %v1133_v36 = vpop.f32.mrf.mxu0  ;;  %1324 = vmatmul.mubr.bf16.gmra.mxu0 %v3084_v29 }
 0x132   :  { %v3658_v38 = vadd.f32 %v1422_v0, %v1133_v36  ;;  %1331 = vmatprep.mubr.bf16.mxu0 %v3092_v32  ;;  %v1449_v47 = vpop.f32.mrf.mxu1 }
 0x133   :  { %v1135_v39 = vpop.f32.mrf.mxu0 }
 0x134   :  { %v1451_v50 = vpop.f32.mrf.mxu1 }
 0x135   :  { %v1136_v42 = vpop.f32.mrf.mxu0 }
 0x136   :  { %v3663_v45 = vadd.f32 %v1425_v7, %v1136_v42  ;;  %v1454_v53 = vpop.f32.mrf.mxu1 }
 0x137   :  { %v1138_v46 = vpop.f32.mrf.mxu0 }
 0x138   :  { %v1456_v56 = vpop.f32.mrf.mxu1 }
 0x139   :  { %v1141_v49 = vpop.f32.mrf.mxu0  ;;  %1332 = vmatmul.mubr.bf16.gmra.mxu0 %v3090_v43 }
 0x13a   :  { %v3665_v51 = vadd.f32 %v1430_v13, %v1141_v49  ;;  %v1457_v59 = vpop.f32.mrf.mxu1 }
 0x13b   :  { %v1143_v52 = vpop.f32.mrf.mxu0 }
 0x13c   :  { %v1459_v61 = vpop.f32.mrf.mxu1 }
 0x13d   :  { %v1144_v55 = vpop.f32.mrf.mxu0 }
 0x13e   :  { %v3667_v57 = vadd.f32 %v1433_v21, %v1144_v55  ;;  %v1462_v1 = vpop.f32.mrf.mxu1 }
 0x13f   :  { %v1146_v58 = vpop.f32.mrf.mxu0 }
 0x140   :  { %v1464_v3 = vpop.f32.mrf.mxu1 }
 0x141   :  { %v1149_v60 = vpop.f32.mrf.mxu0 }
 0x142   :  { %v3669_v63 = vadd.f32 %v1438_v27, %v1149_v60  ;;  %v1465_v7 = vpop.f32.mrf.mxu1 }
 0x143   :  { %v1151_v0 = vpop.f32.mrf.mxu0 }
 0x144   :  { %v1467_v9 = vpop.f32.mrf.mxu1 }
 0x145   :  { %v1152_v2 = vpop.f32.mrf.mxu0 }
 0x146   :  { %v3671_v5 = vadd.f32 %v1441_v35, %v1152_v2  ;;  %v1470_v13 = vpop.f32.mrf.mxu1 }
 0x147   :  { %v1154_v6 = vpop.f32.mrf.mxu0 }
 0x148   :  { %v1472_v15 = vpop.f32.mrf.mxu1 }
 0x149   :  { %v1157_v8 = vpop.f32.mrf.mxu0 }
 0x14a   :  { %v3673_v10 = vadd.f32 %v1446_v41, %v1157_v8  ;;  %v1473_v19 = vpop.f32.mrf.mxu1 }
 0x14b   :  { %v1159_v12 = vpop.f32.mrf.mxu0 }
 0x14c   :  { %v1475_v22 = vpop.f32.mrf.mxu1 }
 0x14d   :  { %v1160_v14 = vpop.f32.mrf.mxu0 }
 0x14e   :  { %v3675_v16 = vadd.f32 %v1449_v47, %v1160_v14  ;;  %v1478_v27 = vpop.f32.mrf.mxu1 }
 0x14f   :  { %v1162_v18 = vpop.f32.mrf.mxu0 }
 0x150   :  { %v1480_v29 = vpop.f32.mrf.mxu1 }
 0x151   :  { %v1165_v21 = vpop.f32.mrf.mxu0 }
 0x152   :  { %v3677_v23 = vadd.f32 %v1454_v53, %v1165_v21  ;;  %v1481_v33 = vpop.f32.mrf.mxu1 }
 0x153   :  { %v1167_v25 = vpop.f32.mrf.mxu0 }
 0x154   :  { %v1483_v36 = vpop.f32.mrf.mxu1 }
 0x155   :  { %v1168_v28 = vpop.f32.mrf.mxu0  ;;  %v1698_v36 = vmul.f32 %v3573_v20, %v3573_v20 }
 0x156   :  { %v3679_v30 = vadd.f32 %v1457_v59, %v1168_v28  ;;  %v1486_v41 = vpop.f32.mrf.mxu1 }
 0x157   :  { %v1170_v32 = vpop.f32.mrf.mxu0 }
 0x158   :  { %v1488_v43 = vpop.f32.mrf.mxu1  ;;  %v1699_v32 = vmul.f32 %v3579_v26, %v3579_v26 }
 0x159   :  { %v1173_v35 = vpop.f32.mrf.mxu0 }
 0x15a   :  { %v3681_v37 = vadd.f32 %v1462_v1, %v1173_v35  ;;  %v1489_v47 = vpop.f32.mrf.mxu1 }
 0x15b   :  { %v1175_v39 = vpop.f32.mrf.mxu0 }
 0x15c   :  { %v1491_v50 = vpop.f32.mrf.mxu1  ;;  %v1629_v39 = vadd.f32 %v3579_v26, %v3573_v20 }
 0x15d   :  { %v1176_v42 = vpop.f32.mrf.mxu0  ;;  %v1701_v50 = vmul.f32 %v3596_v40, %v3596_v40 }
 0x15e   :  { %v3683_v44 = vadd.f32 %v1465_v7, %v1176_v42  ;;  %v1494_v55 = vpop.f32.mrf.mxu1 }
 0x15f   :  { %v1178_v46 = vpop.f32.mrf.mxu0 }
 0x160   :  { %v1496_v58 = vpop.f32.mrf.mxu1 }
 0x161   :  { %v1181_v49 = vpop.f32.mrf.mxu0 }
 0x162   :  { %v3685_v52 = vadd.f32 %v1470_v13, %v1181_v49  ;;  %v1497_v61 = vpop.f32.mrf.mxu1  ;;  %v1630_v49 = vadd.f32 %v1629_v39, %v3590_v34 }
 0x163   :  { %v1183_v53 = vpop.f32.mrf.mxu0 }
 0x164   :  { %v1499_v1 = vpop.f32.mrf.mxu1 }
 0x165   :  { %v1184_v56 = vpop.f32.mrf.mxu0 }
 0x166   :  { %v3687_v59 = vadd.f32 %v1473_v19, %v1184_v56  ;;  %v1502_v6 = vpop.f32.mrf.mxu1 }
 0x167   :  { %v1186_v60 = vpop.f32.mrf.mxu0 }
 0x168   :  { %v1504_v8 = vpop.f32.mrf.mxu1  ;;  %v1631_v60 = vadd.f32 %v1630_v49, %v3596_v40  ;;  %v1706_v49 = vmul.f32 %v3638_v11, %v3638_v11 }
 0x169   :  { %v1189_v0 = vpop.f32.mrf.mxu0 }
 0x16a   :  { %v3689_v2 = vadd.f32 %v1478_v27, %v1189_v0  ;;  %v1505_v13 = vpop.f32.mrf.mxu1  ;;  %v1702_v0 = vmul.f32 %v3607_v48, %v3607_v48  ;;  %v1632_v8 = vadd.f32 %v1631_v60, %v3607_v48  ;;  %v1707_v60 = vmul.f32 %v3643_v17, %v3643_v17 }
 0x16b   :  { %v1191_v3 = vpop.f32.mrf.mxu0 }
 0x16c   :  { %4747 = vst [vmem:[#allocation2_spill] sm:$0xff] %v3689_v2  ;;  %v1507_v15 = vpop.f32.mrf.mxu1 }
 0x16d   :  { %v1192_v7 = vpop.f32.mrf.mxu0 }
 0x16e   :  { %v3691_v9 = vadd.f32 %v1481_v33, %v1192_v7  ;;  %v1510_v21 = vpop.f32.mrf.mxu1 }
 0x16f   :  { %v1194_v12 = vpop.f32.mrf.mxu0 }
 0x170   :  { %v1512_v25 = vpop.f32.mrf.mxu1  ;;  %v1703_v12 = vmul.f32 %v3613_v54, %v3613_v54 }
 0x171   :  { %v1197_v14 = vpop.f32.mrf.mxu0  ;;  %v1704_v25 = vmul.f32 %v3624_v62, %v3624_v62 }
 0x172   :  { %v3693_v18 = vadd.f32 %v1486_v41, %v1197_v14  ;;  %v1513_v29 = vpop.f32.mrf.mxu1  ;;  %v1700_v41 = vmul.f32 %v3590_v34, %v3590_v34 }
 0x173   :  { %v1199_v19 = vpop.f32.mrf.mxu0 }
 0x174   :  { %4748 = vst [vmem:[#allocation3_spill] sm:$0xff] %v3693_v18  ;;  %v1515_v33 = vpop.f32.mrf.mxu1 }
 0x175   :  { %v1200_v22 = vpop.f32.mrf.mxu0 }
 0x176   :  { %v3695_v28 = vadd.f32 %v1489_v47, %v1200_v22  ;;  %v3707_v46 = vpop.f32.mrf.mxu1  ;;  %v1762_v47 = vadd.f32 %v1699_v32, %v1698_v36  ;;  %v1633_v22 = vadd.f32 %v1632_v8, %v3613_v54  ;;  %v1705_v36 = vmul.f32 %v3630_v4, %v3630_v4 }
 0x177   :  { %v1202_v27 = vpop.f32.mrf.mxu0 }
 0x178   :  { %v1520_v56 = vpop.f32.mrf.mxu1  ;;  %v1763_v58 = vadd.f32 %v1762_v47, %v1700_v41  ;;  %v1634_v33 = vadd.f32 %v1633_v22, %v3624_v62 }
 0x179   :  { %v1205_v35 = vpop.f32.mrf.mxu0 }
 0x17a   :  { %v3705_v42 = vadd.f32 %v1494_v55, %v1205_v35  ;;  %v3717_v3 = vpop.f32.mrf.mxu1  ;;  %v1764_v7 = vadd.f32 %v1763_v58, %v1701_v50  ;;  %v1635_v47 = vadd.f32 %v1634_v33, %v3630_v4 }
 0x17b   :  { %v1207_v43 = vpop.f32.mrf.mxu0 }
 0x17c   :  { %4749 = vst [vmem:[#allocation4_spill] sm:$0xff] %v3705_v42  ;;  %v1523_v15 = vpop.f32.mrf.mxu1  ;;  %v1765_v19 = vadd.f32 %v1764_v7, %v1702_v0  ;;  %v1636_v58 = vadd.f32 %v1635_v47, %v3638_v11 }
 0x17d   :  { %v1208_v53 = vpop.f32.mrf.mxu0 }
 0x17e   :  { %v3715_v1 = vadd.f32 %v1497_v61, %v1208_v53  ;;  %v3727_v32 = vpop.f32.mrf.mxu1  ;;  %v1766_v35 = vadd.f32 %v1765_v19, %v1703_v12  ;;  %v1637_v8 = vadd.f32 %v1636_v58, %v3643_v17  ;;  %v1708_v12 = vmul.f32 %v3648_v24, %v3648_v24 }
 0x17f   :  { %v1210_v55 = vpop.f32.mrf.mxu0 }
 0x180   :  { %v1528_v41 = vpop.f32.mrf.mxu1  ;;  %v1767_v43 = vadd.f32 %v1766_v35, %v1704_v25  ;;  %v1638_v22 = vadd.f32 %v1637_v8, %v3648_v24  ;;  %v1709_v25 = vmul.f32 %v3653_v31, %v3653_v31 }
 0x181   :  { %v1213_v14 = vpop.f32.mrf.mxu0 }
 0x182   :  { %v3725_v27 = vadd.f32 %v1502_v6, %v1213_v14  ;;  %v3737_v53 = vpop.f32.mrf.mxu1  ;;  %v1768_v56 = vadd.f32 %v1767_v43, %v1705_v36  ;;  %v1639_v36 = vadd.f32 %v1638_v22, %v3653_v31 }
 0x183   :  { %v1215_v61 = vpop.f32.mrf.mxu0 }
 0x184   :  { %4750 = vst [vmem:[#allocation5_spill] sm:$0xff] %v3725_v27  ;;  %v1531_v55 = vpop.f32.mrf.mxu1  ;;  %v1769_v7 = vadd.f32 %v1768_v56, %v1706_v49  ;;  %v1640_v49 = vadd.f32 %v1639_v36, %v3658_v38 }
 0x185   :  { %v1216_v39 = vpop.f32.mrf.mxu0  ;;  %v1712_v55 = vmul.f32 %v3665_v51, %v3665_v51 }
 0x186   :  { %v3735_v50 = vadd.f32 %v1505_v13, %v1216_v39  ;;  %v3747_v15 = vpop.f32.mrf.mxu1  ;;  %v1770_v19 = vadd.f32 %v1769_v7, %v1707_v60  ;;  %v1710_v39 = vmul.f32 %v3658_v38, %v3658_v38 }
 0x187   :  { %v1218_v6 = vpop.f32.mrf.mxu0 }
 0x188   :  { %v1536_v35 = vpop.f32.mrf.mxu1  ;;  %v1771_v33 = vadd.f32 %v1770_v19, %v1708_v12  ;;  %v1711_v6 = vmul.f32 %v3663_v45, %v3663_v45  ;;  %v1713_v19 = vmul.f32 %v3667_v57, %v3667_v57 }
 0x189   :  { %v1221_v0 = vpop.f32.mrf.mxu0 }
 0x18a   :  { %v3745_v14 = vadd.f32 %v1510_v21, %v1221_v0  ;;  %v3757_v43 = vpop.f32.mrf.mxu1  ;;  %v1772_v47 = vadd.f32 %v1771_v33, %v1709_v25  ;;  %v1641_v0 = vadd.f32 %v1640_v49, %v3663_v45  ;;  %v1714_v33 = vmul.f32 %v3669_v63, %v3669_v63 }
 0x18b   :  { %v1223_v13 = vpop.f32.mrf.mxu0  ;;  %v1715_v49 = vmul.f32 %v3671_v5, %v3671_v5 }
 0x18c   :  { %4751 = vst [vmem:[#allocation6_spill] sm:$0xff] %v3745_v14  ;;  %v1539_v58 = vpop.f32.mrf.mxu1  ;;  %v1773_v60 = vadd.f32 %v1772_v47, %v1710_v39  ;;  %v1642_v13 = vadd.f32 %v1641_v0, %v3665_v51  ;;  %v1716_v0 = vmul.f32 %v3673_v10, %v3673_v10 }
 0x18d   :  { %v1224_v61 = vpop.f32.mrf.mxu0 }
 0x18e   :  { %v3755_v41 = vadd.f32 %v1513_v29, %v1224_v61  ;;  %v3768_v8 = vpop.f32.mrf.mxu1  ;;  %v1774_v12 = vadd.f32 %v1773_v60, %v1711_v6  ;;  %v1643_v35 = vadd.f32 %v1642_v13, %v3667_v57 }
 0x18f   :  { %v1226_v21 = vpop.f32.mrf.mxu0 }
 0x190   :  { %v1544_v25 = vpop.f32.mrf.mxu1  ;;  %v1775_v61 = vadd.f32 %v1774_v12, %v1712_v55  ;;  %v1644_v47 = vadd.f32 %v1643_v35, %v3669_v63 }
 0x191   :  { %v1229_v56 = vpop.f32.mrf.mxu0 }
 0x192   :  { %v3766_v29 = vadd.f32 %v3707_v46, %v1229_v56  ;;  %v3779_v39 = vpop.f32.mrf.mxu1  ;;  %v1776_v21 = vadd.f32 %v1775_v61, %v1713_v19  ;;  %v1645_v60 = vadd.f32 %v1644_v47, %v3671_v5  ;;  %v1717_v19 = vmul.f32 %v3675_v16, %v3675_v16 }
 0x193   :  { %v1231_v7 = vpop.f32.mrf.mxu0 }
 0x194   :  { %4752 = vst [vmem:[#allocation7_spill] sm:$0xff] %v3766_v29  ;;  %v1547_v56 = vpop.f32.mrf.mxu1  ;;  %v1777_v58 = vadd.f32 %v1776_v21, %v1714_v33  ;;  %v1646_v13 = vadd.f32 %v1645_v60, %v3673_v10  ;;  %v1718_v33 = vmul.f32 %v3677_v23, %v3677_v23 }
 0x195   :  { %v1232_v22 = vpop.f32.mrf.mxu0 }
 0x196   :  { %v3777_v46 = vadd.f32 %v3717_v3, %v1232_v22  ;;  %v3790_v7 = vpop.f32.mrf.mxu1  ;;  %v1778_v12 = vadd.f32 %v1777_v58, %v1715_v49  ;;  %v1647_v35 = vadd.f32 %v1646_v13, %v3675_v16 }
 0x197   :  { %v1234_v36 = vpop.f32.mrf.mxu0 }
 0x198   :  { %v1552_v25 = vpop.f32.mrf.mxu1  ;;  %v1779_v61 = vadd.f32 %v1778_v12, %v1716_v0  ;;  %v1648_v49 = vadd.f32 %v1647_v35, %v3677_v23 }
 0x199   :  { %v1237_v6 = vpop.f32.mrf.mxu0  ;;  %v1721_v25 = vmul.f32 %v3683_v44, %v3683_v44 }
 0x19a   :  { %v3788_v3 = vadd.f32 %v3727_v32, %v1237_v6  ;;  %v3801_v21 = vpop.f32.mrf.mxu1  ;;  %v1780_v47 = vadd.f32 %v1779_v61, %v1717_v19  ;;  %v1719_v6 = vmul.f32 %v3679_v30, %v3679_v30  ;;  %v1649_v0 = vadd.f32 %v1648_v49, %v3679_v30 }
 0x19b   :  { %v1239_v55 = vpop.f32.mrf.mxu0 }
 0x19c   :  { %4753 = vst [vmem:[#allocation8_spill] sm:$0xff] %v3788_v3  ;;  %v1555_v58 = vpop.f32.mrf.mxu1  ;;  %v1781_v60 = vadd.f32 %v1780_v47, %v1718_v33  ;;  %v1720_v55 = vmul.f32 %v3681_v37, %v3681_v37  ;;  %v1722_v47 = vmul.f32 %v3685_v52, %v3685_v52 }
 0x19d   :  { %v1240_v22 = vpop.f32.mrf.mxu0 }
 0x19e   :  { %v3799_v32 = vadd.f32 %v3737_v53, %v1240_v22  ;;  %v3812_v13 = vpop.f32.mrf.mxu1  ;;  %v1782_v19 = vadd.f32 %v1781_v60, %v1719_v6  ;;  %v1650_v22 = vadd.f32 %v1649_v0, %v3681_v37  ;;  %v1723_v60 = vmul.f32 %v3687_v59, %v3687_v59 }
 0x19f   :  { %v1242_v36 = vpop.f32.mrf.mxu0 }
 0x1a0   :  { %v1560_v35 = vpop.f32.mrf.mxu1  ;;  %v1783_v33 = vadd.f32 %v1782_v19, %v1720_v55  ;;  %v1651_v36 = vadd.f32 %v1650_v22, %v3683_v44  ;;  %v1724_v22 = vmul.f32 %v3689_v2, %v3689_v2 }
 0x1a1   :  { %v1245_v56 = vpop.f32.mrf.mxu0 }
 0x1a2   :  { %v3810_v53 = vadd.f32 %v3747_v15, %v1245_v56  ;;  %v3823_v56 = vpop.f32.mrf.mxu1  ;;  %v1784_v6 = vadd.f32 %v1783_v33, %v1721_v25  ;;  %v1652_v58 = vadd.f32 %v1651_v36, %v3685_v52  ;;  %v1725_v36 = vmul.f32 %v3691_v9, %v3691_v9 }
 0x1a3   :  { %v1247_v12 = vpop.f32.mrf.mxu0 }
 0x1a4   :  { %4754 = vst [vmem:[#allocation9_spill] sm:$0xff] %v3810_v53  ;;  %v1563_v12 = vpop.f32.mrf.mxu1  ;;  %v1785_v55 = vadd.f32 %v1784_v6, %v1722_v47  ;;  %v1653_v19 = vadd.f32 %v1652_v58, %v3687_v59  ;;  %v1726_v58 = vmul.f32 %v3693_v18, %v3693_v18 }
 0x1a5   :  { %v1248_v61 = vpop.f32.mrf.mxu0 }
 0x1a6   :  { %v3821_v15 = vadd.f32 %v3757_v43, %v1248_v61  ;;  %v3834_v35 = vpop.f32.mrf.mxu1  ;;  %v1786_v25 = vadd.f32 %v1785_v55, %v1723_v60  ;;  %v1654_v33 = vadd.f32 %v1653_v19, %v3689_v2  ;;  %v1727_v19 = vmul.f32 %v3695_v28, %v3695_v28 }
 0x1a7   :  { %v1250_v49 = vpop.f32.mrf.mxu0 }
 0x1a8   :  { %v1568_v12 = vpop.f32.mrf.mxu1  ;;  %v1787_v47 = vadd.f32 %v1786_v25, %v1724_v22  ;;  %v1655_v6 = vadd.f32 %v1654_v33, %v3691_v9  ;;  %v1728_v33 = vmul.f32 %v3705_v42, %v3705_v42 }
 0x1a9   :  { %v1253_v0 = vpop.f32.mrf.mxu0 }
 0x1aa   :  { %v3832_v43 = vadd.f32 %v3768_v8, %v1253_v0  ;;  %v1788_v60 = vadd.f32 %v1787_v47, %v1725_v36  ;;  %v1656_v55 = vadd.f32 %v1655_v6, %v3693_v18  ;;  %v1729_v6 = vmul.f32 %v3715_v1, %v3715_v1 }
 0x1ab   :  { %v1255_v61 = vpop.f32.mrf.mxu0 }
 0x1ac   :  { %4755 = vst [vmem:[#allocation10_spill] sm:$0xff] %v3832_v43  ;;  %v3845_v61 = vpop.f32.mrf.mxu1  ;;  %v1789_v22 = vadd.f32 %v1788_v60, %v1726_v58  ;;  %v1657_v25 = vadd.f32 %v1656_v55, %v3695_v28  ;;  %v1730_v55 = vmul.f32 %v3725_v27, %v3725_v27 }
 0x1ad   :  { %v1256_v49 = vpop.f32.mrf.mxu0 }
 0x1ae   :  { %v3843_v8 = vadd.f32 %v3779_v39, %v1256_v49  ;;  %v1571_v12 = vpop.f32.mrf.mxu1  ;;  %v1790_v36 = vadd.f32 %v1789_v22, %v1727_v19  ;;  %v1658_v47 = vadd.f32 %v1657_v25, %v3705_v42  ;;  %v1731_v25 = vmul.f32 %v3735_v50, %v3735_v50 }
 0x1af   :  { %v1258_v0 = vpop.f32.mrf.mxu0 }
 0x1b0   :  { %4756 = vst [vmem:[#allocation11_spill] sm:$0xff] %v3843_v8  ;;  %v3856_v0 = vpop.f32.mrf.mxu1  ;;  %v1791_v58 = vadd.f32 %v1790_v36, %v1728_v33  ;;  %v1659_v60 = vadd.f32 %v1658_v47, %v3715_v1  ;;  %v1732_v47 = vmul.f32 %v3745_v14, %v3745_v14 }
 0x1b1   :  { %v1261_v2 = vpop.f32.mrf.mxu0 }
 0x1b2   :  { %v3854_v39 = vadd.f32 %v3790_v7, %v1261_v2  ;;  %v1576_v12 = vpop.f32.mrf.mxu1  ;;  %v1792_v19 = vadd.f32 %v1791_v58, %v1729_v6  ;;  %v1660_v22 = vadd.f32 %v1659_v60, %v3725_v27  ;;  %v1733_v60 = vmul.f32 %v3755_v41, %v3755_v41 }
 0x1b3   :  { %v1263_v49 = vpop.f32.mrf.mxu0 }
 0x1b4   :  { %4757 = vst [vmem:[#allocation12_spill] sm:$0xff] %v3854_v39  ;;  %v3867_v49 = vpop.f32.mrf.mxu1  ;;  %v1793_v33 = vadd.f32 %v1792_v19, %v1730_v55  ;;  %v1661_v36 = vadd.f32 %v1660_v22, %v3735_v50  ;;  %v1734_v22 = vmul.f32 %v3766_v29, %v3766_v29 }
 0x1b5   :  { %v1264_v18 = vpop.f32.mrf.mxu0 }
 0x1b6   :  { %v3865_v2 = vadd.f32 %v3801_v21, %v1264_v18  ;;  %v1579_v12 = vpop.f32.mrf.mxu1  ;;  %v1794_v6 = vadd.f32 %v1793_v33, %v1731_v25  ;;  %v1662_v58 = vadd.f32 %v1661_v36, %v3745_v14  ;;  %v1735_v36 = vmul.f32 %v3777_v46, %v3777_v46 }
 0x1b7   :  { %v1266_v7 = vpop.f32.mrf.mxu0 }
 0x1b8   :  { %4758 = vst [vmem:[#allocation13_spill] sm:$0xff] %v3865_v2  ;;  %v3878_v7 = vpop.f32.mrf.mxu1  ;;  %v1795_v55 = vadd.f32 %v1794_v6, %v1732_v47  ;;  %v1663_v19 = vadd.f32 %v1662_v58, %v3755_v41  ;;  %v1736_v58 = vmul.f32 %v3788_v3, %v3788_v3 }
 0x1b9   :  { %v1269_v42 = vpop.f32.mrf.mxu0 }
 0x1ba   :  { %v3876_v18 = vadd.f32 %v3812_v13, %v1269_v42  ;;  %v1584_v12 = vpop.f32.mrf.mxu1  ;;  %v1796_v25 = vadd.f32 %v1795_v55, %v1733_v60  ;;  %v1664_v33 = vadd.f32 %v1663_v19, %v3766_v29  ;;  %v1737_v19 = vmul.f32 %v3799_v32, %v3799_v32 }
 0x1bb   :  { %v1271_v21 = vpop.f32.mrf.mxu0 }
 0x1bc   :  { %4759 = vst [vmem:[#allocation14_spill] sm:$0xff] %v3876_v18  ;;  %v3889_v21 = vpop.f32.mrf.mxu1  ;;  %v1797_v47 = vadd.f32 %v1796_v25, %v1734_v22  ;;  %v1665_v6 = vadd.f32 %v1664_v33, %v3777_v46  ;;  %v1738_v33 = vmul.f32 %v3810_v53, %v3810_v53 }
 0x1bd   :  { %v1272_v27 = vpop.f32.mrf.mxu0 }
 0x1be   :  { %v3887_v42 = vadd.f32 %v3823_v56, %v1272_v27  ;;  %v1587_v12 = vpop.f32.mrf.mxu1  ;;  %v1798_v60 = vadd.f32 %v1797_v47, %v1735_v36  ;;  %v1666_v55 = vadd.f32 %v1665_v6, %v3788_v3  ;;  %v1739_v6 = vmul.f32 %v3821_v15, %v3821_v15 }
 0x1bf   :  { %v1274_v13 = vpop.f32.mrf.mxu0 }
 0x1c0   :  { %v3900_v13 = vpop.f32.mrf.mxu1  ;;  %v1799_v22 = vadd.f32 %v1798_v60, %v1736_v58  ;;  %v1667_v25 = vadd.f32 %v1666_v55, %v3799_v32  ;;  %v1740_v55 = vmul.f32 %v3832_v43, %v3832_v43 }
 0x1c1   :  { %v1277_v14 = vpop.f32.mrf.mxu0 }
 0x1c2   :  { %v3898_v27 = vadd.f32 %v3834_v35, %v1277_v14  ;;  %v1592_v12 = vpop.f32.mrf.mxu1  ;;  %v1800_v36 = vadd.f32 %v1799_v22, %v1737_v19  ;;  %v1668_v47 = vadd.f32 %v1667_v25, %v3810_v53  ;;  %v1741_v25 = vmul.f32 %v3843_v8, %v3843_v8 }
 0x1c3   :  { %v1279_v56 = vpop.f32.mrf.mxu0 }
 0x1c4   :  { %4760 = vst [vmem:[#allocation15_spill] sm:$0xff] %v3898_v27  ;;  %v3911_v56 = vpop.f32.mrf.mxu1  ;;  %v1801_v58 = vadd.f32 %v1800_v36, %v1738_v33  ;;  %v1669_v60 = vadd.f32 %v1668_v47, %v3821_v15  ;;  %v1742_v47 = vmul.f32 %v3854_v39, %v3854_v39 }
 0x1c5   :  { %v1280_v29 = vpop.f32.mrf.mxu0 }
 0x1c6   :  { %v3909_v14 = vadd.f32 %v3845_v61, %v1280_v29  ;;  %v1595_v12 = vpop.f32.mrf.mxu1  ;;  %v1802_v19 = vadd.f32 %v1801_v58, %v1739_v6  ;;  %v1670_v22 = vadd.f32 %v1669_v60, %v3832_v43  ;;  %v1743_v60 = vmul.f32 %v3865_v2, %v3865_v2 }
 0x1c7   :  { %v1282_v35 = vpop.f32.mrf.mxu0 }
 0x1c8   :  { %v3922_v35 = vpop.f32.mrf.mxu1  ;;  %v1803_v33 = vadd.f32 %v1802_v19, %v1740_v55  ;;  %v1671_v36 = vadd.f32 %v1670_v22, %v3843_v8  ;;  %v1744_v22 = vmul.f32 %v3876_v18, %v3876_v18 }
 0x1c9   :  { %v1285_v3 = vpop.f32.mrf.mxu0 }
 0x1ca   :  { %v3920_v29 = vadd.f32 %v3856_v0, %v1285_v3  ;;  %v1600_v12 = vpop.f32.mrf.mxu1  ;;  %v1804_v6 = vadd.f32 %v1803_v33, %v1741_v25  ;;  %v1672_v58 = vadd.f32 %v1671_v36, %v3854_v39  ;;  %v1745_v36 = vmul.f32 %v3887_v42, %v3887_v42 }
 0x1cb   :  { %v1287_v61 = vpop.f32.mrf.mxu0 }
 0x1cc   :  { %v3933_v61 = vpop.f32.mrf.mxu1  ;;  %v1805_v55 = vadd.f32 %v1804_v6, %v1742_v47  ;;  %v1673_v19 = vadd.f32 %v1672_v58, %v3865_v2  ;;  %v1746_v58 = vmul.f32 %v3898_v27, %v3898_v27 }
 0x1cd   :  { %v1288_v53 = vpop.f32.mrf.mxu0 }
 0x1ce   :  { %v3931_v3 = vadd.f32 %v3867_v49, %v1288_v53  ;;  %v1603_v12 = vpop.f32.mrf.mxu1  ;;  %v1806_v25 = vadd.f32 %v1805_v55, %v1743_v60  ;;  %v1674_v33 = vadd.f32 %v1673_v19, %v3876_v18  ;;  %v1747_v60 = vmul.f32 %v3909_v14, %v3909_v14 }
 0x1cf   :  { %v1290_v0 = vpop.f32.mrf.mxu0 }
 0x1d0   :  { %4761 = vst [vmem:[#allocation16_spill] sm:$0xff] %v3931_v3  ;;  %v3944_v0 = vpop.f32.mrf.mxu1  ;;  %v1807_v47 = vadd.f32 %v1806_v25, %v1744_v22  ;;  %v1675_v6 = vadd.f32 %v1674_v33, %v3887_v42  ;;  %v1748_v22 = vmul.f32 %v3920_v29, %v3920_v29 }
 0x1d1   :  { %v1293_v43 = vpop.f32.mrf.mxu0 }
 0x1d2   :  { %v3942_v53 = vadd.f32 %v3878_v7, %v1293_v43  ;;  %v1608_v12 = vpop.f32.mrf.mxu1  ;;  %v1808_v7 = vadd.f32 %v1807_v47, %v1745_v36  ;;  %v1749_v36 = vmul.f32 %v3931_v3, %v3931_v3 }
 0x1d3   :  { %v1295_v49 = vpop.f32.mrf.mxu0 }
 0x1d4   :  { %4762 = vst [vmem:[#allocation17_spill] sm:$0xff] %v3942_v53  ;;  %v1609_v43 = vpop.f32.mrf.mxu1  ;;  %v1676_v49 = vadd.f32 %v1675_v6, %v3898_v27  ;;  %v1809_v18 = vadd.f32 %v1808_v7, %v1746_v58  ;;  %v1750_v7 = vmul.f32 %v3942_v53, %v3942_v53 }
 0x1d5   :  { %v1296_v39 = vpop.f32.mrf.mxu0 }
 0x1d6   :  { %v1611_v19 = vpop.f32.mrf.mxu1  ;;  %v1677_v8 = vadd.f32 %v1676_v49, %v3909_v14  ;;  %v1810_v12 = vadd.f32 %v1809_v18, %v1747_v60  ;;  %v3962_v47 = vadd.f32 %v3889_v21, %v1296_v39 }
 0x1d7   :  { %v1298_v2 = vpop.f32.mrf.mxu0 }
 0x1d8   :  { %v1614_v33 = vpop.f32.mrf.mxu1  ;;  %v1678_v2 = vadd.f32 %v1677_v8, %v3920_v29  ;;  %4763 = vst [vmem:[#allocation18_spill] sm:$0xff] %v3962_v47  ;;  %v1811_v19 = vadd.f32 %v1810_v12, %v1748_v22  ;;  %v1751_v39 = vmul.f32 %v3962_v47, %v3962_v47 }
 0x1d9   :  { %v1301_v55 = vpop.f32.mrf.mxu0 }
 0x1da   :  { %v1616_v27 = vpop.f32.mrf.mxu1  ;;  %v1679_v58 = vadd.f32 %v1678_v2, %v3931_v3  ;;  %v3968_v49 = vadd.f32 %v3900_v13, %v1301_v55  ;;  %v1812_v8 = vadd.f32 %v1811_v19, %v1749_v36 }
 0x1db   :  { %v1303_v25 = vpop.f32.mrf.mxu0 }
 0x1dc   :  { %4764 = vst [vmem:[#allocation19_spill] sm:$0xff] %v3968_v49  ;;  %v1617_v60 = vpop.f32.mrf.mxu1  ;;  %v1680_v25 = vadd.f32 %v1679_v58, %v3942_v53  ;;  %v1813_v12 = vadd.f32 %v1812_v8, %v1750_v7  ;;  %v1752_v13 = vmul.f32 %v3968_v49, %v3968_v49 }
 0x1dd   :  { %v1304_v6 = vpop.f32.mrf.mxu0 }
 0x1de   :  { %v3974_v21 = vadd.f32 %v3911_v56, %v1304_v6  ;;  %v1619_v22 = vpop.f32.mrf.mxu1  ;;  %v1681_v2 = vadd.f32 %v1680_v25, %v3962_v47  ;;  %v1814_v58 = vadd.f32 %v1813_v12, %v1751_v39 }
 0x1df   :  { %v1306_v18 = vpop.f32.mrf.mxu0 }
 0x1e0   :  { %4765 = vst [vmem:[#allocation20_spill] sm:$0xff] %v3974_v21  ;;  %v1622_v19 = vpop.f32.mrf.mxu1  ;;  %v1682_v18 = vadd.f32 %v1681_v2, %v3968_v49  ;;  %v1753_v56 = vmul.f32 %v3974_v21, %v3974_v21  ;;  %v1815_v22 = vadd.f32 %v1814_v58, %v1752_v13 }
 0x1e1   :  { %v1309_v27 = vpop.f32.mrf.mxu0 }
 0x1e2   :  { %v3980_v55 = vadd.f32 %v3922_v35, %v1309_v27  ;;  %v1624_v53 = vpop.f32.mrf.mxu1  ;;  %v1683_v7 = vadd.f32 %v1682_v18, %v3974_v21 }
 0x1e3   :  { %v1311_v36 = vpop.f32.mrf.mxu0 }
 0x1e4   :  { %4766 = vst [vmem:[#allocation21_spill] sm:$0xff] %v3980_v55  ;;  %v1754_v8 = vmul.f32 %v3980_v55, %v3980_v55  ;;  %v1625_v27 = vpop.f32.mrf.mxu1  ;;  %v1816_v36 = vadd.f32 %v1815_v22, %v1753_v56  ;;  %v1684_v39 = vadd.f32 %v1683_v7, %v3980_v55 }
 0x1e5   :  { %v1312_v6 = vpop.f32.mrf.mxu0 }
 0x1e6   :  { %v3989_v25 = vadd.f32 %v3933_v61, %v1312_v6  ;;  %v1627_v49 = vpop.f32.mrf.mxu1  ;;  %v1817_v53 = vadd.f32 %v1816_v36, %v1754_v8 }
 0x1e7   :  { %v1314_v35 = vpop.f32.mrf.mxu0 }
 0x1e8   :  { %v1755_v12 = vmul.f32 %v3989_v25, %v3989_v25  ;;  %v1685_v13 = vadd.f32 %v1684_v39, %v3989_v25 }
 0x1e9   :  { %v1317_v2 = vpop.f32.mrf.mxu0 }
 0x1ea   :  { %v3996_v58 = vadd.f32 %v3944_v0, %v1317_v2  ;;  %v1818_v21 = vadd.f32 %v1817_v53, %v1755_v12 }
 0x1eb   :  { %v1319_v18 = vpop.f32.mrf.mxu0 }
 0x1ec   :  { %v1686_v61 = vadd.f32 %v1685_v13, %v3996_v58  ;;  %v1756_v56 = vmul.f32 %v3996_v58, %v3996_v58 }
 0x1ed   :  { %v1320_v6 = vpop.f32.mrf.mxu0 }
 0x1ee   :  { %v1819_v22 = vadd.f32 %v1818_v21, %v1756_v56  ;;  %v4001_v7 = vadd.f32 %v1609_v43, %v1320_v6 }
 0x1ef   :  { %v1322_v35 = vpop.f32.mrf.mxu0 }
 0x1f0   :  { %v1687_v49 = vadd.f32 %v1686_v61, %v4001_v7  ;;  %v1757_v8 = vmul.f32 %v4001_v7, %v4001_v7 }
 0x1f1   :  { %v1325_v36 = vpop.f32.mrf.mxu0 }
 0x1f2   :  { %v1820_v0 = vadd.f32 %v1819_v22, %v1757_v8  ;;  %v4006_v39 = vadd.f32 %v1614_v33, %v1325_v36 }
 0x1f3   :  { %v1327_v12 = vpop.f32.mrf.mxu0 }
 0x1f4   :  { %v1688_v2 = vadd.f32 %v1687_v49, %v4006_v39  ;;  %v1758_v53 = vmul.f32 %v4006_v39, %v4006_v39 }
 0x1f5   :  { %v1328_v13 = vpop.f32.mrf.mxu0 }
 0x1f6   :  { %v1821_v21 = vadd.f32 %v1820_v0, %v1758_v53  ;;  %v4011_v43 = vadd.f32 %v1617_v60, %v1328_v13 }
 0x1f7   :  { %v1330_v18 = vpop.f32.mrf.mxu0 }
 0x1f8   :  { %4767 = vst [vmem:[#allocation22_spill] sm:$0xff] %v4011_v43  ;;  %v1689_v61 = vadd.f32 %v1688_v2, %v4011_v43  ;;  %v1759_v56 = vmul.f32 %v4011_v43, %v4011_v43 }
 0x1f9   :  { %v1333_v6 = vpop.f32.mrf.mxu0 }
 0x1fa   :  { %v1822_v22 = vadd.f32 %v1821_v21, %v1759_v56  ;;  %v4016_v33 = vadd.f32 %v1622_v19, %v1333_v6 }
 0x1fb   :  { %v1335_v35 = vpop.f32.mrf.mxu0 }
 0x1fc   :  { %4768 = vst [vmem:[#allocation23_spill] sm:$0xff] %v4016_v33  ;;  %v1690_v49 = vadd.f32 %v1689_v61, %v4016_v33  ;;  %v1760_v8 = vmul.f32 %v4016_v33, %v4016_v33 }
 0x1fd   :  { %v1336_v36 = vpop.f32.mrf.mxu0 }
 0x1fe   :  { %v1823_v0 = vadd.f32 %v1822_v22, %v1760_v8  ;;  %v4021_v60 = vadd.f32 %v1625_v27, %v1336_v36 }
 0x1ff   :  { %v1338_v12 = vpop.f32.mrf.mxu0 }
 0x200   :  { %4769 = vst [vmem:[#allocation24_spill] sm:$0xff] %v4021_v60  ;;  %v1691_v2 = vadd.f32 %v1690_v49, %v4021_v60  ;;  %v1761_v53 = vmul.f32 %v4021_v60, %v4021_v60  ;;  %v1844_v60 = vlaneseq }
 0x202   :  { %v1692_v13 = vrot.slane %v1691_v2, 4  ;;  %v1824_v21 = vadd.f32 %v1823_v0, %v1761_v53  ;;  %v4026_v0 = vshrl.u32 %v1844_v60, 7 }
 0x204   :  { %v1693_v19 = vadd.f32 %v1692_v13, %v1691_v2  ;;  %v1825_v18 = vrot.slane %v1824_v21, 4  ;;  %v1838_v2 = vld [vmem:[%s4715_s2] sm:$0x1]  ;;  %v4741_v53 = vsub.s32 0, %v4026_v0 }
 0x206   :  { %v1694_v56 = vrot.slane %v1693_v19, 2  ;;  %v1826_v6 = vadd.f32 %v1825_v18, %v1824_v21 }
 0x208   :  { %v1695_v61 = vadd.f32 %v1694_v56, %v1693_v19  ;;  %v1827_v35 = vrot.slane %v1826_v6, 2 }
 0x20a   :  { %v1696_v55 = vrot.slane %v1695_v61, 1  ;;  %v1828_v47 = vadd.f32 %v1827_v35, %v1826_v6  ;;  %v4770_v6 = vld [vmem:[#allocation2_spill] sm:$0xff]  ;;  %v4772_v35 = vld [vmem:[#allocation4_spill] sm:$0xff] }
 0x20c   :  { %v1697_v3 = vadd.f32 %v1696_v55, %v1695_v61  ;;  %v1829_v22 = vrot.slane %v1828_v47, 1  ;;  %v4771_v61 = vld [vmem:[#allocation3_spill] sm:$0xff] }
 0x20e   :  { %v1830_v27 = vadd.f32 %v1829_v22, %v1828_v47  ;;  %v1831_v8 = vmul.f32 0.001953125, %v1697_v3  ;;  %v4035_v3 = vld [vmem:[%s4716_s3] sm:$0x1] }
 0x210   :  { %v1832_v36 = vmul.f32 0.001953125, %v1830_v27  ;;  %v1833_v12 = vmul.f32 %v1831_v8, %v1831_v8  ;;  %v4773_v27 = vld [vmem:[#allocation5_spill] sm:$0xff] }
 0x212   :  { %v1834_v49 = vsub.f32 %v1832_v36, %v1833_v12  ;;  %v4774_v36 = vld [vmem:[#allocation6_spill] sm:$0xff] }
 0x214   :  { %v1835_v33 = vmax.f32 %v1834_v49, 0.0  ;;  %v4775_v49 = vld [vmem:[#allocation7_spill] sm:$0xff] }
 0x216   :  { %v1836_v43 = vadd.f32 1e-05, %v1835_v33 }
 0x218   :  { %3093 = vrsqrt.f32 %v1836_v43 }
 0x225   :  { %v3094_v13 = vpop.eup %3093 }
 0x226   :  { %v1839_v55 = vmul.f32 %v3094_v13, %v1838_v2  ;;  %v4776_v13 = vld [vmem:[#allocation8_spill] sm:$0xff] }
 0x228   :  { %v4037_v47 = vmul.f32 %v1839_v55, %v1831_v8  ;;  %v4041_v43 = vrot.slane %v1839_v55, %v4741_v53  ;;  %v4792_v53 = vld [vmem:[#allocation22_spill] sm:$0xff] }
 0x22a   :  { %v1842_v33 = vsub.f32 %v4035_v3, %v4037_v47  ;;  %v4047_v60 = vmul.f32 %v4041_v43, %v3573_v20  ;;  %v4051_v21 = vmul.f32 %v4041_v43, %v3579_v26  ;;  %v4055_v19 = vmul.f32 %v4041_v43, %v3590_v34  ;;  %v4777_v3 = vld [vmem:[#allocation9_spill] sm:$0xff] }
 0x22b   :  { %v4059_v18 = vmul.f32 %v4041_v43, %v3596_v40  ;;  %v4063_v56 = vmul.f32 %v4041_v43, %v3607_v48  ;;  %v4067_v20 = vmul.f32 %v4041_v43, %v3613_v54  ;;  %v4071_v26 = vmul.f32 %v4041_v43, %v3624_v62 }
 0x22c   :  { %v4075_v34 = vmul.f32 %v4041_v43, %v3630_v4  ;;  %v4079_v40 = vmul.f32 %v4041_v43, %v3638_v11  ;;  %v4083_v48 = vmul.f32 %v4041_v43, %v3643_v17  ;;  %v4087_v54 = vmul.f32 %v4041_v43, %v3648_v24 }
 0x22d   :  { %v4091_v62 = vmul.f32 %v4041_v43, %v3653_v31  ;;  %v4095_v4 = vmul.f32 %v4041_v43, %v3658_v38  ;;  %v4099_v11 = vmul.f32 %v4041_v43, %v3663_v45  ;;  %v4103_v17 = vmul.f32 %v4041_v43, %v3665_v51 }
 0x22e   :  { %v4107_v24 = vmul.f32 %v4041_v43, %v3667_v57  ;;  %v4111_v31 = vmul.f32 %v4041_v43, %v3669_v63  ;;  %v4115_v38 = vmul.f32 %v4041_v43, %v3671_v5  ;;  %v4119_v45 = vmul.f32 %v4041_v43, %v3673_v10 }
 0x22f   :  { %v4123_v51 = vmul.f32 %v4041_v43, %v3675_v16  ;;  %v4127_v57 = vmul.f32 %v4041_v43, %v3677_v23  ;;  %v4131_v63 = vmul.f32 %v4041_v43, %v3679_v30  ;;  %v4135_v5 = vmul.f32 %v4041_v43, %v3681_v37 }
 0x230   :  { %v4139_v10 = vmul.f32 %v4041_v43, %v3683_v44  ;;  %v4143_v16 = vmul.f32 %v4041_v43, %v3685_v52  ;;  %v4147_v23 = vmul.f32 %v4041_v43, %v3687_v59  ;;  %v4151_v30 = vmul.f32 %v4041_v43, %v4770_v6  ;;  %v4778_v6 = vld [vmem:[#allocation10_spill] sm:$0xff] }
 0x231   :  { %v4155_v37 = vmul.f32 %v4041_v43, %v3691_v9  ;;  %v4159_v44 = vmul.f32 %v4041_v43, %v4771_v61  ;;  %v4163_v52 = vmul.f32 %v4041_v43, %v3695_v28  ;;  %v4167_v59 = vmul.f32 %v4041_v43, %v4772_v35  ;;  %v4779_v61 = vld [vmem:[#allocation11_spill] sm:$0xff] }
 0x232   :  { %v4171_v22 = vmul.f32 %v4041_v43, %v3715_v1  ;;  %v4175_v9 = vmul.f32 %v4041_v43, %v4773_v27  ;;  %v4179_v8 = vmul.f32 %v4041_v43, %v3735_v50  ;;  %v4183_v28 = vmul.f32 %v4041_v43, %v4774_v36  ;;  %v4780_v27 = vld [vmem:[#allocation12_spill] sm:$0xff]  ;;  %v4781_v36 = vld [vmem:[#allocation13_spill] sm:$0xff] }
 0x233   :  { %v4187_v12 = vmul.f32 %v4041_v43, %v3755_v41  ;;  %v4191_v1 = vmul.f32 %v4041_v43, %v4775_v49  ;;  %v4195_v2 = vmul.f32 %v4041_v43, %v3777_v46  ;;  %v4199_v50 = vmul.f32 %v4041_v43, %v4776_v13  ;;  %v4782_v13 = vld [vmem:[#allocation14_spill] sm:$0xff] }
 0x234   :  { %v4203_v55 = vmul.f32 %v4041_v43, %v3799_v32  ;;  %v4207_v41 = vmul.f32 %v4041_v43, %v4777_v3  ;;  %v4211_v47 = vmul.f32 %v4041_v43, %v3821_v15  ;;  %v4215_v46 = vmul.f32 %v4041_v43, %v4778_v6  ;;  %v4784_v6 = vld [vmem:[#allocation15_spill] sm:$0xff] }
 0x235   :  { %v4219_v35 = vmul.f32 %v4041_v43, %v4779_v61  ;;  %v4223_v32 = vmul.f32 %v4041_v43, %v4780_v27  ;;  %v4227_v49 = vmul.f32 %v4041_v43, %v4781_v36  ;;  %v4231_v15 = vmul.f32 %v4041_v43, %v4782_v13 }
 0x236   :  { %v4235_v3 = vmul.f32 %v4041_v43, %v3887_v42  ;;  %v4239_v61 = vmul.f32 %v4041_v43, %v4784_v6  ;;  %v4243_v27 = vmul.f32 %v4041_v43, %v3909_v14  ;;  %v4247_v36 = vmul.f32 %v4041_v43, %v3920_v29 }
 0x237   :  { %v4251_v13 = vmul.f32 %v4041_v43, %v3989_v25  ;;  %v4255_v42 = vmul.f32 %v4041_v43, %v3996_v58  ;;  %v4259_v6 = vmul.f32 %v4041_v43, %v4001_v7  ;;  %v4263_v14 = vmul.f32 %v4041_v43, %v4006_v39  ;;  %v4798_v7 = vld [vmem:[#allocation24_spill] sm:$0xff] }
 0x238   :  { %4783 = vst [vmem:[#allocation2_spill] sm:$0xff] %v4235_v3  ;;  %4785 = vst [vmem:[#allocation3_spill] sm:$0xff] %v4239_v61  ;;  %v4267_v29 = vmul.f32 %v4041_v43, %v4792_v53  ;;  %v4799_v39 = vsub.s32 0, %v4026_v0  ;;  %v4800_v53 = vld [vmem:[#allocation18_spill] sm:$0xff]  ;;  %v4801_v61 = vld [vmem:[#allocation19_spill] sm:$0xff] }
 0x239   :  { %4786 = vst [vmem:[#allocation4_spill] sm:$0xff] %v4243_v27  ;;  %4787 = vst [vmem:[#allocation5_spill] sm:$0xff] %v4247_v36  ;;  %v4794_v36 = vld [vmem:[#allocation23_spill] sm:$0xff]  ;;  %v4803_v3 = vld [vmem:[#allocation21_spill] sm:$0xff] }
 0x23a   :  { %4788 = vst [vmem:[#allocation6_spill] sm:$0xff] %v4251_v13  ;;  %4789 = vst [vmem:[#allocation7_spill] sm:$0xff] %v4255_v42  ;;  %v4271_v25 = vmul.f32 %v4041_v43, %v4794_v36  ;;  %v4796_v13 = vld [vmem:[#allocation16_spill] sm:$0xff]  ;;  %v4797_v42 = vld [vmem:[#allocation17_spill] sm:$0xff]  ;;  %v1903_v36 = vmul.f32 %v4041_v43, %v4801_v61 }
 0x23b   :  { %4790 = vst [vmem:[#allocation8_spill] sm:$0xff] %v4259_v6  ;;  %4791 = vst [vmem:[#allocation9_spill] sm:$0xff] %v4263_v14  ;;  %v1900_v58 = vmul.f32 %v4041_v43, %v4796_v13  ;;  %v1901_v27 = vmul.f32 %v4041_v43, %v4797_v42  ;;  %v4279_v6 = vmul.f32 %v4041_v43, %v4798_v7 }
 0x23c   :  { %4793 = vst [vmem:[#allocation10_spill] sm:$0xff] %v4267_v29  ;;  %4795 = vst [vmem:[#allocation11_spill] sm:$0xff] %v4271_v25  ;;  %v4283_v14 = vrot.slane %v1842_v33, %v4799_v39  ;;  %v1902_v29 = vmul.f32 %v4041_v43, %v4800_v53  ;;  %v4802_v25 = vld [vmem:[#allocation20_spill] sm:$0xff]  ;;  %v1905_v42 = vmul.f32 %v4041_v43, %v4803_v3 }
 0x23d   :  { %v1904_v13 = vmul.f32 %v4041_v43, %v4802_v25 }
 0x23e   :  { %v4295_v7 = vadd.f32 %v4283_v14, %v4047_v60  ;;  %v4299_v0 = vadd.f32 %v4283_v14, %v4051_v21  ;;  %v4303_v33 = vadd.f32 %v4283_v14, %v4055_v19  ;;  %v4307_v61 = vadd.f32 %v4283_v14, %v4059_v18 }
 0x23f   :  { %v4311_v25 = vadd.f32 %v4283_v14, %v4063_v56  ;;  %v4315_v43 = vadd.f32 %v4283_v14, %v4067_v20  ;;  %v4319_v60 = vadd.f32 %v4283_v14, %v4071_v26  ;;  %v4323_v21 = vadd.f32 %v4283_v14, %v4075_v34  ;;  %v4811_v3 = vld [vmem:[#allocation3_spill] sm:$0xff] }
 0x240   :  { %4804 = vst [vmem:[#allocation12_spill] sm:$0xff] %v4295_v7  ;;  %4805 = vst [vmem:[#allocation13_spill] sm:$0xff] %v4299_v0  ;;  %v4327_v19 = vadd.f32 %v4283_v14, %v4079_v40  ;;  %v4331_v18 = vadd.f32 %v4283_v14, %v4083_v48  ;;  %v4335_v56 = vadd.f32 %v4283_v14, %v4087_v54  ;;  %v4813_v39 = vld [vmem:[#allocation4_spill] sm:$0xff]  ;;  %v4814_v53 = vld [vmem:[#allocation5_spill] sm:$0xff] }
 0x241   :  { %4806 = vst [vmem:[#allocation14_spill] sm:$0xff] %v4303_v33  ;;  %4807 = vst [vmem:[#allocation15_spill] sm:$0xff] %v4307_v61  ;;  %v4339_v20 = vadd.f32 %v4283_v14, %v4091_v62  ;;  %v4343_v26 = vadd.f32 %v4283_v14, %v4095_v4  ;;  %v4347_v34 = vadd.f32 %v4283_v14, %v4099_v11 }
 0x242   :  { %4808 = vst [vmem:[#allocation22_spill] sm:$0xff] %v4311_v25  ;;  %v4351_v40 = vadd.f32 %v4283_v14, %v4103_v17  ;;  %v4355_v48 = vadd.f32 %v4283_v14, %v4107_v24  ;;  %v4359_v54 = vadd.f32 %v4283_v14, %v4111_v31  ;;  %v4363_v62 = vadd.f32 %v4283_v14, %v4115_v38 }
 0x243   :  { %v4367_v4 = vadd.f32 %v4283_v14, %v4119_v45  ;;  %v4371_v11 = vadd.f32 %v4283_v14, %v4123_v51  ;;  %v4375_v17 = vadd.f32 %v4283_v14, %v4127_v57  ;;  %v4379_v24 = vadd.f32 %v4283_v14, %v4131_v63 }
 0x244   :  { %v4383_v31 = vadd.f32 %v4283_v14, %v4135_v5  ;;  %v4387_v38 = vadd.f32 %v4283_v14, %v4139_v10  ;;  %v4391_v45 = vadd.f32 %v4283_v14, %v4143_v16  ;;  %v4395_v51 = vadd.f32 %v4283_v14, %v4147_v23 }
 0x245   :  { %v4399_v57 = vadd.f32 %v4283_v14, %v4151_v30  ;;  %v4403_v63 = vadd.f32 %v4283_v14, %v4155_v37  ;;  %v4407_v5 = vadd.f32 %v4283_v14, %v4159_v44  ;;  %v4411_v10 = vadd.f32 %v4283_v14, %v4163_v52 }
 0x246   :  { %v4415_v16 = vadd.f32 %v4283_v14, %v4167_v59  ;;  %v4419_v23 = vadd.f32 %v4283_v14, %v4171_v22  ;;  %v4423_v30 = vadd.f32 %v4283_v14, %v4175_v9  ;;  %v4427_v37 = vadd.f32 %v4283_v14, %v4179_v8 }
 0x247   :  { %v4431_v44 = vadd.f32 %v4283_v14, %v4183_v28  ;;  %v4435_v52 = vadd.f32 %v4283_v14, %v4187_v12  ;;  %v4439_v59 = vadd.f32 %v4283_v14, %v4191_v1  ;;  %v4443_v22 = vadd.f32 %v4283_v14, %v4195_v2 }
 0x248   :  { %v4447_v9 = vadd.f32 %v4283_v14, %v4199_v50  ;;  %v4451_v8 = vadd.f32 %v4283_v14, %v4203_v55  ;;  %v4455_v28 = vadd.f32 %v4283_v14, %v4207_v41  ;;  %v4459_v12 = vadd.f32 %v4283_v14, %v4211_v47  ;;  %v4810_v47 = vld [vmem:[#allocation2_spill] sm:$0xff] }
 0x249   :  { %v4463_v1 = vadd.f32 %v4283_v14, %v4215_v46  ;;  %v4467_v2 = vadd.f32 %v4283_v14, %v4219_v35  ;;  %v4471_v50 = vadd.f32 %v4283_v14, %v4223_v32  ;;  %v4475_v55 = vadd.f32 %v4283_v14, %v4227_v49 }
 0x24a   :  { %v4479_v41 = vadd.f32 %v4283_v14, %v4231_v15  ;;  %v4483_v46 = vadd.f32 %v4283_v14, %v4810_v47  ;;  %v4487_v35 = vadd.f32 %v4283_v14, %v4811_v3  ;;  %v4491_v32 = vadd.f32 %v4283_v14, %v4813_v39 }
 0x24b   :  { %4809 = vst [vmem:[#allocation23_spill] sm:$0xff] %v4475_v55  ;;  %v4495_v49 = vadd.f32 %v4283_v14, %v4814_v53  ;;  %v4498_v55 = vadd.f32 %v4283_v14, %v1900_v58  ;;  %v4501_v15 = vadd.f32 %v4283_v14, %v1901_v27  ;;  %v4504_v47 = vadd.f32 %v4283_v14, %v1902_v29  ;;  %v4819_v53 = vld [vmem:[#allocation6_spill] sm:$0xff]  ;;  %v4820_v58 = vld [vmem:[#allocation7_spill] sm:$0xff] }
 0x24c   :  { %4812 = vst [vmem:[#allocation16_spill] sm:$0xff] %v4487_v35  ;;  %v4507_v3 = vadd.f32 %v4283_v14, %v1903_v36  ;;  %v4510_v35 = vadd.f32 %v4283_v14, %v1904_v13  ;;  %v4513_v39 = vadd.f32 %v4283_v14, %v1905_v42  ;;  %v4521_v27 = vadd.f32 %v4283_v14, %v4820_v58  ;;  %v4824_v36 = vld [vmem:[#allocation9_spill] sm:$0xff]  ;;  %v4826_v13 = vld [vmem:[#allocation10_spill] sm:$0xff] }
 0x24d   :  { %4815 = vst [vmem:[#allocation17_spill] sm:$0xff] %v4495_v49  ;;  %4816 = vst [vmem:[#allocation24_spill] sm:$0xff] %v4501_v15  ;;  %v4517_v49 = vadd.f32 %v4283_v14, %v4819_v53  ;;  %v4822_v15 = vld [vmem:[#allocation8_spill] sm:$0xff]  ;;  %v4533_v42 = vadd.f32 %v4283_v14, %v4826_v13  ;;  %v4541_v58 = vadd.f32 %v4283_v14, %v4279_v6  ;;  %v1988_v13 = vmax.f32 %v4315_v43, 0.0 }
 0x24e   :  { %4817 = vst [vmem:[#allocation18_spill] sm:$0xff] %v4507_v3  ;;  %4818 = vst [vmem:[#allocation19_spill] sm:$0xff] %v4513_v39  ;;  %v4525_v29 = vadd.f32 %v4283_v14, %v4822_v15  ;;  %v4529_v3 = vadd.f32 %v4283_v14, %v4824_v36  ;;  %v4828_v39 = vld [vmem:[#allocation11_spill] sm:$0xff]  ;;  %v1992_v6 = vmax.f32 %v4331_v18, 0.0  ;;  %v1994_v15 = vmax.f32 %v4339_v20, 0.0 }
 0x24f   :  { %4821 = vst [vmem:[#allocation20_spill] sm:$0xff] %v4521_v27  ;;  %4827 = vst [vmem:[#allocation3_spill] sm:$0xff] %v4533_v42  ;;  %v4537_v53 = vadd.f32 %v4283_v14, %v4828_v39  ;;  %v1989_v42 = vmax.f32 %v4319_v60, 0.0  ;;  %v1990_v39 = vmax.f32 %v4323_v21, 0.0  ;;  %v1993_v14 = vmax.f32 %v4335_v56, 0.0 }
 0x250   :  { %4823 = vst [vmem:[#allocation21_spill] sm:$0xff] %v4525_v29  ;;  %4825 = vst [vmem:[#allocation2_spill] sm:$0xff] %v4529_v3  ;;  %v1995_v29 = vmax.f32 %v4343_v26, 0.0  ;;  %v1996_v36 = vmax.f32 %v4347_v34, 0.0  ;;  %v1997_v3 = vmax.f32 %v4351_v40, 0.0  ;;  %v1998_v43 = vmax.f32 %v4355_v48, 0.0 }
 0x251   :  { %4829 = vst [vmem:[#allocation4_spill] sm:$0xff] %v4537_v53  ;;  %4830 = vst [vmem:[#allocation5_spill] sm:$0xff] %v4541_v58  ;;  %v1991_v53 = vmax.f32 %v4327_v19, 0.0  ;;  %v1999_v60 = vmax.f32 %v4359_v54, 0.0  ;;  %v2000_v21 = vmax.f32 %v4363_v62, 0.0  ;;  %v2001_v19 = vmax.f32 %v4367_v4, 0.0 }
 0x252   :  { %v2002_v18 = vmax.f32 %v4371_v11, 0.0  ;;  %v2003_v56 = vmax.f32 %v4375_v17, 0.0  ;;  %v2004_v20 = vmax.f32 %v4379_v24, 0.0  ;;  %v2005_v26 = vmax.f32 %v4383_v31, 0.0  ;;  %v4831_v27 = vld [vmem:[#allocation23_spill] sm:$0xff] }
 0x253   :  { %v2006_v34 = vmax.f32 %v4387_v38, 0.0  ;;  %v2007_v40 = vmax.f32 %v4391_v45, 0.0  ;;  %v2008_v48 = vmax.f32 %v4395_v51, 0.0  ;;  %v2009_v54 = vmax.f32 %v4399_v57, 0.0  ;;  %v4832_v25 = vld [vmem:[#allocation16_spill] sm:$0xff] }
 0x254   :  { %v2010_v62 = vmax.f32 %v4403_v63, 0.0  ;;  %v2011_v4 = vmax.f32 %v4407_v5, 0.0  ;;  %v2012_v11 = vmax.f32 %v4411_v10, 0.0  ;;  %v2013_v17 = vmax.f32 %v4415_v16, 0.0  ;;  %v4833_v61 = vld [vmem:[#allocation17_spill] sm:$0xff]  ;;  %v4834_v33 = vld [vmem:[#allocation24_spill] sm:$0xff] }
 0x255   :  { %v2014_v24 = vmax.f32 %v4419_v23, 0.0  ;;  %v2015_v31 = vmax.f32 %v4423_v30, 0.0  ;;  %v2016_v38 = vmax.f32 %v4427_v37, 0.0  ;;  %v2017_v45 = vmax.f32 %v4431_v44, 0.0  ;;  %v4835_v0 = vld [vmem:[#allocation18_spill] sm:$0xff]  ;;  %v4836_v7 = vld [vmem:[#allocation19_spill] sm:$0xff] }
 0x256   :  { %v2018_v51 = vmax.f32 %v4435_v52, 0.0  ;;  %v2019_v57 = vmax.f32 %v4439_v59, 0.0  ;;  %v2020_v63 = vmax.f32 %v4443_v22, 0.0  ;;  %v2021_v5 = vmax.f32 %v4447_v9, 0.0  ;;  %v4837_v58 = vld [vmem:[#allocation20_spill] sm:$0xff] }
 0x257   :  { %v2022_v10 = vmax.f32 %v4451_v8, 0.0  ;;  %v2023_v16 = vmax.f32 %v4455_v28, 0.0  ;;  %v2024_v23 = vmax.f32 %v4459_v12, 0.0  ;;  %v2025_v30 = vmax.f32 %v4463_v1, 0.0 }
 0x258   :  { %v2026_v37 = vmax.f32 %v4467_v2, 0.0  ;;  %v2027_v44 = vmax.f32 %v4471_v50, 0.0  ;;  %v2028_v52 = vmax.f32 %v4831_v27, 0.0  ;;  %v2029_v59 = vmax.f32 %v4479_v41, 0.0 }
 0x259   :  { %v2030_v22 = vmax.f32 %v4483_v46, 0.0  ;;  %v2031_v9 = vmax.f32 %v4832_v25, 0.0  ;;  %v2032_v8 = vmax.f32 %v4491_v32, 0.0  ;;  %v2033_v28 = vmax.f32 %v4833_v61, 0.0  ;;  %v4838_v32 = vld [vmem:[#allocation21_spill] sm:$0xff] }
 0x25a   :  { %v2034_v12 = vmax.f32 %v4498_v55, 0.0  ;;  %v2035_v1 = vmax.f32 %v4834_v33, 0.0  ;;  %v2036_v2 = vmax.f32 %v4504_v47, 0.0  ;;  %v2037_v50 = vmax.f32 %v4835_v0, 0.0  ;;  %v4839_v55 = vld [vmem:[#allocation2_spill] sm:$0xff]  ;;  %v4840_v47 = vld [vmem:[#allocation3_spill] sm:$0xff] }
 0x25b   :  { %v2038_v27 = vmax.f32 %v4510_v35, 0.0  ;;  %v2039_v41 = vmax.f32 %v4836_v7, 0.0  ;;  %v2040_v46 = vmax.f32 %v4517_v49, 0.0  ;;  %v2041_v25 = vmax.f32 %v4837_v58, 0.0  ;;  %v4841_v35 = vld [vmem:[#allocation4_spill] sm:$0xff]  ;;  %v4842_v49 = vld [vmem:[#allocation5_spill] sm:$0xff] }
 0x25c   :  { %v2042_v61 = vmax.f32 %v4838_v32, 0.0  ;;  %v2043_v33 = vmax.f32 %v4839_v55, 0.0  ;;  %v2044_v0 = vmax.f32 %v4840_v47, 0.0  ;;  %v2045_v7 = vmax.f32 %v4841_v35, 0.0  ;;  %v4843_v32 = vld [vmem:[#allocation12_spill] sm:$0xff]  ;;  %v4845_v47 = vld [vmem:[#allocation13_spill] sm:$0xff] }
 0x25d   :  { %v2046_v58 = vmax.f32 %v4842_v49, 0.0  ;;  %v4844_v55 = vmax.f32 %v4843_v32, 0.0  ;;  %v4846_v35 = vmax.f32 %v4845_v47, 0.0  ;;  %v4847_v32 = vld [vmem:[#allocation14_spill] sm:$0xff] }
 0x25e   :  { %v4848_v47 = vmax.f32 %v4847_v32, 0.0 }
 0x25f   :  { %v2687_v49 = vpack.c.bf16 %v4846_v35, %v4844_v55  ;;  %v4849_v35 = vld [vmem:[#allocation15_spill] sm:$0xff] }
 0x260   :  { %v4850_v55 = vmax.f32 %v4849_v35, 0.0  ;;  %v4851_v35 = vld [vmem:[#allocation22_spill] sm:$0xff] }
 0x261   :  { %2688 = vst [vmem:[%s4717_s4] sm:$0xff] %v2687_v49  }
 0x262   :  { %v2692_v32 = vpack.c.bf16 %v4850_v55, %v4848_v47  ;;  %v4852_v47 = vmax.f32 %v4851_v35, 0.0  ;;  %v2702_v35 = vpack.c.bf16 %v1990_v39, %v1989_v42  ;;  %v2717_v39 = vpack.c.bf16 %v1996_v36, %v1995_v29 }
 0x263   :  { %v2722_v42 = vpack.c.bf16 %v1998_v43, %v1997_v3  ;;  %v2737_v29 = vpack.c.bf16 %v2004_v20, %v2003_v56  ;;  %v2742_v3 = vpack.c.bf16 %v2006_v34, %v2005_v26  ;;  %v2747_v36 = vpack.c.bf16 %v2008_v48, %v2007_v40 }
 0x264   :  { %v2697_v55 = vpack.c.bf16 %v1988_v13, %v4852_v47  ;;  %v2707_v13 = vpack.c.bf16 %v1992_v6, %v1991_v53  ;;  %v2712_v47 = vpack.c.bf16 %v1994_v15, %v1993_v14  ;;  %2844 = vst [vmem:[%s4717_s4 + $0x8] sm:$0xff] %v2692_v32   ;;  %2846 = vst [vmem:[%s4717_s4 + $0x18] sm:$0xff] %v2702_v35  }
 0x265   :  { %v2727_v53 = vpack.c.bf16 %v2000_v21, %v1999_v60  ;;  %v2732_v15 = vpack.c.bf16 %v2002_v18, %v2001_v19  ;;  %2849 = vst [vmem:[%s4717_s4 + $0x30] sm:$0xff] %v2717_v39   ;;  %2850 = vst [vmem:[%s4717_s4 + $0x38] sm:$0xff] %v2722_v42   ;;  %v2752_v6 = vpack.c.bf16 %v2010_v62, %v2009_v54 }
 0x266   :  { %2845 = vst [vmem:[%s4717_s4 + $0x10] sm:$0xff] %v2697_v55   ;;  %2847 = vst [vmem:[%s4717_s4 + $0x20] sm:$0xff] %v2707_v13   ;;  %v2757_v14 = vpack.c.bf16 %v2012_v11, %v2011_v4  ;;  %v2762_v43 = vpack.c.bf16 %v2014_v24, %v2013_v17  ;;  %v2767_v60 = vpack.c.bf16 %v2016_v38, %v2015_v31 }
 0x267   :  { %2848 = vst [vmem:[%s4717_s4 + $0x28] sm:$0xff] %v2712_v47   ;;  %2851 = vst [vmem:[%s4717_s4 + $0x40] sm:$0xff] %v2727_v53   ;;  %v2772_v21 = vpack.c.bf16 %v2018_v51, %v2017_v45  ;;  %v2777_v19 = vpack.c.bf16 %v2020_v63, %v2019_v57  ;;  %v2782_v18 = vpack.c.bf16 %v2022_v10, %v2021_v5 }
 0x268   :  { %2852 = vst [vmem:[%s4717_s4 + $0x48] sm:$0xff] %v2732_v15   ;;  %2853 = vst [vmem:[%s4717_s4 + $0x50] sm:$0xff] %v2737_v29   ;;  %v2787_v56 = vpack.c.bf16 %v2024_v23, %v2023_v16  ;;  %v2792_v20 = vpack.c.bf16 %v2026_v37, %v2025_v30  ;;  %v2797_v26 = vpack.c.bf16 %v2028_v52, %v2027_v44 }
 0x269   :  { %2854 = vst [vmem:[%s4717_s4 + $0x58] sm:$0xff] %v2742_v3   ;;  %2855 = vst [vmem:[%s4717_s4 + $0x60] sm:$0xff] %v2747_v36   ;;  %v2802_v34 = vpack.c.bf16 %v2030_v22, %v2029_v59  ;;  %v2807_v40 = vpack.c.bf16 %v2032_v8, %v2031_v9  ;;  %v2812_v48 = vpack.c.bf16 %v2034_v12, %v2033_v28 }
 0x26a   :  { %2856 = vst [vmem:[%s4717_s4 + $0x68] sm:$0xff] %v2752_v6   ;;  %2857 = vst [vmem:[%s4717_s4 + $0x70] sm:$0xff] %v2757_v14   ;;  %v2817_v54 = vpack.c.bf16 %v2036_v2, %v2035_v1  ;;  %v2822_v62 = vpack.c.bf16 %v2038_v27, %v2037_v50  ;;  %v2827_v4 = vpack.c.bf16 %v2040_v46, %v2039_v41 }
 0x26b   :  { %2858 = vst [vmem:[%s4717_s4 + $0x78] sm:$0xff] %v2762_v43   ;;  %2859 = vst [vmem:[%s4717_s4 + $0x80] sm:$0xff] %v2767_v60   ;;  %v2832_v11 = vpack.c.bf16 %v2042_v61, %v2041_v25  ;;  %v2837_v17 = vpack.c.bf16 %v2044_v0, %v2043_v33  ;;  %v2842_v24 = vpack.c.bf16 %v2046_v58, %v2045_v7 }
 0x26c   :  { %2860 = vst [vmem:[%s4717_s4 + $0x88] sm:$0xff] %v2772_v21   ;;  %2861 = vst [vmem:[%s4717_s4 + $0x90] sm:$0xff] %v2777_v19  }
 0x26d   :  { %2862 = vst [vmem:[%s4717_s4 + $0x98] sm:$0xff] %v2782_v18   ;;  %2863 = vst [vmem:[%s4717_s4 + $0xa0] sm:$0xff] %v2787_v56  }
 0x26e   :  { %2864 = vst [vmem:[%s4717_s4 + $0xa8] sm:$0xff] %v2792_v20   ;;  %2865 = vst [vmem:[%s4717_s4 + $0xb0] sm:$0xff] %v2797_v26  }
 0x26f   :  { %2866 = vst [vmem:[%s4717_s4 + $0xb8] sm:$0xff] %v2802_v34   ;;  %2867 = vst [vmem:[%s4717_s4 + $0xc0] sm:$0xff] %v2807_v40  }
 0x270   :  { %2868 = vst [vmem:[%s4717_s4 + $0xc8] sm:$0xff] %v2812_v48   ;;  %2869 = vst [vmem:[%s4717_s4 + $0xd0] sm:$0xff] %v2817_v54  }
 0x271   :  { %2870 = vst [vmem:[%s4717_s4 + $0xd8] sm:$0xff] %v2822_v62   ;;  %2871 = vst [vmem:[%s4717_s4 + $0xe0] sm:$0xff] %v2827_v4  }
 0x272   :  { %2872 = vst [vmem:[%s4717_s4 + $0xe8] sm:$0xff] %v2832_v11   ;;  %2873 = vst [vmem:[%s4717_s4 + $0xf0] sm:$0xff] %v2837_v17  }
 0x273   :  { %2874 = vst [vmem:[%s4717_s4 + $0xf8] sm:$0xff] %v2842_v24  }

// kernel: generator_forward.11
= control target key start
LH: loop header
LB: loop body
LE: loop exit
PB: predicated region body
PF: predicated region fallthrough
CT: control target
= control target key end

     0   :  { %vm135_vm0 = vcmask 1043456   ;;  %vm110_vm1 = vcmask 588800   ;;  %s808_s1 = inlined_call_operand.vmem [shape: bf16[72,128], index: 1, kind: input, shape index: {}]   ;;  %s809_s0 = inlined_call_operand.vmem [shape: bf16[128,72], index: 0, kind: input, shape index: {}]   ;;  %s810_s2 = inlined_call_operand.vmem [shape: f32[1,128], index: 2, kind: input, shape index: {}]   ;;  %s811_s3 = inlined_call_operand.vmem [shape: f32[1,128], index: 3, kind: input, shape index: {}]   ;;  %s812_s4 = inlined_call_operand.vmem [shape: bf16[128,128], index: 4, kind: output, shape index: {}]  }
   0x1   :  { %v601_v0 = vld [vmem:[%s808_s1 + $0x20] ss:$0 sps:$4 sm:$0xff]   ;;  %v602_v1 = vld [vmem:[%s808_s1 + $0x18] sm:$0xff]   ;;  %v603_v3 = vld [vmem:[%s808_s1 + $0x10] sm:$0xff]  }
   0x2   :  { %599 = vmatprep.subr.msk.bf16.mxu0 %vm135_vm0, %v601_v0  ;;  %v137_v2 = vsel %vm135_vm0, %v601_v0, 0  ;;  %600 = vmatprep.subr.msk.bf16.mxu1 %vm135_vm0, %v601_v0  ;;  %v606_v4 = vld [vmem:[%s809_s0] sm:$0xff]   ;;  %v604_v5 = vld [vmem:[%s808_s1 + $0x8] sm:$0xff]   ;;  %v608_v10 = vld [vmem:[%s809_s0 + $0x10] sm:$0xff]  }
   0x3   :  { %564 = vmatpush3.bf16.msra.mxu0 %v137_v2  ;;  %594 = vmatpush3.bf16.msra.mxu1 %v137_v2  ;;  %v610_v6 = vld [vmem:[%s809_s0 + $0x20] sm:$0xff]   ;;  %v607_v8 = vld [vmem:[%s809_s0 + $0x8] sm:$0xff]   ;;  %v612_v11 = vld [vmem:[%s809_s0 + $0x30] sm:$0xff]  }
   0x4   :  { %565 = vmatprep.subr.bf16.mxu0 %v602_v1  ;;  %590 = vmatprep.subr.bf16.mxu1 %v602_v1  ;;  %v605_v7 = vld [vmem:[%s808_s1] sm:$0xff]   ;;  %v611_v9 = vld [vmem:[%s809_s0 + $0x28] sm:$0xff]   ;;  %v609_v12 = vld [vmem:[%s809_s0 + $0x18] sm:$0xff]  }
   0x5   :  { %573 = vmatprep.mubr.msk.bf16.mxu0 %vm110_vm1, %v606_v4  ;;  %581 = vmatprep.mubr.msk.bf16.mxu1 %vm110_vm1, %v610_v6  ;;  %v613_v13 = vld [vmem:[%s809_s0 + $0x38] sm:$0xff]  }
   0x7   :  { %566 = vmatpush3.bf16.msra.mxu0 %v602_v1  ;;  %595 = vmatpush3.bf16.msra.mxu1 %v602_v1 }
   0x8   :  { %567 = vmatprep.subr.bf16.mxu0 %v603_v3  ;;  %591 = vmatprep.subr.bf16.mxu1 %v603_v3 }
   0xb   :  { %568 = vmatpush3.bf16.msra.mxu0 %v603_v3  ;;  %596 = vmatpush3.bf16.msra.mxu1 %v603_v3 }
   0xc   :  { %569 = vmatprep.subr.bf16.mxu0 %v604_v5  ;;  %592 = vmatprep.subr.bf16.mxu1 %v604_v5 }
   0xf   :  { %570 = vmatpush3.bf16.msra.mxu0 %v604_v5  ;;  %597 = vmatpush3.bf16.msra.mxu1 %v604_v5 }
  0x10   :  { %571 = vmatprep.subr.bf16.mxu0 %v605_v7  ;;  %593 = vmatprep.subr.bf16.mxu1 %v605_v7 }
  0x13   :  { %572 = vmatpush3.bf16.msra.mxu0 %v605_v7  ;;  %598 = vmatpush3.bf16.msra.mxu1 %v605_v7 }
  0x16   :  { %574 = vmatmul.mubr.msk.bf16.vlgmr.msra.gmra.mxu0 %vm110_vm1, %v607_v8  ;;  %582 = vmatmul.mubr.msk.bf16.vlgmr.msra.gmra.mxu1 %vm110_vm1, %v611_v9 }
  0x17   :  { %577 = vmatprep.mubr.msk.bf16.mxu0 %vm110_vm1, %v608_v10  ;;  %585 = vmatprep.mubr.msk.bf16.mxu1 %vm110_vm1, %v612_v11 }
  0x1e   :  { %578 = vmatmul.mubr.msk.bf16.gmra.mxu0 %vm110_vm1, %v609_v12  ;;  %586 = vmatmul.mubr.msk.bf16.gmra.mxu1 %vm110_vm1, %v613_v13 }
  0xd6   :  { %v688_v14 = vpop.f32.mrf.mxu0  ;;  %v690_v15 = vpop.f32.mrf.mxu1 }
  0xd7   :  { %v259_v25 = vmul.f32 %v688_v14, %v688_v14  ;;  %v267_v56 = vmul.f32 %v690_v15, %v690_v15 }
  0xd8   :  { %v692_v16 = vpop.f32.mrf.mxu0  ;;  %v696_v18 = vpop.f32.mrf.mxu1 }
  0xd9   :  { %v257_v20 = vmul.f32 %v692_v16, %v692_v16  ;;  %v265_v49 = vmul.f32 %v696_v18, %v696_v18 }
  0xda   :  { %v694_v17 = vpop.f32.mrf.mxu0  ;;  %v708_v24 = vpop.f32.mrf.mxu1 }
  0xdb   :  { %v260_v29 = vmul.f32 %v694_v17, %v694_v17  ;;  %v268_v59 = vmul.f32 %v708_v24, %v708_v24 }
  0xdc   :  { %v698_v19 = vpop.f32.mrf.mxu0  ;;  %v720_v33 = vpop.f32.mrf.mxu1 }
  0xdd   :  { %v236_v21 = vadd.f32 %v698_v19, %v692_v16  ;;  %v258_v22 = vmul.f32 %v698_v19, %v698_v19  ;;  %v266_v53 = vmul.f32 %v720_v33, %v720_v33 }
  0xde   :  { %v706_v23 = vpop.f32.mrf.mxu0  ;;  %v730_v41 = vpop.f32.mrf.mxu1 }
  0xdf   :  { %v237_v26 = vadd.f32 %v688_v14, %v236_v21  ;;  %v273_v27 = vadd.f32 %v258_v22, %v257_v20  ;;  %v263_v42 = vmul.f32 %v706_v23, %v706_v23  ;;  %v271_v5 = vmul.f32 %v730_v41, %v730_v41 }
  0xe0   :  { %v713_v28 = vpop.f32.mrf.mxu0  ;;  %v738_v48 = vpop.f32.mrf.mxu1 }
  0xe1   :  { %v274_v30 = vadd.f32 %v273_v27, %v259_v25  ;;  %v238_v31 = vadd.f32 %v694_v17, %v237_v26  ;;  %v261_v35 = vmul.f32 %v713_v28, %v713_v28  ;;  %v269_v0 = vmul.f32 %v738_v48, %v738_v48 }
  0xe2   :  { %v718_v32 = vpop.f32.mrf.mxu0  ;;  %v746_v55 = vpop.f32.mrf.mxu1 }
  0xe3   :  { %v239_v34 = vadd.f32 %v238_v31, %v713_v28  ;;  %v275_v36 = vadd.f32 %v274_v30, %v260_v29  ;;  %v264_v45 = vmul.f32 %v718_v32, %v718_v32  ;;  %v272_v8 = vmul.f32 %v746_v55, %v746_v55 }
  0xe4   :  { %v725_v37 = vpop.f32.mrf.mxu0  ;;  %v224_v62 = vpop.f32.mrf.mxu1 }
  0xe5   :  { %v276_v38 = vadd.f32 %v275_v36, %v261_v35  ;;  %v240_v39 = vadd.f32 %v239_v34, %v725_v37  ;;  %v262_v40 = vmul.f32 %v725_v37, %v725_v37  ;;  %v270_v4 = vmul.f32 %v224_v62, %v224_v62 }
  0xe7   :  { %v241_v43 = vadd.f32 %v706_v23, %v240_v39  ;;  %v277_v44 = vadd.f32 %v276_v38, %v262_v40 }
  0xe9   :  { %v242_v46 = vadd.f32 %v718_v32, %v241_v43  ;;  %v278_v47 = vadd.f32 %v277_v44, %v263_v42  ;;  %v307_v43 = vlaneseq }
  0xeb   :  { %v279_v50 = vadd.f32 %v278_v47, %v264_v45  ;;  %v243_v51 = vadd.f32 %v242_v46, %v696_v18  ;;  %v308_v44 = vshrl.u32 %v307_v43, 7  ;;  %v301_v45 = vld [vmem:[%s810_s2] sm:$0x1] }
  0xed   :  { %v244_v52 = vadd.f32 %v243_v51, %v720_v33  ;;  %v280_v54 = vadd.f32 %v279_v50, %v265_v49  ;;  %v309_v46 = vsub.s32 0, %v308_v44  ;;  %v303_v50 = vld [vmem:[%s811_s3] sm:$0x1] }
  0xef   :  { %v245_v57 = vadd.f32 %v690_v15, %v244_v52  ;;  %v281_v58 = vadd.f32 %v280_v54, %v266_v53 }
  0xf1   :  { %v282_v60 = vadd.f32 %v281_v58, %v267_v56  ;;  %v246_v61 = vadd.f32 %v708_v24, %v245_v57 }
  0xf3   :  { %v247_v63 = vadd.f32 %v246_v61, %v738_v48  ;;  %v283_v1 = vadd.f32 %v282_v60, %v268_v59 }
  0xf5   :  { %v284_v2 = vadd.f32 %v283_v1, %v269_v0  ;;  %v248_v3 = vadd.f32 %v247_v63, %v224_v62 }
  0xf7   :  { %v249_v6 = vadd.f32 %v730_v41, %v248_v3  ;;  %v285_v7 = vadd.f32 %v284_v2, %v270_v4 }
  0xf9   :  { %v250_v9 = vadd.f32 %v746_v55, %v249_v6  ;;  %v286_v10 = vadd.f32 %v285_v7, %v271_v5 }
  0xfb   :  { %v251_v11 = vrot.slane %v250_v9, 4  ;;  %v287_v12 = vadd.f32 %v286_v10, %v272_v8 }
  0xfd   :  { %v252_v13 = vadd.f32 %v251_v11, %v250_v9  ;;  %v288_v20 = vrot.slane %v287_v12, 4 }
  0xff   :  { %v253_v21 = vrot.slane %v252_v13, 2  ;;  %v289_v22 = vadd.f32 %v288_v20, %v287_v12 }
 0x101   :  { %v254_v25 = vadd.f32 %v253_v21, %v252_v13  ;;  %v290_v26 = vrot.slane %v289_v22, 2 }
 0x103   :  { %v255_v27 = vrot.slane %v254_v25, 1  ;;  %v291_v29 = vadd.f32 %v290_v26, %v289_v22 }
 0x105   :  { %v256_v30 = vadd.f32 %v255_v27, %v254_v25  ;;  %v292_v31 = vrot.slane %v291_v29, 1 }
 0x107   :  { %v293_v34 = vadd.f32 %v292_v31, %v291_v29  ;;  %v294_v35 = vmul.f32 0.0078125, %v256_v30 }
 0x109   :  { %v295_v36 = vmul.f32 0.0078125, %v293_v34  ;;  %v296_v38 = vmul.f32 %v294_v35, %v294_v35 }
 0x10b   :  { %v297_v39 = vsub.f32 %v295_v36, %v296_v38 }
 0x10d   :  { %v298_v40 = vmax.f32 %v297_v39, 0.0 }
 0x10f   :  { %v299_v42 = vadd.f32 1e-05, %v298_v40 }
 0x111   :  { %614 = vrsqrt.f32 %v299_v42 }
 0x11e   :  { %v615_v47 = vpop.eup %614 }
 0x11f   :  { %v302_v49 = vmul.f32 %v615_v47, %v301_v45 }
 0x121   :  { %v304_v51 = vmul.f32 %v302_v49, %v294_v35  ;;  %v310_v52 = vrot.slane %v302_v49, %v309_v46 }
 0x123   :  { %v305_v53 = vsub.f32 %v303_v50, %v304_v51  ;;  %v312_v54 = vmul.f32 %v310_v52, %v692_v16  ;;  %v313_v56 = vmul.f32 %v310_v52, %v698_v19  ;;  %v314_v57 = vmul.f32 %v688_v14, %v310_v52 }
 0x124   :  { %v315_v58 = vmul.f32 %v694_v17, %v310_v52  ;;  %v316_v59 = vmul.f32 %v310_v52, %v713_v28  ;;  %v317_v60 = vmul.f32 %v310_v52, %v725_v37  ;;  %v318_v61 = vmul.f32 %v706_v23, %v310_v52 }
 0x125   :  { %v319_v63 = vmul.f32 %v718_v32, %v310_v52  ;;  %v320_v0 = vmul.f32 %v310_v52, %v696_v18  ;;  %v321_v1 = vmul.f32 %v310_v52, %v720_v33  ;;  %v322_v16 = vmul.f32 %v690_v15, %v310_v52 }
 0x126   :  { %v323_v19 = vmul.f32 %v708_v24, %v310_v52  ;;  %v332_v2 = vrot.slane %v305_v53, %v309_v46  ;;  %v324_v14 = vmul.f32 %v310_v52, %v738_v48  ;;  %v325_v17 = vmul.f32 %v310_v52, %v224_v62 }
 0x127   :  { %v326_v28 = vmul.f32 %v730_v41, %v310_v52  ;;  %v327_v37 = vmul.f32 %v746_v55, %v310_v52 }
 0x128   :  { %v334_v3 = vadd.f32 %v332_v2, %v312_v54  ;;  %v335_v23 = vadd.f32 %v332_v2, %v313_v56  ;;  %v336_v4 = vadd.f32 %v332_v2, %v314_v57  ;;  %v337_v32 = vadd.f32 %v332_v2, %v315_v58 }
 0x129   :  { %v338_v5 = vadd.f32 %v332_v2, %v316_v59  ;;  %v339_v18 = vadd.f32 %v332_v2, %v317_v60  ;;  %v340_v6 = vadd.f32 %v332_v2, %v318_v61  ;;  %v341_v33 = vadd.f32 %v332_v2, %v319_v63 }
 0x12a   :  { %v342_v7 = vadd.f32 %v332_v2, %v320_v0  ;;  %v343_v15 = vadd.f32 %v332_v2, %v321_v1  ;;  %v344_v8 = vadd.f32 %v332_v2, %v322_v16  ;;  %v345_v24 = vadd.f32 %v332_v2, %v323_v19 }
 0x12b   :  { %v346_v9 = vadd.f32 %v332_v2, %v324_v14  ;;  %v347_v10 = vadd.f32 %v332_v2, %v325_v17  ;;  %v348_v48 = vadd.f32 %v332_v2, %v326_v28  ;;  %v349_v62 = vadd.f32 %v332_v2, %v327_v37 }
 0x12c   :  { %v350_v11 = vmax.f32 %v334_v3, 0.0  ;;  %v351_v41 = vmax.f32 %v335_v23, 0.0  ;;  %v352_v12 = vmax.f32 %v336_v4, 0.0  ;;  %v353_v55 = vmax.f32 %v337_v32, 0.0 }
 0x12d   :  { %v354_v13 = vmax.f32 %v338_v5, 0.0  ;;  %v355_v20 = vmax.f32 %v339_v18, 0.0  ;;  %v356_v21 = vmax.f32 %v340_v6, 0.0  ;;  %v357_v22 = vmax.f32 %v341_v33, 0.0 }
 0x12e   :  { %v358_v25 = vmax.f32 %v342_v7, 0.0  ;;  %v359_v26 = vmax.f32 %v343_v15, 0.0  ;;  %v360_v27 = vmax.f32 %v344_v8, 0.0  ;;  %v361_v29 = vmax.f32 %v345_v24, 0.0 }
 0x12f   :  { %v362_v30 = vmax.f32 %v346_v9, 0.0  ;;  %v363_v31 = vmax.f32 %v347_v10, 0.0  ;;  %v364_v34 = vmax.f32 %v348_v48, 0.0  ;;  %v365_v35 = vmax.f32 %v349_v62, 0.0 }
 0x130   :  { %v506_v36 = vpack.c.bf16 %v351_v41, %v350_v11  ;;  %v511_v38 = vpack.c.bf16 %v353_v55, %v352_v12  ;;  %v516_v39 = vpack.c.bf16 %v355_v20, %v354_v13  ;;  %v521_v40 = vpack.c.bf16 %v357_v22, %v356_v21 }
 0x131   :  { %v526_v42 = vpack.c.bf16 %v359_v26, %v358_v25  ;;  %v531_v43 = vpack.c.bf16 %v361_v29, %v360_v27  ;;  %v536_v44 = vpack.c.bf16 %v363_v31, %v362_v30  ;;  %v541_v45 = vpack.c.bf16 %v365_v35, %v364_v34 }
 0x132   :  { %507 = vst [vmem:[%s812_s4] sm:$0xff] %v506_v36   ;;  %543 = vst [vmem:[%s812_s4 + $0x8] sm:$0xff] %v511_v38  }
 0x133   :  { %544 = vst [vmem:[%s812_s4 + $0x10] sm:$0xff] %v516_v39   ;;  %545 = vst [vmem:[%s812_s4 + $0x18] sm:$0xff] %v521_v40  }
 0x134   :  { %546 = vst [vmem:[%s812_s4 + $0x20] sm:$0xff] %v526_v42   ;;  %547 = vst [vmem:[%s812_s4 + $0x28] sm:$0xff] %v531_v43  }
 0x135   :  { %548 = vst [vmem:[%s812_s4 + $0x30] sm:$0xff] %v536_v44   ;;  %549 = vst [vmem:[%s812_s4 + $0x38] sm:$0xff] %v541_v45  }

// kernel: generator_forward.12
= control target key start
LH: loop header
LB: loop body
LE: loop exit
PB: predicated region body
PF: predicated region fallthrough
CT: control target
= control target key end

     0   :  { %v320_v0 = vmov 0   ;;  %vm112_vm0 = vcmask 130048   ;;  %v203_v50 = vlaneseq  ;;  %s397_s1 = inlined_call_operand.vmem [shape: bf16[144,128], index: 1, kind: input, shape index: {}]   ;;  %s398_s0 = inlined_call_operand.vmem [shape: bf16[32,144], index: 0, kind: input, shape index: {}]   ;;  %s399_s2 = inlined_call_operand.vmem [shape: f32[1,128], index: 2, kind: input, shape index: {}]   ;;  %s400_s3 = inlined_call_operand.vmem [shape: f32[1,128], index: 3, kind: input, shape index: {}]   ;;  %s401_s4 = inlined_call_operand.vmem [shape: bf16[32,128], index: 4, kind: output, shape index: {}]  }
   0x1   :  { %119 = vmatprep.subr.bf16.mxu0 %v320_v0  ;;  %284 = vmatprep.subr.bf16.mxu1 %v320_v0  ;;  %v303_v1 = vld [vmem:[%s397_s1 + $0x38] sm:$0xff]   ;;  %v304_v2 = vld [vmem:[%s397_s1 + $0x30] sm:$0xff]   ;;  %v305_v3 = vld [vmem:[%s397_s1 + $0x28] sm:$0xff]  }
   0x2   :  { %120 = vmatpush1.bf16.msra.mxu0 %v303_v1  ;;  %293 = vmatpush1.bf16.msra.mxu1 %v303_v1  ;;  %v306_v4 = vld [vmem:[%s397_s1 + $0x20] sm:$0xff]   ;;  %v317_v6 = vld [vmem:[%s398_s0 + $0x14] ss:$8 sps:$4 sm:$0xff]   ;;  %v309_v9 = vld [vmem:[%s397_s1 + $0x8] sm:$0xff]   ;;  %v204_v51 = vshrl.u32 %v203_v50, 7 }
   0x3   :  { %121 = vmatprep.subr.bf16.mxu0 %v320_v0  ;;  %285 = vmatprep.subr.bf16.mxu1 %v320_v0  ;;  %v314_v5 = vld [vmem:[%s398_s0 + $0x4] ss:$8 sps:$4 sm:$0xff]   ;;  %v307_v7 = vld [vmem:[%s397_s1 + $0x18] sm:$0xff]   ;;  %v308_v8 = vld [vmem:[%s397_s1 + $0x10] sm:$0xff]  }
   0x4   :  { %263 = vmatprep.mubr.msk.bf16.mxu0 %vm112_vm0, %v314_v5  ;;  %264 = vmatprep.mubr.msk.bf16.mxu1 %vm112_vm0, %v317_v6  ;;  %v310_v10 = vld [vmem:[%s397_s1] sm:$0xff]   ;;  %v315_v13 = vld [vmem:[%s398_s0 + $0x10] ss:$8 sps:$4 sm:$0xff]   ;;  %v205_v53 = vsub.s32 0, %v204_v51 }
   0x5   :  { %v311_v11 = vld [vmem:[%s397_s1 + $0x40] sm:$0xff]  }
   0x6   :  { %122 = vmatpush1.bf16.msra.mxu0 %v304_v2  ;;  %294 = vmatpush1.bf16.msra.mxu1 %v304_v2  ;;  %v312_v12 = vld [vmem:[%s398_s0] ss:$8 sps:$4 sm:$0xff]  }
   0x7   :  { %123 = vmatprep.subr.bf16.mxu0 %v320_v0  ;;  %286 = vmatprep.subr.bf16.mxu1 %v320_v0  ;;  %v197_v52 = vld [vmem:[%s399_s2] sm:$0x1] }
   0x8   :  { %v199_v56 = vld [vmem:[%s400_s3] sm:$0x1] }
   0xa   :  { %124 = vmatpush1.bf16.msra.mxu0 %v305_v3  ;;  %295 = vmatpush1.bf16.msra.mxu1 %v305_v3 }
   0xb   :  { %125 = vmatprep.subr.bf16.mxu0 %v320_v0  ;;  %287 = vmatprep.subr.bf16.mxu1 %v320_v0 }
   0xe   :  { %126 = vmatpush1.bf16.msra.mxu0 %v306_v4  ;;  %296 = vmatpush1.bf16.msra.mxu1 %v306_v4 }
   0xf   :  { %127 = vmatprep.subr.bf16.mxu0 %v320_v0  ;;  %288 = vmatprep.subr.bf16.mxu1 %v320_v0 }
  0x12   :  { %128 = vmatpush1.bf16.msra.mxu0 %v307_v7  ;;  %297 = vmatpush1.bf16.msra.mxu1 %v307_v7 }
  0x13   :  { %129 = vmatprep.subr.bf16.mxu0 %v320_v0  ;;  %289 = vmatprep.subr.bf16.mxu1 %v320_v0 }
  0x16   :  { %130 = vmatpush1.bf16.msra.mxu0 %v308_v8  ;;  %298 = vmatpush1.bf16.msra.mxu1 %v308_v8 }
  0x17   :  { %131 = vmatprep.subr.bf16.mxu0 %v320_v0  ;;  %290 = vmatprep.subr.bf16.mxu1 %v320_v0 }
  0x1a   :  { %132 = vmatpush1.bf16.msra.mxu0 %v309_v9  ;;  %299 = vmatpush1.bf16.msra.mxu1 %v309_v9 }
  0x1b   :  { %133 = vmatprep.subr.bf16.mxu0 %v320_v0  ;;  %291 = vmatprep.subr.bf16.mxu1 %v320_v0 }
  0x1e   :  { %134 = vmatpush1.bf16.msra.mxu0 %v310_v10  ;;  %300 = vmatpush1.bf16.msra.mxu1 %v310_v10 }
  0x1f   :  { %149 = vmatprep.subr.bf16.mxu0 %v320_v0  ;;  %292 = vmatprep.subr.bf16.mxu1 %v320_v0 }
  0x22   :  { %150 = vmatpush2.bf16.msra.mxu0 %v311_v11  ;;  %301 = vmatpush2.bf16.msra.mxu1 %v311_v11 }
  0x25   :  { %152 = vmatmul.mubr.bf16.vlgmr.msra.gmra.mxu0 %v312_v12  ;;  %160 = vmatmul.mubr.bf16.vlgmr.msra.gmra.mxu1 %v315_v13 }
  0xe5   :  { %v153_v14 = vpop.f32.mrf.mxu0  ;;  %v161_v15 = vpop.f32.mrf.mxu1 }
  0xe6   :  { %v177_v20 = vmul.f32 %v153_v14, %v153_v14  ;;  %v179_v25 = vmul.f32 %v161_v15, %v161_v15 }
  0xe7   :  { %v155_v16 = vpop.f32.mrf.mxu0  ;;  %v163_v17 = vpop.f32.mrf.mxu1 }
  0xe9   :  { %v156_v18 = vpop.f32.mrf.mxu0  ;;  %v164_v19 = vpop.f32.mrf.mxu1 }
  0xea   :  { %v168_v21 = vadd.f32 %v156_v18, %v153_v14  ;;  %v178_v22 = vmul.f32 %v156_v18, %v156_v18  ;;  %v180_v29 = vmul.f32 %v164_v19, %v164_v19 }
  0xeb   :  { %v158_v23 = vpop.f32.mrf.mxu0  ;;  %v166_v24 = vpop.f32.mrf.mxu1 }
  0xec   :  { %v181_v26 = vadd.f32 %v178_v22, %v177_v20  ;;  %v169_v27 = vadd.f32 %v168_v21, %v161_v15 }
  0xee   :  { %v170_v28 = vadd.f32 %v169_v27, %v164_v19  ;;  %v182_v30 = vadd.f32 %v181_v26, %v179_v25 }
  0xf0   :  { %v171_v31 = vrot.slane %v170_v28, 4  ;;  %v183_v32 = vadd.f32 %v182_v30, %v180_v29 }
  0xf2   :  { %v172_v33 = vadd.f32 %v171_v31, %v170_v28  ;;  %v184_v34 = vrot.slane %v183_v32, 4 }
  0xf4   :  { %v173_v35 = vrot.slane %v172_v33, 2  ;;  %v185_v36 = vadd.f32 %v184_v34, %v183_v32 }
  0xf6   :  { %v174_v37 = vadd.f32 %v173_v35, %v172_v33  ;;  %v186_v38 = vrot.slane %v185_v36, 2 }
  0xf8   :  { %v175_v39 = vrot.slane %v174_v37, 1  ;;  %v187_v40 = vadd.f32 %v186_v38, %v185_v36 }
  0xfa   :  { %v176_v41 = vadd.f32 %v175_v39, %v174_v37  ;;  %v188_v42 = vrot.slane %v187_v40, 1 }
  0xfc   :  { %v189_v43 = vadd.f32 %v188_v42, %v187_v40  ;;  %v190_v44 = vmul.f32 0.03125, %v176_v41 }
  0xfe   :  { %v191_v45 = vmul.f32 0.03125, %v189_v43  ;;  %v192_v46 = vmul.f32 %v190_v44, %v190_v44 }
 0x100   :  { %v193_v47 = vsub.f32 %v191_v45, %v192_v46 }
 0x102   :  { %v194_v48 = vmax.f32 %v193_v47, 0.0 }
 0x104   :  { %v195_v49 = vadd.f32 1e-05, %v194_v48 }
 0x106   :  { %318 = vrsqrt.f32 %v195_v49 }
 0x113   :  { %v319_v54 = vpop.eup %318 }
 0x114   :  { %v198_v55 = vmul.f32 %v319_v54, %v197_v52 }
 0x116   :  { %v200_v57 = vmul.f32 %v198_v55, %v190_v44  ;;  %v206_v58 = vrot.slane %v198_v55, %v205_v53 }
 0x118   :  { %v201_v59 = vsub.f32 %v199_v56, %v200_v57  ;;  %v208_v60 = vmul.f32 %v206_v58, %v153_v14  ;;  %v209_v61 = vmul.f32 %v206_v58, %v156_v18  ;;  %v210_v62 = vmul.f32 %v206_v58, %v161_v15 }
 0x119   :  { %v211_v63 = vmul.f32 %v206_v58, %v164_v19 }
 0x11a   :  { %v216_v0 = vrot.slane %v201_v59, %v205_v53 }
 0x11c   :  { %v218_v1 = vadd.f32 %v216_v0, %v208_v60  ;;  %v219_v2 = vadd.f32 %v216_v0, %v209_v61  ;;  %v220_v3 = vadd.f32 %v216_v0, %v210_v62  ;;  %v221_v4 = vadd.f32 %v216_v0, %v211_v63 }
 0x11e   :  { %v222_v5 = vmax.f32 %v218_v1, 0.0  ;;  %v223_v6 = vmax.f32 %v219_v2, 0.0  ;;  %v224_v7 = vmax.f32 %v220_v3, 0.0  ;;  %v225_v8 = vmax.f32 %v221_v4, 0.0 }
 0x120   :  { %v276_v9 = vpack.c.bf16 %v223_v6, %v222_v5  ;;  %v281_v10 = vpack.c.bf16 %v225_v8, %v224_v7 }
 0x122   :  { %277 = vst [vmem:[%s401_s4] sm:$0xff] %v276_v9   ;;  %283 = vst [vmem:[%s401_s4 + $0x8] sm:$0xff] %v281_v10  }

// kernel: generator_forward.13
= control target key start
LH: loop header
LB: loop body
LE: loop exit
PB: predicated region body
PF: predicated region fallthrough
CT: control target
= control target key end

     0   :  { %vm200_vm0 = vcmask 261120   ;;  %s609_s1 = inlined_call_operand.vmem [shape: bf16[288,128], index: 1, kind: input, shape index: {}]   ;;  %s610_s0 = inlined_call_operand.vmem [shape: bf16[32,288], index: 0, kind: input, shape index: {}]   ;;  %s611_s2 = inlined_call_operand.vmem [shape: f32[1,128], index: 2, kind: input, shape index: {}]   ;;  %s612_s3 = inlined_call_operand.vmem [shape: f32[1,128], index: 3, kind: input, shape index: {}]   ;;  %s613_s4 = inlined_call_operand.vmem [shape: bf16[32,128], index: 4, kind: output, shape index: {}]  }
   0x1   :  { %v472_v0 = vld [vmem:[%s609_s1 + $0x78] sm:$0xff]   ;;  %v474_v2 = vld [vmem:[%s609_s1 + $0x70] sm:$0xff]   ;;  %v476_v4 = vld [vmem:[%s609_s1 + $0x68] sm:$0xff]  }
   0x2   :  { %v473_v1 = vld [vmem:[%s609_s1 + $0x38] sm:$0xff]   ;;  %432 = vmatprep.subr.bf16.mxu0 %v472_v0  ;;  %v475_v3 = vld [vmem:[%s609_s1 + $0x30] sm:$0xff]   ;;  %v477_v5 = vld [vmem:[%s609_s1 + $0x28] sm:$0xff]  }
   0x3   :  { %433 = vmatpush3.bf16.msra.mxu0 %v473_v1  ;;  %v478_v6 = vld [vmem:[%s609_s1 + $0x60] sm:$0xff]   ;;  %v480_v8 = vld [vmem:[%s609_s1 + $0x58] sm:$0xff]   ;;  %v485_v9 = vld [vmem:[%s609_s1 + $0x88] sm:$0xff]  }
   0x4   :  { %434 = vmatprep.subr.bf16.mxu0 %v474_v2  ;;  %v479_v7 = vld [vmem:[%s609_s1 + $0x20] sm:$0xff]   ;;  %v481_v10 = vld [vmem:[%s609_s1 + $0x18] sm:$0xff]   ;;  %v482_v11 = vld [vmem:[%s609_s1 + $0x50] sm:$0xff]   ;;  %464 = vmatprep.subr.bf16.mxu1 %v485_v9 }
   0x5   :  { %465 = vmatpush3.bf16.msra.mxu1 %v485_v9  ;;  %v488_v12 = vld [vmem:[%s609_s1 + $0x80] sm:$0xff]   ;;  %v483_v13 = vld [vmem:[%s609_s1 + $0x10] sm:$0xff]   ;;  %v484_v14 = vld [vmem:[%s609_s1 + $0x48] sm:$0xff]  }
   0x6   :  { %466 = vmatprep.subr.bf16.mxu1 %v488_v12  ;;  %v492_v15 = vld [vmem:[%s610_s0 + $0x4] ss:$12 sps:$4 sm:$0xff]   ;;  %v493_v16 = vld [vmem:[%s610_s0 + $0x8] ss:$12 sps:$4 sm:$0xff]   ;;  %v494_v17 = vld [vmem:[%s610_s0 + $0x20] ss:$12 sps:$4 sm:$0xff]  }
   0x7   :  { %435 = vmatpush3.bf16.msra.mxu0 %v475_v3  ;;  %239 = vmatprep.mubr.bf16.mxu0 %v492_v15  ;;  %v486_v18 = vld [vmem:[%s609_s1 + $0x8] sm:$0xff]   ;;  %v487_v19 = vld [vmem:[%s609_s1 + $0x40] sm:$0xff]  }
   0x8   :  { %436 = vmatprep.subr.bf16.mxu0 %v476_v4  ;;  %468 = vmatprep.mubr.msk.bf16.mxu1 %vm200_vm0, %v493_v16  ;;  %v489_v20 = vld [vmem:[%s609_s1] sm:$0xff]   ;;  %v495_v22 = vld [vmem:[%s610_s0 + $0x1c] ss:$12 sps:$4 sm:$0xff]  }
   0x9   :  { %467 = vmatpush3.bf16.msra.mxu1 %v488_v12  ;;  %v490_v21 = vld [vmem:[%s610_s0] ss:$12 sps:$4 sm:$0xff]   ;;  %v497_v23 = vld [vmem:[%s610_s0 + $0x18] ss:$12 sps:$4 sm:$0xff]  }
   0xb   :  { %437 = vmatpush3.bf16.msra.mxu0 %v477_v5 }
   0xc   :  { %438 = vmatprep.subr.bf16.mxu0 %v478_v6  ;;  %469 = vmatmul.mubr.msk.bf16.vlgmr.msra.gmra.mxu1 %vm200_vm0, %v494_v17 }
   0xf   :  { %439 = vmatpush3.bf16.msra.mxu0 %v479_v7 }
  0x10   :  { %440 = vmatprep.subr.bf16.mxu0 %v480_v8  ;;  %v340_v8 = vlaneseq }
  0x12   :  { %v341_v9 = vshrl.u32 %v340_v8, 7 }
  0x13   :  { %441 = vmatpush3.bf16.msra.mxu0 %v481_v10  ;;  %v334_v10 = vld [vmem:[%s611_s2] sm:$0x1] }
  0x14   :  { %442 = vmatprep.subr.bf16.mxu0 %v482_v11  ;;  %v342_v11 = vsub.s32 0, %v341_v9 }
  0x17   :  { %443 = vmatpush3.bf16.msra.mxu0 %v483_v13 }
  0x18   :  { %444 = vmatprep.subr.bf16.mxu0 %v484_v14  ;;  %v336_v14 = vld [vmem:[%s612_s3] sm:$0x1] }
  0x1b   :  { %445 = vmatpush3.bf16.msra.mxu0 %v486_v18 }
  0x1c   :  { %446 = vmatprep.subr.bf16.mxu0 %v487_v19 }
  0x1f   :  { %447 = vmatpush3.bf16.msra.mxu0 %v489_v20 }
  0x22   :  { %240 = vmatmul.mubr.bf16.vlgmr.msra.gmra.mxu0 %v490_v21 }
  0x23   :  { %247 = vmatprep.mubr.bf16.mxu0 %v495_v22 }
  0x2a   :  { %248 = vmatmul.mubr.bf16.gmra.mxu0 %v497_v23 }
  0xcc   :  { %v470_v24 = vpop.f32.mrf.mxu1 }
  0xce   :  { %v290_v26 = vpop.f32.mrf.mxu1 }
  0xd0   :  { %v471_v29 = vpop.f32.mrf.mxu1 }
  0xd2   :  { %v293_v33 = vpop.f32.mrf.mxu1 }
  0xe2   :  { %v448_v25 = vpop.f32.mrf.mxu0 }
  0xe4   :  { %v449_v27 = vpop.f32.mrf.mxu0 }
  0xe5   :  { %v450_v31 = vadd.f32 %v449_v27, %v448_v25 }
  0xe6   :  { %v451_v28 = vpop.f32.mrf.mxu0 }
  0xe7   :  { %v291_v37 = vadd.f32 %v450_v31, %v290_v26 }
  0xe8   :  { %v452_v30 = vpop.f32.mrf.mxu0 }
  0xe9   :  { %v453_v32 = vadd.f32 %v452_v30, %v451_v28  ;;  %v314_v43 = vmul.f32 %v291_v37, %v291_v37 }
  0xea   :  { %v454_v34 = vpop.f32.mrf.mxu0 }
  0xeb   :  { %v294_v35 = vadd.f32 %v453_v32, %v293_v33 }
  0xec   :  { %v455_v36 = vpop.f32.mrf.mxu0 }
  0xed   :  { %v456_v38 = vadd.f32 %v455_v36, %v454_v34  ;;  %v315_v40 = vmul.f32 %v294_v35, %v294_v35  ;;  %v305_v44 = vadd.f32 %v294_v35, %v291_v37 }
  0xee   :  { %v457_v39 = vpop.f32.mrf.mxu0 }
  0xef   :  { %v299_v41 = vadd.f32 %v470_v24, %v456_v38  ;;  %v318_v47 = vadd.f32 %v315_v40, %v314_v43 }
  0xf0   :  { %v458_v42 = vpop.f32.mrf.mxu0 }
  0xf1   :  { %v316_v45 = vmul.f32 %v299_v41, %v299_v41  ;;  %v459_v46 = vadd.f32 %v458_v42, %v457_v39  ;;  %v306_v48 = vadd.f32 %v305_v44, %v299_v41 }
  0xf3   :  { %v302_v49 = vadd.f32 %v471_v29, %v459_v46  ;;  %v319_v50 = vadd.f32 %v318_v47, %v316_v45 }
  0xf5   :  { %v307_v51 = vadd.f32 %v306_v48, %v302_v49  ;;  %v317_v52 = vmul.f32 %v302_v49, %v302_v49 }
  0xf7   :  { %v308_v53 = vrot.slane %v307_v51, 4  ;;  %v320_v54 = vadd.f32 %v319_v50, %v317_v52 }
  0xf9   :  { %v309_v55 = vadd.f32 %v308_v53, %v307_v51  ;;  %v321_v56 = vrot.slane %v320_v54, 4 }
  0xfb   :  { %v310_v57 = vrot.slane %v309_v55, 2  ;;  %v322_v58 = vadd.f32 %v321_v56, %v320_v54 }
  0xfd   :  { %v311_v59 = vadd.f32 %v310_v57, %v309_v55  ;;  %v323_v60 = vrot.slane %v322_v58, 2 }
  0xff   :  { %v312_v61 = vrot.slane %v311_v59, 1  ;;  %v324_v62 = vadd.f32 %v323_v60, %v322_v58 }
 0x101   :  { %v313_v63 = vadd.f32 %v312_v61, %v311_v59  ;;  %v325_v0 = vrot.slane %v324_v62, 1 }
 0x103   :  { %v326_v1 = vadd.f32 %v325_v0, %v324_v62  ;;  %v327_v2 = vmul.f32 0.03125, %v313_v63 }
 0x105   :  { %v328_v3 = vmul.f32 0.03125, %v326_v1  ;;  %v329_v4 = vmul.f32 %v327_v2, %v327_v2 }
 0x107   :  { %v330_v5 = vsub.f32 %v328_v3, %v329_v4 }
 0x109   :  { %v331_v6 = vmax.f32 %v330_v5, 0.0 }
 0x10b   :  { %v332_v7 = vadd.f32 1e-05, %v331_v6 }
 0x10d   :  { %498 = vrsqrt.f32 %v332_v7 }
 0x11a   :  { %v499_v12 = vpop.eup %498 }
 0x11b   :  { %v335_v13 = vmul.f32 %v499_v12, %v334_v10 }
 0x11d   :  { %v337_v15 = vmul.f32 %v335_v13, %v327_v2  ;;  %v343_v16 = vrot.slane %v335_v13, %v342_v11 }
 0x11f   :  { %v338_v17 = vsub.f32 %v336_v14, %v337_v15  ;;  %v345_v18 = vmul.f32 %v343_v16, %v291_v37  ;;  %v346_v19 = vmul.f32 %v343_v16, %v294_v35  ;;  %v347_v20 = vmul.f32 %v343_v16, %v299_v41 }
 0x120   :  { %v348_v21 = vmul.f32 %v343_v16, %v302_v49 }
 0x121   :  { %v353_v22 = vrot.slane %v338_v17, %v342_v11 }
 0x123   :  { %v355_v23 = vadd.f32 %v353_v22, %v345_v18  ;;  %v356_v24 = vadd.f32 %v353_v22, %v346_v19  ;;  %v357_v25 = vadd.f32 %v353_v22, %v347_v20  ;;  %v358_v26 = vadd.f32 %v353_v22, %v348_v21 }
 0x125   :  { %v359_v27 = vmax.f32 %v355_v23, 0.0  ;;  %v360_v28 = vmax.f32 %v356_v24, 0.0  ;;  %v361_v29 = vmax.f32 %v357_v25, 0.0  ;;  %v362_v30 = vmax.f32 %v358_v26, 0.0 }
 0x127   :  { %v424_v31 = vpack.c.bf16 %v360_v28, %v359_v27  ;;  %v429_v32 = vpack.c.bf16 %v362_v30, %v361_v29 }
 0x129   :  { %425 = vst [vmem:[%s613_s4] sm:$0xff] %v424_v31   ;;  %431 = vst [vmem:[%s613_s4 + $0x8] sm:$0xff] %v429_v32  }

// kernel: generator_forward.14
= control target key start
LH: loop header
LB: loop body
LE: loop exit
PB: predicated region body
PF: predicated region fallthrough
CT: control target
= control target key end

     0   :  { %vm203_vm0 = vcmask 261120   ;;  %s640_s1 = inlined_call_operand.vmem [shape: bf16[288,128], index: 1, kind: input, shape index: {}]   ;;  %s641_s0 = inlined_call_operand.vmem [shape: bf16[32,288], index: 0, kind: input, shape index: {}]   ;;  %s642_s2 = inlined_call_operand.vmem [shape: f32[1,128], index: 2, kind: input, shape index: {}]   ;;  %s643_s3 = inlined_call_operand.vmem [shape: f32[1,128], index: 3, kind: input, shape index: {}]   ;;  %s644_s4 = inlined_call_operand.vmem [shape: bf16[32,128], index: 4, kind: input, shape index: {}]   ;;  %s645_s5 = inlined_call_operand.vmem [shape: bf16[32,128], index: 5, kind: output, shape index: {}]  }
   0x1   :  { %v492_v0 = vld [vmem:[%s640_s1 + $0x78] sm:$0xff]   ;;  %v494_v2 = vld [vmem:[%s640_s1 + $0x70] sm:$0xff]   ;;  %v496_v4 = vld [vmem:[%s640_s1 + $0x68] sm:$0xff]  }
   0x2   :  { %v493_v1 = vld [vmem:[%s640_s1 + $0x38] sm:$0xff]   ;;  %452 = vmatprep.subr.bf16.mxu0 %v492_v0  ;;  %v495_v3 = vld [vmem:[%s640_s1 + $0x30] sm:$0xff]   ;;  %v497_v5 = vld [vmem:[%s640_s1 + $0x28] sm:$0xff]  }
   0x3   :  { %453 = vmatpush3.bf16.msra.mxu0 %v493_v1  ;;  %v498_v6 = vld [vmem:[%s640_s1 + $0x60] sm:$0xff]   ;;  %v500_v8 = vld [vmem:[%s640_s1 + $0x58] sm:$0xff]   ;;  %v505_v9 = vld [vmem:[%s640_s1 + $0x88] sm:$0xff]  }
   0x4   :  { %454 = vmatprep.subr.bf16.mxu0 %v494_v2  ;;  %v499_v7 = vld [vmem:[%s640_s1 + $0x20] sm:$0xff]   ;;  %v501_v10 = vld [vmem:[%s640_s1 + $0x18] sm:$0xff]   ;;  %v502_v11 = vld [vmem:[%s640_s1 + $0x50] sm:$0xff]   ;;  %484 = vmatprep.subr.bf16.mxu1 %v505_v9 }
   0x5   :  { %485 = vmatpush3.bf16.msra.mxu1 %v505_v9  ;;  %v508_v12 = vld [vmem:[%s640_s1 + $0x80] sm:$0xff]   ;;  %v503_v13 = vld [vmem:[%s640_s1 + $0x10] sm:$0xff]   ;;  %v504_v14 = vld [vmem:[%s640_s1 + $0x48] sm:$0xff]  }
   0x6   :  { %486 = vmatprep.subr.bf16.mxu1 %v508_v12  ;;  %v512_v15 = vld [vmem:[%s641_s0 + $0x4] ss:$12 sps:$4 sm:$0xff]   ;;  %v513_v16 = vld [vmem:[%s641_s0 + $0x8] ss:$12 sps:$4 sm:$0xff]   ;;  %v514_v17 = vld [vmem:[%s641_s0 + $0x20] ss:$12 sps:$4 sm:$0xff]  }
   0x7   :  { %455 = vmatpush3.bf16.msra.mxu0 %v495_v3  ;;  %242 = vmatprep.mubr.bf16.mxu0 %v512_v15  ;;  %v506_v18 = vld [vmem:[%s640_s1 + $0x8] sm:$0xff]   ;;  %v507_v19 = vld [vmem:[%s640_s1 + $0x40] sm:$0xff]  }
   0x8   :  { %456 = vmatprep.subr.bf16.mxu0 %v496_v4  ;;  %488 = vmatprep.mubr.msk.bf16.mxu1 %vm203_vm0, %v513_v16  ;;  %v509_v20 = vld [vmem:[%s640_s1] sm:$0xff]   ;;  %v515_v22 = vld [vmem:[%s641_s0 + $0x1c] ss:$12 sps:$4 sm:$0xff]  }
   0x9   :  { %487 = vmatpush3.bf16.msra.mxu1 %v508_v12  ;;  %v510_v21 = vld [vmem:[%s641_s0] ss:$12 sps:$4 sm:$0xff]   ;;  %v517_v23 = vld [vmem:[%s641_s0 + $0x18] ss:$12 sps:$4 sm:$0xff]  }
   0xa   :  { %v433_v15 = vld [vmem:[%s644_s4] sm:$0xff]  }
   0xb   :  { %457 = vmatpush3.bf16.msra.mxu0 %v497_v5 }
   0xc   :  { %458 = vmatprep.subr.bf16.mxu0 %v498_v6  ;;  %489 = vmatmul.mubr.msk.bf16.vlgmr.msra.gmra.mxu1 %vm203_vm0, %v514_v17 }
   0xf   :  { %459 = vmatpush3.bf16.msra.mxu0 %v499_v7 }
  0x10   :  { %460 = vmatprep.subr.bf16.mxu0 %v500_v8  ;;  %v343_v8 = vlaneseq }
  0x12   :  { %v344_v9 = vshrl.u32 %v343_v8, 7 }
  0x13   :  { %461 = vmatpush3.bf16.msra.mxu0 %v501_v10  ;;  %v337_v10 = vld [vmem:[%s642_s2] sm:$0x1] }
  0x14   :  { %462 = vmatprep.subr.bf16.mxu0 %v502_v11  ;;  %v345_v11 = vsub.s32 0, %v344_v9 }
  0x17   :  { %463 = vmatpush3.bf16.msra.mxu0 %v503_v13 }
  0x18   :  { %464 = vmatprep.subr.bf16.mxu0 %v504_v14  ;;  %v339_v14 = vld [vmem:[%s643_s3] sm:$0x1] }
  0x1b   :  { %465 = vmatpush3.bf16.msra.mxu0 %v506_v18  ;;  %v450_v18 = vld [vmem:[%s644_s4 + $0x8] sm:$0xff]  }
  0x1c   :  { %466 = vmatprep.subr.bf16.mxu0 %v507_v19 }
  0x1f   :  { %467 = vmatpush3.bf16.msra.mxu0 %v509_v20  ;;  %v434_v20 = vunpack.c.l.bf16 %v433_v15 }
  0x22   :  { %243 = vmatmul.mubr.bf16.vlgmr.msra.gmra.mxu0 %v510_v21 }
  0x23   :  { %250 = vmatprep.mubr.bf16.mxu0 %v515_v22  ;;  %v435_v22 = vunpack.c.h.bf16 %v433_v15 }
  0x2a   :  { %251 = vmatmul.mubr.bf16.gmra.mxu0 %v517_v23  ;;  %v438_v23 = vunpack.c.l.bf16 %v450_v18 }
  0xcc   :  { %v490_v24 = vpop.f32.mrf.mxu1 }
  0xce   :  { %v293_v26 = vpop.f32.mrf.mxu1 }
  0xd0   :  { %v491_v29 = vpop.f32.mrf.mxu1 }
  0xd2   :  { %v296_v33 = vpop.f32.mrf.mxu1 }
  0xe2   :  { %v468_v25 = vpop.f32.mrf.mxu0 }
  0xe4   :  { %v469_v27 = vpop.f32.mrf.mxu0 }
  0xe5   :  { %v470_v31 = vadd.f32 %v469_v27, %v468_v25 }
  0xe6   :  { %v471_v28 = vpop.f32.mrf.mxu0 }
  0xe7   :  { %v294_v37 = vadd.f32 %v470_v31, %v293_v26 }
  0xe8   :  { %v472_v30 = vpop.f32.mrf.mxu0 }
  0xe9   :  { %v473_v32 = vadd.f32 %v472_v30, %v471_v28  ;;  %v317_v43 = vmul.f32 %v294_v37, %v294_v37 }
  0xea   :  { %v474_v34 = vpop.f32.mrf.mxu0 }
  0xeb   :  { %v297_v35 = vadd.f32 %v473_v32, %v296_v33 }
  0xec   :  { %v475_v36 = vpop.f32.mrf.mxu0 }
  0xed   :  { %v476_v38 = vadd.f32 %v475_v36, %v474_v34  ;;  %v318_v40 = vmul.f32 %v297_v35, %v297_v35  ;;  %v308_v44 = vadd.f32 %v297_v35, %v294_v37 }
  0xee   :  { %v477_v39 = vpop.f32.mrf.mxu0 }
  0xef   :  { %v302_v41 = vadd.f32 %v490_v24, %v476_v38  ;;  %v321_v47 = vadd.f32 %v318_v40, %v317_v43  ;;  %v439_v24 = vunpack.c.h.bf16 %v450_v18 }
  0xf0   :  { %v478_v42 = vpop.f32.mrf.mxu0 }
  0xf1   :  { %v319_v45 = vmul.f32 %v302_v41, %v302_v41  ;;  %v479_v46 = vadd.f32 %v478_v42, %v477_v39  ;;  %v309_v48 = vadd.f32 %v308_v44, %v302_v41 }
  0xf3   :  { %v305_v49 = vadd.f32 %v491_v29, %v479_v46  ;;  %v322_v50 = vadd.f32 %v321_v47, %v319_v45 }
  0xf5   :  { %v310_v51 = vadd.f32 %v309_v48, %v305_v49  ;;  %v320_v52 = vmul.f32 %v305_v49, %v305_v49 }
  0xf7   :  { %v311_v53 = vrot.slane %v310_v51, 4  ;;  %v323_v54 = vadd.f32 %v322_v50, %v320_v52 }
  0xf9   :  { %v312_v55 = vadd.f32 %v311_v53, %v310_v51  ;;  %v324_v56 = vrot.slane %v323_v54, 4 }
  0xfb   :  { %v313_v57 = vrot.slane %v312_v55, 2  ;;  %v325_v58 = vadd.f32 %v324_v56, %v323_v54 }
  0xfd   :  { %v314_v59 = vadd.f32 %v313_v57, %v312_v55  ;;  %v326_v60 = vrot.slane %v325_v58, 2 }
  0xff   :  { %v315_v61 = vrot.slane %v314_v59, 1  ;;  %v327_v62 = vadd.f32 %v326_v60, %v325_v58 }
 0x101   :  { %v316_v63 = vadd.f32 %v315_v61, %v314_v59  ;;  %v328_v0 = vrot.slane %v327_v62, 1 }
 0x103   :  { %v329_v1 = vadd.f32 %v328_v0, %v327_v62  ;;  %v330_v2 = vmul.f32 0.03125, %v316_v63 }
 0x105   :  { %v331_v3 = vmul.f32 0.03125, %v329_v1  ;;  %v332_v4 = vmul.f32 %v330_v2, %v330_v2 }
 0x107   :  { %v333_v5 = vsub.f32 %v331_v3, %v332_v4 }
 0x109   :  { %v334_v6 = vmax.f32 %v333_v5, 0.0 }
 0x10b   :  { %v335_v7 = vadd.f32 1e-05, %v334_v6 }
 0x10d   :  { %518 = vrsqrt.f32 %v335_v7 }
 0x11a   :  { %v519_v12 = vpop.eup %518 }
 0x11b   :  { %v338_v13 = vmul.f32 %v519_v12, %v337_v10 }
 0x11d   :  { %v340_v16 = vmul.f32 %v338_v13, %v330_v2  ;;  %v346_v17 = vrot.slane %v338_v13, %v345_v11 }
 0x11f   :  { %v341_v19 = vsub.f32 %v339_v14, %v340_v16  ;;  %v348_v21 = vmul.f32 %v346_v17, %v294_v37  ;;  %v349_v25 = vmul.f32 %v346_v17, %v297_v35  ;;  %v350_v26 = vmul.f32 %v346_v17, %v302_v41 }
 0x120   :  { %v351_v27 = vmul.f32 %v346_v17, %v305_v49 }
 0x121   :  { %v356_v28 = vrot.slane %v341_v19, %v345_v11 }
 0x123   :  { %v358_v29 = vadd.f32 %v356_v28, %v348_v21  ;;  %v359_v30 = vadd.f32 %v356_v28, %v349_v25  ;;  %v360_v31 = vadd.f32 %v356_v28, %v350_v26  ;;  %v361_v32 = vadd.f32 %v356_v28, %v351_v27 }
 0x125   :  { %v370_v33 = vadd.f32 %v434_v20, %v358_v29  ;;  %v371_v34 = vadd.f32 %v435_v22, %v359_v30  ;;  %v372_v36 = vadd.f32 %v438_v23, %v360_v31  ;;  %v373_v38 = vadd.f32 %v439_v24, %v361_v32 }
 0x127   :  { %v443_v39 = vpack.c.bf16 %v371_v34, %v370_v33  ;;  %v448_v40 = vpack.c.bf16 %v373_v38, %v372_v36 }
 0x129   :  { %444 = vst [vmem:[%s645_s5] sm:$0xff] %v443_v39   ;;  %451 = vst [vmem:[%s645_s5 + $0x8] sm:$0xff] %v448_v40  }

// kernel: generator_forward.17
= control target key start
LH: loop header
LB: loop body
LE: loop exit
PB: predicated region body
PF: predicated region fallthrough
CT: control target
= control target key end

     0   :  { %vm314_vm0 = vcmask 261120   ;;  %s1329_s1 = inlined_call_operand.vmem [shape: bf16[288,128], index: 1, kind: input, shape index: {}]   ;;  %s1330_s0 = inlined_call_operand.vmem [shape: bf16[128,288], index: 0, kind: input, shape index: {}]   ;;  %s1331_s2 = inlined_call_operand.vmem [shape: f32[1,128], index: 2, kind: input, shape index: {}]   ;;  %s1332_s3 = inlined_call_operand.vmem [shape: f32[1,128], index: 3, kind: input, shape index: {}]   ;;  %s1333_s4 = inlined_call_operand.vmem [shape: bf16[128,128], index: 4, kind: output, shape index: {}]  }
   0x1   :  { %v986_v0 = vld [vmem:[%s1329_s1 + $0x78] sm:$0xff]   ;;  %v988_v2 = vld [vmem:[%s1329_s1 + $0x70] sm:$0xff]   ;;  %v990_v4 = vld [vmem:[%s1329_s1 + $0x68] sm:$0xff]  }
   0x2   :  { %v987_v1 = vld [vmem:[%s1329_s1 + $0x38] sm:$0xff]   ;;  %876 = vmatprep.subr.bf16.mxu0 %v986_v0  ;;  %970 = vmatprep.subr.bf16.mxu1 %v986_v0  ;;  %v989_v3 = vld [vmem:[%s1329_s1 + $0x30] sm:$0xff]   ;;  %v991_v5 = vld [vmem:[%s1329_s1 + $0x28] sm:$0xff]  }
   0x3   :  { %877 = vmatpush3.bf16.msra.mxu0 %v987_v1  ;;  %978 = vmatpush3.bf16.msra.mxu1 %v987_v1  ;;  %v992_v6 = vld [vmem:[%s1329_s1 + $0x60] sm:$0xff]   ;;  %v994_v8 = vld [vmem:[%s1329_s1 + $0x58] sm:$0xff]   ;;  %v996_v10 = vld [vmem:[%s1329_s1 + $0x50] sm:$0xff]  }
   0x4   :  { %878 = vmatprep.subr.bf16.mxu0 %v988_v2  ;;  %971 = vmatprep.subr.bf16.mxu1 %v988_v2  ;;  %v993_v7 = vld [vmem:[%s1329_s1 + $0x20] sm:$0xff]   ;;  %v995_v9 = vld [vmem:[%s1329_s1 + $0x18] sm:$0xff]   ;;  %v997_v13 = vld [vmem:[%s1329_s1 + $0x10] sm:$0xff]  }
   0x5   :  { %v1004_v11 = vld [vmem:[%s1330_s0 + $0x4] ss:$12 sps:$4 sm:$0xff]   ;;  %v1007_v12 = vld [vmem:[%s1330_s0 + $0x94] ss:$12 sps:$4 sm:$0xff]   ;;  %v998_v14 = vld [vmem:[%s1329_s1 + $0x48] sm:$0xff]  }
   0x6   :  { %371 = vmatprep.mubr.bf16.mxu0 %v1004_v11  ;;  %419 = vmatprep.mubr.bf16.mxu1 %v1007_v12  ;;  %v999_v15 = vld [vmem:[%s1329_s1 + $0x8] sm:$0xff]   ;;  %v1000_v16 = vld [vmem:[%s1329_s1 + $0x40] sm:$0xff]   ;;  %v1005_v20 = vld [vmem:[%s1330_s0 + $0x90] ss:$12 sps:$4 sm:$0xff]  }
   0x7   :  { %879 = vmatpush3.bf16.msra.mxu0 %v989_v3  ;;  %979 = vmatpush3.bf16.msra.mxu1 %v989_v3  ;;  %v1001_v17 = vld [vmem:[%s1329_s1] sm:$0xff]   ;;  %v1008_v19 = vld [vmem:[%s1329_s1 + $0x88] sm:$0xff]   ;;  %v1019_v28 = vld [vmem:[%s1330_s0 + $0x30] ss:$12 sps:$4 sm:$0xff]  }
   0x8   :  { %880 = vmatprep.subr.bf16.mxu0 %v990_v4  ;;  %972 = vmatprep.subr.bf16.mxu1 %v990_v4  ;;  %v1002_v18 = vld [vmem:[%s1330_s0] ss:$12 sps:$4 sm:$0xff]   ;;  %v1009_v21 = vld [vmem:[%s1330_s0 + $0x1c] ss:$12 sps:$4 sm:$0xff]   ;;  %v1013_v24 = vld [vmem:[%s1330_s0 + $0x18] ss:$12 sps:$4 sm:$0xff]  }
   0x9   :  { %v1011_v22 = vld [vmem:[%s1330_s0 + $0xac] ss:$12 sps:$4 sm:$0xff]   ;;  %v1015_v23 = vld [vmem:[%s1329_s1 + $0x80] sm:$0xff]   ;;  %v1014_v25 = vld [vmem:[%s1330_s0 + $0xa8] ss:$12 sps:$4 sm:$0xff]  }
   0xa   :  { %v1016_v26 = vld [vmem:[%s1330_s0 + $0x34] ss:$12 sps:$4 sm:$0xff]   ;;  %v1021_v30 = vld [vmem:[%s1330_s0 + $0x4c] ss:$12 sps:$4 sm:$0xff]   ;;  %v1025_v33 = vld [vmem:[%s1330_s0 + $0x50] ss:$12 sps:$4 sm:$0xff]  }
   0xb   :  { %881 = vmatpush3.bf16.msra.mxu0 %v991_v5  ;;  %980 = vmatpush3.bf16.msra.mxu1 %v991_v5  ;;  %v1018_v27 = vld [vmem:[%s1330_s0 + $0x8] ss:$12 sps:$4 sm:$0xff]   ;;  %v1020_v29 = vld [vmem:[%s1330_s0 + $0x20] ss:$12 sps:$4 sm:$0xff]   ;;  %v1023_v31 = vld [vmem:[%s1330_s0 + $0x38] ss:$12 sps:$4 sm:$0xff]  }
   0xc   :  { %882 = vmatprep.subr.bf16.mxu0 %v992_v6  ;;  %973 = vmatprep.subr.bf16.mxu1 %v992_v6  ;;  %v1024_v32 = vld [vmem:[%s1330_s0 + $0x48] ss:$12 sps:$4 sm:$0xff]   ;;  %v1026_v34 = vld [vmem:[%s1330_s0 + $0x64] ss:$12 sps:$4 sm:$0xff]   ;;  %v1029_v36 = vld [vmem:[%s1330_s0 + $0x60] ss:$12 sps:$4 sm:$0xff]  }
   0xd   :  { %v1028_v35 = vld [vmem:[%s1330_s0 + $0x68] ss:$12 sps:$4 sm:$0xff]   ;;  %v1030_v37 = vld [vmem:[%s1330_s0 + $0x80] ss:$12 sps:$4 sm:$0xff]   ;;  %v1033_v39 = vld [vmem:[%s1330_s0 + $0x98] ss:$12 sps:$4 sm:$0xff]  }
   0xe   :  { %v1031_v38 = vld [vmem:[%s1330_s0 + $0x7c] ss:$12 sps:$4 sm:$0xff]   ;;  %v1034_v40 = vld [vmem:[%s1330_s0 + $0x78] ss:$12 sps:$4 sm:$0xff]  }
   0xf   :  { %883 = vmatpush3.bf16.msra.mxu0 %v993_v7  ;;  %981 = vmatpush3.bf16.msra.mxu1 %v993_v7  ;;  %v1035_v41 = vld [vmem:[%s1330_s0 + $0xb0] ss:$12 sps:$4 sm:$0xff]  }
  0x10   :  { %884 = vmatprep.subr.bf16.mxu0 %v994_v8  ;;  %974 = vmatprep.subr.bf16.mxu1 %v994_v8 }
  0x13   :  { %885 = vmatpush3.bf16.msra.mxu0 %v995_v9  ;;  %982 = vmatpush3.bf16.msra.mxu1 %v995_v9 }
  0x14   :  { %886 = vmatprep.subr.bf16.mxu0 %v996_v10  ;;  %975 = vmatprep.subr.bf16.mxu1 %v996_v10 }
  0x17   :  { %887 = vmatpush3.bf16.msra.mxu0 %v997_v13  ;;  %983 = vmatpush3.bf16.msra.mxu1 %v997_v13 }
  0x18   :  { %888 = vmatprep.subr.bf16.mxu0 %v998_v14  ;;  %976 = vmatprep.subr.bf16.mxu1 %v998_v14 }
  0x1b   :  { %889 = vmatpush3.bf16.msra.mxu0 %v999_v15  ;;  %984 = vmatpush3.bf16.msra.mxu1 %v999_v15 }
  0x1c   :  { %890 = vmatprep.subr.bf16.mxu0 %v1000_v16  ;;  %977 = vmatprep.subr.bf16.mxu1 %v1000_v16 }
  0x1f   :  { %891 = vmatpush3.bf16.msra.mxu0 %v1001_v17  ;;  %985 = vmatpush3.bf16.msra.mxu1 %v1001_v17 }
  0x20   :  { %950 = vmatprep.subr.bf16.mxu1 %v1008_v19 }
  0x22   :  { %372 = vmatmul.mubr.bf16.vlgmr.msra.gmra.mxu0 %v1002_v18  ;;  %420 = vmatmul.mubr.bf16.vlgmr.msra.gmra.mxu1 %v1005_v20 }
  0x23   :  { %951 = vmatpush3.bf16.msra.mxu1 %v1008_v19  ;;  %379 = vmatprep.mubr.bf16.mxu0 %v1009_v21 }
  0x24   :  { %427 = vmatprep.mubr.bf16.mxu1 %v1011_v22  ;;  %952 = vmatprep.subr.bf16.mxu1 %v1015_v23 }
  0x27   :  { %953 = vmatpush3.bf16.msra.mxu1 %v1015_v23 }
  0x2a   :  { %380 = vmatmul.mubr.bf16.gmra.mxu0 %v1013_v24  ;;  %428 = vmatmul.mubr.bf16.gmra.mxu1 %v1014_v25 }
  0x2b   :  { %387 = vmatprep.mubr.bf16.mxu0 %v1016_v26  ;;  %954 = vmatprep.mubr.msk.bf16.mxu1 %vm314_vm0, %v1018_v27 }
  0x32   :  { %388 = vmatmul.mubr.bf16.gmra.mxu0 %v1019_v28  ;;  %955 = vmatmul.mubr.msk.bf16.vlgmr.msra.gmra.mxu1 %vm314_vm0, %v1020_v29 }
  0x33   :  { %395 = vmatprep.mubr.bf16.mxu0 %v1021_v30  ;;  %958 = vmatprep.mubr.msk.bf16.mxu1 %vm314_vm0, %v1023_v31 }
  0x3a   :  { %396 = vmatmul.mubr.bf16.gmra.mxu0 %v1024_v32  ;;  %959 = vmatmul.mubr.msk.bf16.gmra.mxu1 %vm314_vm0, %v1025_v33 }
  0x3b   :  { %403 = vmatprep.mubr.bf16.mxu0 %v1026_v34  ;;  %962 = vmatprep.mubr.msk.bf16.mxu1 %vm314_vm0, %v1028_v35 }
  0x42   :  { %404 = vmatmul.mubr.bf16.gmra.mxu0 %v1029_v36  ;;  %963 = vmatmul.mubr.msk.bf16.gmra.mxu1 %vm314_vm0, %v1030_v37 }
  0x43   :  { %411 = vmatprep.mubr.bf16.mxu0 %v1031_v38  ;;  %966 = vmatprep.mubr.msk.bf16.mxu1 %vm314_vm0, %v1033_v39 }
  0x4a   :  { %412 = vmatmul.mubr.bf16.gmra.mxu0 %v1034_v40  ;;  %967 = vmatmul.mubr.msk.bf16.gmra.mxu1 %vm314_vm0, %v1035_v41 }
  0xe2   :  { %v892_v42 = vpop.f32.mrf.mxu0  ;;  %v1197_v43 = vpop.f32.mrf.mxu1 }
  0xe4   :  { %v893_v44 = vpop.f32.mrf.mxu0  ;;  %v1199_v45 = vpop.f32.mrf.mxu1 }
  0xe5   :  { %v894_v62 = vadd.f32 %v893_v44, %v892_v42 }
  0xe6   :  { %v895_v46 = vpop.f32.mrf.mxu0  ;;  %v1201_v47 = vpop.f32.mrf.mxu1 }
  0xe8   :  { %v896_v48 = vpop.f32.mrf.mxu0  ;;  %v1203_v49 = vpop.f32.mrf.mxu1 }
  0xe9   :  { %v897_v1 = vadd.f32 %v896_v48, %v895_v46 }
  0xea   :  { %v898_v50 = vpop.f32.mrf.mxu0  ;;  %v1205_v51 = vpop.f32.mrf.mxu1 }
  0xec   :  { %v899_v52 = vpop.f32.mrf.mxu0  ;;  %v1207_v53 = vpop.f32.mrf.mxu1 }
  0xed   :  { %v900_v2 = vadd.f32 %v899_v52, %v898_v50 }
  0xee   :  { %v901_v54 = vpop.f32.mrf.mxu0  ;;  %v1209_v55 = vpop.f32.mrf.mxu1 }
  0xf0   :  { %v902_v56 = vpop.f32.mrf.mxu0  ;;  %v1211_v57 = vpop.f32.mrf.mxu1 }
  0xf1   :  { %v903_v6 = vadd.f32 %v902_v56, %v901_v54 }
  0xf2   :  { %v904_v58 = vpop.f32.mrf.mxu0  ;;  %v956_v59 = vpop.f32.mrf.mxu1 }
  0xf3   :  { %v1215_v7 = vadd.f32 %v956_v59, %v900_v2 }
  0xf4   :  { %v905_v60 = vpop.f32.mrf.mxu0  ;;  %v470_v61 = vpop.f32.mrf.mxu1 }
  0xf5   :  { %v1213_v3 = vadd.f32 %v894_v62, %v470_v61  ;;  %v906_v9 = vadd.f32 %v905_v60, %v904_v58  ;;  %v556_v18 = vmul.f32 %v1215_v7, %v1215_v7 }
  0xf6   :  { %v907_v63 = vpop.f32.mrf.mxu0  ;;  %v957_v0 = vpop.f32.mrf.mxu1 }
  0xf7   :  { %v554_v12 = vmul.f32 %v1213_v3, %v1213_v3  ;;  %v1221_v13 = vadd.f32 %v957_v0, %v903_v6 }
  0xf8   :  { %v908_v4 = vpop.f32.mrf.mxu0  ;;  %v473_v5 = vpop.f32.mrf.mxu1 }
  0xf9   :  { %v1217_v8 = vadd.f32 %v897_v1, %v473_v5  ;;  %v557_v24 = vmul.f32 %v1221_v13, %v1221_v13  ;;  %v909_v28 = vadd.f32 %v908_v4, %v907_v63 }
  0xfa   :  { %v910_v10 = vpop.f32.mrf.mxu0  ;;  %v960_v11 = vpop.f32.mrf.mxu1 }
  0xfb   :  { %v533_v14 = vadd.f32 %v1217_v8, %v1213_v3  ;;  %v555_v15 = vmul.f32 %v1217_v8, %v1217_v8 }
  0xfc   :  { %v911_v16 = vpop.f32.mrf.mxu0  ;;  %v486_v17 = vpop.f32.mrf.mxu1 }
  0xfd   :  { %v534_v19 = vadd.f32 %v533_v14, %v1215_v7  ;;  %v570_v20 = vadd.f32 %v555_v15, %v554_v12  ;;  %v1230_v21 = vadd.f32 %v906_v9, %v486_v17  ;;  %v912_v26 = vadd.f32 %v911_v16, %v910_v10 }
  0xfe   :  { %v913_v22 = vpop.f32.mrf.mxu0  ;;  %v961_v23 = vpop.f32.mrf.mxu1 }
  0xff   :  { %v571_v25 = vadd.f32 %v570_v20, %v556_v18  ;;  %v535_v27 = vadd.f32 %v534_v19, %v1221_v13  ;;  %v558_v32 = vmul.f32 %v1230_v21, %v1230_v21  ;;  %v1240_v37 = vadd.f32 %v960_v11, %v912_v26 }
 0x100   :  { %v914_v29 = vpop.f32.mrf.mxu0  ;;  %v489_v30 = vpop.f32.mrf.mxu1  ;;  %v930_v19 = vadd.f32 %v1199_v45, %v1197_v43  ;;  %v933_v26 = vadd.f32 %v1203_v49, %v1201_v47  ;;  %v936_v43 = vadd.f32 %v1207_v53, %v1205_v51  ;;  %v939_v47 = vadd.f32 %v1211_v57, %v1209_v55 }
 0x101   :  { %v536_v31 = vadd.f32 %v535_v27, %v1230_v21  ;;  %v572_v33 = vadd.f32 %v571_v25, %v557_v24  ;;  %v1238_v34 = vadd.f32 %v909_v28, %v489_v30  ;;  %v915_v39 = vadd.f32 %v914_v29, %v913_v22 }
 0x102   :  { %v916_v35 = vpop.f32.mrf.mxu0  ;;  %v964_v36 = vpop.f32.mrf.mxu1  ;;  %v560_v54 = vmul.f32 %v1240_v37, %v1240_v37 }
 0x103   :  { %v573_v38 = vadd.f32 %v572_v33, %v558_v32  ;;  %v537_v40 = vadd.f32 %v536_v31, %v1238_v34  ;;  %v559_v41 = vmul.f32 %v1238_v34, %v1238_v34  ;;  %v1247_v56 = vadd.f32 %v961_v23, %v915_v39 }
 0x104   :  { %v917_v42 = vpop.f32.mrf.mxu0  ;;  %v502_v44 = vpop.f32.mrf.mxu1 }
 0x105   :  { %v918_v46 = vadd.f32 %v917_v42, %v916_v35  ;;  %v574_v48 = vadd.f32 %v573_v38, %v559_v41  ;;  %v538_v58 = vadd.f32 %v537_v40, %v1240_v37  ;;  %v561_v2 = vmul.f32 %v1247_v56, %v1247_v56 }
 0x106   :  { %v919_v50 = vpop.f32.mrf.mxu0  ;;  %v965_v52 = vpop.f32.mrf.mxu1 }
 0x107   :  { %v575_v61 = vadd.f32 %v574_v48, %v560_v54  ;;  %v1250_v62 = vadd.f32 %v918_v46, %v502_v44  ;;  %v539_v4 = vadd.f32 %v538_v58, %v1247_v56 }
 0x108   :  { %v920_v59 = vpop.f32.mrf.mxu0  ;;  %v505_v60 = vpop.f32.mrf.mxu1 }
 0x109   :  { %v921_v63 = vadd.f32 %v920_v59, %v919_v50  ;;  %v562_v10 = vmul.f32 %v1250_v62, %v1250_v62  ;;  %v576_v11 = vadd.f32 %v575_v61, %v561_v2  ;;  %v540_v16 = vadd.f32 %v539_v4, %v1250_v62 }
 0x10a   :  { %v922_v0 = vpop.f32.mrf.mxu0  ;;  %v968_v1 = vpop.f32.mrf.mxu1 }
 0x10b   :  { %v1255_v5 = vadd.f32 %v921_v63, %v505_v60  ;;  %v577_v22 = vadd.f32 %v576_v11, %v562_v10  ;;  %v527_v49 = vadd.f32 %v968_v1, %v936_v43 }
 0x10c   :  { %v923_v6 = vpop.f32.mrf.mxu0  ;;  %v518_v9 = vpop.f32.mrf.mxu1 }
 0x10d   :  { %v924_v12 = vadd.f32 %v923_v6, %v922_v0  ;;  %v563_v17 = vmul.f32 %v1255_v5, %v1255_v5  ;;  %v541_v23 = vadd.f32 %v540_v16, %v1255_v5  ;;  %v1272_v30 = vadd.f32 %v930_v19, %v518_v9  ;;  %v598_v19 = vld [vmem:[%s1331_s2] sm:$0x1] }
 0x10e   :  { %v925_v14 = vpop.f32.mrf.mxu0  ;;  %v969_v15 = vpop.f32.mrf.mxu1  ;;  %v568_v42 = vmul.f32 %v527_v49, %v527_v49  ;;  %v604_v16 = vlaneseq }
 0x10f   :  { %v1262_v18 = vadd.f32 %v964_v36, %v924_v12  ;;  %v578_v28 = vadd.f32 %v577_v22, %v563_v17  ;;  %v566_v36 = vmul.f32 %v1272_v30, %v1272_v30  ;;  %v530_v40 = vadd.f32 %v969_v15, %v939_v47 }
 0x110   :  { %v926_v20 = vpop.f32.mrf.mxu0  ;;  %v521_v27 = vpop.f32.mrf.mxu1  ;;  %v605_v17 = vshrl.u32 %v604_v16, 7 }
 0x111   :  { %v564_v24 = vmul.f32 %v1262_v18, %v1262_v18  ;;  %v927_v25 = vadd.f32 %v926_v20, %v925_v14  ;;  %v542_v29 = vadd.f32 %v541_v23, %v1262_v18  ;;  %v522_v35 = vadd.f32 %v933_v26, %v521_v27 }
 0x112   :  { %v569_v48 = vmul.f32 %v530_v40, %v530_v40  ;;  %v606_v20 = vsub.s32 0, %v605_v17 }
 0x113   :  { %v1274_v31 = vadd.f32 %v965_v52, %v927_v25  ;;  %v579_v45 = vadd.f32 %v578_v28, %v564_v24  ;;  %v567_v51 = vmul.f32 %v522_v35, %v522_v35  ;;  %v600_v24 = vld [vmem:[%s1332_s3] sm:$0x1] }
 0x115   :  { %v543_v32 = vadd.f32 %v542_v29, %v1274_v31  ;;  %v565_v33 = vmul.f32 %v1274_v31, %v1274_v31 }
 0x117   :  { %v580_v38 = vadd.f32 %v579_v45, %v565_v33  ;;  %v544_v39 = vadd.f32 %v543_v32, %v1272_v30 }
 0x119   :  { %v545_v41 = vadd.f32 %v544_v39, %v522_v35  ;;  %v581_v53 = vadd.f32 %v580_v38, %v566_v36 }
 0x11b   :  { %v546_v44 = vadd.f32 %v545_v41, %v527_v49  ;;  %v582_v46 = vadd.f32 %v581_v53, %v567_v51 }
 0x11d   :  { %v547_v50 = vadd.f32 %v546_v44, %v530_v40  ;;  %v583_v52 = vadd.f32 %v582_v46, %v568_v42 }
 0x11f   :  { %v548_v54 = vrot.slane %v547_v50, 4  ;;  %v584_v58 = vadd.f32 %v583_v52, %v569_v48 }
 0x121   :  { %v549_v55 = vadd.f32 %v548_v54, %v547_v50  ;;  %v585_v57 = vrot.slane %v584_v58, 4 }
 0x123   :  { %v550_v59 = vrot.slane %v549_v55, 2  ;;  %v586_v60 = vadd.f32 %v585_v57, %v584_v58 }
 0x125   :  { %v551_v61 = vadd.f32 %v550_v59, %v549_v55  ;;  %v587_v63 = vrot.slane %v586_v60, 2 }
 0x127   :  { %v552_v0 = vrot.slane %v551_v61, 1  ;;  %v588_v1 = vadd.f32 %v587_v63, %v586_v60 }
 0x129   :  { %v553_v2 = vadd.f32 %v552_v0, %v551_v61  ;;  %v589_v4 = vrot.slane %v588_v1, 1 }
 0x12b   :  { %v590_v6 = vadd.f32 %v589_v4, %v588_v1  ;;  %v591_v9 = vmul.f32 0.0078125, %v553_v2 }
 0x12d   :  { %v592_v10 = vmul.f32 0.0078125, %v590_v6  ;;  %v593_v11 = vmul.f32 %v591_v9, %v591_v9 }
 0x12f   :  { %v594_v12 = vsub.f32 %v592_v10, %v593_v11 }
 0x131   :  { %v595_v14 = vmax.f32 %v594_v12, 0.0 }
 0x133   :  { %v596_v15 = vadd.f32 1e-05, %v595_v14 }
 0x135   :  { %1036 = vrsqrt.f32 %v596_v15 }
 0x142   :  { %v1037_v22 = vpop.eup %1036 }
 0x143   :  { %v599_v23 = vmul.f32 %v1037_v22, %v598_v19 }
 0x145   :  { %v601_v25 = vmul.f32 %v599_v23, %v591_v9  ;;  %v607_v26 = vrot.slane %v599_v23, %v606_v20 }
 0x147   :  { %v602_v27 = vsub.f32 %v600_v24, %v601_v25  ;;  %v609_v28 = vmul.f32 %v607_v26, %v1213_v3  ;;  %v610_v29 = vmul.f32 %v607_v26, %v1217_v8  ;;  %v611_v43 = vmul.f32 %v607_v26, %v1215_v7 }
 0x148   :  { %v612_v45 = vmul.f32 %v607_v26, %v1221_v13  ;;  %v613_v32 = vmul.f32 %v607_v26, %v1230_v21  ;;  %v614_v33 = vmul.f32 %v607_v26, %v1238_v34  ;;  %v615_v47 = vmul.f32 %v607_v26, %v1240_v37 }
 0x149   :  { %v616_v36 = vmul.f32 %v607_v26, %v1247_v56  ;;  %v617_v38 = vmul.f32 %v607_v26, %v1250_v62  ;;  %v618_v39 = vmul.f32 %v607_v26, %v1255_v5  ;;  %v619_v3 = vmul.f32 %v607_v26, %v1262_v18 }
 0x14a   :  { %v620_v8 = vmul.f32 %v607_v26, %v1274_v31  ;;  %v629_v41 = vrot.slane %v602_v27, %v606_v20  ;;  %v621_v7 = vmul.f32 %v607_v26, %v1272_v30  ;;  %v622_v13 = vmul.f32 %v607_v26, %v522_v35 }
 0x14b   :  { %v623_v51 = vmul.f32 %v607_v26, %v527_v49  ;;  %v624_v21 = vmul.f32 %v607_v26, %v530_v40 }
 0x14c   :  { %v631_v53 = vadd.f32 %v629_v41, %v609_v28  ;;  %v632_v34 = vadd.f32 %v629_v41, %v610_v29  ;;  %v633_v42 = vadd.f32 %v629_v41, %v611_v43  ;;  %v634_v37 = vadd.f32 %v629_v41, %v612_v45 }
 0x14d   :  { %v635_v44 = vadd.f32 %v629_v41, %v613_v32  ;;  %v636_v56 = vadd.f32 %v629_v41, %v614_v33  ;;  %v637_v46 = vadd.f32 %v629_v41, %v615_v47  ;;  %v638_v62 = vadd.f32 %v629_v41, %v616_v36 }
 0x14e   :  { %v639_v48 = vadd.f32 %v629_v41, %v617_v38  ;;  %v640_v5 = vadd.f32 %v629_v41, %v618_v39  ;;  %v641_v50 = vadd.f32 %v629_v41, %v619_v3  ;;  %v642_v18 = vadd.f32 %v629_v41, %v620_v8 }
 0x14f   :  { %v643_v52 = vadd.f32 %v629_v41, %v621_v7  ;;  %v644_v31 = vadd.f32 %v629_v41, %v622_v13  ;;  %v645_v54 = vadd.f32 %v629_v41, %v623_v51  ;;  %v646_v58 = vadd.f32 %v629_v41, %v624_v21 }
 0x150   :  { %v647_v30 = vmax.f32 %v631_v53, 0.0  ;;  %v648_v35 = vmax.f32 %v632_v34, 0.0  ;;  %v649_v49 = vmax.f32 %v633_v42, 0.0  ;;  %v650_v40 = vmax.f32 %v634_v37, 0.0 }
 0x151   :  { %v651_v55 = vmax.f32 %v635_v44, 0.0  ;;  %v652_v57 = vmax.f32 %v636_v56, 0.0  ;;  %v653_v59 = vmax.f32 %v637_v46, 0.0  ;;  %v654_v60 = vmax.f32 %v638_v62, 0.0 }
 0x152   :  { %v655_v61 = vmax.f32 %v639_v48, 0.0  ;;  %v656_v63 = vmax.f32 %v640_v5, 0.0  ;;  %v657_v0 = vmax.f32 %v641_v50, 0.0  ;;  %v658_v1 = vmax.f32 %v642_v18, 0.0 }
 0x153   :  { %v659_v2 = vmax.f32 %v643_v52, 0.0  ;;  %v660_v4 = vmax.f32 %v644_v31, 0.0  ;;  %v661_v6 = vmax.f32 %v645_v54, 0.0  ;;  %v662_v9 = vmax.f32 %v646_v58, 0.0 }
 0x154   :  { %v832_v10 = vpack.c.bf16 %v648_v35, %v647_v30  ;;  %v837_v11 = vpack.c.bf16 %v650_v40, %v649_v49  ;;  %v842_v12 = vpack.c.bf16 %v652_v57, %v651_v55  ;;  %v847_v14 = vpack.c.bf16 %v654_v60, %v653_v59 }
 0x155   :  { %v852_v15 = vpack.c.bf16 %v656_v63, %v655_v61  ;;  %v857_v16 = vpack.c.bf16 %v658_v1, %v657_v0  ;;  %v862_v17 = vpack.c.bf16 %v660_v4, %v659_v2  ;;  %v867_v19 = vpack.c.bf16 %v662_v9, %v661_v6 }
 0x156   :  { %833 = vst [vmem:[%s1333_s4] sm:$0xff] %v832_v10   ;;  %869 = vst [vmem:[%s1333_s4 + $0x8] sm:$0xff] %v837_v11  }
 0x157   :  { %870 = vst [vmem:[%s1333_s4 + $0x10] sm:$0xff] %v842_v12   ;;  %871 = vst [vmem:[%s1333_s4 + $0x18] sm:$0xff] %v847_v14  }
 0x158   :  { %872 = vst [vmem:[%s1333_s4 + $0x20] sm:$0xff] %v852_v15   ;;  %873 = vst [vmem:[%s1333_s4 + $0x28] sm:$0xff] %v857_v16  }
 0x159   :  { %874 = vst [vmem:[%s1333_s4 + $0x30] sm:$0xff] %v862_v17   ;;  %875 = vst [vmem:[%s1333_s4 + $0x38] sm:$0xff] %v867_v19  }

// kernel: generator_forward.18
= control target key start
LH: loop header
LB: loop body
LE: loop exit
PB: predicated region body
PF: predicated region fallthrough
CT: control target
= control target key end

     0   :  { %v2120_v0 = vmov 0   ;;  %vm442_vm0 = vcmask 130048   ;;  %s3422_s1 = inlined_call_operand.vmem [shape: bf16[144,128], index: 1, kind: input, shape index: {}]   ;;  %s3423_s0 = inlined_call_operand.vmem [shape: bf16[512,144], index: 0, kind: input, shape index: {}]   ;;  %s3424_s2 = inlined_call_operand.vmem [shape: f32[1,128], index: 2, kind: input, shape index: {}]   ;;  %s3425_s3 = inlined_call_operand.vmem [shape: f32[1,128], index: 3, kind: input, shape index: {}]   ;;  %s3426_s4 = inlined_call_operand.vmem [shape: bf16[512,128], index: 4, kind: output, shape index: {}]  }
   0x1   :  { %539 = vmatprep.subr.bf16.mxu0 %v2120_v0  ;;  %v2013_v1 = vld [vmem:[%s3422_s1 + $0x38] sm:$0xff]   ;;  %1994 = vmatprep.subr.bf16.mxu1 %v2120_v0  ;;  %v2014_v2 = vld [vmem:[%s3422_s1 + $0x30] sm:$0xff]   ;;  %v2015_v3 = vld [vmem:[%s3422_s1 + $0x28] sm:$0xff]  }
   0x2   :  { %540 = vmatpush1.bf16.msra.mxu0 %v2013_v1  ;;  %2003 = vmatpush1.bf16.msra.mxu1 %v2013_v1  ;;  %v2016_v4 = vld [vmem:[%s3422_s1 + $0x20] sm:$0xff]   ;;  %v2017_v6 = vld [vmem:[%s3422_s1 + $0x18] sm:$0xff]   ;;  %v2018_v7 = vld [vmem:[%s3422_s1 + $0x10] sm:$0xff]  }
   0x3   :  { %541 = vmatprep.subr.bf16.mxu0 %v2120_v0  ;;  %1995 = vmatprep.subr.bf16.mxu1 %v2120_v0  ;;  %v2024_v5 = vld [vmem:[%s3423_s0 + $0x4] ss:$8 sps:$4 sm:$0xff]   ;;  %v2022_v12 = vld [vmem:[%s3423_s0] ss:$8 sps:$4 sm:$0xff]   ;;  %v2025_v13 = vld [vmem:[%s3423_s0 + $0x14] ss:$8 sps:$4 sm:$0xff]  }
   0x4   :  { %1643 = vmatprep.mubr.msk.bf16.mxu0 %vm442_vm0, %v2024_v5  ;;  %v2048_v8 = vld [vmem:[%s3423_s0 + $0x104] ss:$8 sps:$4 sm:$0xff]   ;;  %v2046_v14 = vld [vmem:[%s3423_s0 + $0x100] ss:$8 sps:$4 sm:$0xff]   ;;  %v2052_v15 = vld [vmem:[%s3423_s0 + $0x114] ss:$8 sps:$4 sm:$0xff]  }
   0x5   :  { %v2019_v9 = vld [vmem:[%s3422_s1 + $0x8] sm:$0xff]   ;;  %1659 = vmatprep.mubr.msk.bf16.mxu1 %vm442_vm0, %v2048_v8  ;;  %v2020_v10 = vld [vmem:[%s3422_s1] sm:$0xff]   ;;  %v2027_v16 = vld [vmem:[%s3423_s0 + $0x10] ss:$8 sps:$4 sm:$0xff]  }
   0x6   :  { %542 = vmatpush1.bf16.msra.mxu0 %v2014_v2  ;;  %2004 = vmatpush1.bf16.msra.mxu1 %v2014_v2  ;;  %v2021_v11 = vld [vmem:[%s3422_s1 + $0x40] sm:$0xff]   ;;  %v2054_v18 = vld [vmem:[%s3423_s0 + $0x110] ss:$8 sps:$4 sm:$0xff]   ;;  %v2031_v21 = vld [vmem:[%s3423_s0 + $0x34] ss:$8 sps:$4 sm:$0xff]  }
   0x7   :  { %543 = vmatprep.subr.bf16.mxu0 %v2120_v0  ;;  %1996 = vmatprep.subr.bf16.mxu1 %v2120_v0  ;;  %v2028_v17 = vld [vmem:[%s3423_s0 + $0x24] ss:$8 sps:$4 sm:$0xff]   ;;  %v2030_v20 = vld [vmem:[%s3423_s0 + $0x20] ss:$8 sps:$4 sm:$0xff]   ;;  %v2064_v23 = vld [vmem:[%s3423_s0 + $0x134] ss:$8 sps:$4 sm:$0xff]  }
   0x8   :  { %v2058_v19 = vld [vmem:[%s3423_s0 + $0x124] ss:$8 sps:$4 sm:$0xff]   ;;  %v2060_v22 = vld [vmem:[%s3423_s0 + $0x120] ss:$8 sps:$4 sm:$0xff]   ;;  %v2033_v24 = vld [vmem:[%s3423_s0 + $0x30] ss:$8 sps:$4 sm:$0xff]  }
   0x9   :  { %v2066_v25 = vld [vmem:[%s3423_s0 + $0x130] ss:$8 sps:$4 sm:$0xff]   ;;  %v2034_v26 = vld [vmem:[%s3423_s0 + $0x44] ss:$8 sps:$4 sm:$0xff]   ;;  %v2036_v28 = vld [vmem:[%s3423_s0 + $0x40] ss:$8 sps:$4 sm:$0xff]  }
   0xa   :  { %544 = vmatpush1.bf16.msra.mxu0 %v2015_v3  ;;  %2005 = vmatpush1.bf16.msra.mxu1 %v2015_v3  ;;  %v2070_v27 = vld [vmem:[%s3423_s0 + $0x144] ss:$8 sps:$4 sm:$0xff]   ;;  %v2072_v29 = vld [vmem:[%s3423_s0 + $0x140] ss:$8 sps:$4 sm:$0xff]   ;;  %v2037_v30 = vld [vmem:[%s3423_s0 + $0x54] ss:$8 sps:$4 sm:$0xff]  }
   0xb   :  { %545 = vmatprep.subr.bf16.mxu0 %v2120_v0  ;;  %1997 = vmatprep.subr.bf16.mxu1 %v2120_v0  ;;  %v2076_v31 = vld [vmem:[%s3423_s0 + $0x154] ss:$8 sps:$4 sm:$0xff]   ;;  %v2039_v32 = vld [vmem:[%s3423_s0 + $0x50] ss:$8 sps:$4 sm:$0xff]   ;;  %v2040_v34 = vld [vmem:[%s3423_s0 + $0x64] ss:$8 sps:$4 sm:$0xff]  }
   0xc   :  { %v2078_v33 = vld [vmem:[%s3423_s0 + $0x150] ss:$8 sps:$4 sm:$0xff]   ;;  %v2082_v35 = vld [vmem:[%s3423_s0 + $0x164] ss:$8 sps:$4 sm:$0xff]   ;;  %v2042_v36 = vld [vmem:[%s3423_s0 + $0x60] ss:$8 sps:$4 sm:$0xff]  }
   0xd   :  { %v2084_v37 = vld [vmem:[%s3423_s0 + $0x160] ss:$8 sps:$4 sm:$0xff]   ;;  %v2043_v38 = vld [vmem:[%s3423_s0 + $0x74] ss:$8 sps:$4 sm:$0xff]   ;;  %v2045_v40 = vld [vmem:[%s3423_s0 + $0x70] ss:$8 sps:$4 sm:$0xff]  }
   0xe   :  { %546 = vmatpush1.bf16.msra.mxu0 %v2016_v4  ;;  %2006 = vmatpush1.bf16.msra.mxu1 %v2016_v4  ;;  %v2088_v39 = vld [vmem:[%s3423_s0 + $0x174] ss:$8 sps:$4 sm:$0xff]   ;;  %v2090_v41 = vld [vmem:[%s3423_s0 + $0x170] ss:$8 sps:$4 sm:$0xff]   ;;  %v2049_v42 = vld [vmem:[%s3423_s0 + $0x84] ss:$8 sps:$4 sm:$0xff]  }
   0xf   :  { %547 = vmatprep.subr.bf16.mxu0 %v2120_v0  ;;  %1998 = vmatprep.subr.bf16.mxu1 %v2120_v0  ;;  %v2094_v43 = vld [vmem:[%s3423_s0 + $0x184] ss:$8 sps:$4 sm:$0xff]   ;;  %v2051_v44 = vld [vmem:[%s3423_s0 + $0x80] ss:$8 sps:$4 sm:$0xff]   ;;  %v2055_v46 = vld [vmem:[%s3423_s0 + $0x94] ss:$8 sps:$4 sm:$0xff]  }
  0x10   :  { %v2096_v45 = vld [vmem:[%s3423_s0 + $0x180] ss:$8 sps:$4 sm:$0xff]   ;;  %v2097_v47 = vld [vmem:[%s3423_s0 + $0x194] ss:$8 sps:$4 sm:$0xff]   ;;  %v2057_v48 = vld [vmem:[%s3423_s0 + $0x90] ss:$8 sps:$4 sm:$0xff]  }
  0x11   :  { %v2099_v49 = vld [vmem:[%s3423_s0 + $0x190] ss:$8 sps:$4 sm:$0xff]   ;;  %v2061_v50 = vld [vmem:[%s3423_s0 + $0xa4] ss:$8 sps:$4 sm:$0xff]   ;;  %v2063_v52 = vld [vmem:[%s3423_s0 + $0xa0] ss:$8 sps:$4 sm:$0xff]  }
  0x12   :  { %548 = vmatpush1.bf16.msra.mxu0 %v2017_v6  ;;  %2007 = vmatpush1.bf16.msra.mxu1 %v2017_v6  ;;  %v2100_v51 = vld [vmem:[%s3423_s0 + $0x1a4] ss:$8 sps:$4 sm:$0xff]   ;;  %v2102_v53 = vld [vmem:[%s3423_s0 + $0x1a0] ss:$8 sps:$4 sm:$0xff]   ;;  %v2067_v54 = vld [vmem:[%s3423_s0 + $0xb4] ss:$8 sps:$4 sm:$0xff]  }
  0x13   :  { %549 = vmatprep.subr.bf16.mxu0 %v2120_v0  ;;  %1999 = vmatprep.subr.bf16.mxu1 %v2120_v0  ;;  %v2103_v55 = vld [vmem:[%s3423_s0 + $0x1b4] ss:$8 sps:$4 sm:$0xff]   ;;  %v2069_v56 = vld [vmem:[%s3423_s0 + $0xb0] ss:$8 sps:$4 sm:$0xff]   ;;  %v2073_v58 = vld [vmem:[%s3423_s0 + $0xc4] ss:$8 sps:$4 sm:$0xff]  }
  0x14   :  { %v2105_v57 = vld [vmem:[%s3423_s0 + $0x1b0] ss:$8 sps:$4 sm:$0xff]   ;;  %v2106_v59 = vld [vmem:[%s3423_s0 + $0x1c4] ss:$8 sps:$4 sm:$0xff]   ;;  %v2075_v60 = vld [vmem:[%s3423_s0 + $0xc0] ss:$8 sps:$4 sm:$0xff]  }
  0x15   :  { %v2108_v61 = vld [vmem:[%s3423_s0 + $0x1c0] ss:$8 sps:$4 sm:$0xff]   ;;  %v2079_v62 = vld [vmem:[%s3423_s0 + $0xd4] ss:$8 sps:$4 sm:$0xff]   ;;  %v2111_v1 = vld [vmem:[%s3423_s0 + $0x1d0] ss:$8 sps:$4 sm:$0xff]  }
  0x16   :  { %550 = vmatpush1.bf16.msra.mxu0 %v2018_v7  ;;  %2008 = vmatpush1.bf16.msra.mxu1 %v2018_v7  ;;  %v2109_v63 = vld [vmem:[%s3423_s0 + $0x1d4] ss:$8 sps:$4 sm:$0xff]   ;;  %v2085_v2 = vld [vmem:[%s3423_s0 + $0xe4] ss:$8 sps:$4 sm:$0xff]   ;;  %v2087_v4 = vld [vmem:[%s3423_s0 + $0xe0] ss:$8 sps:$4 sm:$0xff]  }
  0x17   :  { %551 = vmatprep.subr.bf16.mxu0 %v2120_v0  ;;  %2000 = vmatprep.subr.bf16.mxu1 %v2120_v0  ;;  %v2112_v3 = vld [vmem:[%s3423_s0 + $0x1e4] ss:$8 sps:$4 sm:$0xff]   ;;  %v2114_v5 = vld [vmem:[%s3423_s0 + $0x1e0] ss:$8 sps:$4 sm:$0xff]   ;;  %v2091_v6 = vld [vmem:[%s3423_s0 + $0xf4] ss:$8 sps:$4 sm:$0xff]  }
  0x18   :  { %v2115_v7 = vld [vmem:[%s3423_s0 + $0x1f4] ss:$8 sps:$4 sm:$0xff]   ;;  %v2093_v8 = vld [vmem:[%s3423_s0 + $0xf0] ss:$8 sps:$4 sm:$0xff]  }
  0x1a   :  { %552 = vmatpush1.bf16.msra.mxu0 %v2019_v9  ;;  %2009 = vmatpush1.bf16.msra.mxu1 %v2019_v9  ;;  %v2117_v9 = vld [vmem:[%s3423_s0 + $0x1f0] ss:$8 sps:$4 sm:$0xff]  }
  0x1b   :  { %553 = vmatprep.subr.bf16.mxu0 %v2120_v0  ;;  %2001 = vmatprep.subr.bf16.mxu1 %v2120_v0 }
  0x1e   :  { %554 = vmatpush1.bf16.msra.mxu0 %v2020_v10  ;;  %2010 = vmatpush1.bf16.msra.mxu1 %v2020_v10 }
  0x1f   :  { %569 = vmatprep.subr.bf16.mxu0 %v2120_v0  ;;  %2002 = vmatprep.subr.bf16.mxu1 %v2120_v0  ;;  %v2081_v0 = vld [vmem:[%s3423_s0 + $0xd0] ss:$8 sps:$4 sm:$0xff]  }
  0x22   :  { %570 = vmatpush2.bf16.msra.mxu0 %v2021_v11  ;;  %2011 = vmatpush2.bf16.msra.mxu1 %v2021_v11 }
  0x25   :  { %572 = vmatmul.mubr.bf16.vlgmr.msra.gmra.mxu0 %v2022_v12  ;;  %700 = vmatmul.mubr.bf16.vlgmr.msra.gmra.mxu1 %v2046_v14 }
  0x26   :  { %1644 = vmatprep.mubr.msk.bf16.mxu0 %vm442_vm0, %v2025_v13  ;;  %1660 = vmatprep.mubr.msk.bf16.mxu1 %vm442_vm0, %v2052_v15 }
  0x2d   :  { %580 = vmatmul.mubr.bf16.gmra.mxu0 %v2027_v16  ;;  %708 = vmatmul.mubr.bf16.gmra.mxu1 %v2054_v18 }
  0x2e   :  { %1645 = vmatprep.mubr.msk.bf16.mxu0 %vm442_vm0, %v2028_v17  ;;  %1661 = vmatprep.mubr.msk.bf16.mxu1 %vm442_vm0, %v2058_v19 }
  0x35   :  { %588 = vmatmul.mubr.bf16.gmra.mxu0 %v2030_v20  ;;  %716 = vmatmul.mubr.bf16.gmra.mxu1 %v2060_v22 }
  0x36   :  { %1646 = vmatprep.mubr.msk.bf16.mxu0 %vm442_vm0, %v2031_v21  ;;  %1662 = vmatprep.mubr.msk.bf16.mxu1 %vm442_vm0, %v2064_v23 }
  0x3d   :  { %596 = vmatmul.mubr.bf16.gmra.mxu0 %v2033_v24  ;;  %724 = vmatmul.mubr.bf16.gmra.mxu1 %v2066_v25 }
  0x3e   :  { %1647 = vmatprep.mubr.msk.bf16.mxu0 %vm442_vm0, %v2034_v26  ;;  %1663 = vmatprep.mubr.msk.bf16.mxu1 %vm442_vm0, %v2070_v27 }
  0x45   :  { %604 = vmatmul.mubr.bf16.gmra.mxu0 %v2036_v28  ;;  %732 = vmatmul.mubr.bf16.gmra.mxu1 %v2072_v29 }
  0x46   :  { %1648 = vmatprep.mubr.msk.bf16.mxu0 %vm442_vm0, %v2037_v30  ;;  %1664 = vmatprep.mubr.msk.bf16.mxu1 %vm442_vm0, %v2076_v31 }
  0x4d   :  { %612 = vmatmul.mubr.bf16.gmra.mxu0 %v2039_v32  ;;  %740 = vmatmul.mubr.bf16.gmra.mxu1 %v2078_v33 }
  0x4e   :  { %1649 = vmatprep.mubr.msk.bf16.mxu0 %vm442_vm0, %v2040_v34  ;;  %1665 = vmatprep.mubr.msk.bf16.mxu1 %vm442_vm0, %v2082_v35 }
  0x55   :  { %620 = vmatmul.mubr.bf16.gmra.mxu0 %v2042_v36  ;;  %748 = vmatmul.mubr.bf16.gmra.mxu1 %v2084_v37 }
  0x56   :  { %1650 = vmatprep.mubr.msk.bf16.mxu0 %vm442_vm0, %v2043_v38  ;;  %1666 = vmatprep.mubr.msk.bf16.mxu1 %vm442_vm0, %v2088_v39 }
  0x5d   :  { %628 = vmatmul.mubr.bf16.gmra.mxu0 %v2045_v40  ;;  %756 = vmatmul.mubr.bf16.gmra.mxu1 %v2090_v41 }
  0x5e   :  { %1651 = vmatprep.mubr.msk.bf16.mxu0 %vm442_vm0, %v2049_v42  ;;  %1667 = vmatprep.mubr.msk.bf16.mxu1 %vm442_vm0, %v2094_v43 }
  0x65   :  { %636 = vmatmul.mubr.bf16.gmra.mxu0 %v2051_v44  ;;  %764 = vmatmul.mubr.bf16.gmra.mxu1 %v2096_v45 }
  0x66   :  { %1652 = vmatprep.mubr.msk.bf16.mxu0 %vm442_vm0, %v2055_v46  ;;  %1668 = vmatprep.mubr.msk.bf16.mxu1 %vm442_vm0, %v2097_v47 }
  0x6d   :  { %644 = vmatmul.mubr.bf16.gmra.mxu0 %v2057_v48  ;;  %772 = vmatmul.mubr.bf16.gmra.mxu1 %v2099_v49 }
  0x6e   :  { %1653 = vmatprep.mubr.msk.bf16.mxu0 %vm442_vm0, %v2061_v50  ;;  %1669 = vmatprep.mubr.msk.bf16.mxu1 %vm442_vm0, %v2100_v51 }
  0x75   :  { %652 = vmatmul.mubr.bf16.gmra.mxu0 %v2063_v52  ;;  %780 = vmatmul.mubr.bf16.gmra.mxu1 %v2102_v53 }
  0x76   :  { %1654 = vmatprep.mubr.msk.bf16.mxu0 %vm442_vm0, %v2067_v54  ;;  %1670 = vmatprep.mubr.msk.bf16.mxu1 %vm442_vm0, %v2103_v55 }
  0x7d   :  { %660 = vmatmul.mubr.bf16.gmra.mxu0 %v2069_v56  ;;  %788 = vmatmul.mubr.bf16.gmra.mxu1 %v2105_v57 }
  0x7e   :  { %1655 = vmatprep.mubr.msk.bf16.mxu0 %vm442_vm0, %v2073_v58  ;;  %1671 = vmatprep.mubr.msk.bf16.mxu1 %vm442_vm0, %v2106_v59 }
  0x85   :  { %668 = vmatmul.mubr.bf16.gmra.mxu0 %v2075_v60  ;;  %796 = vmatmul.mubr.bf16.gmra.mxu1 %v2108_v61 }
  0x86   :  { %1656 = vmatprep.mubr.msk.bf16.mxu0 %vm442_vm0, %v2079_v62  ;;  %1672 = vmatprep.mubr.msk.bf16.mxu1 %vm442_vm0, %v2109_v63 }
  0x8d   :  { %676 = vmatmul.mubr.bf16.gmra.mxu0 %v2081_v0  ;;  %804 = vmatmul.mubr.bf16.gmra.mxu1 %v2111_v1 }
  0x8e   :  { %1657 = vmatprep.mubr.msk.bf16.mxu0 %vm442_vm0, %v2085_v2  ;;  %1673 = vmatprep.mubr.msk.bf16.mxu1 %vm442_vm0, %v2112_v3 }
  0x95   :  { %684 = vmatmul.mubr.bf16.gmra.mxu0 %v2087_v4  ;;  %812 = vmatmul.mubr.bf16.gmra.mxu1 %v2114_v5 }
  0x96   :  { %1658 = vmatprep.mubr.msk.bf16.mxu0 %vm442_vm0, %v2091_v6  ;;  %1674 = vmatprep.mubr.msk.bf16.mxu1 %vm442_vm0, %v2115_v7 }
  0x9d   :  { %692 = vmatmul.mubr.bf16.gmra.mxu0 %v2093_v8  ;;  %820 = vmatmul.mubr.bf16.gmra.mxu1 %v2117_v9 }
  0xe5   :  { %v2397_v10 = vpop.f32.mrf.mxu0  ;;  %v2399_v11 = vpop.f32.mrf.mxu1 }
  0xe7   :  { %v575_v12 = vpop.f32.mrf.mxu0  ;;  %v703_v13 = vpop.f32.mrf.mxu1 }
  0xe9   :  { %v2401_v14 = vpop.f32.mrf.mxu0  ;;  %v2403_v15 = vpop.f32.mrf.mxu1 }
  0xea   :  { %v898_v12 = vmul.f32 %v2401_v14, %v2401_v14 }
  0xeb   :  { %v578_v16 = vpop.f32.mrf.mxu0  ;;  %v706_v17 = vpop.f32.mrf.mxu1 }
  0xec   :  { %v897_v17 = vmul.f32 %v2397_v10, %v2397_v10 }
  0xed   :  { %v2405_v18 = vpop.f32.mrf.mxu0  ;;  %v2407_v19 = vpop.f32.mrf.mxu1 }
  0xef   :  { %v583_v20 = vpop.f32.mrf.mxu0  ;;  %v711_v21 = vpop.f32.mrf.mxu1 }
  0xf0   :  { %v828_v20 = vadd.f32 %v2401_v14, %v2397_v10  ;;  %v899_v21 = vmul.f32 %v2405_v18, %v2405_v18 }
  0xf1   :  { %v2409_v22 = vpop.f32.mrf.mxu0  ;;  %v2411_v23 = vpop.f32.mrf.mxu1 }
  0xf3   :  { %v586_v24 = vpop.f32.mrf.mxu0  ;;  %v714_v25 = vpop.f32.mrf.mxu1 }
  0xf5   :  { %v2413_v26 = vpop.f32.mrf.mxu0  ;;  %v2415_v27 = vpop.f32.mrf.mxu1 }
  0xf7   :  { %v591_v28 = vpop.f32.mrf.mxu0  ;;  %v719_v29 = vpop.f32.mrf.mxu1 }
  0xf8   :  { %v961_v28 = vadd.f32 %v898_v12, %v897_v17  ;;  %v829_v29 = vadd.f32 %v828_v20, %v2405_v18 }
  0xf9   :  { %v2417_v30 = vpop.f32.mrf.mxu0  ;;  %v2419_v31 = vpop.f32.mrf.mxu1 }
  0xfb   :  { %v594_v32 = vpop.f32.mrf.mxu0  ;;  %v722_v33 = vpop.f32.mrf.mxu1 }
  0xfc   :  { %v900_v32 = vmul.f32 %v2409_v22, %v2409_v22 }
  0xfd   :  { %v2421_v34 = vpop.f32.mrf.mxu0  ;;  %v2423_v35 = vpop.f32.mrf.mxu1 }
  0xff   :  { %v599_v36 = vpop.f32.mrf.mxu0  ;;  %v727_v37 = vpop.f32.mrf.mxu1 }
 0x100   :  { %v962_v37 = vadd.f32 %v961_v28, %v899_v21 }
 0x101   :  { %v2425_v38 = vpop.f32.mrf.mxu0  ;;  %v2427_v39 = vpop.f32.mrf.mxu1 }
 0x103   :  { %v602_v40 = vpop.f32.mrf.mxu0  ;;  %v730_v41 = vpop.f32.mrf.mxu1 }
 0x104   :  { %v830_v40 = vadd.f32 %v829_v29, %v2409_v22  ;;  %v901_v41 = vmul.f32 %v2413_v26, %v2413_v26 }
 0x105   :  { %v2429_v42 = vpop.f32.mrf.mxu0  ;;  %v2431_v43 = vpop.f32.mrf.mxu1 }
 0x106   :  { %v905_v21 = vmul.f32 %v2429_v42, %v2429_v42 }
 0x107   :  { %v607_v44 = vpop.f32.mrf.mxu0  ;;  %v735_v45 = vpop.f32.mrf.mxu1 }
 0x109   :  { %v2433_v46 = vpop.f32.mrf.mxu0  ;;  %v2435_v47 = vpop.f32.mrf.mxu1 }
 0x10b   :  { %v610_v48 = vpop.f32.mrf.mxu0  ;;  %v738_v49 = vpop.f32.mrf.mxu1 }
 0x10c   :  { %v963_v48 = vadd.f32 %v962_v37, %v900_v32  ;;  %v831_v49 = vadd.f32 %v830_v40, %v2413_v26  ;;  %v906_v32 = vmul.f32 %v2433_v46, %v2433_v46 }
 0x10d   :  { %v2437_v50 = vpop.f32.mrf.mxu0  ;;  %v2439_v51 = vpop.f32.mrf.mxu1 }
 0x10f   :  { %v615_v52 = vpop.f32.mrf.mxu0  ;;  %v743_v53 = vpop.f32.mrf.mxu1 }
 0x110   :  { %v902_v52 = vmul.f32 %v2417_v30, %v2417_v30 }
 0x111   :  { %v2441_v54 = vpop.f32.mrf.mxu0  ;;  %v2443_v55 = vpop.f32.mrf.mxu1 }
 0x113   :  { %v618_v56 = vpop.f32.mrf.mxu0  ;;  %v746_v57 = vpop.f32.mrf.mxu1 }
 0x114   :  { %v964_v57 = vadd.f32 %v963_v48, %v901_v41 }
 0x115   :  { %v2445_v58 = vpop.f32.mrf.mxu0  ;;  %v2447_v59 = vpop.f32.mrf.mxu1 }
 0x117   :  { %v623_v60 = vpop.f32.mrf.mxu0  ;;  %v751_v61 = vpop.f32.mrf.mxu1 }
 0x118   :  { %v832_v60 = vadd.f32 %v831_v49, %v2417_v30  ;;  %v903_v61 = vmul.f32 %v2421_v34, %v2421_v34 }
 0x119   :  { %v2449_v62 = vpop.f32.mrf.mxu0  ;;  %v2451_v63 = vpop.f32.mrf.mxu1 }
 0x11b   :  { %v626_v0 = vpop.f32.mrf.mxu0  ;;  %v754_v1 = vpop.f32.mrf.mxu1 }
 0x11d   :  { %v2453_v2 = vpop.f32.mrf.mxu0  ;;  %v2455_v3 = vpop.f32.mrf.mxu1 }
 0x11f   :  { %v631_v4 = vpop.f32.mrf.mxu0  ;;  %v759_v5 = vpop.f32.mrf.mxu1 }
 0x120   :  { %v965_v4 = vadd.f32 %v964_v57, %v902_v52  ;;  %v833_v5 = vadd.f32 %v832_v60, %v2421_v34  ;;  %v908_v60 = vmul.f32 %v2441_v54, %v2441_v54 }
 0x121   :  { %v2457_v6 = vpop.f32.mrf.mxu0  ;;  %v2459_v7 = vpop.f32.mrf.mxu1 }
 0x122   :  { %v966_v17 = vadd.f32 %v965_v4, %v903_v61  ;;  %v834_v20 = vadd.f32 %v833_v5, %v2425_v38  ;;  %v909_v5 = vmul.f32 %v2445_v58, %v2445_v58 }
 0x123   :  { %v634_v8 = vpop.f32.mrf.mxu0  ;;  %v762_v9 = vpop.f32.mrf.mxu1 }
 0x124   :  { %v904_v8 = vmul.f32 %v2425_v38, %v2425_v38  ;;  %v835_v29 = vadd.f32 %v834_v20, %v2429_v42 }
 0x125   :  { %v2463_v13 = vpop.f32.mrf.mxu0  ;;  %v2465_v16 = vpop.f32.mrf.mxu1 }
 0x126   :  { %3456 = vst [vmem:[#allocation2_spill] sm:$0xff] %v2463_v13  ;;  %v967_v28 = vadd.f32 %v966_v17, %v904_v8 }
 0x127   :  { %v639_v24 = vpop.f32.mrf.mxu0  ;;  %v767_v25 = vpop.f32.mrf.mxu1 }
 0x128   :  { %v968_v41 = vadd.f32 %v967_v28, %v905_v21 }
 0x129   :  { %v2476_v33 = vpop.f32.mrf.mxu0  ;;  %v2478_v36 = vpop.f32.mrf.mxu1 }
 0x12a   :  { %3457 = vst [vmem:[#allocation3_spill] sm:$0xff] %v2476_v33  ;;  %v969_v52 = vadd.f32 %v968_v41, %v906_v32  ;;  %v911_v41 = vmul.f32 %v2453_v2, %v2453_v2 }
 0x12b   :  { %v642_v44 = vpop.f32.mrf.mxu0  ;;  %v770_v45 = vpop.f32.mrf.mxu1 }
 0x12c   :  { %v836_v44 = vadd.f32 %v835_v29, %v2433_v46  ;;  %v907_v45 = vmul.f32 %v2437_v50, %v2437_v50 }
 0x12d   :  { %v2486_v53 = vpop.f32.mrf.mxu0  ;;  %v2488_v56 = vpop.f32.mrf.mxu1 }
 0x12e   :  { %3458 = vst [vmem:[#allocation4_spill] sm:$0xff] %v2486_v53  ;;  %v837_v57 = vadd.f32 %v836_v44, %v2437_v50 }
 0x12f   :  { %v647_v0 = vpop.f32.mrf.mxu0  ;;  %v775_v1 = vpop.f32.mrf.mxu1 }
 0x130   :  { %v970_v1 = vadd.f32 %v969_v52, %v907_v45  ;;  %v838_v4 = vadd.f32 %v837_v57, %v2441_v54  ;;  %v912_v52 = vmul.f32 %v2457_v6, %v2457_v6 }
 0x131   :  { %v2496_v9 = vpop.f32.mrf.mxu0  ;;  %v2498_v12 = vpop.f32.mrf.mxu1 }
 0x132   :  { %3459 = vst [vmem:[#allocation5_spill] sm:$0xff] %v2496_v9  ;;  %v971_v20 = vadd.f32 %v970_v1, %v908_v60  ;;  %v839_v21 = vadd.f32 %v838_v4, %v2445_v58 }
 0x133   :  { %v650_v24 = vpop.f32.mrf.mxu0  ;;  %v778_v25 = vpop.f32.mrf.mxu1 }
 0x134   :  { %v910_v24 = vmul.f32 %v2449_v62, %v2449_v62  ;;  %v972_v29 = vadd.f32 %v971_v20, %v909_v5  ;;  %v840_v32 = vadd.f32 %v839_v21, %v2449_v62  ;;  %v913_v5 = vmul.f32 %v2463_v13, %v2463_v13 }
 0x135   :  { %v2506_v37 = vpop.f32.mrf.mxu0  ;;  %v2508_v40 = vpop.f32.mrf.mxu1 }
 0x136   :  { %3460 = vst [vmem:[#allocation6_spill] sm:$0xff] %v2506_v37 }
 0x137   :  { %v655_v48 = vpop.f32.mrf.mxu0  ;;  %v783_v49 = vpop.f32.mrf.mxu1 }
 0x138   :  { %v973_v48 = vadd.f32 %v972_v29, %v910_v24  ;;  %v841_v49 = vadd.f32 %v840_v32, %v2453_v2  ;;  %v914_v24 = vmul.f32 %v2476_v33, %v2476_v33 }
 0x139   :  { %v2516_v61 = vpop.f32.mrf.mxu0  ;;  %v2518_v0 = vpop.f32.mrf.mxu1 }
 0x13a   :  { %3461 = vst [vmem:[#allocation7_spill] sm:$0xff] %v2516_v61  ;;  %v974_v1 = vadd.f32 %v973_v48, %v911_v41  ;;  %v842_v4 = vadd.f32 %v841_v49, %v2457_v6 }
 0x13b   :  { %v658_v8 = vpop.f32.mrf.mxu0  ;;  %v786_v17 = vpop.f32.mrf.mxu1 }
 0x13c   :  { %v975_v20 = vadd.f32 %v974_v1, %v912_v52  ;;  %v843_v21 = vadd.f32 %v842_v4, %v2463_v13  ;;  %v916_v1 = vmul.f32 %v2496_v9, %v2496_v9 }
 0x13d   :  { %v2526_v25 = vpop.f32.mrf.mxu0  ;;  %v2528_v28 = vpop.f32.mrf.mxu1 }
 0x13e   :  { %3462 = vst [vmem:[#allocation8_spill] sm:$0xff] %v2526_v25  ;;  %v844_v41 = vadd.f32 %v843_v21, %v2476_v33 }
 0x13f   :  { %v663_v44 = vpop.f32.mrf.mxu0  ;;  %v791_v45 = vpop.f32.mrf.mxu1 }
 0x140   :  { %v976_v44 = vadd.f32 %v975_v20, %v913_v5  ;;  %v915_v45 = vmul.f32 %v2486_v53, %v2486_v53  ;;  %v845_v52 = vadd.f32 %v844_v41, %v2486_v53  ;;  %v917_v20 = vmul.f32 %v2506_v37, %v2506_v37 }
 0x141   :  { %v2536_v57 = vpop.f32.mrf.mxu0  ;;  %v2538_v60 = vpop.f32.mrf.mxu1 }
 0x142   :  { %3463 = vst [vmem:[#allocation9_spill] sm:$0xff] %v2536_v57  ;;  %v846_v5 = vadd.f32 %v845_v52, %v2496_v9 }
 0x143   :  { %v666_v8 = vpop.f32.mrf.mxu0  ;;  %v794_v17 = vpop.f32.mrf.mxu1 }
 0x144   :  { %v977_v8 = vadd.f32 %v976_v44, %v914_v24  ;;  %v847_v24 = vadd.f32 %v846_v5, %v2506_v37  ;;  %v918_v44 = vmul.f32 %v2516_v61, %v2516_v61 }
 0x145   :  { %v2546_v29 = vpop.f32.mrf.mxu0  ;;  %v2548_v32 = vpop.f32.mrf.mxu1 }
 0x146   :  { %3464 = vst [vmem:[#allocation10_spill] sm:$0xff] %v2546_v29  ;;  %3465 = vst [vmem:[#allocation11_spill] sm:$0xff] %v2548_v32  ;;  %v978_v13 = vadd.f32 %v977_v8, %v915_v45  ;;  %v848_v45 = vadd.f32 %v847_v24, %v2516_v61  ;;  %v919_v8 = vmul.f32 %v2526_v25, %v2526_v25 }
 0x147   :  { %v671_v48 = vpop.f32.mrf.mxu0  ;;  %v799_v49 = vpop.f32.mrf.mxu1 }
 0x148   :  { %v979_v48 = vadd.f32 %v978_v13, %v916_v1  ;;  %v849_v13 = vadd.f32 %v848_v45, %v2526_v25 }
 0x149   :  { %v2556_v4 = vpop.f32.mrf.mxu0  ;;  %v2558_v17 = vpop.f32.mrf.mxu1 }
 0x14a   :  { %3466 = vst [vmem:[#allocation12_spill] sm:$0xff] %v2556_v4  ;;  %3467 = vst [vmem:[#allocation13_spill] sm:$0xff] %v2558_v17  ;;  %v980_v53 = vadd.f32 %v979_v48, %v917_v20  ;;  %v850_v20 = vadd.f32 %v849_v13, %v2536_v57  ;;  %v921_v48 = vmul.f32 %v2546_v29, %v2546_v29 }
 0x14b   :  { %v674_v21 = vpop.f32.mrf.mxu0  ;;  %v802_v33 = vpop.f32.mrf.mxu1 }
 0x14c   :  { %v981_v21 = vadd.f32 %v980_v53, %v918_v44  ;;  %v920_v33 = vmul.f32 %v2536_v57, %v2536_v57  ;;  %v851_v53 = vadd.f32 %v850_v20, %v2546_v29 }
 0x14d   :  { %v2566_v41 = vpop.f32.mrf.mxu0  ;;  %v2568_v49 = vpop.f32.mrf.mxu1 }
 0x14e   :  { %3468 = vst [vmem:[#allocation14_spill] sm:$0xff] %v2566_v41  ;;  %3469 = vst [vmem:[#allocation15_spill] sm:$0xff] %v2568_v49  ;;  %v982_v37 = vadd.f32 %v981_v21, %v919_v8  ;;  %v852_v8 = vadd.f32 %v851_v53, %v2556_v4  ;;  %v923_v21 = vmul.f32 %v2566_v41, %v2566_v41 }
 0x14f   :  { %v679_v52 = vpop.f32.mrf.mxu0  ;;  %v807_v9 = vpop.f32.mrf.mxu1 }
 0x150   :  { %v983_v52 = vadd.f32 %v982_v37, %v920_v33  ;;  %v922_v9 = vmul.f32 %v2556_v4, %v2556_v4  ;;  %v853_v37 = vadd.f32 %v852_v8, %v2566_v41 }
 0x151   :  { %v2576_v1 = vpop.f32.mrf.mxu0  ;;  %v2578_v5 = vpop.f32.mrf.mxu1 }
 0x152   :  { %3470 = vst [vmem:[#allocation16_spill] sm:$0xff] %v2576_v1  ;;  %3471 = vst [vmem:[#allocation17_spill] sm:$0xff] %v2578_v5  ;;  %v984_v25 = vadd.f32 %v983_v52, %v921_v48  ;;  %v854_v48 = vadd.f32 %v853_v37, %v2576_v1 }
 0x153   :  { %v682_v24 = vpop.f32.mrf.mxu0  ;;  %v810_v61 = vpop.f32.mrf.mxu1 }
 0x154   :  { %v985_v24 = vadd.f32 %v984_v25, %v922_v9  ;;  %v924_v61 = vmul.f32 %v2576_v1, %v2576_v1 }
 0x155   :  { %v2586_v44 = vpop.f32.mrf.mxu0  ;;  %v2588_v45 = vpop.f32.mrf.mxu1 }
 0x156   :  { %3472 = vst [vmem:[#allocation18_spill] sm:$0xff] %v2586_v44  ;;  %3473 = vst [vmem:[#allocation19_spill] sm:$0xff] %v2588_v45  ;;  %v986_v29 = vadd.f32 %v985_v24, %v923_v21  ;;  %v925_v52 = vmul.f32 %v2586_v44, %v2586_v44  ;;  %v855_v25 = vadd.f32 %v854_v48, %v2586_v44 }
 0x157   :  { %v687_v13 = vpop.f32.mrf.mxu0  ;;  %v815_v57 = vpop.f32.mrf.mxu1 }
 0x158   :  { %v987_v13 = vadd.f32 %v986_v29, %v924_v61 }
 0x159   :  { %v2596_v33 = vpop.f32.mrf.mxu0  ;;  %v2598_v20 = vpop.f32.mrf.mxu1 }
 0x15a   :  { %3474 = vst [vmem:[#allocation20_spill] sm:$0xff] %v2596_v33  ;;  %3475 = vst [vmem:[#allocation21_spill] sm:$0xff] %v2598_v20  ;;  %v926_v57 = vmul.f32 %v2596_v33, %v2596_v33  ;;  %v988_v41 = vadd.f32 %v987_v13, %v925_v52  ;;  %v856_v21 = vadd.f32 %v855_v25, %v2596_v33 }
 0x15b   :  { %v690_v53 = vpop.f32.mrf.mxu0  ;;  %v818_v4 = vpop.f32.mrf.mxu1  ;;  %v929_v33 = vmul.f32 %v2399_v11, %v2399_v11 }
 0x15c   :  { %v989_v53 = vadd.f32 %v988_v41, %v926_v57  ;;  %v930_v57 = vmul.f32 %v2403_v15, %v2403_v15 }
 0x15d   :  { %v2606_v9 = vpop.f32.mrf.mxu0  ;;  %v2608_v8 = vpop.f32.mrf.mxu1 }
 0x15e   :  { %3476 = vst [vmem:[#allocation22_spill] sm:$0xff] %v2608_v8  ;;  %v927_v24 = vmul.f32 %v2606_v9, %v2606_v9  ;;  %v857_v29 = vadd.f32 %v856_v21, %v2606_v9 }
 0x15f   :  { %v695_v37 = vpop.f32.mrf.mxu0  ;;  %v823_v1 = vpop.f32.mrf.mxu1 }
 0x160   :  { %v990_v48 = vadd.f32 %v989_v53, %v927_v24  ;;  %v931_v24 = vmul.f32 %v2407_v19, %v2407_v19 }
 0x161   :  { %v2614_v4 = vpop.f32.mrf.mxu0  ;;  %v2616_v61 = vpop.f32.mrf.mxu1 }
 0x162   :  { %3477 = vst [vmem:[#allocation23_spill] sm:$0xff] %v2614_v4  ;;  %3478 = vst [vmem:[#allocation24_spill] sm:$0xff] %v2616_v61  ;;  %v858_v44 = vadd.f32 %v857_v29, %v2614_v4  ;;  %v928_v52 = vmul.f32 %v2614_v4, %v2614_v4 }
 0x163   :  { %v698_v13 = vpop.f32.mrf.mxu0  ;;  %v826_v25 = vpop.f32.mrf.mxu1 }
 0x164   :  { %v859_v1 = vadd.f32 %v858_v44, %v2399_v11  ;;  %v991_v41 = vadd.f32 %v990_v48, %v928_v52  ;;  %v932_v13 = vmul.f32 %v2411_v23, %v2411_v23  ;;  %v933_v44 = vmul.f32 %v2415_v27, %v2415_v27 }
 0x166   :  { %v860_v21 = vadd.f32 %v859_v1, %v2403_v15  ;;  %v992_v37 = vadd.f32 %v991_v41, %v929_v33  ;;  %v934_v33 = vmul.f32 %v2419_v31, %v2419_v31 }
 0x168   :  { %v861_v53 = vadd.f32 %v860_v21, %v2407_v19  ;;  %v993_v29 = vadd.f32 %v992_v37, %v930_v57  ;;  %v935_v57 = vmul.f32 %v2423_v35, %v2423_v35 }
 0x16a   :  { %v862_v25 = vadd.f32 %v861_v53, %v2411_v23  ;;  %v994_v4 = vadd.f32 %v993_v29, %v931_v24  ;;  %v936_v24 = vmul.f32 %v2427_v39, %v2427_v39 }
 0x16c   :  { %v863_v48 = vadd.f32 %v862_v25, %v2415_v27  ;;  %v995_v52 = vadd.f32 %v994_v4, %v932_v13  ;;  %v937_v4 = vmul.f32 %v2431_v43, %v2431_v43 }
 0x16e   :  { %v864_v1 = vadd.f32 %v863_v48, %v2419_v31  ;;  %v996_v41 = vadd.f32 %v995_v52, %v933_v44  ;;  %v938_v44 = vmul.f32 %v2435_v47, %v2435_v47 }
 0x170   :  { %v865_v21 = vadd.f32 %v864_v1, %v2423_v35  ;;  %v997_v37 = vadd.f32 %v996_v41, %v934_v33  ;;  %v939_v33 = vmul.f32 %v2439_v51, %v2439_v51 }
 0x172   :  { %v866_v53 = vadd.f32 %v865_v21, %v2427_v39  ;;  %v998_v29 = vadd.f32 %v997_v37, %v935_v57  ;;  %v940_v57 = vmul.f32 %v2443_v55, %v2443_v55 }
 0x174   :  { %v999_v13 = vadd.f32 %v998_v29, %v936_v24  ;;  %v867_v25 = vadd.f32 %v866_v53, %v2431_v43  ;;  %v941_v24 = vmul.f32 %v2447_v59, %v2447_v59 }
 0x176   :  { %v868_v48 = vadd.f32 %v867_v25, %v2435_v47  ;;  %v1000_v52 = vadd.f32 %v999_v13, %v937_v4  ;;  %v942_v4 = vmul.f32 %v2451_v63, %v2451_v63 }
 0x178   :  { %v869_v1 = vadd.f32 %v868_v48, %v2439_v51  ;;  %v1001_v41 = vadd.f32 %v1000_v52, %v938_v44  ;;  %v943_v44 = vmul.f32 %v2455_v3, %v2455_v3 }
 0x17a   :  { %v870_v21 = vadd.f32 %v869_v1, %v2443_v55  ;;  %v1002_v37 = vadd.f32 %v1001_v41, %v939_v33  ;;  %v944_v33 = vmul.f32 %v2459_v7, %v2459_v7 }
 0x17c   :  { %v871_v53 = vadd.f32 %v870_v21, %v2447_v59  ;;  %v1003_v29 = vadd.f32 %v1002_v37, %v940_v57  ;;  %v945_v57 = vmul.f32 %v2465_v16, %v2465_v16 }
 0x17e   :  { %v872_v13 = vadd.f32 %v871_v53, %v2451_v63  ;;  %v1004_v25 = vadd.f32 %v1003_v29, %v941_v24  ;;  %v946_v53 = vmul.f32 %v2478_v36, %v2478_v36 }
 0x180   :  { %v873_v48 = vadd.f32 %v872_v13, %v2455_v3  ;;  %v1005_v52 = vadd.f32 %v1004_v25, %v942_v4  ;;  %v947_v25 = vmul.f32 %v2488_v56, %v2488_v56 }
 0x182   :  { %v874_v1 = vadd.f32 %v873_v48, %v2459_v7  ;;  %v1006_v41 = vadd.f32 %v1005_v52, %v943_v44  ;;  %v948_v52 = vmul.f32 %v2498_v12, %v2498_v12 }
 0x184   :  { %v875_v21 = vadd.f32 %v874_v1, %v2465_v16  ;;  %v1007_v37 = vadd.f32 %v1006_v41, %v944_v33  ;;  %v949_v41 = vmul.f32 %v2508_v40, %v2508_v40 }
 0x186   :  { %v876_v24 = vadd.f32 %v875_v21, %v2478_v36  ;;  %v1008_v29 = vadd.f32 %v1007_v37, %v945_v57  ;;  %v950_v37 = vmul.f32 %v2518_v0, %v2518_v0 }
 0x188   :  { %v1009_v13 = vadd.f32 %v1008_v29, %v946_v53  ;;  %v877_v4 = vadd.f32 %v876_v24, %v2488_v56  ;;  %v951_v29 = vmul.f32 %v2528_v28, %v2528_v28 }
 0x18a   :  { %v1010_v48 = vadd.f32 %v1009_v13, %v947_v25  ;;  %v878_v44 = vadd.f32 %v877_v4, %v2498_v12  ;;  %v952_v25 = vmul.f32 %v2538_v60, %v2538_v60 }
 0x18c   :  { %v1011_v1 = vadd.f32 %v1010_v48, %v948_v52  ;;  %v879_v33 = vadd.f32 %v878_v44, %v2508_v40  ;;  %v953_v52 = vmul.f32 %v2548_v32, %v2548_v32 }
 0x18e   :  { %v1012_v21 = vadd.f32 %v1011_v1, %v949_v41  ;;  %v880_v57 = vadd.f32 %v879_v33, %v2518_v0  ;;  %v954_v41 = vmul.f32 %v2558_v17, %v2558_v17 }
 0x190   :  { %v1013_v24 = vadd.f32 %v1012_v21, %v950_v37  ;;  %v881_v53 = vadd.f32 %v880_v57, %v2528_v28  ;;  %v955_v37 = vmul.f32 %v2568_v49, %v2568_v49 }
 0x192   :  { %v1014_v13 = vadd.f32 %v1013_v24, %v951_v29  ;;  %v882_v4 = vadd.f32 %v881_v53, %v2538_v60  ;;  %v956_v29 = vmul.f32 %v2578_v5, %v2578_v5 }
 0x194   :  { %v1015_v48 = vadd.f32 %v1014_v13, %v952_v25  ;;  %v883_v44 = vadd.f32 %v882_v4, %v2548_v32  ;;  %v957_v25 = vmul.f32 %v2588_v45, %v2588_v45 }
 0x196   :  { %v1016_v1 = vadd.f32 %v1015_v48, %v953_v52  ;;  %v884_v33 = vadd.f32 %v883_v44, %v2558_v17  ;;  %v958_v52 = vmul.f32 %v2598_v20, %v2598_v20 }
 0x198   :  { %v1017_v21 = vadd.f32 %v1016_v1, %v954_v41  ;;  %v885_v57 = vadd.f32 %v884_v33, %v2568_v49  ;;  %v959_v41 = vmul.f32 %v2608_v8, %v2608_v8 }
 0x19a   :  { %v1018_v24 = vadd.f32 %v1017_v21, %v955_v37  ;;  %v886_v53 = vadd.f32 %v885_v57, %v2578_v5  ;;  %v960_v37 = vmul.f32 %v2616_v61, %v2616_v61 }
 0x19c   :  { %v1019_v13 = vadd.f32 %v1018_v24, %v956_v29  ;;  %v887_v4 = vadd.f32 %v886_v53, %v2588_v45 }
 0x19e   :  { %v1020_v48 = vadd.f32 %v1019_v13, %v957_v25  ;;  %v888_v44 = vadd.f32 %v887_v4, %v2598_v20 }
 0x1a0   :  { %v1021_v1 = vadd.f32 %v1020_v48, %v958_v52  ;;  %v889_v33 = vadd.f32 %v888_v44, %v2608_v8 }
 0x1a2   :  { %v1022_v21 = vadd.f32 %v1021_v1, %v959_v41  ;;  %v890_v57 = vadd.f32 %v889_v33, %v2616_v61  ;;  %v1043_v61 = vlaneseq }
 0x1a4   :  { %v891_v24 = vrot.slane %v890_v57, 4  ;;  %v1023_v53 = vadd.f32 %v1022_v21, %v960_v37  ;;  %v2717_v21 = vshrl.u32 %v1043_v61, 7 }
 0x1a6   :  { %v892_v29 = vadd.f32 %v891_v24, %v890_v57  ;;  %v1024_v13 = vrot.slane %v1023_v53, 4  ;;  %v1037_v57 = vld [vmem:[%s3424_s2] sm:$0x1]  ;;  %v3450_v37 = vsub.s32 0, %v2717_v21 }
 0x1a8   :  { %v893_v4 = vrot.slane %v892_v29, 2  ;;  %v1025_v25 = vadd.f32 %v1024_v13, %v1023_v53  ;;  %v3479_v13 = vld [vmem:[#allocation2_spill] sm:$0xff] }
 0x1aa   :  { %v894_v45 = vadd.f32 %v893_v4, %v892_v29  ;;  %v1026_v20 = vrot.slane %v1025_v25, 2  ;;  %v3480_v4 = vld [vmem:[#allocation3_spill] sm:$0xff] }
 0x1ac   :  { %v895_v48 = vrot.slane %v894_v45, 1  ;;  %v1027_v52 = vadd.f32 %v1026_v20, %v1025_v25  ;;  %v3481_v25 = vld [vmem:[#allocation4_spill] sm:$0xff] }
 0x1ae   :  { %v896_v44 = vadd.f32 %v895_v48, %v894_v45  ;;  %v1028_v5 = vrot.slane %v1027_v52, 1  ;;  %v3482_v48 = vld [vmem:[#allocation5_spill] sm:$0xff] }
 0x1b0   :  { %v1029_v49 = vadd.f32 %v1028_v5, %v1027_v52  ;;  %v1030_v8 = vmul.f32 0.001953125, %v896_v44  ;;  %v3483_v52 = vld [vmem:[#allocation6_spill] sm:$0xff]  ;;  %v3484_v44 = vld [vmem:[#allocation7_spill] sm:$0xff] }
 0x1b2   :  { %v1031_v1 = vmul.f32 0.001953125, %v1029_v49  ;;  %v1032_v41 = vmul.f32 %v1030_v8, %v1030_v8  ;;  %v2726_v49 = vld [vmem:[%s3425_s3] sm:$0x1] }
 0x1b4   :  { %v1033_v33 = vsub.f32 %v1031_v1, %v1032_v41  ;;  %v3485_v41 = vld [vmem:[#allocation8_spill] sm:$0xff] }
 0x1b6   :  { %v1034_v17 = vmax.f32 %v1033_v33, 0.0 }
 0x1b8   :  { %v1035_v32 = vadd.f32 1e-05, %v1034_v17 }
 0x1ba   :  { %2118 = vrsqrt.f32 %v1035_v32 }
 0x1c7   :  { %v2119_v20 = vpop.eup %2118 }
 0x1c8   :  { %v1038_v45 = vmul.f32 %v2119_v20, %v1037_v57  ;;  %v3486_v57 = vld [vmem:[#allocation9_spill] sm:$0xff] }
 0x1ca   :  { %v2728_v5 = vmul.f32 %v1038_v45, %v1030_v8  ;;  %v2732_v32 = vrot.slane %v1038_v45, %v3450_v37  ;;  %v3487_v45 = vld [vmem:[#allocation10_spill] sm:$0xff]  ;;  %v3493_v37 = vld [vmem:[#allocation23_spill] sm:$0xff] }
 0x1cc   :  { %v1041_v17 = vsub.f32 %v2726_v49, %v2728_v5  ;;  %v2738_v61 = vmul.f32 %v2732_v32, %v2397_v10  ;;  %v2742_v24 = vmul.f32 %v2732_v32, %v2401_v14  ;;  %v2746_v53 = vmul.f32 %v2732_v32, %v2405_v18  ;;  %v3488_v5 = vld [vmem:[#allocation12_spill] sm:$0xff] }
 0x1cd   :  { %v2750_v8 = vmul.f32 %v2732_v32, %v2409_v22  ;;  %v2754_v29 = vmul.f32 %v2732_v32, %v2413_v26  ;;  %v2758_v10 = vmul.f32 %v2732_v32, %v2417_v30  ;;  %v2762_v14 = vmul.f32 %v2732_v32, %v2421_v34 }
 0x1ce   :  { %v2766_v18 = vmul.f32 %v2732_v32, %v2425_v38  ;;  %v2770_v22 = vmul.f32 %v2732_v32, %v2429_v42  ;;  %v2774_v26 = vmul.f32 %v2732_v32, %v2433_v46  ;;  %v2778_v30 = vmul.f32 %v2732_v32, %v2437_v50 }
 0x1cf   :  { %v2782_v34 = vmul.f32 %v2732_v32, %v2441_v54  ;;  %v2786_v38 = vmul.f32 %v2732_v32, %v2445_v58  ;;  %v2790_v42 = vmul.f32 %v2732_v32, %v2449_v62  ;;  %v2794_v46 = vmul.f32 %v2732_v32, %v2453_v2 }
 0x1d0   :  { %v2798_v50 = vmul.f32 %v2732_v32, %v2457_v6  ;;  %v2802_v54 = vmul.f32 %v2732_v32, %v3479_v13  ;;  %v2806_v58 = vmul.f32 %v2732_v32, %v3480_v4  ;;  %v2810_v62 = vmul.f32 %v2732_v32, %v3481_v25  ;;  %v3489_v4 = vld [vmem:[#allocation14_spill] sm:$0xff] }
 0x1d1   :  { %v2814_v2 = vmul.f32 %v2732_v32, %v3482_v48  ;;  %v2818_v6 = vmul.f32 %v2732_v32, %v3483_v52  ;;  %v2822_v1 = vmul.f32 %v2732_v32, %v3484_v44  ;;  %v2826_v33 = vmul.f32 %v2732_v32, %v3485_v41  ;;  %v3490_v48 = vld [vmem:[#allocation16_spill] sm:$0xff]  ;;  %v3491_v44 = vld [vmem:[#allocation18_spill] sm:$0xff] }
 0x1d2   :  { %v2830_v20 = vmul.f32 %v2732_v32, %v3486_v57  ;;  %v2834_v49 = vmul.f32 %v2732_v32, %v3487_v45  ;;  %v2838_v13 = vmul.f32 %v2732_v32, %v3488_v5  ;;  %v2842_v25 = vmul.f32 %v2732_v32, %v3489_v4  ;;  %v3492_v57 = vld [vmem:[#allocation20_spill] sm:$0xff] }
 0x1d3   :  { %v2846_v52 = vmul.f32 %v2732_v32, %v3490_v48  ;;  %v2850_v41 = vmul.f32 %v2732_v32, %v3491_v44  ;;  %v2854_v45 = vmul.f32 %v2732_v32, %v3492_v57  ;;  %v2858_v5 = vmul.f32 %v2732_v32, %v2606_v9 }
 0x1d4   :  { %v2862_v4 = vmul.f32 %v2732_v32, %v3493_v37  ;;  %v2866_v48 = vmul.f32 %v2732_v32, %v2399_v11  ;;  %v2870_v44 = vmul.f32 %v2732_v32, %v2403_v15  ;;  %v2874_v57 = vmul.f32 %v2732_v32, %v2407_v19 }
 0x1d5   :  { %v2878_v9 = vmul.f32 %v2732_v32, %v2411_v23  ;;  %v2882_v37 = vmul.f32 %v2732_v32, %v2415_v27  ;;  %v2886_v11 = vmul.f32 %v2732_v32, %v2419_v31  ;;  %v2890_v15 = vmul.f32 %v2732_v32, %v2423_v35 }
 0x1d6   :  { %v2894_v19 = vmul.f32 %v2732_v32, %v2427_v39  ;;  %v2898_v23 = vmul.f32 %v2732_v32, %v2431_v43  ;;  %v2902_v27 = vmul.f32 %v2732_v32, %v2435_v47  ;;  %v2906_v31 = vmul.f32 %v2732_v32, %v2439_v51 }
 0x1d7   :  { %v2910_v35 = vmul.f32 %v2732_v32, %v2443_v55  ;;  %v2914_v39 = vmul.f32 %v2732_v32, %v2447_v59  ;;  %v2918_v43 = vmul.f32 %v2732_v32, %v2451_v63  ;;  %v2922_v47 = vmul.f32 %v2732_v32, %v2455_v3 }
 0x1d8   :  { %v2926_v51 = vmul.f32 %v2732_v32, %v2459_v7  ;;  %v2930_v55 = vmul.f32 %v2732_v32, %v2465_v16  ;;  %v2934_v59 = vmul.f32 %v2732_v32, %v2478_v36  ;;  %v2938_v63 = vmul.f32 %v2732_v32, %v2488_v56 }
 0x1d9   :  { %v2942_v3 = vmul.f32 %v2732_v32, %v2498_v12  ;;  %v2946_v7 = vmul.f32 %v2732_v32, %v2508_v40  ;;  %v2950_v16 = vmul.f32 %v2732_v32, %v2518_v0  ;;  %v2954_v36 = vmul.f32 %v2732_v32, %v2528_v28 }
 0x1da   :  { %3494 = vst [vmem:[#allocation2_spill] sm:$0xff] %v2938_v63  ;;  %v2958_v56 = vmul.f32 %v2732_v32, %v2538_v60  ;;  %v3500_v63 = vld [vmem:[#allocation11_spill] sm:$0xff] }
 0x1db   :  { %3495 = vst [vmem:[#allocation3_spill] sm:$0xff] %v2942_v3  ;;  %3496 = vst [vmem:[#allocation4_spill] sm:$0xff] %v2946_v7  ;;  %v2962_v12 = vmul.f32 %v2732_v32, %v3500_v63  ;;  %v3502_v3 = vld [vmem:[#allocation13_spill] sm:$0xff]  ;;  %v3504_v7 = vld [vmem:[#allocation15_spill] sm:$0xff] }
 0x1dc   :  { %3497 = vst [vmem:[#allocation5_spill] sm:$0xff] %v2950_v16  ;;  %3498 = vst [vmem:[#allocation6_spill] sm:$0xff] %v2954_v36  ;;  %v2966_v40 = vmul.f32 %v2732_v32, %v3502_v3  ;;  %v2970_v0 = vmul.f32 %v2732_v32, %v3504_v7  ;;  %v3506_v16 = vld [vmem:[#allocation17_spill] sm:$0xff]  ;;  %v3507_v36 = vsub.s32 0, %v2717_v21 }
 0x1dd   :  { %3499 = vst [vmem:[#allocation7_spill] sm:$0xff] %v2958_v56  ;;  %3501 = vst [vmem:[#allocation8_spill] sm:$0xff] %v2962_v12  ;;  %v2974_v28 = vmul.f32 %v2732_v32, %v3506_v16  ;;  %v3508_v56 = vld [vmem:[#allocation19_spill] sm:$0xff]  ;;  %v3509_v12 = vld [vmem:[#allocation21_spill] sm:$0xff] }
 0x1de   :  { %3503 = vst [vmem:[#allocation9_spill] sm:$0xff] %v2966_v40  ;;  %3505 = vst [vmem:[#allocation10_spill] sm:$0xff] %v2970_v0  ;;  %v2978_v60 = vrot.slane %v1041_v17, %v3507_v36  ;;  %v2982_v63 = vmul.f32 %v2732_v32, %v3508_v56  ;;  %v2986_v3 = vmul.f32 %v2732_v32, %v3509_v12  ;;  %v3510_v40 = vld [vmem:[#allocation22_spill] sm:$0xff]  ;;  %v3511_v0 = vld [vmem:[#allocation24_spill] sm:$0xff] }
 0x1df   :  { %v2990_v7 = vmul.f32 %v2732_v32, %v3510_v40  ;;  %v2994_v16 = vmul.f32 %v2732_v32, %v3511_v0 }
 0x1e0   :  { %v2998_v21 = vadd.f32 %v2978_v60, %v2738_v61  ;;  %v3002_v17 = vadd.f32 %v2978_v60, %v2742_v24  ;;  %v3006_v36 = vadd.f32 %v2978_v60, %v2746_v53  ;;  %v3010_v56 = vadd.f32 %v2978_v60, %v2750_v8 }
 0x1e1   :  { %v3014_v32 = vadd.f32 %v2978_v60, %v2754_v29  ;;  %v3018_v61 = vadd.f32 %v2978_v60, %v2758_v10  ;;  %v3022_v24 = vadd.f32 %v2978_v60, %v2762_v14  ;;  %v3026_v53 = vadd.f32 %v2978_v60, %v2766_v18  ;;  %v3520_v12 = vld [vmem:[#allocation2_spill] sm:$0xff] }
 0x1e2   :  { %3512 = vst [vmem:[#allocation12_spill] sm:$0xff] %v2998_v21  ;;  %3513 = vst [vmem:[#allocation14_spill] sm:$0xff] %v3002_v17  ;;  %v3030_v8 = vadd.f32 %v2978_v60, %v2770_v22  ;;  %v3034_v29 = vadd.f32 %v2978_v60, %v2774_v26  ;;  %v3038_v10 = vadd.f32 %v2978_v60, %v2778_v30  ;;  %v3522_v40 = vld [vmem:[#allocation3_spill] sm:$0xff]  ;;  %v3524_v0 = vld [vmem:[#allocation4_spill] sm:$0xff] }
 0x1e3   :  { %3514 = vst [vmem:[#allocation16_spill] sm:$0xff] %v3006_v36  ;;  %3515 = vst [vmem:[#allocation18_spill] sm:$0xff] %v3010_v56  ;;  %v3042_v14 = vadd.f32 %v2978_v60, %v2782_v34  ;;  %v3046_v18 = vadd.f32 %v2978_v60, %v2786_v38  ;;  %v3050_v22 = vadd.f32 %v2978_v60, %v2790_v42 }
 0x1e4   :  { %3516 = vst [vmem:[#allocation20_spill] sm:$0xff] %v3014_v32  ;;  %v3054_v26 = vadd.f32 %v2978_v60, %v2794_v46  ;;  %v3058_v30 = vadd.f32 %v2978_v60, %v2798_v50  ;;  %v3062_v34 = vadd.f32 %v2978_v60, %v2802_v54  ;;  %v3066_v38 = vadd.f32 %v2978_v60, %v2806_v58 }
 0x1e5   :  { %v3070_v42 = vadd.f32 %v2978_v60, %v2810_v62  ;;  %v3074_v46 = vadd.f32 %v2978_v60, %v2814_v2  ;;  %v3078_v50 = vadd.f32 %v2978_v60, %v2818_v6  ;;  %v3082_v54 = vadd.f32 %v2978_v60, %v2822_v1 }
 0x1e6   :  { %v3086_v58 = vadd.f32 %v2978_v60, %v2826_v33  ;;  %v3090_v62 = vadd.f32 %v2978_v60, %v2830_v20  ;;  %v3094_v2 = vadd.f32 %v2978_v60, %v2834_v49  ;;  %v3098_v6 = vadd.f32 %v2978_v60, %v2838_v13 }
 0x1e7   :  { %v3102_v1 = vadd.f32 %v2978_v60, %v2842_v25  ;;  %v3106_v33 = vadd.f32 %v2978_v60, %v2846_v52  ;;  %v3110_v20 = vadd.f32 %v2978_v60, %v2850_v41  ;;  %v3114_v49 = vadd.f32 %v2978_v60, %v2854_v45 }
 0x1e8   :  { %v3118_v13 = vadd.f32 %v2978_v60, %v2858_v5  ;;  %v3122_v25 = vadd.f32 %v2978_v60, %v2862_v4  ;;  %v3126_v52 = vadd.f32 %v2978_v60, %v2866_v48  ;;  %v3130_v41 = vadd.f32 %v2978_v60, %v2870_v44 }
 0x1e9   :  { %v3134_v45 = vadd.f32 %v2978_v60, %v2874_v57  ;;  %v3138_v5 = vadd.f32 %v2978_v60, %v2878_v9  ;;  %v3142_v4 = vadd.f32 %v2978_v60, %v2882_v37  ;;  %v3146_v48 = vadd.f32 %v2978_v60, %v2886_v11 }
 0x1ea   :  { %v3150_v44 = vadd.f32 %v2978_v60, %v2890_v15  ;;  %v3154_v57 = vadd.f32 %v2978_v60, %v2894_v19  ;;  %v3158_v9 = vadd.f32 %v2978_v60, %v2898_v23  ;;  %v3162_v37 = vadd.f32 %v2978_v60, %v2902_v27 }
 0x1eb   :  { %v3166_v11 = vadd.f32 %v2978_v60, %v2906_v31  ;;  %v3170_v15 = vadd.f32 %v2978_v60, %v2910_v35  ;;  %v3174_v19 = vadd.f32 %v2978_v60, %v2914_v39  ;;  %v3178_v23 = vadd.f32 %v2978_v60, %v2918_v43 }
 0x1ec   :  { %v3182_v27 = vadd.f32 %v2978_v60, %v2922_v47  ;;  %v3186_v31 = vadd.f32 %v2978_v60, %v2926_v51  ;;  %v3190_v35 = vadd.f32 %v2978_v60, %v2930_v55  ;;  %v3194_v39 = vadd.f32 %v2978_v60, %v2934_v59 }
 0x1ed   :  { %v3198_v43 = vadd.f32 %v2978_v60, %v3520_v12  ;;  %v3202_v47 = vadd.f32 %v2978_v60, %v3522_v40  ;;  %v3206_v51 = vadd.f32 %v2978_v60, %v3524_v0 }
 0x1ee   :  { %3517 = vst [vmem:[#allocation23_spill] sm:$0xff] %v3186_v31  ;;  %3518 = vst [vmem:[#allocation11_spill] sm:$0xff] %v3190_v35  ;;  %v3526_v31 = vld [vmem:[#allocation5_spill] sm:$0xff]  ;;  %v3527_v35 = vld [vmem:[#allocation6_spill] sm:$0xff] }
 0x1ef   :  { %3519 = vst [vmem:[#allocation13_spill] sm:$0xff] %v3194_v39  ;;  %3521 = vst [vmem:[#allocation15_spill] sm:$0xff] %v3198_v43  ;;  %v3210_v55 = vadd.f32 %v2978_v60, %v3526_v31  ;;  %v3214_v59 = vadd.f32 %v2978_v60, %v3527_v35  ;;  %v3528_v39 = vld [vmem:[#allocation7_spill] sm:$0xff]  ;;  %v3529_v43 = vld [vmem:[#allocation8_spill] sm:$0xff]  ;;  %v3234_v35 = vadd.f32 %v2978_v60, %v2974_v28  ;;  %v1193_v28 = vmax.f32 %v3042_v14, 0.0 }
 0x1f0   :  { %3523 = vst [vmem:[#allocation17_spill] sm:$0xff] %v3202_v47  ;;  %3525 = vst [vmem:[#allocation19_spill] sm:$0xff] %v3206_v51  ;;  %v3218_v12 = vadd.f32 %v2978_v60, %v3528_v39  ;;  %v3222_v40 = vadd.f32 %v2978_v60, %v3529_v43  ;;  %v3530_v47 = vld [vmem:[#allocation9_spill] sm:$0xff]  ;;  %v3531_v51 = vld [vmem:[#allocation10_spill] sm:$0xff]  ;;  %v3238_v39 = vadd.f32 %v2978_v60, %v2982_v63  ;;  %v1195_v63 = vmax.f32 %v3050_v22, 0.0 }
 0x1f1   :  { %v3226_v0 = vadd.f32 %v2978_v60, %v3530_v47  ;;  %v3230_v31 = vadd.f32 %v2978_v60, %v3531_v51  ;;  %3533 = vst [vmem:[#allocation22_spill] sm:$0xff] %v3234_v35  ;;  %v3242_v43 = vadd.f32 %v2978_v60, %v2986_v3  ;;  %v3246_v47 = vadd.f32 %v2978_v60, %v2990_v7 }
 0x1f2   :  { %3534 = vst [vmem:[#allocation24_spill] sm:$0xff] %v3238_v39  ;;  %v3250_v51 = vadd.f32 %v2978_v60, %v2994_v16  ;;  %v1187_v3 = vmax.f32 %v3018_v61, 0.0  ;;  %v1189_v7 = vmax.f32 %v3026_v53, 0.0  ;;  %v1191_v60 = vmax.f32 %v3034_v29, 0.0 }
 0x1f3   :  { %3532 = vst [vmem:[#allocation21_spill] sm:$0xff] %v3230_v31  ;;  %3535 = vst [vmem:[#allocation2_spill] sm:$0xff] %v3242_v43  ;;  %v1188_v43 = vmax.f32 %v3022_v24, 0.0  ;;  %v1192_v16 = vmax.f32 %v3038_v10, 0.0  ;;  %v1194_v35 = vmax.f32 %v3046_v18, 0.0  ;;  %v1196_v39 = vmax.f32 %v3054_v26, 0.0 }
 0x1f4   :  { %3536 = vst [vmem:[#allocation3_spill] sm:$0xff] %v3246_v47  ;;  %3537 = vst [vmem:[#allocation4_spill] sm:$0xff] %v3250_v51  ;;  %v1190_v47 = vmax.f32 %v3030_v8, 0.0  ;;  %v1197_v61 = vmax.f32 %v3058_v30, 0.0  ;;  %v1198_v24 = vmax.f32 %v3062_v34, 0.0  ;;  %v1199_v53 = vmax.f32 %v3066_v38, 0.0 }
 0x1f5   :  { %v1200_v8 = vmax.f32 %v3070_v42, 0.0  ;;  %v1201_v29 = vmax.f32 %v3074_v46, 0.0  ;;  %v1202_v10 = vmax.f32 %v3078_v50, 0.0  ;;  %v1203_v14 = vmax.f32 %v3082_v54, 0.0  ;;  %v3538_v31 = vld [vmem:[#allocation23_spill] sm:$0xff] }
 0x1f6   :  { %v1204_v18 = vmax.f32 %v3086_v58, 0.0  ;;  %v1205_v22 = vmax.f32 %v3090_v62, 0.0  ;;  %v1206_v26 = vmax.f32 %v3094_v2, 0.0  ;;  %v1207_v30 = vmax.f32 %v3098_v6, 0.0  ;;  %v3539_v32 = vld [vmem:[#allocation11_spill] sm:$0xff]  ;;  %v3540_v56 = vld [vmem:[#allocation13_spill] sm:$0xff] }
 0x1f7   :  { %v1208_v34 = vmax.f32 %v3102_v1, 0.0  ;;  %v1209_v38 = vmax.f32 %v3106_v33, 0.0  ;;  %v1210_v42 = vmax.f32 %v3110_v20, 0.0  ;;  %v1211_v46 = vmax.f32 %v3114_v49, 0.0  ;;  %v3541_v36 = vld [vmem:[#allocation15_spill] sm:$0xff]  ;;  %v3542_v17 = vld [vmem:[#allocation17_spill] sm:$0xff] }
 0x1f8   :  { %v1212_v50 = vmax.f32 %v3118_v13, 0.0  ;;  %v1213_v54 = vmax.f32 %v3122_v25, 0.0  ;;  %v1214_v58 = vmax.f32 %v3126_v52, 0.0  ;;  %v1215_v62 = vmax.f32 %v3130_v41, 0.0  ;;  %v3543_v21 = vld [vmem:[#allocation19_spill] sm:$0xff] }
 0x1f9   :  { %v1216_v2 = vmax.f32 %v3134_v45, 0.0  ;;  %v1217_v6 = vmax.f32 %v3138_v5, 0.0  ;;  %v1218_v1 = vmax.f32 %v3142_v4, 0.0  ;;  %v1219_v33 = vmax.f32 %v3146_v48, 0.0 }
 0x1fa   :  { %v1220_v20 = vmax.f32 %v3150_v44, 0.0  ;;  %v1221_v49 = vmax.f32 %v3154_v57, 0.0  ;;  %v1222_v13 = vmax.f32 %v3158_v9, 0.0  ;;  %v1223_v25 = vmax.f32 %v3162_v37, 0.0  ;;  %v3544_v51 = vld [vmem:[#allocation21_spill] sm:$0xff] }
 0x1fb   :  { %v1224_v52 = vmax.f32 %v3166_v11, 0.0  ;;  %v1225_v41 = vmax.f32 %v3170_v15, 0.0  ;;  %v1226_v45 = vmax.f32 %v3174_v19, 0.0  ;;  %v1227_v5 = vmax.f32 %v3178_v23, 0.0 }
 0x1fc   :  { %v1228_v4 = vmax.f32 %v3182_v27, 0.0  ;;  %v1229_v48 = vmax.f32 %v3538_v31, 0.0  ;;  %v1230_v44 = vmax.f32 %v3539_v32, 0.0  ;;  %v1231_v57 = vmax.f32 %v3540_v56, 0.0  ;;  %v3545_v56 = vld [vmem:[#allocation22_spill] sm:$0xff] }
 0x1fd   :  { %v1232_v9 = vmax.f32 %v3541_v36, 0.0  ;;  %v1233_v37 = vmax.f32 %v3542_v17, 0.0  ;;  %v1234_v11 = vmax.f32 %v3543_v21, 0.0  ;;  %v1235_v15 = vmax.f32 %v3210_v55, 0.0  ;;  %v3546_v17 = vld [vmem:[#allocation24_spill] sm:$0xff]  ;;  %v3547_v55 = vld [vmem:[#allocation2_spill] sm:$0xff] }
 0x1fe   :  { %v1236_v19 = vmax.f32 %v3214_v59, 0.0  ;;  %v1237_v23 = vmax.f32 %v3218_v12, 0.0  ;;  %v1238_v27 = vmax.f32 %v3222_v40, 0.0  ;;  %v1239_v31 = vmax.f32 %v3226_v0, 0.0  ;;  %v3548_v12 = vld [vmem:[#allocation3_spill] sm:$0xff]  ;;  %v3549_v0 = vld [vmem:[#allocation4_spill] sm:$0xff] }
 0x1ff   :  { %v1240_v32 = vmax.f32 %v3544_v51, 0.0  ;;  %v1241_v36 = vmax.f32 %v3545_v56, 0.0  ;;  %v1242_v21 = vmax.f32 %v3546_v17, 0.0  ;;  %v1243_v59 = vmax.f32 %v3547_v55, 0.0  ;;  %v3550_v56 = vld [vmem:[#allocation12_spill] sm:$0xff]  ;;  %v3552_v55 = vld [vmem:[#allocation14_spill] sm:$0xff] }
 0x200   :  { %v1244_v40 = vmax.f32 %v3548_v12, 0.0  ;;  %v1245_v51 = vmax.f32 %v3549_v0, 0.0  ;;  %v3551_v17 = vmax.f32 %v3550_v56, 0.0  ;;  %v3553_v12 = vmax.f32 %v3552_v55, 0.0  ;;  %v3554_v56 = vld [vmem:[#allocation16_spill] sm:$0xff] }
 0x201   :  { %v3555_v55 = vmax.f32 %v3554_v56, 0.0 }
 0x202   :  { %v1806_v0 = vpack.c.bf16 %v3553_v12, %v3551_v17  ;;  %v3556_v12 = vld [vmem:[#allocation18_spill] sm:$0xff] }
 0x203   :  { %v3557_v17 = vmax.f32 %v3556_v12, 0.0  ;;  %v3558_v12 = vld [vmem:[#allocation20_spill] sm:$0xff] }
 0x204   :  { %1807 = vst [vmem:[%s3426_s4] sm:$0xff] %v1806_v0  }
 0x205   :  { %v1811_v56 = vpack.c.bf16 %v3557_v17, %v3555_v55  ;;  %v3559_v17 = vmax.f32 %v3558_v12, 0.0  ;;  %v1821_v12 = vpack.c.bf16 %v1189_v7, %v1188_v43  ;;  %v1836_v7 = vpack.c.bf16 %v1195_v63, %v1194_v35 }
 0x206   :  { %v1841_v43 = vpack.c.bf16 %v1197_v61, %v1196_v39  ;;  %v1856_v35 = vpack.c.bf16 %v1203_v14, %v1202_v10  ;;  %v1861_v39 = vpack.c.bf16 %v1205_v22, %v1204_v18  ;;  %v1866_v63 = vpack.c.bf16 %v1207_v30, %v1206_v26 }
 0x207   :  { %v1816_v55 = vpack.c.bf16 %v1187_v3, %v3559_v17  ;;  %v1826_v3 = vpack.c.bf16 %v1191_v60, %v1190_v47  ;;  %v1831_v17 = vpack.c.bf16 %v1193_v28, %v1192_v16  ;;  %1963 = vst [vmem:[%s3426_s4 + $0x8] sm:$0xff] %v1811_v56   ;;  %1965 = vst [vmem:[%s3426_s4 + $0x18] sm:$0xff] %v1821_v12  }
 0x208   :  { %v1846_v47 = vpack.c.bf16 %v1199_v53, %v1198_v24  ;;  %v1851_v28 = vpack.c.bf16 %v1201_v29, %v1200_v8  ;;  %1968 = vst [vmem:[%s3426_s4 + $0x30] sm:$0xff] %v1836_v7   ;;  %1969 = vst [vmem:[%s3426_s4 + $0x38] sm:$0xff] %v1841_v43   ;;  %v1871_v60 = vpack.c.bf16 %v1209_v38, %v1208_v34 }
 0x209   :  { %1964 = vst [vmem:[%s3426_s4 + $0x10] sm:$0xff] %v1816_v55   ;;  %1966 = vst [vmem:[%s3426_s4 + $0x20] sm:$0xff] %v1826_v3   ;;  %v1876_v16 = vpack.c.bf16 %v1211_v46, %v1210_v42  ;;  %v1881_v61 = vpack.c.bf16 %v1213_v54, %v1212_v50  ;;  %v1886_v24 = vpack.c.bf16 %v1215_v62, %v1214_v58 }
 0x20a   :  { %1967 = vst [vmem:[%s3426_s4 + $0x28] sm:$0xff] %v1831_v17   ;;  %1970 = vst [vmem:[%s3426_s4 + $0x40] sm:$0xff] %v1846_v47   ;;  %v1891_v53 = vpack.c.bf16 %v1217_v6, %v1216_v2  ;;  %v1896_v8 = vpack.c.bf16 %v1219_v33, %v1218_v1  ;;  %v1901_v29 = vpack.c.bf16 %v1221_v49, %v1220_v20 }
 0x20b   :  { %1971 = vst [vmem:[%s3426_s4 + $0x48] sm:$0xff] %v1851_v28   ;;  %1972 = vst [vmem:[%s3426_s4 + $0x50] sm:$0xff] %v1856_v35   ;;  %v1906_v10 = vpack.c.bf16 %v1223_v25, %v1222_v13  ;;  %v1911_v14 = vpack.c.bf16 %v1225_v41, %v1224_v52  ;;  %v1916_v18 = vpack.c.bf16 %v1227_v5, %v1226_v45 }
 0x20c   :  { %1973 = vst [vmem:[%s3426_s4 + $0x58] sm:$0xff] %v1861_v39   ;;  %1974 = vst [vmem:[%s3426_s4 + $0x60] sm:$0xff] %v1866_v63   ;;  %v1921_v22 = vpack.c.bf16 %v1229_v48, %v1228_v4  ;;  %v1926_v26 = vpack.c.bf16 %v1231_v57, %v1230_v44  ;;  %v1931_v30 = vpack.c.bf16 %v1233_v37, %v1232_v9 }
 0x20d   :  { %1975 = vst [vmem:[%s3426_s4 + $0x68] sm:$0xff] %v1871_v60   ;;  %1976 = vst [vmem:[%s3426_s4 + $0x70] sm:$0xff] %v1876_v16   ;;  %v1936_v34 = vpack.c.bf16 %v1235_v15, %v1234_v11  ;;  %v1941_v38 = vpack.c.bf16 %v1237_v23, %v1236_v19  ;;  %v1946_v42 = vpack.c.bf16 %v1239_v31, %v1238_v27 }
 0x20e   :  { %1977 = vst [vmem:[%s3426_s4 + $0x78] sm:$0xff] %v1881_v61   ;;  %1978 = vst [vmem:[%s3426_s4 + $0x80] sm:$0xff] %v1886_v24   ;;  %v1951_v46 = vpack.c.bf16 %v1241_v36, %v1240_v32  ;;  %v1956_v50 = vpack.c.bf16 %v1243_v59, %v1242_v21  ;;  %v1961_v54 = vpack.c.bf16 %v1245_v51, %v1244_v40 }
 0x20f   :  { %1979 = vst [vmem:[%s3426_s4 + $0x88] sm:$0xff] %v1891_v53   ;;  %1980 = vst [vmem:[%s3426_s4 + $0x90] sm:$0xff] %v1896_v8  }
 0x210   :  { %1981 = vst [vmem:[%s3426_s4 + $0x98] sm:$0xff] %v1901_v29   ;;  %1982 = vst [vmem:[%s3426_s4 + $0xa0] sm:$0xff] %v1906_v10  }
 0x211   :  { %1983 = vst [vmem:[%s3426_s4 + $0xa8] sm:$0xff] %v1911_v14   ;;  %1984 = vst [vmem:[%s3426_s4 + $0xb0] sm:$0xff] %v1916_v18  }
 0x212   :  { %1985 = vst [vmem:[%s3426_s4 + $0xb8] sm:$0xff] %v1921_v22   ;;  %1986 = vst [vmem:[%s3426_s4 + $0xc0] sm:$0xff] %v1926_v26  }
 0x213   :  { %1987 = vst [vmem:[%s3426_s4 + $0xc8] sm:$0xff] %v1931_v30   ;;  %1988 = vst [vmem:[%s3426_s4 + $0xd0] sm:$0xff] %v1936_v34  }
 0x214   :  { %1989 = vst [vmem:[%s3426_s4 + $0xd8] sm:$0xff] %v1941_v38   ;;  %1990 = vst [vmem:[%s3426_s4 + $0xe0] sm:$0xff] %v1946_v42  }
 0x215   :  { %1991 = vst [vmem:[%s3426_s4 + $0xe8] sm:$0xff] %v1951_v46   ;;  %1992 = vst [vmem:[%s3426_s4 + $0xf0] sm:$0xff] %v1956_v50  }
 0x216   :  { %1993 = vst [vmem:[%s3426_s4 + $0xf8] sm:$0xff] %v1961_v54  }

// kernel: generator_forward.19
= control target key start
LH: loop header
LB: loop body
LE: loop exit
PB: predicated region body
PF: predicated region fallthrough
CT: control target
= control target key end

     0   :  { %v2298_v0 = vmov 0   ;;  %vm954_vm0 = vcmask 64512   ;;  %vm1051_vm1 = vcmask 1043456   ;;  %s3134_s1 = inlined_call_operand.vmem [shape: bf16[392,128], index: 1, kind: input, shape index: {}]   ;;  %s3135_s0 = inlined_call_operand.vmem [shape: bf16[512,392], index: 0, kind: input, shape index: {}]   ;;  %s3136_s2 = inlined_call_operand.vmem [shape: f32[1,128], index: 2, kind: input, shape index: {}]   ;;  %s3137_s3 = inlined_call_operand.vmem [shape: f32[512,128], index: 3, kind: output, shape index: {}]  }
   0x1   :  { %1055 = vmatprep.subr.bf16.mxu0 %v2298_v0  ;;  %v1952_v1 = vld [vmem:[%s3134_s1 + $0x38] sm:$0xff]   ;;  %1344 = vmatprep.subr.bf16.mxu1 %v2298_v0  ;;  %v1953_v2 = vld [vmem:[%s3134_s1 + $0x30] sm:$0xff]   ;;  %v1954_v3 = vld [vmem:[%s3134_s1 + $0x28] sm:$0xff]  }
   0x2   :  { %1056 = vmatpush1.bf16.msra.mxu0 %v1952_v1  ;;  %v1959_v4 = vld [vmem:[%s3134_s1 + $0xb8] sm:$0xff]   ;;  %v1961_v5 = vld [vmem:[%s3134_s1 + $0xb0] sm:$0xff]   ;;  %v1955_v6 = vld [vmem:[%s3134_s1 + $0x20] sm:$0xff]  }
   0x3   :  { %1057 = vmatprep.subr.bf16.mxu0 %v2298_v0  ;;  %1345 = vmatpush1.bf16.msra.mxu1 %v1959_v4  ;;  %v1963_v7 = vld [vmem:[%s3134_s1 + $0xa8] sm:$0xff]   ;;  %v1956_v8 = vld [vmem:[%s3134_s1 + $0x18] sm:$0xff]   ;;  %v1965_v9 = vld [vmem:[%s3134_s1 + $0xa0] sm:$0xff]  }
   0x4   :  { %1346 = vmatprep.subr.bf16.mxu1 %v2298_v0  ;;  %v1957_v10 = vld [vmem:[%s3134_s1 + $0x10] sm:$0xff]   ;;  %v1967_v11 = vld [vmem:[%s3134_s1 + $0x98] sm:$0xff]   ;;  %v1958_v12 = vld [vmem:[%s3134_s1 + $0x8] sm:$0xff]  }
   0x5   :  { %v1978_v13 = vld [vmem:[%s3135_s0 + $0xc] ss:$16 sps:$4 sm:$0xff]   ;;  %v1969_v14 = vld [vmem:[%s3134_s1 + $0x90] sm:$0xff]   ;;  %v1960_v15 = vld [vmem:[%s3134_s1] sm:$0xff]  }
   0x6   :  { %1058 = vmatpush1.bf16.msra.mxu0 %v1953_v2  ;;  %1919 = vmatprep.mubr.msk.bf16.mxu1 %vm954_vm0, %v1978_v13  ;;  %v1982_v16 = vld [vmem:[%s3135_s0 + $0x4] ss:$16 sps:$4 sm:$0xff]   ;;  %v1971_v17 = vld [vmem:[%s3134_s1 + $0x88] sm:$0xff]   ;;  %v1962_v18 = vld [vmem:[%s3134_s1 + $0x78] sm:$0xff]  }
   0x7   :  { %1059 = vmatprep.subr.bf16.mxu0 %v2298_v0  ;;  %1347 = vmatpush1.bf16.msra.mxu1 %v1961_v5  ;;  %v1964_v19 = vld [vmem:[%s3134_s1 + $0x70] sm:$0xff]   ;;  %v1973_v20 = vld [vmem:[%s3134_s1 + $0x80] sm:$0xff]   ;;  %v1966_v22 = vld [vmem:[%s3134_s1 + $0x68] sm:$0xff]  }
   0x8   :  { %1348 = vmatprep.subr.bf16.mxu1 %v2298_v0  ;;  %1087 = vmatprep.mubr.bf16.mxu0 %v1982_v16  ;;  %v1975_v21 = vld [vmem:[%s3134_s1 + $0xc0] ss:$0 sps:$4 sm:$0xff]   ;;  %v1976_v24 = vld [vmem:[%s3135_s0 + $0x8] ss:$16 sps:$4 sm:$0xff]   ;;  %v1983_v25 = vld [vmem:[%s3135_s0 + $0x2c] ss:$16 sps:$4 sm:$0xff]  }
   0x9   :  { %v1053_v23 = vsel %vm1051_vm1, %v1975_v21, 0  ;;  %v1968_v26 = vld [vmem:[%s3134_s1 + $0x60] sm:$0xff]   ;;  %v1970_v27 = vld [vmem:[%s3134_s1 + $0x58] sm:$0xff]   ;;  %v1972_v30 = vld [vmem:[%s3134_s1 + $0x50] sm:$0xff]  }
   0xa   :  { %1060 = vmatpush1.bf16.msra.mxu0 %v1954_v3  ;;  %v1985_v28 = vld [vmem:[%s3135_s0 + $0x28] ss:$16 sps:$4 sm:$0xff]   ;;  %v1989_v29 = vld [vmem:[%s3135_s0 + $0x4c] ss:$16 sps:$4 sm:$0xff]   ;;  %v1979_v34 = vld [vmem:[%s3134_s1 + $0x40] sm:$0xff]  }
   0xb   :  { %1061 = vmatprep.subr.bf16.mxu0 %v2298_v0  ;;  %1349 = vmatpush1.bf16.msra.mxu1 %v1963_v7  ;;  %v1974_v31 = vld [vmem:[%s3134_s1 + $0x48] sm:$0xff]   ;;  %v1980_v35 = vld [vmem:[%s3135_s0] ss:$16 sps:$4 sm:$0xff]   ;;  %v1986_v36 = vld [vmem:[%s3135_s0 + $0x24] ss:$16 sps:$4 sm:$0xff]  }
   0xc   :  { %1350 = vmatprep.subr.bf16.mxu1 %v2298_v0  ;;  %v1991_v32 = vld [vmem:[%s3135_s0 + $0x48] ss:$16 sps:$4 sm:$0xff]   ;;  %v1995_v33 = vld [vmem:[%s3135_s0 + $0x6c] ss:$16 sps:$4 sm:$0xff]   ;;  %v1988_v39 = vld [vmem:[%s3135_s0 + $0x20] ss:$16 sps:$4 sm:$0xff]  }
   0xd   :  { %v1997_v37 = vld [vmem:[%s3135_s0 + $0x68] ss:$16 sps:$4 sm:$0xff]   ;;  %v2001_v38 = vld [vmem:[%s3135_s0 + $0x8c] ss:$16 sps:$4 sm:$0xff]   ;;  %v1992_v40 = vld [vmem:[%s3135_s0 + $0x44] ss:$16 sps:$4 sm:$0xff]  }
   0xe   :  { %1062 = vmatpush1.bf16.msra.mxu0 %v1955_v6  ;;  %v2003_v41 = vld [vmem:[%s3135_s0 + $0x88] ss:$16 sps:$4 sm:$0xff]   ;;  %v2007_v42 = vld [vmem:[%s3135_s0 + $0xac] ss:$16 sps:$4 sm:$0xff]   ;;  %v1994_v43 = vld [vmem:[%s3135_s0 + $0x40] ss:$16 sps:$4 sm:$0xff]  }
   0xf   :  { %1063 = vmatprep.subr.bf16.mxu0 %v2298_v0  ;;  %1351 = vmatpush1.bf16.msra.mxu1 %v1965_v9  ;;  %v1998_v44 = vld [vmem:[%s3135_s0 + $0x64] ss:$16 sps:$4 sm:$0xff]   ;;  %v2009_v45 = vld [vmem:[%s3135_s0 + $0xa8] ss:$16 sps:$4 sm:$0xff]   ;;  %v2013_v46 = vld [vmem:[%s3135_s0 + $0xcc] ss:$16 sps:$4 sm:$0xff]  }
  0x10   :  { %1352 = vmatprep.subr.bf16.mxu1 %v2298_v0  ;;  %v2000_v47 = vld [vmem:[%s3135_s0 + $0x60] ss:$16 sps:$4 sm:$0xff]   ;;  %v2004_v48 = vld [vmem:[%s3135_s0 + $0x84] ss:$16 sps:$4 sm:$0xff]   ;;  %v2015_v49 = vld [vmem:[%s3135_s0 + $0xc8] ss:$16 sps:$4 sm:$0xff]  }
  0x11   :  { %v2019_v50 = vld [vmem:[%s3135_s0 + $0xec] ss:$16 sps:$4 sm:$0xff]   ;;  %v2006_v51 = vld [vmem:[%s3135_s0 + $0x80] ss:$16 sps:$4 sm:$0xff]   ;;  %v2010_v52 = vld [vmem:[%s3135_s0 + $0xa4] ss:$16 sps:$4 sm:$0xff]  }
  0x12   :  { %1064 = vmatpush1.bf16.msra.mxu0 %v1956_v8  ;;  %v2021_v53 = vld [vmem:[%s3135_s0 + $0xe8] ss:$16 sps:$4 sm:$0xff]   ;;  %v2025_v54 = vld [vmem:[%s3135_s0 + $0x10c] ss:$16 sps:$4 sm:$0xff]   ;;  %v2012_v55 = vld [vmem:[%s3135_s0 + $0xa0] ss:$16 sps:$4 sm:$0xff]  }
  0x13   :  { %1065 = vmatprep.subr.bf16.mxu0 %v2298_v0  ;;  %1353 = vmatpush1.bf16.msra.mxu1 %v1967_v11  ;;  %v2016_v56 = vld [vmem:[%s3135_s0 + $0xc4] ss:$16 sps:$4 sm:$0xff]   ;;  %v2027_v57 = vld [vmem:[%s3135_s0 + $0x108] ss:$16 sps:$4 sm:$0xff]   ;;  %v2031_v58 = vld [vmem:[%s3135_s0 + $0x12c] ss:$16 sps:$4 sm:$0xff]  }
  0x14   :  { %1354 = vmatprep.subr.bf16.mxu1 %v2298_v0  ;;  %v2018_v59 = vld [vmem:[%s3135_s0 + $0xc0] ss:$16 sps:$4 sm:$0xff]   ;;  %v2022_v60 = vld [vmem:[%s3135_s0 + $0xe4] ss:$16 sps:$4 sm:$0xff]   ;;  %v2033_v61 = vld [vmem:[%s3135_s0 + $0x128] ss:$16 sps:$4 sm:$0xff]  }
  0x15   :  { %v2037_v62 = vld [vmem:[%s3135_s0 + $0x14c] ss:$16 sps:$4 sm:$0xff]   ;;  %v2024_v63 = vld [vmem:[%s3135_s0 + $0xe0] ss:$16 sps:$4 sm:$0xff]   ;;  %v2039_v1 = vld [vmem:[%s3135_s0 + $0x148] ss:$16 sps:$4 sm:$0xff]  }
  0x16   :  { %1066 = vmatpush1.bf16.msra.mxu0 %v1957_v10  ;;  %v2043_v2 = vld [vmem:[%s3135_s0 + $0x16c] ss:$16 sps:$4 sm:$0xff]   ;;  %v2030_v3 = vld [vmem:[%s3135_s0 + $0x100] ss:$16 sps:$4 sm:$0xff]   ;;  %v2034_v4 = vld [vmem:[%s3135_s0 + $0x124] ss:$16 sps:$4 sm:$0xff]  }
  0x17   :  { %1067 = vmatprep.subr.bf16.mxu0 %v2298_v0  ;;  %1355 = vmatpush1.bf16.msra.mxu1 %v1969_v14  ;;  %v2045_v5 = vld [vmem:[%s3135_s0 + $0x168] ss:$16 sps:$4 sm:$0xff]   ;;  %v2049_v6 = vld [vmem:[%s3135_s0 + $0x18c] ss:$16 sps:$4 sm:$0xff]   ;;  %v2036_v7 = vld [vmem:[%s3135_s0 + $0x120] ss:$16 sps:$4 sm:$0xff]  }
  0x18   :  { %1356 = vmatprep.subr.bf16.mxu1 %v2298_v0  ;;  %v2040_v8 = vld [vmem:[%s3135_s0 + $0x144] ss:$16 sps:$4 sm:$0xff]   ;;  %v2051_v9 = vld [vmem:[%s3135_s0 + $0x188] ss:$16 sps:$4 sm:$0xff]   ;;  %v2055_v10 = vld [vmem:[%s3135_s0 + $0x1ac] ss:$16 sps:$4 sm:$0xff]  }
  0x19   :  { %v2042_v11 = vld [vmem:[%s3135_s0 + $0x140] ss:$16 sps:$4 sm:$0xff]   ;;  %v2057_v13 = vld [vmem:[%s3135_s0 + $0x1a8] ss:$16 sps:$4 sm:$0xff]   ;;  %v2061_v14 = vld [vmem:[%s3135_s0 + $0x1cc] ss:$16 sps:$4 sm:$0xff]  }
  0x1a   :  { %1068 = vmatpush1.bf16.msra.mxu0 %v1958_v12  ;;  %v2046_v12 = vld [vmem:[%s3135_s0 + $0x164] ss:$16 sps:$4 sm:$0xff]   ;;  %v2069_v21 = vld [vmem:[%s3135_s0 + $0x1e8] ss:$16 sps:$4 sm:$0xff]  }
  0x1b   :  { %1069 = vmatprep.subr.bf16.mxu0 %v2298_v0  ;;  %1357 = vmatpush1.bf16.msra.mxu1 %v1971_v17  ;;  %v2052_v16 = vld [vmem:[%s3135_s0 + $0x184] ss:$16 sps:$4 sm:$0xff]   ;;  %v2063_v17 = vld [vmem:[%s3135_s0 + $0x1c8] ss:$16 sps:$4 sm:$0xff]  }
  0x1c   :  { %1358 = vmatprep.subr.bf16.mxu1 %v2298_v0 }
  0x1e   :  { %1070 = vmatpush1.bf16.msra.mxu0 %v1960_v15  ;;  %v2048_v15 = vld [vmem:[%s3135_s0 + $0x160] ss:$16 sps:$4 sm:$0xff]  }
  0x1f   :  { %1071 = vmatprep.subr.bf16.mxu0 %v2298_v0  ;;  %1359 = vmatpush1.bf16.msra.mxu1 %v1973_v20  ;;  %v2058_v20 = vld [vmem:[%s3135_s0 + $0x1a4] ss:$16 sps:$4 sm:$0xff]  }
  0x20   :  { %1374 = vmatprep.subr.bf16.mxu1 %v2298_v0 }
  0x22   :  { %1072 = vmatpush2.bf16.msra.mxu0 %v1962_v18  ;;  %v2067_v18 = vld [vmem:[%s3135_s0 + $0x1ec] ss:$16 sps:$4 sm:$0xff]  }
  0x23   :  { %1073 = vmatprep.subr.bf16.mxu0 %v2298_v0  ;;  %1375 = vmatpush2.bf16.msra.mxu1 %v1053_v23  ;;  %v2060_v23 = vld [vmem:[%s3135_s0 + $0x1a0] ss:$16 sps:$4 sm:$0xff]  }
  0x26   :  { %1074 = vmatpush2.bf16.msra.mxu0 %v1964_v19  ;;  %1377 = vmatmul.mubr.bf16.vlgmr.msra.gmra.mxu1 %v1976_v24  ;;  %v2054_v19 = vld [vmem:[%s3135_s0 + $0x180] ss:$16 sps:$4 sm:$0xff]   ;;  %v2064_v24 = vld [vmem:[%s3135_s0 + $0x1c4] ss:$16 sps:$4 sm:$0xff]  }
  0x27   :  { %1075 = vmatprep.subr.bf16.mxu0 %v2298_v0  ;;  %1920 = vmatprep.mubr.msk.bf16.mxu1 %vm954_vm0, %v1983_v25  ;;  %v2075_v25 = vld [vmem:[%s3135_s0 + $0x208] ss:$16 sps:$4 sm:$0xff]  }
  0x2a   :  { %1076 = vmatpush2.bf16.msra.mxu0 %v1966_v22  ;;  %v2073_v22 = vld [vmem:[%s3135_s0 + $0x20c] ss:$16 sps:$4 sm:$0xff]  }
  0x2b   :  { %1077 = vmatprep.subr.bf16.mxu0 %v2298_v0 }
  0x2e   :  { %1078 = vmatpush2.bf16.msra.mxu0 %v1968_v26  ;;  %1385 = vmatmul.mubr.bf16.gmra.mxu1 %v1985_v28  ;;  %v2079_v26 = vld [vmem:[%s3135_s0 + $0x22c] ss:$16 sps:$4 sm:$0xff]   ;;  %v2070_v28 = vld [vmem:[%s3135_s0 + $0x1e4] ss:$16 sps:$4 sm:$0xff]  }
  0x2f   :  { %1079 = vmatprep.subr.bf16.mxu0 %v2298_v0  ;;  %1921 = vmatprep.mubr.msk.bf16.mxu1 %vm954_vm0, %v1989_v29  ;;  %v2081_v29 = vld [vmem:[%s3135_s0 + $0x228] ss:$16 sps:$4 sm:$0xff]  }
  0x32   :  { %1080 = vmatpush2.bf16.msra.mxu0 %v1970_v27  ;;  %v2066_v27 = vld [vmem:[%s3135_s0 + $0x1c0] ss:$16 sps:$4 sm:$0xff]  }
  0x33   :  { %1081 = vmatprep.subr.bf16.mxu0 %v2298_v0 }
  0x36   :  { %1082 = vmatpush2.bf16.msra.mxu0 %v1972_v30  ;;  %1393 = vmatmul.mubr.bf16.gmra.mxu1 %v1991_v32  ;;  %v2085_v30 = vld [vmem:[%s3135_s0 + $0x24c] ss:$16 sps:$4 sm:$0xff]   ;;  %v2076_v32 = vld [vmem:[%s3135_s0 + $0x204] ss:$16 sps:$4 sm:$0xff]  }
  0x37   :  { %1083 = vmatprep.subr.bf16.mxu0 %v2298_v0  ;;  %1922 = vmatprep.mubr.msk.bf16.mxu1 %vm954_vm0, %v1995_v33  ;;  %v2087_v33 = vld [vmem:[%s3135_s0 + $0x248] ss:$16 sps:$4 sm:$0xff]  }
  0x3a   :  { %1084 = vmatpush2.bf16.msra.mxu0 %v1974_v31  ;;  %v2072_v31 = vld [vmem:[%s3135_s0 + $0x1e0] ss:$16 sps:$4 sm:$0xff]  }
  0x3b   :  { %1085 = vmatprep.subr.bf16.mxu0 %v2298_v0  ;;  %v2028_v0 = vld [vmem:[%s3135_s0 + $0x104] ss:$16 sps:$4 sm:$0xff]  }
  0x3e   :  { %1086 = vmatpush2.bf16.msra.mxu0 %v1979_v34  ;;  %1401 = vmatmul.mubr.bf16.gmra.mxu1 %v1997_v37  ;;  %v2091_v34 = vld [vmem:[%s3135_s0 + $0x26c] ss:$16 sps:$4 sm:$0xff]   ;;  %v2093_v37 = vld [vmem:[%s3135_s0 + $0x268] ss:$16 sps:$4 sm:$0xff]  }
  0x3f   :  { %1923 = vmatprep.mubr.msk.bf16.mxu1 %vm954_vm0, %v2001_v38  ;;  %v2097_v38 = vld [vmem:[%s3135_s0 + $0x28c] ss:$16 sps:$4 sm:$0xff]  }
  0x41   :  { %1088 = vmatmul.mubr.bf16.vlgmr.msra.gmra.mxu0 %v1980_v35  ;;  %v2078_v35 = vld [vmem:[%s3135_s0 + $0x200] ss:$16 sps:$4 sm:$0xff]  }
  0x42   :  { %1095 = vmatprep.mubr.bf16.mxu0 %v1986_v36  ;;  %v2082_v36 = vld [vmem:[%s3135_s0 + $0x224] ss:$16 sps:$4 sm:$0xff]  }
  0x46   :  { %1409 = vmatmul.mubr.bf16.gmra.mxu1 %v2003_v41  ;;  %v2099_v41 = vld [vmem:[%s3135_s0 + $0x288] ss:$16 sps:$4 sm:$0xff]  }
  0x47   :  { %1924 = vmatprep.mubr.msk.bf16.mxu1 %vm954_vm0, %v2007_v42  ;;  %v2103_v42 = vld [vmem:[%s3135_s0 + $0x2ac] ss:$16 sps:$4 sm:$0xff]  }
  0x49   :  { %1096 = vmatmul.mubr.bf16.gmra.mxu0 %v1988_v39  ;;  %v2084_v39 = vld [vmem:[%s3135_s0 + $0x220] ss:$16 sps:$4 sm:$0xff]  }
  0x4a   :  { %1103 = vmatprep.mubr.bf16.mxu0 %v1992_v40  ;;  %v2088_v40 = vld [vmem:[%s3135_s0 + $0x244] ss:$16 sps:$4 sm:$0xff]  }
  0x4e   :  { %1417 = vmatmul.mubr.bf16.gmra.mxu1 %v2009_v45  ;;  %v2105_v45 = vld [vmem:[%s3135_s0 + $0x2a8] ss:$16 sps:$4 sm:$0xff]  }
  0x4f   :  { %1925 = vmatprep.mubr.msk.bf16.mxu1 %vm954_vm0, %v2013_v46  ;;  %v2109_v46 = vld [vmem:[%s3135_s0 + $0x2cc] ss:$16 sps:$4 sm:$0xff]  }
  0x51   :  { %1104 = vmatmul.mubr.bf16.gmra.mxu0 %v1994_v43  ;;  %v2090_v43 = vld [vmem:[%s3135_s0 + $0x240] ss:$16 sps:$4 sm:$0xff]  }
  0x52   :  { %1111 = vmatprep.mubr.bf16.mxu0 %v1998_v44  ;;  %v2094_v44 = vld [vmem:[%s3135_s0 + $0x264] ss:$16 sps:$4 sm:$0xff]  }
  0x56   :  { %1425 = vmatmul.mubr.bf16.gmra.mxu1 %v2015_v49  ;;  %v2111_v49 = vld [vmem:[%s3135_s0 + $0x2c8] ss:$16 sps:$4 sm:$0xff]  }
  0x57   :  { %1926 = vmatprep.mubr.msk.bf16.mxu1 %vm954_vm0, %v2019_v50  ;;  %v2115_v50 = vld [vmem:[%s3135_s0 + $0x2ec] ss:$16 sps:$4 sm:$0xff]  }
  0x59   :  { %1112 = vmatmul.mubr.bf16.gmra.mxu0 %v2000_v47  ;;  %v2096_v47 = vld [vmem:[%s3135_s0 + $0x260] ss:$16 sps:$4 sm:$0xff]  }
  0x5a   :  { %1119 = vmatprep.mubr.bf16.mxu0 %v2004_v48  ;;  %v2100_v48 = vld [vmem:[%s3135_s0 + $0x284] ss:$16 sps:$4 sm:$0xff]  }
  0x5e   :  { %1433 = vmatmul.mubr.bf16.gmra.mxu1 %v2021_v53  ;;  %v2117_v53 = vld [vmem:[%s3135_s0 + $0x2e8] ss:$16 sps:$4 sm:$0xff]  }
  0x5f   :  { %1927 = vmatprep.mubr.msk.bf16.mxu1 %vm954_vm0, %v2025_v54  ;;  %v2121_v54 = vld [vmem:[%s3135_s0 + $0x30c] ss:$16 sps:$4 sm:$0xff]  }
  0x61   :  { %1120 = vmatmul.mubr.bf16.gmra.mxu0 %v2006_v51  ;;  %v2102_v51 = vld [vmem:[%s3135_s0 + $0x280] ss:$16 sps:$4 sm:$0xff]  }
  0x62   :  { %1127 = vmatprep.mubr.bf16.mxu0 %v2010_v52  ;;  %v2106_v52 = vld [vmem:[%s3135_s0 + $0x2a4] ss:$16 sps:$4 sm:$0xff]  }
  0x66   :  { %1441 = vmatmul.mubr.bf16.gmra.mxu1 %v2027_v57  ;;  %v2123_v57 = vld [vmem:[%s3135_s0 + $0x308] ss:$16 sps:$4 sm:$0xff]  }
  0x67   :  { %1928 = vmatprep.mubr.msk.bf16.mxu1 %vm954_vm0, %v2031_v58  ;;  %v2127_v58 = vld [vmem:[%s3135_s0 + $0x32c] ss:$16 sps:$4 sm:$0xff]  }
  0x69   :  { %1128 = vmatmul.mubr.bf16.gmra.mxu0 %v2012_v55  ;;  %v2108_v55 = vld [vmem:[%s3135_s0 + $0x2a0] ss:$16 sps:$4 sm:$0xff]  }
  0x6a   :  { %1135 = vmatprep.mubr.bf16.mxu0 %v2016_v56  ;;  %v2112_v56 = vld [vmem:[%s3135_s0 + $0x2c4] ss:$16 sps:$4 sm:$0xff]  }
  0x6e   :  { %1449 = vmatmul.mubr.bf16.gmra.mxu1 %v2033_v61  ;;  %v2118_v61 = vld [vmem:[%s3135_s0 + $0x2e4] ss:$16 sps:$4 sm:$0xff]  }
  0x6f   :  { %1929 = vmatprep.mubr.msk.bf16.mxu1 %vm954_vm0, %v2037_v62 }
  0x71   :  { %1136 = vmatmul.mubr.bf16.gmra.mxu0 %v2018_v59 }
  0x72   :  { %1143 = vmatprep.mubr.bf16.mxu0 %v2022_v60  ;;  %v2114_v60 = vld [vmem:[%s3135_s0 + $0x2c0] ss:$16 sps:$4 sm:$0xff]  }
  0x76   :  { %1457 = vmatmul.mubr.bf16.gmra.mxu1 %v2039_v1  ;;  %v2133_v1 = vld [vmem:[%s3135_s0 + $0x34c] ss:$16 sps:$4 sm:$0xff]  }
  0x77   :  { %1930 = vmatprep.mubr.msk.bf16.mxu1 %vm954_vm0, %v2043_v2 }
  0x79   :  { %1144 = vmatmul.mubr.bf16.gmra.mxu0 %v2024_v63 }
  0x7a   :  { %1151 = vmatprep.mubr.bf16.mxu0 %v2028_v0  ;;  %v2129_v0 = vld [vmem:[%s3135_s0 + $0x328] ss:$16 sps:$4 sm:$0xff]  }
  0x7e   :  { %1465 = vmatmul.mubr.bf16.gmra.mxu1 %v2045_v5  ;;  %v2124_v5 = vld [vmem:[%s3135_s0 + $0x304] ss:$16 sps:$4 sm:$0xff]  }
  0x7f   :  { %1931 = vmatprep.mubr.msk.bf16.mxu1 %vm954_vm0, %v2049_v6 }
  0x81   :  { %1152 = vmatmul.mubr.bf16.gmra.mxu0 %v2030_v3 }
  0x82   :  { %1159 = vmatprep.mubr.bf16.mxu0 %v2034_v4  ;;  %v2120_v4 = vld [vmem:[%s3135_s0 + $0x2e0] ss:$16 sps:$4 sm:$0xff]  }
  0x86   :  { %1473 = vmatmul.mubr.bf16.gmra.mxu1 %v2051_v9  ;;  %v2139_v9 = vld [vmem:[%s3135_s0 + $0x36c] ss:$16 sps:$4 sm:$0xff]  }
  0x87   :  { %1932 = vmatprep.mubr.msk.bf16.mxu1 %vm954_vm0, %v2055_v10 }
  0x89   :  { %1160 = vmatmul.mubr.bf16.gmra.mxu0 %v2036_v7 }
  0x8a   :  { %1167 = vmatprep.mubr.bf16.mxu0 %v2040_v8  ;;  %v2135_v8 = vld [vmem:[%s3135_s0 + $0x348] ss:$16 sps:$4 sm:$0xff]  }
  0x8e   :  { %1481 = vmatmul.mubr.bf16.gmra.mxu1 %v2057_v13  ;;  %v2130_v13 = vld [vmem:[%s3135_s0 + $0x324] ss:$16 sps:$4 sm:$0xff]  }
  0x8f   :  { %1933 = vmatprep.mubr.msk.bf16.mxu1 %vm954_vm0, %v2061_v14 }
  0x91   :  { %1168 = vmatmul.mubr.bf16.gmra.mxu0 %v2042_v11 }
  0x92   :  { %1175 = vmatprep.mubr.bf16.mxu0 %v2046_v12  ;;  %v2126_v12 = vld [vmem:[%s3135_s0 + $0x300] ss:$16 sps:$4 sm:$0xff]  }
  0x96   :  { %1489 = vmatmul.mubr.bf16.gmra.mxu1 %v2063_v17  ;;  %v2141_v17 = vld [vmem:[%s3135_s0 + $0x368] ss:$16 sps:$4 sm:$0xff]  }
  0x97   :  { %1934 = vmatprep.mubr.msk.bf16.mxu1 %vm954_vm0, %v2067_v18 }
  0x99   :  { %1176 = vmatmul.mubr.bf16.gmra.mxu0 %v2048_v15  ;;  %v2770_v15 = vld [vmem:[%s3136_s2] ss:$0 sm:$0xff] }
  0x9a   :  { %1183 = vmatprep.mubr.bf16.mxu0 %v2052_v16 }
  0x9e   :  { %1497 = vmatmul.mubr.bf16.gmra.mxu1 %v2069_v21 }
  0x9f   :  { %1935 = vmatprep.mubr.msk.bf16.mxu1 %vm954_vm0, %v2073_v22 }
  0xa1   :  { %1184 = vmatmul.mubr.bf16.gmra.mxu0 %v2054_v19  ;;  %v2145_v19 = vld [vmem:[%s3135_s0 + $0x38c] ss:$16 sps:$4 sm:$0xff]  }
  0xa2   :  { %1191 = vmatprep.mubr.bf16.mxu0 %v2058_v20 }
  0xa6   :  { %1505 = vmatmul.mubr.bf16.gmra.mxu1 %v2075_v25 }
  0xa7   :  { %1936 = vmatprep.mubr.msk.bf16.mxu1 %vm954_vm0, %v2079_v26  ;;  %v2132_v26 = vld [vmem:[%s3135_s0 + $0x320] ss:$16 sps:$4 sm:$0xff]  }
  0xa9   :  { %1192 = vmatmul.mubr.bf16.gmra.mxu0 %v2060_v23 }
  0xaa   :  { %1199 = vmatprep.mubr.bf16.mxu0 %v2064_v24 }
  0xae   :  { %1513 = vmatmul.mubr.bf16.gmra.mxu1 %v2081_v29 }
  0xaf   :  { %1937 = vmatprep.mubr.msk.bf16.mxu1 %vm954_vm0, %v2085_v30 }
  0xb1   :  { %1200 = vmatmul.mubr.bf16.gmra.mxu0 %v2066_v27 }
  0xb2   :  { %1207 = vmatprep.mubr.bf16.mxu0 %v2070_v28  ;;  %v2136_v28 = vld [vmem:[%s3135_s0 + $0x344] ss:$16 sps:$4 sm:$0xff]  }
  0xb6   :  { %1521 = vmatmul.mubr.bf16.gmra.mxu1 %v2087_v33  ;;  %v2147_v33 = vld [vmem:[%s3135_s0 + $0x388] ss:$16 sps:$4 sm:$0xff]  }
  0xb7   :  { %1938 = vmatprep.mubr.msk.bf16.mxu1 %vm954_vm0, %v2091_v34 }
  0xb9   :  { %1208 = vmatmul.mubr.bf16.gmra.mxu0 %v2072_v31 }
  0xba   :  { %1215 = vmatprep.mubr.bf16.mxu0 %v2076_v32 }
  0xbe   :  { %1529 = vmatmul.mubr.bf16.gmra.mxu1 %v2093_v37 }
  0xbf   :  { %1939 = vmatprep.mubr.msk.bf16.mxu1 %vm954_vm0, %v2097_v38 }
  0xc1   :  { %1216 = vmatmul.mubr.bf16.gmra.mxu0 %v2078_v35  ;;  %v2151_v35 = vld [vmem:[%s3135_s0 + $0x3ac] ss:$16 sps:$4 sm:$0xff]  }
  0xc2   :  { %1223 = vmatprep.mubr.bf16.mxu0 %v2082_v36 }
  0xc6   :  { %1537 = vmatmul.mubr.bf16.gmra.mxu1 %v2099_v41 }
  0xc7   :  { %1940 = vmatprep.mubr.msk.bf16.mxu1 %vm954_vm0, %v2103_v42  ;;  %v2138_v42 = vld [vmem:[%s3135_s0 + $0x340] ss:$16 sps:$4 sm:$0xff]  }
  0xc9   :  { %1224 = vmatmul.mubr.bf16.gmra.mxu0 %v2084_v39 }
  0xca   :  { %1231 = vmatprep.mubr.bf16.mxu0 %v2088_v40 }
  0xce   :  { %1545 = vmatmul.mubr.bf16.gmra.mxu1 %v2105_v45 }
  0xcf   :  { %1941 = vmatprep.mubr.msk.bf16.mxu1 %vm954_vm0, %v2109_v46 }
  0xd1   :  { %1232 = vmatmul.mubr.bf16.gmra.mxu0 %v2090_v43 }
  0xd2   :  { %1239 = vmatprep.mubr.bf16.mxu0 %v2094_v44  ;;  %v2142_v44 = vld [vmem:[%s3135_s0 + $0x364] ss:$16 sps:$4 sm:$0xff]  }
  0xd6   :  { %1553 = vmatmul.mubr.bf16.gmra.mxu1 %v2111_v49  ;;  %v2153_v49 = vld [vmem:[%s3135_s0 + $0x3a8] ss:$16 sps:$4 sm:$0xff]  }
  0xd7   :  { %1942 = vmatprep.mubr.msk.bf16.mxu1 %vm954_vm0, %v2115_v50 }
  0xd9   :  { %1240 = vmatmul.mubr.bf16.gmra.mxu0 %v2096_v47 }
  0xda   :  { %1247 = vmatprep.mubr.bf16.mxu0 %v2100_v48 }
  0xde   :  { %1561 = vmatmul.mubr.bf16.gmra.mxu1 %v2117_v53 }
  0xdf   :  { %1943 = vmatprep.mubr.msk.bf16.mxu1 %vm954_vm0, %v2121_v54 }
  0xe1   :  { %1248 = vmatmul.mubr.bf16.gmra.mxu0 %v2102_v51  ;;  %v2157_v51 = vld [vmem:[%s3135_s0 + $0x3cc] ss:$16 sps:$4 sm:$0xff]  }
  0xe2   :  { %1255 = vmatprep.mubr.bf16.mxu0 %v2106_v52 }
  0xe6   :  { %v1378_v59 = vpop.f32.mrf.mxu1  ;;  %1569 = vmatmul.mubr.bf16.gmra.mxu1 %v2123_v57 }
  0xe7   :  { %1944 = vmatprep.mubr.msk.bf16.mxu1 %vm954_vm0, %v2127_v58 }
  0xe8   :  { %v1380_v62 = vpop.f32.mrf.mxu1 }
  0xe9   :  { %1256 = vmatmul.mubr.bf16.gmra.mxu0 %v2108_v55 }
  0xea   :  { %1263 = vmatprep.mubr.bf16.mxu0 %v2112_v56  ;;  %v1381_v63 = vpop.f32.mrf.mxu1 }
  0xec   :  { %v1383_v2 = vpop.f32.mrf.mxu1 }
  0xee   :  { %v1386_v3 = vpop.f32.mrf.mxu1  ;;  %1577 = vmatmul.mubr.bf16.gmra.mxu1 %v2129_v0 }
  0xef   :  { %1945 = vmatprep.mubr.msk.bf16.mxu1 %vm954_vm0, %v2133_v1 }
  0xf0   :  { %v1388_v6 = vpop.f32.mrf.mxu1 }
  0xf1   :  { %1264 = vmatmul.mubr.bf16.gmra.mxu0 %v2114_v60 }
  0xf2   :  { %1271 = vmatprep.mubr.bf16.mxu0 %v2118_v61  ;;  %v1389_v7 = vpop.f32.mrf.mxu1  ;;  %v2150_v61 = vld [vmem:[%s3135_s0 + $0x384] ss:$16 sps:$4 sm:$0xff]  }
  0xf4   :  { %v1391_v10 = vpop.f32.mrf.mxu1 }
  0xf6   :  { %v2758_v11 = vpop.f32.mrf.mxu1  ;;  %1585 = vmatmul.mubr.bf16.gmra.mxu1 %v2135_v8 }
  0xf7   :  { %1946 = vmatprep.mubr.msk.bf16.mxu1 %vm954_vm0, %v2139_v9 }
  0xf8   :  { %v1396_v14 = vpop.f32.mrf.mxu1 }
  0xf9   :  { %1272 = vmatmul.mubr.bf16.gmra.mxu0 %v2120_v4 }
  0xfa   :  { %1279 = vmatprep.mubr.bf16.mxu0 %v2124_v5  ;;  %v2772_v16 = vpop.f32.mrf.mxu1  ;;  %v2163_v5 = vld [vmem:[%s3135_s0 + $0x3ec] ss:$16 sps:$4 sm:$0xff]  }
  0xfc   :  { %v1399_v21 = vpop.f32.mrf.mxu1 }
  0xfe   :  { %v2781_v24 = vpop.f32.mrf.mxu1  ;;  %1593 = vmatmul.mubr.bf16.gmra.mxu1 %v2141_v17 }
  0xff   :  { %1947 = vmatprep.mubr.msk.bf16.mxu1 %vm954_vm0, %v2145_v19 }
 0x100   :  { %v1404_v29 = vpop.f32.mrf.mxu1 }
 0x101   :  { %v1089_v18 = vpop.f32.mrf.mxu0  ;;  %1280 = vmatmul.mubr.bf16.gmra.mxu0 %v2126_v12 }
 0x102   :  { %v1090_v20 = vadd.f32 %v2770_v15, %v1089_v18  ;;  %1287 = vmatprep.mubr.bf16.mxu0 %v2130_v13  ;;  %v2791_v32 = vpop.f32.mrf.mxu1  ;;  %v2148_v13 = vld [vmem:[%s3135_s0 + $0x380] ss:$16 sps:$4 sm:$0xff]  }
 0x103   :  { %v1091_v22 = vpop.f32.mrf.mxu0 }
 0x104   :  { %v1379_v23 = vadd.f32 %v1378_v59, %v1090_v20  ;;  %v1407_v37 = vpop.f32.mrf.mxu1  ;;  %v2144_v59 = vld [vmem:[%s3135_s0 + $0x360] ss:$16 sps:$4 sm:$0xff]   ;;  %v2165_v22 = vld [vmem:[%s3135_s0 + $0x3e8] ss:$16 sps:$4 sm:$0xff]  }
 0x105   :  { %v1092_v25 = vpop.f32.mrf.mxu0 }
 0x106   :  { %2169 = vtanh.f32 %v1379_v23  ;;  %v1093_v27 = vadd.f32 %v2770_v15, %v1092_v25  ;;  %v2800_v40 = vpop.f32.mrf.mxu1  ;;  %1601 = vmatmul.mubr.bf16.gmra.mxu1 %v2147_v33  ;;  %v2162_v33 = vld [vmem:[%s3135_s0 + $0x3c4] ss:$16 sps:$4 sm:$0xff]  }
 0x107   :  { %v1094_v30 = vpop.f32.mrf.mxu0  ;;  %1948 = vmatprep.mubr.msk.bf16.mxu1 %vm954_vm0, %v2151_v35 }
 0x108   :  { %v1382_v31 = vadd.f32 %v1381_v63, %v1093_v27  ;;  %v1412_v45 = vpop.f32.mrf.mxu1 }
 0x109   :  { %v1097_v34 = vpop.f32.mrf.mxu0  ;;  %1288 = vmatmul.mubr.bf16.gmra.mxu0 %v2132_v26 }
 0x10a   :  { %2171 = vtanh.f32 %v1382_v31  ;;  %v1098_v36 = vadd.f32 %v2770_v15, %v1097_v34  ;;  %1295 = vmatprep.mubr.bf16.mxu0 %v2136_v28  ;;  %v2810_v48 = vpop.f32.mrf.mxu1  ;;  %v2154_v31 = vld [vmem:[%s3135_s0 + $0x3a0] ss:$16 sps:$4 sm:$0xff]  }
 0x10b   :  { %v1099_v38 = vpop.f32.mrf.mxu0 }
 0x10c   :  { %v1387_v39 = vadd.f32 %v1386_v3, %v1098_v36  ;;  %v1415_v53 = vpop.f32.mrf.mxu1  ;;  %v2159_v3 = vld [vmem:[%s3135_s0 + $0x3c8] ss:$16 sps:$4 sm:$0xff]  }
 0x10d   :  { %v1100_v41 = vpop.f32.mrf.mxu0 }
 0x10e   :  { %2173 = vtanh.f32 %v1387_v39  ;;  %v1101_v43 = vadd.f32 %v2770_v15, %v1100_v41  ;;  %v2823_v57 = vpop.f32.mrf.mxu1  ;;  %1609 = vmatmul.mubr.bf16.gmra.mxu1 %v2153_v49  ;;  %v2168_v49 = vld [vmem:[%s3135_s0 + $0x3e4] ss:$16 sps:$4 sm:$0xff]  }
 0x10f   :  { %v1102_v46 = vpop.f32.mrf.mxu0  ;;  %1949 = vmatprep.mubr.msk.bf16.mxu1 %vm954_vm0, %v2157_v51 }
 0x110   :  { %v1390_v47 = vadd.f32 %v1389_v7, %v1101_v43  ;;  %v1420_v62 = vpop.f32.mrf.mxu1 }
 0x111   :  { %v1105_v50 = vpop.f32.mrf.mxu0  ;;  %1296 = vmatmul.mubr.bf16.gmra.mxu0 %v2138_v42 }
 0x112   :  { %2175 = vtanh.f32 %v1390_v47  ;;  %v1106_v52 = vadd.f32 %v2770_v15, %v1105_v50  ;;  %1303 = vmatprep.mubr.bf16.mxu0 %v2142_v44  ;;  %v2837_v2 = vpop.f32.mrf.mxu1  ;;  %v2160_v47 = vld [vmem:[%s3135_s0 + $0x3c0] ss:$16 sps:$4 sm:$0xff]  }
 0x113   :  { %v2170_v54 = vpop.eup %2169  ;;  %v1107_v55 = vpop.f32.mrf.mxu0 }
 0x114   :  { %1697 = vst [vmem:[%s3137_s3] sm:$0xff] %v2170_v54  ;;  %v1395_v56 = vadd.f32 %v2758_v11, %v1106_v52  ;;  %v1423_v7 = vpop.f32.mrf.mxu1 }
 0x115   :  { %v1108_v58 = vpop.f32.mrf.mxu0 }
 0x116   :  { %2177 = vtanh.f32 %v1395_v56  ;;  %v1109_v60 = vadd.f32 %v2770_v15, %v1108_v58  ;;  %v2850_v11 = vpop.f32.mrf.mxu1  ;;  %1617 = vmatmul.mubr.bf16.gmra.mxu1 %v2159_v3 }
 0x117   :  { %v2172_v63 = vpop.eup %2171  ;;  %v1110_v0 = vpop.f32.mrf.mxu0  ;;  %1950 = vmatprep.mubr.msk.bf16.mxu1 %vm954_vm0, %v2163_v5 }
 0x118   :  { %1698 = vst [vmem:[%s3137_s3 + $0x8] sm:$0xff] %v2172_v63  ;;  %v1398_v1 = vadd.f32 %v2772_v16, %v1109_v60  ;;  %v2156_v16 = vld [vmem:[%s3135_s0 + $0x3a4] ss:$16 sps:$4 sm:$0xff]   ;;  %v1428_v17 = vpop.f32.mrf.mxu1  ;;  %v2166_v63 = vld [vmem:[%s3135_s0 + $0x3e0] ss:$16 sps:$4 sm:$0xff]  }
 0x119   :  { %v1113_v4 = vpop.f32.mrf.mxu0  ;;  %1304 = vmatmul.mubr.bf16.gmra.mxu0 %v2144_v59 }
 0x11a   :  { %2179 = vtanh.f32 %v1398_v1  ;;  %v1114_v6 = vadd.f32 %v2770_v15, %v1113_v4  ;;  %1311 = vmatprep.mubr.bf16.mxu0 %v2150_v61  ;;  %v2864_v21 = vpop.f32.mrf.mxu1 }
 0x11b   :  { %v2174_v8 = vpop.eup %2173  ;;  %v1115_v9 = vpop.f32.mrf.mxu0 }
 0x11c   :  { %1699 = vst [vmem:[%s3137_s3 + $0x10] sm:$0xff] %v2174_v8  ;;  %v1403_v10 = vadd.f32 %v2781_v24, %v1114_v6  ;;  %v1431_v25 = vpop.f32.mrf.mxu1 }
 0x11d   :  { %v1116_v12 = vpop.f32.mrf.mxu0 }
 0x11e   :  { %2181 = vtanh.f32 %v1403_v10  ;;  %v1117_v14 = vadd.f32 %v2770_v15, %v1116_v12  ;;  %v2874_v29 = vpop.f32.mrf.mxu1  ;;  %1625 = vmatmul.mubr.bf16.gmra.mxu1 %v2165_v22 }
 0x11f   :  { %v2176_v18 = vpop.eup %2175  ;;  %v1118_v19 = vpop.f32.mrf.mxu0 }
 0x120   :  { %1700 = vst [vmem:[%s3137_s3 + $0x18] sm:$0xff] %v2176_v18  ;;  %v1406_v20 = vadd.f32 %v2791_v32, %v1117_v14  ;;  %v1436_v34 = vpop.f32.mrf.mxu1 }
 0x121   :  { %v1121_v23 = vpop.f32.mrf.mxu0  ;;  %1312 = vmatmul.mubr.bf16.gmra.mxu0 %v2148_v13 }
 0x122   :  { %2183 = vtanh.f32 %v1406_v20  ;;  %v1122_v24 = vadd.f32 %v2770_v15, %v1121_v23  ;;  %1319 = vmatprep.mubr.bf16.mxu0 %v2156_v16  ;;  %v1437_v38 = vpop.f32.mrf.mxu1 }
 0x123   :  { %v2178_v26 = vpop.eup %2177  ;;  %v1123_v27 = vpop.f32.mrf.mxu0 }
 0x124   :  { %1701 = vst [vmem:[%s3137_s3 + $0x20] sm:$0xff] %v2178_v26  ;;  %v1411_v28 = vadd.f32 %v2800_v40, %v1122_v24  ;;  %v1439_v41 = vpop.f32.mrf.mxu1 }
 0x125   :  { %v1124_v30 = vpop.f32.mrf.mxu0 }
 0x126   :  { %2185 = vtanh.f32 %v1411_v28  ;;  %v1125_v32 = vadd.f32 %v2770_v15, %v1124_v30  ;;  %v1442_v45 = vpop.f32.mrf.mxu1 }
 0x127   :  { %v2180_v35 = vpop.eup %2179  ;;  %v1126_v36 = vpop.f32.mrf.mxu0 }
 0x128   :  { %1702 = vst [vmem:[%s3137_s3 + $0x28] sm:$0xff] %v2180_v35  ;;  %v1414_v37 = vadd.f32 %v2810_v48, %v1125_v32  ;;  %v1444_v50 = vpop.f32.mrf.mxu1 }
 0x129   :  { %v1129_v39 = vpop.f32.mrf.mxu0  ;;  %1320 = vmatmul.mubr.bf16.gmra.mxu0 %v2154_v31 }
 0x12a   :  { %2187 = vtanh.f32 %v1414_v37  ;;  %v1130_v40 = vadd.f32 %v2770_v15, %v1129_v39  ;;  %1327 = vmatprep.mubr.bf16.mxu0 %v2162_v33  ;;  %v1445_v54 = vpop.f32.mrf.mxu1 }
 0x12b   :  { %v2182_v42 = vpop.eup %2181  ;;  %v1131_v43 = vpop.f32.mrf.mxu0 }
 0x12c   :  { %1703 = vst [vmem:[%s3137_s3 + $0x30] sm:$0xff] %v2182_v42  ;;  %v1419_v44 = vadd.f32 %v2823_v57, %v1130_v40  ;;  %v1447_v57 = vpop.f32.mrf.mxu1 }
 0x12d   :  { %v1132_v46 = vpop.f32.mrf.mxu0 }
 0x12e   :  { %2189 = vtanh.f32 %v1419_v44  ;;  %v1133_v48 = vadd.f32 %v2770_v15, %v1132_v46  ;;  %v1450_v61 = vpop.f32.mrf.mxu1 }
 0x12f   :  { %v2184_v51 = vpop.eup %2183  ;;  %v1134_v52 = vpop.f32.mrf.mxu0 }
 0x130   :  { %1704 = vst [vmem:[%s3137_s3 + $0x38] sm:$0xff] %v2184_v51  ;;  %v1422_v53 = vadd.f32 %v2837_v2, %v1133_v48  ;;  %v1452_v1 = vpop.f32.mrf.mxu1 }
 0x131   :  { %v1137_v55 = vpop.f32.mrf.mxu0  ;;  %1328 = vmatmul.mubr.bf16.gmra.mxu0 %v2160_v47 }
 0x132   :  { %2191 = vtanh.f32 %v1422_v53  ;;  %v1138_v56 = vadd.f32 %v2770_v15, %v1137_v55  ;;  %1335 = vmatprep.mubr.bf16.mxu0 %v2168_v49  ;;  %v1453_v5 = vpop.f32.mrf.mxu1 }
 0x133   :  { %v2186_v58 = vpop.eup %2185  ;;  %v1139_v59 = vpop.f32.mrf.mxu0 }
 0x134   :  { %1705 = vst [vmem:[%s3137_s3 + $0x40] sm:$0xff] %v2186_v58  ;;  %v1427_v60 = vadd.f32 %v2850_v11, %v1138_v56  ;;  %v1455_v8 = vpop.f32.mrf.mxu1 }
 0x135   :  { %v1140_v62 = vpop.f32.mrf.mxu0 }
 0x136   :  { %2193 = vtanh.f32 %v1427_v60  ;;  %v1141_v0 = vadd.f32 %v2770_v15, %v1140_v62  ;;  %v1458_v12 = vpop.f32.mrf.mxu1 }
 0x137   :  { %v2188_v2 = vpop.eup %2187  ;;  %v1142_v3 = vpop.f32.mrf.mxu0 }
 0x138   :  { %1706 = vst [vmem:[%s3137_s3 + $0x48] sm:$0xff] %v2188_v2  ;;  %v1430_v4 = vadd.f32 %v2864_v21, %v1141_v0  ;;  %v1460_v16 = vpop.f32.mrf.mxu1 }
 0x139   :  { %v1145_v6 = vpop.f32.mrf.mxu0  ;;  %1336 = vmatmul.mubr.bf16.gmra.mxu0 %v2166_v63 }
 0x13a   :  { %2195 = vtanh.f32 %v1430_v4  ;;  %v1146_v7 = vadd.f32 %v2770_v15, %v1145_v6  ;;  %v1461_v20 = vpop.f32.mrf.mxu1 }
 0x13b   :  { %v2190_v9 = vpop.eup %2189  ;;  %v1147_v10 = vpop.f32.mrf.mxu0 }
 0x13c   :  { %1707 = vst [vmem:[%s3137_s3 + $0x50] sm:$0xff] %v2190_v9  ;;  %v1435_v11 = vadd.f32 %v2874_v29, %v1146_v7  ;;  %v1463_v23 = vpop.f32.mrf.mxu1 }
 0x13d   :  { %v1148_v13 = vpop.f32.mrf.mxu0 }
 0x13e   :  { %2197 = vtanh.f32 %v1435_v11  ;;  %v1149_v14 = vadd.f32 %v2770_v15, %v1148_v13  ;;  %v1466_v27 = vpop.f32.mrf.mxu1 }
 0x13f   :  { %v2192_v17 = vpop.eup %2191  ;;  %v1150_v18 = vpop.f32.mrf.mxu0 }
 0x140   :  { %1708 = vst [vmem:[%s3137_s3 + $0x58] sm:$0xff] %v2192_v17  ;;  %v1438_v19 = vadd.f32 %v1437_v38, %v1149_v14  ;;  %v1468_v30 = vpop.f32.mrf.mxu1 }
 0x141   :  { %v1153_v21 = vpop.f32.mrf.mxu0 }
 0x142   :  { %2199 = vtanh.f32 %v1438_v19  ;;  %v1154_v22 = vadd.f32 %v2770_v15, %v1153_v21  ;;  %v1469_v34 = vpop.f32.mrf.mxu1 }
 0x143   :  { %v2194_v24 = vpop.eup %2193  ;;  %v1155_v25 = vpop.f32.mrf.mxu0 }
 0x144   :  { %1709 = vst [vmem:[%s3137_s3 + $0x60] sm:$0xff] %v2194_v24  ;;  %v1443_v26 = vadd.f32 %v1442_v45, %v1154_v22  ;;  %v1471_v37 = vpop.f32.mrf.mxu1 }
 0x145   :  { %v1156_v28 = vpop.f32.mrf.mxu0 }
 0x146   :  { %2201 = vtanh.f32 %v1443_v26  ;;  %v1157_v29 = vadd.f32 %v2770_v15, %v1156_v28  ;;  %v1474_v41 = vpop.f32.mrf.mxu1 }
 0x147   :  { %v2196_v31 = vpop.eup %2195  ;;  %v1158_v32 = vpop.f32.mrf.mxu0 }
 0x148   :  { %1710 = vst [vmem:[%s3137_s3 + $0x68] sm:$0xff] %v2196_v31  ;;  %v1446_v33 = vadd.f32 %v1445_v54, %v1157_v29  ;;  %v1476_v44 = vpop.f32.mrf.mxu1 }
 0x149   :  { %v1161_v35 = vpop.f32.mrf.mxu0 }
 0x14a   :  { %2203 = vtanh.f32 %v1446_v33  ;;  %v1162_v36 = vadd.f32 %v2770_v15, %v1161_v35  ;;  %v1477_v48 = vpop.f32.mrf.mxu1 }
 0x14b   :  { %v2198_v38 = vpop.eup %2197  ;;  %v1163_v39 = vpop.f32.mrf.mxu0 }
 0x14c   :  { %1711 = vst [vmem:[%s3137_s3 + $0x70] sm:$0xff] %v2198_v38  ;;  %v1451_v40 = vadd.f32 %v1450_v61, %v1162_v36  ;;  %v1479_v51 = vpop.f32.mrf.mxu1 }
 0x14d   :  { %v1164_v42 = vpop.f32.mrf.mxu0 }
 0x14e   :  { %2205 = vtanh.f32 %v1451_v40  ;;  %v1165_v43 = vadd.f32 %v2770_v15, %v1164_v42  ;;  %v1482_v55 = vpop.f32.mrf.mxu1 }
 0x14f   :  { %v2200_v45 = vpop.eup %2199  ;;  %v1166_v46 = vpop.f32.mrf.mxu0 }
 0x150   :  { %1712 = vst [vmem:[%s3137_s3 + $0x78] sm:$0xff] %v2200_v45  ;;  %v1454_v47 = vadd.f32 %v1453_v5, %v1165_v43  ;;  %v1484_v58 = vpop.f32.mrf.mxu1 }
 0x151   :  { %v1169_v49 = vpop.f32.mrf.mxu0 }
 0x152   :  { %2207 = vtanh.f32 %v1454_v47  ;;  %v1170_v50 = vadd.f32 %v2770_v15, %v1169_v49  ;;  %v1485_v62 = vpop.f32.mrf.mxu1 }
 0x153   :  { %v2202_v52 = vpop.eup %2201  ;;  %v1171_v53 = vpop.f32.mrf.mxu0 }
 0x154   :  { %1713 = vst [vmem:[%s3137_s3 + $0x80] sm:$0xff] %v2202_v52  ;;  %v1459_v54 = vadd.f32 %v1458_v12, %v1170_v50  ;;  %v1487_v1 = vpop.f32.mrf.mxu1 }
 0x155   :  { %v1172_v56 = vpop.f32.mrf.mxu0 }
 0x156   :  { %2209 = vtanh.f32 %v1459_v54  ;;  %v1173_v57 = vadd.f32 %v2770_v15, %v1172_v56  ;;  %v1490_v5 = vpop.f32.mrf.mxu1 }
 0x157   :  { %v2204_v59 = vpop.eup %2203  ;;  %v1174_v60 = vpop.f32.mrf.mxu0 }
 0x158   :  { %1714 = vst [vmem:[%s3137_s3 + $0x88] sm:$0xff] %v2204_v59  ;;  %v1462_v61 = vadd.f32 %v1461_v20, %v1173_v57  ;;  %v1492_v8 = vpop.f32.mrf.mxu1 }
 0x159   :  { %v1177_v63 = vpop.f32.mrf.mxu0 }
 0x15a   :  { %2211 = vtanh.f32 %v1462_v61  ;;  %v1178_v0 = vadd.f32 %v2770_v15, %v1177_v63  ;;  %v1493_v12 = vpop.f32.mrf.mxu1 }
 0x15b   :  { %v2206_v2 = vpop.eup %2205  ;;  %v1179_v3 = vpop.f32.mrf.mxu0 }
 0x15c   :  { %1715 = vst [vmem:[%s3137_s3 + $0x90] sm:$0xff] %v2206_v2  ;;  %v1467_v4 = vadd.f32 %v1466_v27, %v1178_v0  ;;  %v1495_v16 = vpop.f32.mrf.mxu1 }
 0x15d   :  { %v1180_v6 = vpop.f32.mrf.mxu0 }
 0x15e   :  { %2213 = vtanh.f32 %v1467_v4  ;;  %v1181_v7 = vadd.f32 %v2770_v15, %v1180_v6  ;;  %v1498_v20 = vpop.f32.mrf.mxu1 }
 0x15f   :  { %v2208_v9 = vpop.eup %2207  ;;  %v1182_v10 = vpop.f32.mrf.mxu0 }
 0x160   :  { %1716 = vst [vmem:[%s3137_s3 + $0x98] sm:$0xff] %v2208_v9  ;;  %v1470_v11 = vadd.f32 %v1469_v34, %v1181_v7  ;;  %v1500_v23 = vpop.f32.mrf.mxu1 }
 0x161   :  { %v1185_v13 = vpop.f32.mrf.mxu0 }
 0x162   :  { %2215 = vtanh.f32 %v1470_v11  ;;  %v1186_v14 = vadd.f32 %v2770_v15, %v1185_v13  ;;  %v1501_v27 = vpop.f32.mrf.mxu1 }
 0x163   :  { %v2210_v17 = vpop.eup %2209  ;;  %v1187_v18 = vpop.f32.mrf.mxu0 }
 0x164   :  { %1717 = vst [vmem:[%s3137_s3 + $0xa0] sm:$0xff] %v2210_v17  ;;  %v1475_v19 = vadd.f32 %v1474_v41, %v1186_v14  ;;  %v1503_v30 = vpop.f32.mrf.mxu1 }
 0x165   :  { %v1188_v21 = vpop.f32.mrf.mxu0 }
 0x166   :  { %2217 = vtanh.f32 %v1475_v19  ;;  %v1189_v22 = vadd.f32 %v2770_v15, %v1188_v21  ;;  %v1506_v34 = vpop.f32.mrf.mxu1 }
 0x167   :  { %v2212_v24 = vpop.eup %2211  ;;  %v1190_v25 = vpop.f32.mrf.mxu0 }
 0x168   :  { %1718 = vst [vmem:[%s3137_s3 + $0xa8] sm:$0xff] %v2212_v24  ;;  %v1478_v26 = vadd.f32 %v1477_v48, %v1189_v22  ;;  %v1508_v37 = vpop.f32.mrf.mxu1 }
 0x169   :  { %v1193_v28 = vpop.f32.mrf.mxu0 }
 0x16a   :  { %2219 = vtanh.f32 %v1478_v26  ;;  %v1194_v29 = vadd.f32 %v2770_v15, %v1193_v28  ;;  %v1509_v41 = vpop.f32.mrf.mxu1 }
 0x16b   :  { %v2214_v31 = vpop.eup %2213  ;;  %v1195_v32 = vpop.f32.mrf.mxu0 }
 0x16c   :  { %1719 = vst [vmem:[%s3137_s3 + $0xb0] sm:$0xff] %v2214_v31  ;;  %v1483_v33 = vadd.f32 %v1482_v55, %v1194_v29  ;;  %v1511_v44 = vpop.f32.mrf.mxu1 }
 0x16d   :  { %v1196_v35 = vpop.f32.mrf.mxu0 }
 0x16e   :  { %2221 = vtanh.f32 %v1483_v33  ;;  %v1197_v36 = vadd.f32 %v2770_v15, %v1196_v35  ;;  %v1514_v48 = vpop.f32.mrf.mxu1 }
 0x16f   :  { %v2216_v38 = vpop.eup %2215  ;;  %v1198_v39 = vpop.f32.mrf.mxu0 }
 0x170   :  { %1720 = vst [vmem:[%s3137_s3 + $0xb8] sm:$0xff] %v2216_v38  ;;  %v1486_v40 = vadd.f32 %v1485_v62, %v1197_v36  ;;  %v1516_v51 = vpop.f32.mrf.mxu1 }
 0x171   :  { %v1201_v42 = vpop.f32.mrf.mxu0 }
 0x172   :  { %2223 = vtanh.f32 %v1486_v40  ;;  %v1202_v43 = vadd.f32 %v2770_v15, %v1201_v42  ;;  %v1517_v55 = vpop.f32.mrf.mxu1 }
 0x173   :  { %v2218_v45 = vpop.eup %2217  ;;  %v1203_v46 = vpop.f32.mrf.mxu0 }
 0x174   :  { %1721 = vst [vmem:[%s3137_s3 + $0xc0] sm:$0xff] %v2218_v45  ;;  %v1491_v47 = vadd.f32 %v1490_v5, %v1202_v43  ;;  %v1519_v58 = vpop.f32.mrf.mxu1 }
 0x175   :  { %v1204_v49 = vpop.f32.mrf.mxu0 }
 0x176   :  { %2225 = vtanh.f32 %v1491_v47  ;;  %v1205_v50 = vadd.f32 %v2770_v15, %v1204_v49  ;;  %v1522_v62 = vpop.f32.mrf.mxu1 }
 0x177   :  { %v2220_v52 = vpop.eup %2219  ;;  %v1206_v53 = vpop.f32.mrf.mxu0 }
 0x178   :  { %1722 = vst [vmem:[%s3137_s3 + $0xc8] sm:$0xff] %v2220_v52  ;;  %v1494_v54 = vadd.f32 %v1493_v12, %v1205_v50  ;;  %v1524_v1 = vpop.f32.mrf.mxu1 }
 0x179   :  { %v1209_v56 = vpop.f32.mrf.mxu0 }
 0x17a   :  { %2227 = vtanh.f32 %v1494_v54  ;;  %v1210_v57 = vadd.f32 %v2770_v15, %v1209_v56  ;;  %v1525_v5 = vpop.f32.mrf.mxu1 }
 0x17b   :  { %v2222_v59 = vpop.eup %2221  ;;  %v1211_v60 = vpop.f32.mrf.mxu0 }
 0x17c   :  { %1723 = vst [vmem:[%s3137_s3 + $0xd0] sm:$0xff] %v2222_v59  ;;  %v1499_v61 = vadd.f32 %v1498_v20, %v1210_v57  ;;  %v1527_v8 = vpop.f32.mrf.mxu1 }
 0x17d   :  { %v1212_v63 = vpop.f32.mrf.mxu0 }
 0x17e   :  { %2229 = vtanh.f32 %v1499_v61  ;;  %v1213_v0 = vadd.f32 %v2770_v15, %v1212_v63  ;;  %v1530_v12 = vpop.f32.mrf.mxu1 }
 0x17f   :  { %v2224_v2 = vpop.eup %2223  ;;  %v1214_v3 = vpop.f32.mrf.mxu0 }
 0x180   :  { %1724 = vst [vmem:[%s3137_s3 + $0xd8] sm:$0xff] %v2224_v2  ;;  %v1502_v4 = vadd.f32 %v1501_v27, %v1213_v0  ;;  %v1532_v16 = vpop.f32.mrf.mxu1 }
 0x181   :  { %v1217_v6 = vpop.f32.mrf.mxu0 }
 0x182   :  { %2231 = vtanh.f32 %v1502_v4  ;;  %v1218_v7 = vadd.f32 %v2770_v15, %v1217_v6  ;;  %v1533_v20 = vpop.f32.mrf.mxu1 }
 0x183   :  { %v2226_v9 = vpop.eup %2225  ;;  %v1219_v10 = vpop.f32.mrf.mxu0 }
 0x184   :  { %1725 = vst [vmem:[%s3137_s3 + $0xe0] sm:$0xff] %v2226_v9  ;;  %v1507_v11 = vadd.f32 %v1506_v34, %v1218_v7  ;;  %v1535_v23 = vpop.f32.mrf.mxu1 }
 0x185   :  { %v1220_v13 = vpop.f32.mrf.mxu0 }
 0x186   :  { %2233 = vtanh.f32 %v1507_v11  ;;  %v1221_v14 = vadd.f32 %v2770_v15, %v1220_v13  ;;  %v1538_v27 = vpop.f32.mrf.mxu1 }
 0x187   :  { %v2228_v17 = vpop.eup %2227  ;;  %v1222_v18 = vpop.f32.mrf.mxu0 }
 0x188   :  { %1726 = vst [vmem:[%s3137_s3 + $0xe8] sm:$0xff] %v2228_v17  ;;  %v1510_v19 = vadd.f32 %v1509_v41, %v1221_v14  ;;  %v1540_v30 = vpop.f32.mrf.mxu1 }
 0x189   :  { %v1225_v21 = vpop.f32.mrf.mxu0 }
 0x18a   :  { %2235 = vtanh.f32 %v1510_v19  ;;  %v1226_v22 = vadd.f32 %v2770_v15, %v1225_v21  ;;  %v1541_v34 = vpop.f32.mrf.mxu1 }
 0x18b   :  { %v2230_v24 = vpop.eup %2229  ;;  %v1227_v25 = vpop.f32.mrf.mxu0 }
 0x18c   :  { %1727 = vst [vmem:[%s3137_s3 + $0xf0] sm:$0xff] %v2230_v24  ;;  %v1515_v26 = vadd.f32 %v1514_v48, %v1226_v22  ;;  %v1543_v37 = vpop.f32.mrf.mxu1 }
 0x18d   :  { %v1228_v28 = vpop.f32.mrf.mxu0 }
 0x18e   :  { %2237 = vtanh.f32 %v1515_v26  ;;  %v1229_v29 = vadd.f32 %v2770_v15, %v1228_v28  ;;  %v1546_v41 = vpop.f32.mrf.mxu1 }
 0x18f   :  { %v2232_v31 = vpop.eup %2231  ;;  %v1230_v32 = vpop.f32.mrf.mxu0 }
 0x190   :  { %1728 = vst [vmem:[%s3137_s3 + $0xf8] sm:$0xff] %v2232_v31  ;;  %v1518_v33 = vadd.f32 %v1517_v55, %v1229_v29  ;;  %v1548_v44 = vpop.f32.mrf.mxu1 }
 0x191   :  { %v1233_v35 = vpop.f32.mrf.mxu0 }
 0x192   :  { %2239 = vtanh.f32 %v1518_v33  ;;  %v1234_v36 = vadd.f32 %v2770_v15, %v1233_v35  ;;  %v1549_v48 = vpop.f32.mrf.mxu1 }
 0x193   :  { %v2234_v38 = vpop.eup %2233  ;;  %v1235_v39 = vpop.f32.mrf.mxu0 }
 0x194   :  { %1729 = vst [vmem:[%s3137_s3 + $0x100] sm:$0xff] %v2234_v38  ;;  %v1523_v40 = vadd.f32 %v1522_v62, %v1234_v36  ;;  %v1551_v51 = vpop.f32.mrf.mxu1 }
 0x195   :  { %v1236_v42 = vpop.f32.mrf.mxu0 }
 0x196   :  { %2241 = vtanh.f32 %v1523_v40  ;;  %v1237_v43 = vadd.f32 %v2770_v15, %v1236_v42  ;;  %v1554_v55 = vpop.f32.mrf.mxu1 }
 0x197   :  { %v2236_v45 = vpop.eup %2235  ;;  %v1238_v46 = vpop.f32.mrf.mxu0 }
 0x198   :  { %1730 = vst [vmem:[%s3137_s3 + $0x108] sm:$0xff] %v2236_v45  ;;  %v1526_v47 = vadd.f32 %v1525_v5, %v1237_v43  ;;  %v1556_v58 = vpop.f32.mrf.mxu1 }
 0x199   :  { %v1241_v49 = vpop.f32.mrf.mxu0 }
 0x19a   :  { %2243 = vtanh.f32 %v1526_v47  ;;  %v1242_v50 = vadd.f32 %v2770_v15, %v1241_v49  ;;  %v1557_v62 = vpop.f32.mrf.mxu1 }
 0x19b   :  { %v2238_v52 = vpop.eup %2237  ;;  %v1243_v53 = vpop.f32.mrf.mxu0 }
 0x19c   :  { %1731 = vst [vmem:[%s3137_s3 + $0x110] sm:$0xff] %v2238_v52  ;;  %v1531_v54 = vadd.f32 %v1530_v12, %v1242_v50  ;;  %v1559_v1 = vpop.f32.mrf.mxu1 }
 0x19d   :  { %v1244_v56 = vpop.f32.mrf.mxu0 }
 0x19e   :  { %2245 = vtanh.f32 %v1531_v54  ;;  %v1245_v57 = vadd.f32 %v2770_v15, %v1244_v56  ;;  %v1562_v5 = vpop.f32.mrf.mxu1 }
 0x19f   :  { %v2240_v59 = vpop.eup %2239  ;;  %v1246_v60 = vpop.f32.mrf.mxu0 }
 0x1a0   :  { %1732 = vst [vmem:[%s3137_s3 + $0x118] sm:$0xff] %v2240_v59  ;;  %v1534_v61 = vadd.f32 %v1533_v20, %v1245_v57  ;;  %v1564_v8 = vpop.f32.mrf.mxu1 }
 0x1a1   :  { %v1249_v63 = vpop.f32.mrf.mxu0 }
 0x1a2   :  { %2247 = vtanh.f32 %v1534_v61  ;;  %v1250_v0 = vadd.f32 %v2770_v15, %v1249_v63  ;;  %v1565_v12 = vpop.f32.mrf.mxu1 }
 0x1a3   :  { %v2242_v2 = vpop.eup %2241  ;;  %v1251_v3 = vpop.f32.mrf.mxu0 }
 0x1a4   :  { %1733 = vst [vmem:[%s3137_s3 + $0x120] sm:$0xff] %v2242_v2  ;;  %v1539_v4 = vadd.f32 %v1538_v27, %v1250_v0  ;;  %v1567_v16 = vpop.f32.mrf.mxu1 }
 0x1a5   :  { %v1252_v6 = vpop.f32.mrf.mxu0 }
 0x1a6   :  { %2249 = vtanh.f32 %v1539_v4  ;;  %v1253_v7 = vadd.f32 %v2770_v15, %v1252_v6  ;;  %v1570_v20 = vpop.f32.mrf.mxu1 }
 0x1a7   :  { %v2244_v9 = vpop.eup %2243  ;;  %v1254_v10 = vpop.f32.mrf.mxu0 }
 0x1a8   :  { %1734 = vst [vmem:[%s3137_s3 + $0x128] sm:$0xff] %v2244_v9  ;;  %v1542_v11 = vadd.f32 %v1541_v34, %v1253_v7  ;;  %v1572_v23 = vpop.f32.mrf.mxu1 }
 0x1a9   :  { %v1257_v13 = vpop.f32.mrf.mxu0 }
 0x1aa   :  { %2251 = vtanh.f32 %v1542_v11  ;;  %v1258_v14 = vadd.f32 %v2770_v15, %v1257_v13  ;;  %v1573_v27 = vpop.f32.mrf.mxu1 }
 0x1ab   :  { %v2246_v17 = vpop.eup %2245  ;;  %v1259_v18 = vpop.f32.mrf.mxu0 }
 0x1ac   :  { %1735 = vst [vmem:[%s3137_s3 + $0x130] sm:$0xff] %v2246_v17  ;;  %v1547_v19 = vadd.f32 %v1546_v41, %v1258_v14  ;;  %v1575_v30 = vpop.f32.mrf.mxu1 }
 0x1ad   :  { %v1260_v21 = vpop.f32.mrf.mxu0 }
 0x1ae   :  { %2253 = vtanh.f32 %v1547_v19  ;;  %v1261_v22 = vadd.f32 %v2770_v15, %v1260_v21  ;;  %v1578_v34 = vpop.f32.mrf.mxu1 }
 0x1af   :  { %v2248_v24 = vpop.eup %2247  ;;  %v1262_v25 = vpop.f32.mrf.mxu0 }
 0x1b0   :  { %1736 = vst [vmem:[%s3137_s3 + $0x138] sm:$0xff] %v2248_v24  ;;  %v1550_v26 = vadd.f32 %v1549_v48, %v1261_v22  ;;  %v1580_v37 = vpop.f32.mrf.mxu1 }
 0x1b1   :  { %v1265_v28 = vpop.f32.mrf.mxu0 }
 0x1b2   :  { %2255 = vtanh.f32 %v1550_v26  ;;  %v1266_v29 = vadd.f32 %v2770_v15, %v1265_v28  ;;  %v1581_v41 = vpop.f32.mrf.mxu1 }
 0x1b3   :  { %v2250_v31 = vpop.eup %2249  ;;  %v1267_v32 = vpop.f32.mrf.mxu0 }
 0x1b4   :  { %1737 = vst [vmem:[%s3137_s3 + $0x140] sm:$0xff] %v2250_v31  ;;  %v1555_v33 = vadd.f32 %v1554_v55, %v1266_v29  ;;  %v1583_v44 = vpop.f32.mrf.mxu1  ;;  %v3076_v29 = vld [vmem:[%s3136_s2] ss:$0 sm:$0xff] }
 0x1b5   :  { %v1268_v35 = vpop.f32.mrf.mxu0 }
 0x1b6   :  { %2257 = vtanh.f32 %v1555_v33  ;;  %v1269_v36 = vadd.f32 %v2770_v15, %v1268_v35  ;;  %v1586_v48 = vpop.f32.mrf.mxu1 }
 0x1b7   :  { %v2252_v38 = vpop.eup %2251  ;;  %v1270_v39 = vpop.f32.mrf.mxu0 }
 0x1b8   :  { %1738 = vst [vmem:[%s3137_s3 + $0x148] sm:$0xff] %v2252_v38  ;;  %v1558_v40 = vadd.f32 %v1557_v62, %v1269_v36  ;;  %v1588_v51 = vpop.f32.mrf.mxu1 }
 0x1b9   :  { %v1273_v42 = vpop.f32.mrf.mxu0 }
 0x1ba   :  { %2259 = vtanh.f32 %v1558_v40  ;;  %v1274_v43 = vadd.f32 %v2770_v15, %v1273_v42  ;;  %v1589_v55 = vpop.f32.mrf.mxu1 }
 0x1bb   :  { %v2254_v45 = vpop.eup %2253  ;;  %v1275_v46 = vpop.f32.mrf.mxu0 }
 0x1bc   :  { %1739 = vst [vmem:[%s3137_s3 + $0x150] sm:$0xff] %v2254_v45  ;;  %v1563_v47 = vadd.f32 %v1562_v5, %v1274_v43  ;;  %v1591_v58 = vpop.f32.mrf.mxu1 }
 0x1bd   :  { %v1276_v49 = vpop.f32.mrf.mxu0 }
 0x1be   :  { %2261 = vtanh.f32 %v1563_v47  ;;  %v1277_v50 = vadd.f32 %v2770_v15, %v1276_v49  ;;  %v1594_v62 = vpop.f32.mrf.mxu1 }
 0x1bf   :  { %v2256_v52 = vpop.eup %2255  ;;  %v1278_v53 = vpop.f32.mrf.mxu0 }
 0x1c0   :  { %1740 = vst [vmem:[%s3137_s3 + $0x158] sm:$0xff] %v2256_v52  ;;  %v1566_v54 = vadd.f32 %v1565_v12, %v1277_v50  ;;  %v1596_v1 = vpop.f32.mrf.mxu1 }
 0x1c1   :  { %v1281_v56 = vpop.f32.mrf.mxu0 }
 0x1c2   :  { %2263 = vtanh.f32 %v1566_v54  ;;  %v1282_v57 = vadd.f32 %v2770_v15, %v1281_v56  ;;  %v1597_v5 = vpop.f32.mrf.mxu1 }
 0x1c3   :  { %v2258_v59 = vpop.eup %2257  ;;  %v1283_v60 = vpop.f32.mrf.mxu0 }
 0x1c4   :  { %1741 = vst [vmem:[%s3137_s3 + $0x160] sm:$0xff] %v2258_v59  ;;  %v1571_v61 = vadd.f32 %v1570_v20, %v1282_v57  ;;  %v1599_v8 = vpop.f32.mrf.mxu1 }
 0x1c5   :  { %v1284_v63 = vpop.f32.mrf.mxu0 }
 0x1c6   :  { %2265 = vtanh.f32 %v1571_v61  ;;  %v1285_v0 = vadd.f32 %v2770_v15, %v1284_v63  ;;  %v1602_v12 = vpop.f32.mrf.mxu1 }
 0x1c7   :  { %v2260_v2 = vpop.eup %2259  ;;  %v1286_v3 = vpop.f32.mrf.mxu0 }
 0x1c8   :  { %1742 = vst [vmem:[%s3137_s3 + $0x168] sm:$0xff] %v2260_v2  ;;  %v1574_v4 = vadd.f32 %v1573_v27, %v1285_v0  ;;  %v1604_v16 = vpop.f32.mrf.mxu1 }
 0x1c9   :  { %v1289_v6 = vpop.f32.mrf.mxu0 }
 0x1ca   :  { %2267 = vtanh.f32 %v1574_v4  ;;  %v1290_v7 = vadd.f32 %v2770_v15, %v1289_v6  ;;  %v1605_v20 = vpop.f32.mrf.mxu1 }
 0x1cb   :  { %v2262_v9 = vpop.eup %2261  ;;  %v1291_v10 = vpop.f32.mrf.mxu0 }
 0x1cc   :  { %1743 = vst [vmem:[%s3137_s3 + $0x170] sm:$0xff] %v2262_v9  ;;  %v1579_v11 = vadd.f32 %v1578_v34, %v1290_v7  ;;  %v1607_v23 = vpop.f32.mrf.mxu1 }
 0x1cd   :  { %v1292_v13 = vpop.f32.mrf.mxu0 }
 0x1ce   :  { %2269 = vtanh.f32 %v1579_v11  ;;  %v1293_v14 = vadd.f32 %v2770_v15, %v1292_v13  ;;  %v1610_v27 = vpop.f32.mrf.mxu1 }
 0x1cf   :  { %v2264_v17 = vpop.eup %2263  ;;  %v1294_v18 = vpop.f32.mrf.mxu0 }
 0x1d0   :  { %1744 = vst [vmem:[%s3137_s3 + $0x178] sm:$0xff] %v2264_v17  ;;  %v1582_v19 = vadd.f32 %v1581_v41, %v1293_v14  ;;  %v1612_v31 = vpop.f32.mrf.mxu1 }
 0x1d1   :  { %v1297_v21 = vpop.f32.mrf.mxu0 }
 0x1d2   :  { %2271 = vtanh.f32 %v1582_v19  ;;  %v1298_v22 = vadd.f32 %v2770_v15, %v1297_v21  ;;  %v1613_v34 = vpop.f32.mrf.mxu1 }
 0x1d3   :  { %v2266_v24 = vpop.eup %2265  ;;  %v1299_v25 = vpop.f32.mrf.mxu0 }
 0x1d4   :  { %1745 = vst [vmem:[%s3137_s3 + $0x180] sm:$0xff] %v2266_v24  ;;  %v1587_v26 = vadd.f32 %v1586_v48, %v1298_v22  ;;  %v1615_v37 = vpop.f32.mrf.mxu1 }
 0x1d5   :  { %v1300_v28 = vpop.f32.mrf.mxu0 }
 0x1d6   :  { %2273 = vtanh.f32 %v1587_v26  ;;  %v1301_v30 = vadd.f32 %v3076_v29, %v1300_v28  ;;  %v1618_v41 = vpop.f32.mrf.mxu1 }
 0x1d7   :  { %v2268_v15 = vpop.eup %2267  ;;  %v1302_v32 = vpop.f32.mrf.mxu0 }
 0x1d8   :  { %1746 = vst [vmem:[%s3137_s3 + $0x188] sm:$0xff] %v2268_v15  ;;  %v1590_v33 = vadd.f32 %v1589_v55, %v1301_v30  ;;  %v1620_v44 = vpop.f32.mrf.mxu1 }
 0x1d9   :  { %v1305_v35 = vpop.f32.mrf.mxu0 }
 0x1da   :  { %2275 = vtanh.f32 %v1590_v33  ;;  %v1306_v36 = vadd.f32 %v3076_v29, %v1305_v35  ;;  %v1621_v48 = vpop.f32.mrf.mxu1 }
 0x1db   :  { %v2270_v38 = vpop.eup %2269  ;;  %v1307_v39 = vpop.f32.mrf.mxu0 }
 0x1dc   :  { %1747 = vst [vmem:[%s3137_s3 + $0x190] sm:$0xff] %v2270_v38  ;;  %v1595_v40 = vadd.f32 %v1594_v62, %v1306_v36  ;;  %v1623_v51 = vpop.f32.mrf.mxu1 }
 0x1dd   :  { %v1308_v42 = vpop.f32.mrf.mxu0 }
 0x1de   :  { %2277 = vtanh.f32 %v1595_v40  ;;  %v1309_v43 = vadd.f32 %v3076_v29, %v1308_v42  ;;  %v1626_v55 = vpop.f32.mrf.mxu1 }
 0x1df   :  { %v2272_v45 = vpop.eup %2271  ;;  %v1310_v46 = vpop.f32.mrf.mxu0 }
 0x1e0   :  { %1748 = vst [vmem:[%s3137_s3 + $0x198] sm:$0xff] %v2272_v45  ;;  %v1598_v47 = vadd.f32 %v1597_v5, %v1309_v43  ;;  %v1628_v58 = vpop.f32.mrf.mxu1 }
 0x1e1   :  { %v1313_v49 = vpop.f32.mrf.mxu0 }
 0x1e2   :  { %2279 = vtanh.f32 %v1598_v47  ;;  %v1314_v50 = vadd.f32 %v3076_v29, %v1313_v49  ;;  %v1629_v62 = vpop.f32.mrf.mxu1 }
 0x1e3   :  { %v2274_v52 = vpop.eup %2273  ;;  %v1315_v53 = vpop.f32.mrf.mxu0 }
 0x1e4   :  { %1749 = vst [vmem:[%s3137_s3 + $0x1a0] sm:$0xff] %v2274_v52  ;;  %v1603_v54 = vadd.f32 %v1602_v12, %v1314_v50  ;;  %v1631_v1 = vpop.f32.mrf.mxu1 }
 0x1e5   :  { %v1316_v56 = vpop.f32.mrf.mxu0 }
 0x1e6   :  { %2281 = vtanh.f32 %v1603_v54  ;;  %v1317_v57 = vadd.f32 %v3076_v29, %v1316_v56 }
 0x1e7   :  { %v2276_v59 = vpop.eup %2275  ;;  %v1318_v60 = vpop.f32.mrf.mxu0 }
 0x1e8   :  { %1750 = vst [vmem:[%s3137_s3 + $0x1a8] sm:$0xff] %v2276_v59  ;;  %v1606_v61 = vadd.f32 %v1605_v20, %v1317_v57 }
 0x1e9   :  { %v1321_v63 = vpop.f32.mrf.mxu0 }
 0x1ea   :  { %2283 = vtanh.f32 %v1606_v61  ;;  %v1322_v0 = vadd.f32 %v3076_v29, %v1321_v63 }
 0x1eb   :  { %v2278_v2 = vpop.eup %2277  ;;  %v1323_v3 = vpop.f32.mrf.mxu0 }
 0x1ec   :  { %1751 = vst [vmem:[%s3137_s3 + $0x1b0] sm:$0xff] %v2278_v2  ;;  %v1611_v4 = vadd.f32 %v1610_v27, %v1322_v0 }
 0x1ed   :  { %v1324_v5 = vpop.f32.mrf.mxu0 }
 0x1ee   :  { %2285 = vtanh.f32 %v1611_v4  ;;  %v1325_v6 = vadd.f32 %v3076_v29, %v1324_v5 }
 0x1ef   :  { %v2280_v7 = vpop.eup %2279  ;;  %v1326_v8 = vpop.f32.mrf.mxu0 }
 0x1f0   :  { %1752 = vst [vmem:[%s3137_s3 + $0x1b8] sm:$0xff] %v2280_v7  ;;  %v1614_v9 = vadd.f32 %v1613_v34, %v1325_v6 }
 0x1f1   :  { %v1329_v10 = vpop.f32.mrf.mxu0 }
 0x1f2   :  { %2287 = vtanh.f32 %v1614_v9  ;;  %v1330_v11 = vadd.f32 %v3076_v29, %v1329_v10 }
 0x1f3   :  { %v2282_v12 = vpop.eup %2281  ;;  %v1331_v13 = vpop.f32.mrf.mxu0 }
 0x1f4   :  { %1753 = vst [vmem:[%s3137_s3 + $0x1c0] sm:$0xff] %v2282_v12  ;;  %v1619_v14 = vadd.f32 %v1618_v41, %v1330_v11 }
 0x1f5   :  { %v1332_v16 = vpop.f32.mrf.mxu0 }
 0x1f6   :  { %2289 = vtanh.f32 %v1619_v14  ;;  %v1333_v17 = vadd.f32 %v3076_v29, %v1332_v16 }
 0x1f7   :  { %v2284_v18 = vpop.eup %2283  ;;  %v1334_v19 = vpop.f32.mrf.mxu0 }
 0x1f8   :  { %1754 = vst [vmem:[%s3137_s3 + $0x1c8] sm:$0xff] %v2284_v18  ;;  %v1622_v20 = vadd.f32 %v1621_v48, %v1333_v17 }
 0x1f9   :  { %v1337_v21 = vpop.f32.mrf.mxu0 }
 0x1fa   :  { %2291 = vtanh.f32 %v1622_v20  ;;  %v1338_v22 = vadd.f32 %v3076_v29, %v1337_v21 }
 0x1fb   :  { %v2286_v23 = vpop.eup %2285  ;;  %v1339_v24 = vpop.f32.mrf.mxu0 }
 0x1fc   :  { %1755 = vst [vmem:[%s3137_s3 + $0x1d0] sm:$0xff] %v2286_v23  ;;  %v1627_v25 = vadd.f32 %v1626_v55, %v1338_v22 }
 0x1fd   :  { %v1340_v26 = vpop.f32.mrf.mxu0 }
 0x1fe   :  { %2293 = vtanh.f32 %v1627_v25  ;;  %v1341_v27 = vadd.f32 %v3076_v29, %v1340_v26 }
 0x1ff   :  { %v2288_v28 = vpop.eup %2287  ;;  %v1342_v30 = vpop.f32.mrf.mxu0 }
 0x200   :  { %1756 = vst [vmem:[%s3137_s3 + $0x1d8] sm:$0xff] %v2288_v28  ;;  %v1630_v31 = vadd.f32 %v1629_v62, %v1341_v27 }
 0x202   :  { %2295 = vtanh.f32 %v1630_v31 }
 0x203   :  { %v2290_v15 = vpop.eup %2289 }
 0x204   :  { %1757 = vst [vmem:[%s3137_s3 + $0x1e0] sm:$0xff] %v2290_v15 }
 0x207   :  { %v2292_v32 = vpop.eup %2291 }
 0x208   :  { %1758 = vst [vmem:[%s3137_s3 + $0x1e8] sm:$0xff] %v2292_v32 }
 0x20b   :  { %v2294_v33 = vpop.eup %2293 }
 0x20c   :  { %1759 = vst [vmem:[%s3137_s3 + $0x1f0] sm:$0xff] %v2294_v33 }
 0x20f   :  { %v2296_v29 = vpop.eup %2295 }
 0x210   :  { %1760 = vst [vmem:[%s3137_s3 + $0x1f8] sm:$0xff] %v2296_v29 }

</bundles_post_ra>
